<compile_context>
chip_gen: v7x
topology: tpu7x:2x2x1
jax: 0.10.0
libtpu: 0.0.40
codegen_flags: <defaults>
</compile_context>

<pallas_src>
import numpy as np
import jax
import jax.numpy as jnp
from jax import lax
from jax.experimental import pallas as pl
from jax.experimental.pallas import tpu as pltpu

# ---------------- module "parameters" (deterministic, from __init__) ----------------
MIN_DEG = 0
MAX_DEG = 6
N_FREQS = MAX_DEG - MIN_DEG + 1          # 7
SCALE = 0.1

_DIRS_FLAT = [
    0.8506508, 0, 0.5257311,
    0.809017, 0.5, 0.309017,
    0.5257311, 0.8506508, 0,
    1, 0, 0,
    0.809017, 0.5, -0.309017,
    0.8506508, 0, -0.5257311,
    0.309017, 0.809017, -0.5,
    0, 0.5257311, -0.8506508,
    0.5, 0.309017, -0.809017,
    0, 1, 0,
    -0.5257311, 0.8506508, 0,
    -0.309017, 0.809017, -0.5,
    0, 0.5257311, 0.8506508,
    -0.309017, 0.809017, 0.5,
    0.309017, 0.809017, 0.5,
    0.5, 0.309017, 0.809017,
    0.5, -0.309017, 0.809017,
    0, 0, 1,
    -0.5, 0.309017, 0.809017,
    -0.809017, 0.5, 0.309017,
    -0.809017, 0.5, -0.309017,
]
DIRS = np.asarray(_DIRS_FLAT, dtype=np.float32).reshape(-1, 3).T            # (3, 21)
FREQS = (2.0 ** np.linspace(MIN_DEG, MAX_DEG, N_FREQS)).astype(np.float32)  # (7,)
N_DIRS = DIRS.shape[1]                                                       # 21
FEAT = N_DIRS * N_FREQS                                                      # 147
FEAT2 = 2 * FEAT                                                             # 294
EMB_SIZE = FEAT2 + 3                                                         # 297
HALF_PI = np.float32(0.5 * np.pi)

# Fold freqs into the projection: dirs_freq[k, i*7+j] = DIRS[k,i] * FREQS[j]
DIRS_FREQ = (DIRS[:, :, None] * FREQS[None, None, :]).reshape(3, FEAT).astype(np.float32)
# Fused sin/cos: sin(x @ [DF|DF] + [0.. | pi/2..]) == [sin(xb), cos(xb)]
_DF2 = np.concatenate([DIRS_FREQ, DIRS_FREQ], axis=1)                        # (3, 294)
_PHASE = np.concatenate([np.zeros(FEAT, np.float32),
                         np.full(FEAT, HALF_PI, np.float32)])                # (294,)
_DF2_PHASE = np.concatenate([_DF2, _PHASE[None, :]], axis=0).astype(np.float32)  # (4, 294)

_df2_phase_dev = None


def _df2_phase_const():
    """One-time host->device push of the (4,294) [DF2 ; phase] constant."""
    global _df2_phase_dev
    if _df2_phase_dev is None:
        _df2_phase_dev = jnp.asarray(_DF2_PHASE)
    return _df2_phase_dev


_SUB = 512      # in-kernel row chunk: bounds xb/sin temporaries in VMEM
_OUT_LANES = (EMB_SIZE + 127) // 128 * 128   # 297 -> 384
_XB_LANES = (FEAT2 + 127) // 128 * 128       # 294 -> 384


def _round_up(v, m):
    return (v + m - 1) // m * m


# ---------------- Pallas kernel ----------------
def _posenc_kernel(x_ref, c_ref, o_ref):
    # x_ref: (TN, 3) points tile; c_ref: (4, 294) = [DF2 ; phase] (grid-invariant);
    # o_ref: (TN, 297) output tile.
    df2 = c_ref[0:3, :]           # (3, 294)
    phase = c_ref[3:4, :]         # (1, 294)

    def process(r, rows):
        x = x_ref[pl.ds(r, rows), :] * SCALE                              # scale_input
        xb = jnp.dot(x, df2, preferred_element_type=jnp.float32) + phase  # (rows, 294)
        o_ref[pl.ds(r, rows), 0:3] = x.astype(o_ref.dtype)
        # sin over the fused [xb | xb+pi/2] block == [sin(xb), cos(xb)];
        # single contiguous 294-wide store.
        o_ref[pl.ds(r, rows), 3:EMB_SIZE] = jnp.sin(xb).astype(o_ref.dtype)

    tile = x_ref.shape[0]
    nfull, rem = divmod(tile, _SUB)
    if nfull > 0:
        def body(c, carry):
            process(pl.multiple_of(c * _SUB, _SUB), _SUB)
            return carry
        lax.fori_loop(0, nfull, body, 0, unroll=2)
    if rem > 0:
        process(nfull * _SUB, rem)        # static tail chunk


# ---------------- wrapper ----------------
def _tpu_vmem_info():
    """(scoped-VMEM cap to request, #TensorCores sharing the grid)."""
    try:
        info = pltpu.get_tpu_info()
        vmem_phys = int(getattr(info, "vmem_capacity_bytes", 0)) or (64 << 20)
    except Exception:
        vmem_phys = 64 << 20                      # conservative fallback
    if vmem_phys >= (100 << 20):                  # v5e / v6e: 128 MiB, single TC
        return (64 << 20), 1
    return (44 << 20), 2                          # v7x-like: 64 MiB per TC, 2 TCs


def _vmem_estimate(tile, out_itemsize):
    """Padding-aware VMEM footprint for one grid step (double-buffered)."""
    chunk = min(tile, _SUB)
    return (2 * tile * _OUT_LANES * out_itemsize   # output block (297 -> 384 lanes)
            + 2 * tile * 128 * 4                   # (tile,3) input pads to 128 lanes
            + 4 * chunk * _XB_LANES * 4            # per-chunk xb / sin temporaries
            + (2 << 20))                           # constants + headroom


def positional_encoding(x, *, tile_n=None, out_dtype=jnp.float32):
    """x: (..., 3) float -> (..., 297) `out_dtype`.

    tile_n: rows per grid step (None = generation-aware default of 8192,
    shrunk until the padding-aware VMEM estimate fits the per-generation cap).
    out_dtype: jnp.bfloat16 halves HBM write traffic (the bottleneck) if the
    consumer tolerates it; default float32 matches the torch module.
    """
    orig_lead = x.shape[:-1]
    flat = x.reshape(-1, 3).astype(jnp.float32)
    n = flat.shape[0]
    out_itemsize = np.dtype(out_dtype).itemsize

    vmem_cap, num_cores = _tpu_vmem_info()

    tile_cap = _round_up(max(8, int(tile_n)), 8) if tile_n is not None else 8192
    while tile_cap > 1024 and _vmem_estimate(tile_cap, out_itemsize) > vmem_cap:
        tile_cap = _round_up(tile_cap // 2, 8)

    if n <= tile_cap:
        tile = n                                   # single exact-fit block
    else:
        nb = pl.cdiv(n, tile_cap)
        if num_cores > 1 and nb > 1:
            nb = _round_up(nb, num_cores)          # even split across TensorCores
        tile = _round_up(pl.cdiv(n, nb), 8)        # near-equal block sizes
    grid = (pl.cdiv(n, tile),)                     # partial trailing block is masked

    vmem_limit = int(min(max(_vmem_estimate(tile, out_itemsize), 16 << 20), vmem_cap))

    out = pl.pallas_call(
        _posenc_kernel,
        out_shape=jax.ShapeDtypeStruct((n, EMB_SIZE), out_dtype),
        grid=grid,
        in_specs=[
            pl.BlockSpec((tile, 3), lambda i: (i, 0)),
            pl.BlockSpec((4, FEAT2), lambda i: (0, 0)),   # grid-invariant constants
        ],
        out_specs=pl.BlockSpec((tile, EMB_SIZE), lambda i: (i, 0)),
        compiler_params=pltpu.CompilerParams(
            dimension_semantics=("parallel",),            # shardable across TCs
            vmem_limit_bytes=vmem_limit,
        ),
    )(flat, _df2_phase_const())

    return out.reshape(*orig_lead, EMB_SIZE)


# ---------------- pure-JAX reference (mirrors the torch forward exactly) ----------------
def positional_encoding_ref(x):
    x = x.astype(jnp.float32) * SCALE
    proj = x @ jnp.asarray(DIRS)                                              # (..., 21)
    xb = (proj[..., None] * jnp.asarray(FREQS)).reshape(*proj.shape[:-1], -1)  # (..., 147)
    emb = jnp.sin(jnp.concatenate([xb, xb + HALF_PI], axis=-1))                # (..., 294)
    return jnp.concatenate([x, emb], axis=-1)                                  # (..., 297)


if __name__ == "__main__":
    key = jax.random.PRNGKey(0)
    k1, k2, k3 = jax.random.split(key, 3)

    # Primary test: batch=2, 64 points, xyz -> single exact-fit block.
    x1 = jax.random.normal(k1, (2, 64, 3), dtype=jnp.float32)
    out1 = jax.block_until_ready(positional_encoding(x1))
    ref1 = positional_encoding_ref(x1)
    assert out1.shape == (2, 64, EMB_SIZE), out1.shape
    assert np.allclose(np.asarray(out1), np.asarray(ref1), atol=1e-5, rtol=1e-5)

    # Non-divisible point count with a small forced tile -> multi-step grid with a
    # masked partial trailing block (no host padding / post-kernel slice anywhere).
    x2 = jax.random.normal(k2, (3, 37, 3), dtype=jnp.float32)
    out2 = jax.block_until_ready(positional_encoding(x2, tile_n=64))
    ref2 = positional_encoding_ref(x2)
    assert out2.shape == (3, 37, EMB_SIZE), out2.shape
    assert np.allclose(np.asarray(out2), np.asarray(ref2), atol=1e-5, rtol=1e-5)

    # Larger single-block case: exercises the in-kernel 512-row fori_loop chunks
    # (2 full chunks) plus the static tail chunk (280 rows).
    x3 = jax.random.normal(k3, (2, 652, 3), dtype=jnp.float32)
    out3 = jax.block_until_ready(positional_encoding(x3))
    ref3 = positional_encoding_ref(x3)
    assert out3.shape == (2, 652, EMB_SIZE), out3.shape
    assert np.allclose(np.asarray(out3), np.asarray(ref3), atol=1e-5, rtol=1e-5)

    print("KERNEL_OK")
</pallas_src>

<mosaic_0001>
module attributes {stable_mosaic.version = 11 : i64} {
  func.func @_posenc_kernel(%arg0: i32, %arg1: memref<128x3xf32, #tpu.memory_space<vmem>>, %arg2: memref<4x294xf32, #tpu.memory_space<vmem>>, %arg3: memref<128x297xf32, #tpu.memory_space<vmem>>) attributes {dimension_semantics = [#tpu.dimension_semantics<parallel>], iteration_bounds = array<i64: 1>, scalar_prefetch = 0 : i64, scratch_operands = 0 : i64, tpu.core_type = #tpu.core_type<tc>, window_params = [{transform_indices = @transform_0, window_bounds = array<i64: 128, 3>}, {pipeline_mode = #tpu.pipeline_mode<synchronous>, transform_indices = @transform_1, window_bounds = array<i64: 4, 294>}, {transform_indices = @transform_2, window_bounds = array<i64: 128, 297>}]} {
    %c0 = arith.constant 0 : index
    %c0_0 = arith.constant 0 : index
    %0 = vector.load %arg2[%c0, %c0_0] : memref<4x294xf32, #tpu.memory_space<vmem>>, vector<3x294xf32>
    %c3 = arith.constant 3 : index
    %c0_1 = arith.constant 0 : index
    %1 = vector.load %arg2[%c3, %c0_1] : memref<4x294xf32, #tpu.memory_space<vmem>>, vector<1x294xf32>
    %c0_2 = arith.constant 0 : index
    %c0_3 = arith.constant 0 : index
    %2 = vector.load %arg1[%c0_2, %c0_3] : memref<128x3xf32, #tpu.memory_space<vmem>>, vector<128x3xf32>
    %cst = arith.constant 1.000000e-01 : f32
    %3 = vector.broadcast %cst : f32 to vector<128x3xf32>
    %4 = arith.mulf %2, %3 : vector<128x3xf32>
    %cst_4 = arith.constant dense<0.000000e+00> : vector<128x294xf32>
    %5 = tpu.matmul %4, %0, %cst_4 {dimension_numbers = #tpu.dot_dimension_numbers<[1], [0], [0], [1], [0, 0, 1, 1], [], []>} : vector<128x3xf32>, vector<3x294xf32>, vector<128x294xf32> -> vector<128x294xf32>
    %6 = vector.broadcast %1 : vector<1x294xf32> to vector<128x294xf32>
    %7 = arith.addf %5, %6 : vector<128x294xf32>
    %c0_5 = arith.constant 0 : index
    %c0_6 = arith.constant 0 : index
    %8 = vector.load %arg3[%c0_5, %c0_6] : memref<128x297xf32, #tpu.memory_space<vmem>>, vector<128x3xf32>
    tpu.vector_store %arg3[%c0_5, %c0_6], %4 {strides = array<i32>} : memref<128x297xf32, #tpu.memory_space<vmem>>, vector<128x3xf32>,
    %9 = math.sin %7 : vector<128x294xf32>
    %c0_7 = arith.constant 0 : index
    %c3_8 = arith.constant 3 : index
    %10 = vector.load %arg3[%c0_7, %c3_8] : memref<128x297xf32, #tpu.memory_space<vmem>>, vector<128x294xf32>
    tpu.vector_store %arg3[%c0_7, %c3_8], %9 {strides = array<i32>} : memref<128x297xf32, #tpu.memory_space<vmem>>, vector<128x294xf32>,
    return
  }
  func.func @transform_0(%arg0: i32) -> (i32, i32) {
    %c0_i32 = arith.constant 0 : i32
    %c0_i32_0 = arith.constant 0 : i32
    return %arg0, %c0_i32 : i32, i32
  }
  func.func @transform_1(%arg0: i32) -> (i32, i32) {
    %c0_i32 = arith.constant 0 : i32
    %c0_i32_0 = arith.constant 0 : i32
    %c0_i32_1 = arith.constant 0 : i32
    return %c0_i32, %c0_i32_0 : i32, i32
  }
  func.func @transform_2(%arg0: i32) -> (i32, i32) {
    %c0_i32 = arith.constant 0 : i32
    %c0_i32_0 = arith.constant 0 : i32
    return %arg0, %c0_i32 : i32, i32
  }
}

</mosaic_0001>

<bundles_post_ra>
// kernel: tpu_custom_call.1
= control target key start
LH: loop header
LB: loop body
LE: loop exit
PB: predicated region body
PF: predicated region fallthrough
CT: control target
= control target key end

     0   :  { %vm115_vm0 = vcmask 1042432   ;;  %v6380_v1 = vmov 0.0   ;;  %vm12163_vm1 = vcmask 23552   ;;  %v48_v36 = vlaneseq  ;;  %s12048_s1 = inlined_call_operand.vmem [shape: f32[4,294], index: 1, kind: input, shape index: {}]   ;;  %s12049_s0 = inlined_call_operand.vmem [shape: f32[128,3], index: 0, kind: input, shape index: {}]   ;;  %s12050_s2 = inlined_call_operand.vmem [shape: f32[128,297], index: 2, kind: output, shape index: {}]  }
   0x1   :  { %v11_v0 = vld [vmem:[%s12048_s1] sm:$0x77]  ;;  %186 = vmatprep.mubr.f32.mxu0 %v6380_v1  ;;  %258 = vmatprep.mubr.f32.mxu1 %v6380_v1  ;;  %v16_v7 = vld [vmem:[%s12049_s0 + $0x8] sm:$0xff]  ;;  %v17_v12 = vld [vmem:[%s12049_s0 + $0x10] sm:$0xff] }
   0x2   :  { %v15_v2 = vld [vmem:[%s12049_s0] sm:$0xff]  ;;  %v65_v3 = vcombine.high %v11_v0, %v11_v0  ;;  %v28_v8 = vld [vmem:[%s12049_s0 + $0x68] sm:$0xff]  ;;  %v6432_v9 = vmul.f32 0.1, %v16_v7  ;;  %v29_v13 = vld [vmem:[%s12049_s0 + $0x70] sm:$0xff]  ;;  %v6575_v37 = vshrl.u32 %v48_v36, 7 }
   0x3   :  { %v6411_v4 = vmul.f32 0.1, %v15_v2  ;;  %v27_v5 = vld [vmem:[%s12049_s0 + $0x60] sm:$0xff]  ;;  %v6434_v10 = vmul.f32 0.1, %v28_v8  ;;  %v18_v16 = vld [vmem:[%s12049_s0 + $0x18] sm:$0xff] }
   0x4   :  { %v6416_v6 = vmul.f32 0.1, %v27_v5  ;;  %5715 = vmatprep.subr.msk.mxu0 %vm115_vm0, %v65_v3  ;;  %5985 = vmatprep.subr.msk.mxu1 %vm115_vm0, %v65_v3  ;;  %12344 = vst [vmem:[#allocation4_spill] sm:$0xff] %v6432_v9  ;;  %v12_v11 = vld [vmem:[%s12048_s1 + $0x8] sm:$0x7]  ;;  %v30_v17 = vld [vmem:[%s12049_s0 + $0x78] sm:$0xff] }
   0x5   :  { %12342 = vst [vmem:[#allocation2_spill] sm:$0xff] %v6411_v4  ;;  %5716 = vmatpush1.msk.msra.mxu0 %vm115_vm0, %v11_v0  ;;  %5986 = vmatpush1.msk.msra.mxu1 %vm115_vm0, %v11_v0  ;;  %12345 = vst [vmem:[#allocation5_spill] sm:$0xff] %v6434_v10  ;;  %v6453_v14 = vmul.f32 0.1, %v17_v12  ;;  %v6455_v15 = vmul.f32 0.1, %v29_v13 }
   0x6   :  { %12343 = vst [vmem:[#allocation3_spill] sm:$0xff] %v6416_v6  ;;  %5717 = vmatmul.mubr.msk.f32.vlgmr.msra.gmra.mrb[0].mxu0 %vm12163_vm1, %v6411_v4  ;;  %5729 = vmatmul.mubr.msk.f32.vlgmr.msra.gmra.mrb[0].mxu1 %vm12163_vm1, %v6416_v6  ;;  %v6469_v18 = vmul.f32 0.1, %v18_v16  ;;  %v6471_v19 = vmul.f32 0.1, %v30_v17  ;;  %v19_v20 = vld [vmem:[%s12049_s0 + $0x20] sm:$0xff] }
   0x7   :  { %192 = vmatprep.mubr.f32.mxu0 %v6380_v1  ;;  %264 = vmatprep.mubr.f32.mxu1 %v6380_v1  ;;  %12346 = vst [vmem:[#allocation6_spill] sm:$0xff] %v6453_v14  ;;  %12347 = vst [vmem:[#allocation7_spill] sm:$0xff] %v6455_v15  ;;  %v6482_v21 = vmul.f32 0.1, %v19_v20  ;;  %v20_v22 = vld [vmem:[%s12049_s0 + $0x28] sm:$0xff]  ;;  %v21_v24 = vld [vmem:[%s12049_s0 + $0x30] sm:$0xff] }
   0x8   :  { %5959 = vmatprep.subr.msk.mxu1 %vm115_vm0, %v12_v11  ;;  %12348 = vst [vmem:[#allocation8_spill] sm:$0xff] %v6469_v18  ;;  %12349 = vst [vmem:[#allocation9_spill] sm:$0xff] %v6471_v19  ;;  %v6494_v23 = vmul.f32 0.1, %v20_v22  ;;  %v6506_v25 = vmul.f32 0.1, %v21_v24 }
   0x9   :  { %5960 = vmatpush3.msk.msra.mxu1 %vm115_vm0, %v12_v11  ;;  %12350 = vst [vmem:[#allocation10_spill] sm:$0xff] %v6482_v21  ;;  %v22_v26 = vld [vmem:[%s12049_s0 + $0x38] sm:$0xff]  ;;  %v23_v27 = vld [vmem:[%s12049_s0 + $0x40] sm:$0xff]  ;;  %v24_v30 = vld [vmem:[%s12049_s0 + $0x48] sm:$0xff]  ;;  %v50_v38 = vsub.s32 0, %v6575_v37  ;;  %v54_v40 = vsub.s32 1, %v6575_v37 }
   0xa   :  { %5718 = vmatmul.mubr.msk.f32.gmra.mrb[2].mxu0 %vm12163_vm1, %v6432_v9  ;;  %5730 = vmatmul.mubr.msk.f32.gmra.mrb[2].mxu1 %vm12163_vm1, %v6434_v10  ;;  %12351 = vst [vmem:[#allocation11_spill] sm:$0xff] %v6494_v23  ;;  %12352 = vst [vmem:[#allocation12_spill] sm:$0xff] %v6506_v25  ;;  %v6521_v28 = vmul.f32 0.1, %v22_v26  ;;  %v6526_v29 = vmul.f32 0.1, %v23_v27 }
   0xb   :  { %198 = vmatprep.mubr.f32.mxu0 %v6380_v1  ;;  %270 = vmatprep.mubr.f32.mxu1 %v6380_v1  ;;  %v25_v31 = vld [vmem:[%s12049_s0 + $0x50] sm:$0xff]  ;;  %v6538_v32 = vmul.f32 0.1, %v24_v30  ;;  %v26_v34 = vld [vmem:[%s12049_s0 + $0x58] sm:$0xff]  ;;  %v12070_v12 = vmov 683565275  }
   0xc   :  { %12353 = vst [vmem:[#allocation13_spill] sm:$0xff] %v6521_v28  ;;  %12354 = vst [vmem:[#allocation14_spill] sm:$0xff] %v6526_v29  ;;  %v6543_v33 = vmul.f32 0.1, %v25_v31  ;;  %v6552_v35 = vmul.f32 0.1, %v26_v34 }
   0xd   :  { %12355 = vst [vmem:[#allocation15_spill] sm:$0xff] %v6538_v32  ;;  %v6581_v39 = vld [vmem:[%s12048_s1 + $0x3] ss:$4 sm:$0x7]  ;;  %v12072_v16 = vmov 2475754826  }
   0xe   :  { %5719 = vmatmul.mubr.msk.f32.gmra.mrb[4].mxu0 %vm12163_vm1, %v6453_v14  ;;  %5731 = vmatmul.mubr.msk.f32.gmra.mrb[4].mxu1 %vm12163_vm1, %v6455_v15  ;;  %12356 = vst [vmem:[#allocation16_spill] sm:$0xff] %v6543_v33  ;;  %12357 = vst [vmem:[#allocation17_spill] sm:$0xff] %v6552_v35  ;;  %v6585_v41 = vrot.slane %v6581_v39, %v50_v38  ;;  %v6588_v42 = vrot.slane %v6581_v39, %v54_v40  ;;  %v12062_v22 = vmov 2131351028   ;;  %v12052_v27 = vmov 2102212464  }
   0xf   :  { %204 = vmatprep.mubr.f32.mxu0 %v6380_v1  ;;  %276 = vmatprep.mubr.f32.mxu1 %v6380_v1  ;;  %v12054_v34 = vmov 920167782   ;;  %v12058_v40 = vmov 1326507024   ;;  %s6387_s1 = smov 3  }
  0x12   :  { %5720 = vmatmul.mubr.msk.f32.gmra.mrb[6].mxu0 %vm12163_vm1, %v6469_v18  ;;  %5732 = vmatmul.mubr.msk.f32.gmra.mrb[6].mxu1 %vm12163_vm1, %v6471_v19 }
  0x13   :  { %210 = vmatprep.mubr.f32.mxu0 %v6380_v1  ;;  %5961 = vmatprep.mubr.msk.f32.mxu1 %vm12163_vm1, %v6411_v4 }
  0x16   :  { %5721 = vmatmul.mubr.msk.f32.gmra.mrb[8].mxu0 %vm12163_vm1, %v6482_v21  ;;  %5962 = vmatmul.mubr.msk.f32.vlgmr.msra.gmra.mrb[8].mxu1 %vm12163_vm1, %v6432_v9 }
  0x17   :  { %216 = vmatprep.mubr.f32.mxu0 %v6380_v1  ;;  %5964 = vmatprep.mubr.msk.f32.mxu1 %vm12163_vm1, %v6453_v14 }
  0x1a   :  { %5722 = vmatmul.mubr.msk.f32.gmra.mrb[10].mxu0 %vm12163_vm1, %v6494_v23  ;;  %5965 = vmatmul.mubr.msk.f32.gmra.mrb[10].mxu1 %vm12163_vm1, %v6469_v18 }
  0x1b   :  { %222 = vmatprep.mubr.f32.mxu0 %v6380_v1  ;;  %5967 = vmatprep.mubr.msk.f32.mxu1 %vm12163_vm1, %v6482_v21 }
  0x1e   :  { %5723 = vmatmul.mubr.msk.f32.gmra.mrb[12].mxu0 %vm12163_vm1, %v6506_v25  ;;  %5968 = vmatmul.mubr.msk.f32.gmra.mrb[12].mxu1 %vm12163_vm1, %v6494_v23 }
  0x1f   :  { %228 = vmatprep.mubr.f32.mxu0 %v6380_v1  ;;  %5970 = vmatprep.mubr.msk.f32.mxu1 %vm12163_vm1, %v6506_v25 }
  0x22   :  { %5724 = vmatmul.mubr.msk.f32.gmra.mrb[14].mxu0 %vm12163_vm1, %v6521_v28  ;;  %5971 = vmatmul.mubr.msk.f32.gmra.mrb[14].mxu1 %vm12163_vm1, %v6521_v28 }
  0x23   :  { %234 = vmatprep.mubr.f32.mxu0 %v6380_v1  ;;  %5973 = vmatprep.mubr.msk.f32.mxu1 %vm12163_vm1, %v6526_v29 }
  0x26   :  { %5725 = vmatmul.mubr.msk.f32.gmra.mrb[16].mxu0 %vm12163_vm1, %v6526_v29  ;;  %5974 = vmatmul.mubr.msk.f32.gmra.mrb[16].mxu1 %vm12163_vm1, %v6538_v32 }
  0x27   :  { %240 = vmatprep.mubr.f32.mxu0 %v6380_v1  ;;  %5976 = vmatprep.mubr.msk.f32.mxu1 %vm12163_vm1, %v6543_v33 }
  0x2a   :  { %5726 = vmatmul.mubr.msk.f32.gmra.mrb[18].mxu0 %vm12163_vm1, %v6538_v32  ;;  %5977 = vmatmul.mubr.msk.f32.gmra.mrb[18].mxu1 %vm12163_vm1, %v6552_v35 }
  0x2b   :  { %246 = vmatprep.mubr.f32.mxu0 %v6380_v1  ;;  %5979 = vmatprep.mubr.msk.f32.mxu1 %vm12163_vm1, %v6416_v6 }
  0x2e   :  { %5727 = vmatmul.mubr.msk.f32.gmra.mrb[20].mxu0 %vm12163_vm1, %v6543_v33  ;;  %5980 = vmatmul.mubr.msk.f32.gmra.mrb[20].mxu1 %vm12163_vm1, %v6434_v10 }
  0x2f   :  { %252 = vmatprep.mubr.f32.mxu0 %v6380_v1  ;;  %5982 = vmatprep.mubr.msk.f32.mxu1 %vm12163_vm1, %v6455_v15 }
  0x32   :  { %5728 = vmatmul.mubr.msk.f32.gmra.mrb[22].mxu0 %vm12163_vm1, %v6552_v35  ;;  %5983 = vmatmul.mubr.msk.f32.gmra.mrb[22].mxu1 %vm12163_vm1, %v6471_v19 }
  0xd9   :  { %v188_v43 = vpop.f32.mrb[0].mxu0  ;;  %v260_v44 = vpop.f32.mrb[0].mxu1 }
  0xda   :  { %v6591_v45 = vadd.f32 %v260_v44, %v6585_v41  ;;  %v190_v46 = vpop.f32.mrb[1].mxu0  ;;  %v6593_v47 = vpop.f32.mrb[1].mxu1  ;;  %v6616_v5 = vadd.f32 %v188_v43, %v6585_v41 }
  0xdb   :  { %v6596_v48 = vadd.f32 %v190_v46, %v6588_v42 }
  0xdc   :  { %12358 = vst [vmem:[#allocation18_spill] sm:$0xff] %v6591_v45  ;;  %v4191_v49 = vand.u32 2139095040, %v6591_v45  ;;  %v12051_v58 = vand.u32 2147483647, %v6591_v45  ;;  %12360 = vst [vmem:[#allocation20_spill] sm:$0xff] %v6616_v5 }
  0xdd   :  { %12359 = vst [vmem:[#allocation19_spill] sm:$0xff] %v6596_v48  ;;  %v551_v50 = vand.u32 2139095040, %v6596_v48  ;;  %v194_v51 = vpop.f32.mrb[2].mxu0  ;;  %v6600_v53 = vpop.f32.mrb[2].mxu1 }
  0xde   :  { %v4192_v52 = vshrl.u32 %v4191_v49, 23  ;;  %v6602_v54 = vpop.f32.mrb[3].mxu0  ;;  %v6604_v56 = vpop.f32.mrb[3].mxu1  ;;  %v4195_v0 = vand.u32 8388607, %v12051_v58 }
  0xdf   :  { %v552_v55 = vshrl.u32 %v551_v50, 23  ;;  %v6638_v50 = vadd.f32 %v194_v51, %v6585_v41 }
  0xe0   :  { %v5894_v57 = vadd.s32 4294967169, %v4192_v52  ;;  %v4196_v7 = vor.u32 8388608, %v4195_v0  ;;  %v447_v52 = vand.u32 2139095040, %v6616_v5 }
  0xe1   :  { %v6607_v59 = vpop.f32.mrb[4].mxu0  ;;  %v6609_v60 = vpop.f32.mrb[4].mxu1  ;;  %v5754_v62 = vadd.s32 4294967169, %v552_v55  ;;  %12361 = vst [vmem:[#allocation21_spill] sm:$0xff] %v6638_v50 }
  0xe2   :  { %v4198_v61 = vadd.s32 1, %v5894_v57  ;;  %v6611_v63 = vpop.f32.mrb[5].mxu0  ;;  %v6696_v58 = vpop.f32.mrb[5].mxu1 }
  0xe3   :  { %v558_v3 = vadd.s32 1, %v5754_v62  ;;  %12362 = vst [vmem:[#allocation22_spill] sm:$0xff] %v6696_v58 }
  0xe4   :  { %vm4199_vm2 = vcmp.gt.s32.totalorder %v4198_v61, 0 }
  0xe5   :  { %v4200_v1 = vsel %vm4199_vm2, %v4198_v61, 0  ;;  %vm559_vm3 = vcmp.gt.s32.totalorder %v558_v3, 0  ;;  %v6643_v61 = vshll.u32 %v4196_v7, 8 }
  0xe6   :  { %v4202_v2 = vand.u32 31, %v4200_v1  ;;  %v6620_v11 = vshrl.u32 %v4200_v1, 5  ;;  %v560_v62 = vsel %vm559_vm3, %v558_v3, 0  ;;  %v759_v3 = vand.u32 2139095040, %v6638_v50 }
  0xe8   :  { %v6618_v8 = vsub.s32 32, %v4202_v2  ;;  %v4205_v13 = vshll.u32 %v12070_v12, %v4202_v2  ;;  %v4208_v17 = vshll.u32 %v12072_v16, %v4202_v2  ;;  %v4211_v26 = vshll.u32 %v12062_v22, %v4202_v2 }
  0xe9   :  { %v4214_v31 = vshll.u32 %v12052_v27, %v4202_v2  ;;  %v4217_v38 = vshll.u32 %v12054_v34, %v4202_v2  ;;  %vm4220_vm4 = vcmp.lt.s32.totalorder %v6620_v11, 1  ;;  %vm4223_vm5 = vcmp.lt.s32.totalorder %v6620_v11, 4 }
  0xea   :  { %v4206_v20 = vshrl.u32 %v12072_v16, %v6618_v8  ;;  %v4209_v24 = vshrl.u32 %v12062_v22, %v6618_v8  ;;  %v4212_v30 = vshrl.u32 %v12052_v27, %v6618_v8  ;;  %v4215_v36 = vshrl.u32 %v12054_v34, %v6618_v8 }
  0xeb   :  { %v4218_v43 = vshrl.u32 %v12058_v40, %v6618_v8  ;;  %vm4222_vm6 = vcmp.lt.s32.totalorder %v6620_v11, 3  ;;  %vm4221_vm7 = vcmp.lt.s32.totalorder %v6620_v11, 2 }
  0xec   :  { %v4207_v44 = vor.u32 %v4206_v20, %v4205_v13  ;;  %v4210_v46 = vor.u32 %v4209_v24, %v4208_v17  ;;  %v4213_v49 = vor.u32 %v4212_v30, %v4211_v26  ;;  %v4216_v55 = vor.u32 %v4215_v36, %v4214_v31 }
  0xed   :  { %v4219_v57 = vor.u32 %v4218_v43, %v4217_v38  ;;  %v562_v20 = vand.u32 31, %v560_v62  ;;  %v448_v43 = vshrl.u32 %v447_v52, 23 }
  0xee   :  { %v4228_v0 = vsel %vm4220_vm4, %v4207_v44, %v4210_v46  ;;  %v4229_v51 = vsel %vm4223_vm5, %v4216_v55, 920167782  ;;  %v4232_v1 = vsel %vm4220_vm4, %v4210_v46, %v4213_v49 }
  0xef   :  { %v4230_v2 = vsel %vm4222_vm6, %v4213_v49, %v4229_v51  ;;  %v4233_v7 = vsel %vm4223_vm5, %v4219_v57, 1326507024  ;;  %v6674_v38 = vsub.s32 32, %v562_v20  ;;  %v12064_v57 = vand.u32 2147483647, %v6596_v48 }
  0xf0   :  { %v4231_v13 = vsel %vm4221_vm7, %v4228_v0, %v4230_v2  ;;  %v4234_v17 = vsel %vm4222_vm6, %v4216_v55, %v4233_v7  ;;  %v760_v0 = vshrl.u32 %v759_v3, 23  ;;  %v6677_v55 = vshrl.u32 %v560_v62, 5 }
  0xf1   :  { %v4235_v24 = vsel %vm4221_vm7, %v4232_v1, %v4234_v17  ;;  %v6666_v26 = vmul.u32.u64.low %v6643_v61, %v4231_v13  ;;  %v6667_v30 = vmul.u32.u64.high %v6643_v61, %v4231_v13, %v6666_v26  ;;  %v566_v51 = vshrl.u32 %v12072_v16, %v6674_v38 }
  0xf2   :  { %v6671_v31 = vmul.u32.u64.low %v6643_v61, %v4235_v24  ;;  %v6672_v36 = vmul.u32.u64.high %v6643_v61, %v4235_v24, %v6671_v31  ;;  %v569_v1 = vshrl.u32 %v12062_v22, %v6674_v38  ;;  %v572_v2 = vshrl.u32 %v12052_v27, %v6674_v38 }
  0xf3   :  { %v574_v7 = vshll.u32 %v12052_v27, %v562_v20  ;;  %v575_v13 = vshrl.u32 %v12054_v34, %v6674_v38  ;;  %v577_v52 = vshll.u32 %v12054_v34, %v562_v20  ;;  %v578_v62 = vshrl.u32 %v12058_v40, %v6674_v38 }
  0xf4   :  { %v4225_v3 = vsel %vm4223_vm5, %v4213_v49, 2102212464  ;;  %v565_v17 = vshll.u32 %v12070_v12, %v562_v20  ;;  %v568_v24 = vshll.u32 %v12072_v16, %v562_v20  ;;  %v571_v31 = vshll.u32 %v12062_v22, %v562_v20 }
  0xf5   :  { %v4204_v27 = vshrl.u32 %v12070_v12, %v6618_v8  ;;  %v555_v34 = vand.u32 8388607, %v12064_v57  ;;  %v576_v19 = vor.u32 %v575_v13, %v574_v7  ;;  %v579_v15 = vor.u32 %v578_v62, %v577_v52 }
  0xf6   :  { %v567_v40 = vor.u32 %v566_v51, %v565_v17  ;;  %v570_v10 = vor.u32 %v569_v1, %v568_v24  ;;  %v573_v6 = vor.u32 %v572_v2, %v571_v31  ;;  %vm583_vm8 = vcmp.lt.s32.totalorder %v6677_v55, 4 }
  0xf7   :  { %v4224_v49 = vsel %vm4220_vm4, %v4204_v27, %v4207_v44  ;;  %v4226_v20 = vsel %vm4222_vm6, %v4210_v46, %v4225_v3  ;;  %v4246_v22 = vadd.s32 1, %v6667_v30  ;;  %v589_v8 = vsel %vm583_vm8, %v576_v19, 920167782 }
  0xf8   :  { %vm4245_vm9 = vc.u32 %v6672_v36, %v6666_v26  ;;  %v5762_v7 = vadd.s32 4294967169, %v760_v0  ;;  %vm580_vm10 = vcmp.lt.s32.totalorder %v6677_v55, 1  ;;  %vm582_vm11 = vcmp.lt.s32.totalorder %v6677_v55, 3 }
  0xf9   :  { %v593_v51 = vsel %vm583_vm8, %v579_v15, 1326507024  ;;  %v4227_v27 = vsel %vm4221_vm7, %v4224_v49, %v4226_v20  ;;  %v556_v44 = vor.u32 8388608, %v555_v34  ;;  %v588_v46 = vsel %vm580_vm10, %v567_v40, %v570_v10 }
  0xfa   :  { %v590_v1 = vsel %vm582_vm11, %v573_v6, %v589_v8  ;;  %v5750_v2 = vadd.s32 4294967169, %v448_v43  ;;  %v4247_v0 = vsel %vm4245_vm9, %v4246_v22, %v6667_v30  ;;  %v6725_v13 = vadd.f32 %v6593_v47, %v6588_v42 }
  0xfb   :  { %vm581_vm12 = vcmp.lt.s32.totalorder %v6677_v55, 2  ;;  %v592_v15 = vsel %vm580_vm10, %v570_v10, %v573_v6  ;;  %v594_v11 = vsel %vm582_vm11, %v576_v19, %v593_v51  ;;  %v766_v34 = vadd.s32 1, %v5762_v7 }
  0xfc   :  { %12363 = vst [vmem:[#allocation23_spill] sm:$0xff] %v6725_v13  ;;  %v4243_v52 = vmul.u32 %v6643_v61, %v4227_v27  ;;  %v591_v43 = vsel %vm581_vm12, %v588_v46, %v590_v1  ;;  %v6735_v62 = vshll.u32 %v556_v44, 8  ;;  %v595_v47 = vsel %vm581_vm12, %v592_v15, %v594_v11 }
  0xfd   :  { %vm767_vm13 = vcmp.gt.s32.totalorder %v766_v34, 0  ;;  %v4295_v30 = vand.u32 2139095040, %v6725_v13  ;;  %v454_v17 = vadd.s32 1, %v5750_v2  ;;  %v12065_v61 = vand.u32 2147483647, %v6638_v50 }
  0xfe   :  { %v4248_v22 = vadd.s32 %v4247_v0, %v4243_v52  ;;  %v768_v3 = vsel %vm767_vm13, %v766_v34, 0  ;;  %v6741_v24 = vmul.u32.u64.low %v6735_v62, %v591_v43  ;;  %v6742_v19 = vmul.u32.u64.high %v6735_v62, %v591_v43, %v6741_v24 }
  0xff   :  { %v770_v31 = vand.u32 31, %v768_v3  ;;  %v6747_v49 = vmul.u32.u64.low %v6735_v62, %v595_v47  ;;  %v6748_v20 = vmul.u32.u64.high %v6735_v62, %v595_v47, %v6747_v49  ;;  %v4296_v7 = vshrl.u32 %v4295_v30, 23 }
 0x100   :  { %v4249_v8 = vadd.s32 536870912, %v4248_v22  ;;  %vm455_vm14 = vcmp.gt.s32.totalorder %v454_v17, 0  ;;  %v564_v27 = vshrl.u32 %v12070_v12, %v6674_v38  ;;  %v763_v44 = vand.u32 8388607, %v12065_v61 }
 0x101   :  { %v6750_v51 = vsub.s32 32, %v770_v31  ;;  %v6758_v46 = vadd.f32 %v6600_v53, %v6585_v41  ;;  %v585_v1 = vsel %vm583_vm8, %v573_v6, 2102212464  ;;  %v12365_v0 = vmov 2131351028  }
 0x102   :  { %v12366_v11 = vmov 2102212464   ;;  %v584_v38 = vsel %vm580_vm10, %v564_v27, %v567_v40  ;;  %v6770_v52 = vshrl.u32 %v768_v3, 5  ;;  %v12367_v43 = vmov 920167782  }
 0x103   :  { %12364 = vst [vmem:[#allocation24_spill] sm:$0xff] %v6758_v46  ;;  %v774_v2 = vshrl.u32 %v12072_v16, %v6750_v51  ;;  %v777_v15 = vshrl.u32 %v12365_v0, %v6750_v51  ;;  %v780_v34 = vshrl.u32 %v12366_v11, %v6750_v51  ;;  %v782_v53 = vshll.u32 %v12366_v11, %v770_v31 }
 0x104   :  { %v783_v47 = vshrl.u32 %v12367_v43, %v6750_v51  ;;  %v6775_v6 = vshrl.u32 %v4249_v8, 30  ;;  %v773_v30 = vshll.u32 %v12070_v12, %v770_v31  ;;  %v776_v49 = vshll.u32 %v12072_v16, %v770_v31 }
 0x105   :  { %v779_v57 = vshll.u32 %v12365_v0, %v770_v31  ;;  %v586_v61 = vsel %vm582_vm11, %v570_v10, %v585_v1  ;;  %v606_v40 = vadd.s32 1, %v6742_v19  ;;  %v12369_v27 = vmov 1326507024  }
 0x106   :  { %12368 = vst [vmem:[#allocation25_spill] sm:$0xff] %v6775_v6  ;;  %v784_v3 = vor.u32 %v783_v47, %v782_v53  ;;  %v786_v35 = vshrl.u32 %v12369_v27, %v6750_v51  ;;  %v775_v33 = vor.u32 %v774_v2, %v773_v30  ;;  %v778_v32 = vor.u32 %v777_v15, %v776_v49 }
 0x107   :  { %v781_v29 = vor.u32 %v780_v34, %v779_v57  ;;  %v785_v8 = vshll.u32 %v12367_v43, %v770_v31  ;;  %v456_v12 = vsel %vm455_vm14, %v454_v17, 0  ;;  %vm605_vm15 = vc.u32 %v6748_v20, %v6741_v24  ;;  %v6795_v57 = vpop.f32.mrb[6].mxu0 }
 0x108   :  { %v5898_v16 = vadd.s32 4294967169, %v4296_v7  ;;  %vm791_vm0 = vcmp.lt.s32.totalorder %v6770_v52, 4  ;;  %v4251_v10 = vshll.u32 %v6775_v6, 30  ;;  %v587_v1 = vsel %vm581_vm12, %v584_v38, %v586_v61  ;;  %12370 = vst [vmem:[#allocation26_spill] sm:$0xff] %v6795_v57 }
 0x109   :  { %v787_v53 = vor.u32 %v786_v35, %v785_v8  ;;  %v797_v2 = vsel %vm791_vm0, %v784_v3, 920167782  ;;  %v764_v31 = vor.u32 8388608, %v763_v44  ;;  %vm788_vm2 = vcmp.lt.s32.totalorder %v6770_v52, 1 }
 0x10a   :  { %vm790_vm3 = vcmp.lt.s32.totalorder %v6770_v52, 3  ;;  %v4503_v17 = vand.u32 2139095040, %v6758_v46  ;;  %v607_v7 = vsel %vm605_vm15, %v606_v40, %v6742_v19  ;;  %v796_v15 = vsel %vm788_vm2, %v775_v33, %v778_v32 }
 0x10b   :  { %v798_v35 = vsel %vm790_vm3, %v781_v29, %v797_v2  ;;  %v801_v55 = vsel %vm791_vm0, %v787_v53, 1326507024  ;;  %v6807_v61 = vand.u32 31, %v456_v12  ;;  %v603_v44 = vmul.u32 %v6735_v62, %v587_v1 }
 0x10c   :  { %v800_v34 = vsel %vm788_vm2, %v778_v32, %v781_v29  ;;  %v6812_v38 = vsub.s32 %v4248_v22, %v4251_v10  ;;  %vm789_vm4 = vcmp.lt.s32.totalorder %v6770_v52, 2  ;;  %v802_v19 = vsel %vm790_vm3, %v784_v3, %v801_v55 }
 0x10d   :  { %12371 = vst [vmem:[#allocation27_spill] sm:$0xff] %v6807_v61  ;;  %v6817_v47 = vadd.s32 %v607_v7, %v603_v44  ;;  %v4302_v30 = vadd.s32 1, %v5898_v16  ;;  %v799_v49 = vsel %vm789_vm4, %v796_v15, %v798_v35  ;;  %v803_v40 = vsel %vm789_vm4, %v800_v34, %v802_v19 }
 0x10e   :  { %v6823_v62 = vshll.u32 %v764_v31, 8  ;;  %v4504_v8 = vshrl.u32 %v4503_v17, 23  ;;  %v6826_v22 = vsub.s32 32, %v6807_v61  ;;  %v4254_v10 = vsub.s32 0, %v6812_v38 }
 0x10f   :  { %v609_v53 = vadd.s32 536870912, %v6817_v47  ;;  %vm4303_vm5 = vcmp.gt.s32.totalorder %v4302_v30, 0  ;;  %v58_v31 = vsub.s32 2, %v6575_v37  ;;  %v793_v17 = vsel %vm791_vm0, %v781_v29, 2102212464 }
 0x110   :  { %12372 = vst [vmem:[#allocation28_spill] sm:$0xff] %v6826_v22  ;;  %v6830_v1 = vmul.u32.u64.low %v6823_v62, %v799_v49  ;;  %v6831_v3 = vmul.u32.u64.high %v6823_v62, %v799_v49, %v6830_v1  ;;  %v5906_v16 = vadd.s32 4294967169, %v4504_v8  ;;  %v471_v35 = vshrl.u32 %v12367_v43, %v6826_v22 }
 0x111   :  { %v6836_v2 = vmul.u32.u64.low %v6823_v62, %v803_v40  ;;  %v6837_v7 = vmul.u32.u64.high %v6823_v62, %v803_v40, %v6836_v2  ;;  %v12373_v55 = vmov 683565275   ;;  %v12075_v34 = vand.u32 2147483647, %v6758_v46 }
 0x112   :  { %v4510_v15 = vadd.s32 1, %v5906_v16  ;;  %v772_v44 = vshrl.u32 %v12373_v55, %v6750_v51  ;;  %v470_v19 = vshll.u32 %v12366_v11, %v6807_v61  ;;  %v5895_v49 = vmin.u32 %v4254_v10, %v6812_v38 }
 0x113   :  { %v6850_v40 = vsel %vm4303_vm5, %v4302_v30, 0  ;;  %v6852_v37 = vshrl.u32 %v609_v53, 30  ;;  %v794_v8 = vsel %vm790_vm3, %v778_v32, %v793_v17  ;;  %v6860_v51 = vadd.f32 %v6602_v54, %v6588_v42 }
 0x114   :  { %vm4511_vm6 = vcmp.gt.s32.totalorder %v4510_v15, 0  ;;  %v792_v29 = vsel %vm788_vm2, %v772_v44, %v775_v33  ;;  %v6863_v16 = vrot.slane %v6581_v39, %v58_v31  ;;  %v6865_v2 = vshrl.u32 %v456_v12, 5 }
 0x115   :  { %12374 = vst [vmem:[#allocation29_spill] sm:$0xff] %v6852_v37  ;;  %12375 = vst [vmem:[#allocation30_spill] sm:$0xff] %v6860_v51  ;;  %v6869_v30 = vshll.u32 %v12367_v43, %v6807_v61  ;;  %v4512_v10 = vsel %vm4511_vm6, %v4510_v15, 0  ;;  %v6871_v53 = vor.u32 %v471_v35, %v470_v19  ;;  %v6875_v33 = vshrl.u32 %v12369_v27, %v6826_v22  ;;  %v6889_v19 = vpop.f32.mrb[6].mxu1 }
 0x116   :  { %12376 = vst [vmem:[#allocation31_spill] sm:$0xff] %v6863_v16  ;;  %12377 = vst [vmem:[#allocation32_spill] sm:$0xff] %v6865_v2  ;;  %v6878_v32 = vand.u32 31, %v6850_v40  ;;  %v4507_v39 = vand.u32 8388607, %v12075_v34  ;;  %v4256_v54 = vclz %v5895_v49  ;;  %v795_v12 = vsel %vm789_vm4, %v792_v29, %v794_v8 }
 0x117   :  { %12378 = vst [vmem:[#allocation33_spill] sm:$0xff] %v6871_v53  ;;  %v814_v31 = vadd.s32 1, %v6831_v3  ;;  %v4514_v17 = vand.u32 31, %v4512_v10  ;;  %v611_v15 = vshll.u32 %v6852_v37, 30  ;;  %vm813_vm7 = vc.u32 %v6837_v7, %v6830_v1  ;;  %12380 = vst [vmem:[#allocation35_spill] sm:$0xff] %v6889_v19 }
 0x118   :  { %12379 = vst [vmem:[#allocation34_spill] sm:$0xff] %v6878_v32  ;;  %v4513_v35 = vshrl.u32 %v4512_v10, 5  ;;  %v863_v44 = vand.u32 2139095040, %v6860_v51  ;;  %v12381_v49 = vmov 2475754826   ;;  %v811_v29 = vmul.u32 %v6823_v62, %v795_v12 }
 0x119   :  { %v4515_v28 = vsub.s32 32, %v4514_v17  ;;  %v4517_v34 = vshll.u32 %v12373_v55, %v4514_v17  ;;  %v4520_v25 = vshll.u32 %v12381_v49, %v4514_v17  ;;  %v4523_v52 = vshll.u32 %v12365_v0, %v4514_v17 }
 0x11a   :  { %v4508_v8 = vor.u32 8388608, %v4507_v39  ;;  %v4526_v23 = vshll.u32 %v12366_v11, %v4514_v17  ;;  %v4529_v21 = vshll.u32 %v12367_v43, %v4514_v17  ;;  %v815_v10 = vsel %vm813_vm7, %v814_v31, %v6831_v3 }
 0x11b   :  { %v4518_v18 = vshrl.u32 %v12381_v49, %v4515_v28  ;;  %v4521_v14 = vshrl.u32 %v12365_v0, %v4515_v28  ;;  %v4524_v9 = vshrl.u32 %v12366_v11, %v4515_v28  ;;  %vm479_vm8 = vcmp.lt.s32.totalorder %v6865_v2, 4 }
 0x11c   :  { %v4527_v4 = vshrl.u32 %v12367_v43, %v4515_v28  ;;  %v4530_v37 = vshrl.u32 %v12369_v27, %v4515_v28  ;;  %vm4532_vm9 = vcmp.lt.s32.totalorder %v4513_v35, 1  ;;  %v864_v62 = vshrl.u32 %v863_v44, 23 }
 0x11d   :  { %v5896_v39 = vadd.s32 4294967294, %v4256_v54  ;;  %v4519_v12 = vor.u32 %v4518_v18, %v4517_v34  ;;  %v4522_v6 = vor.u32 %v4521_v14, %v4520_v25  ;;  %v4525_v17 = vor.u32 %v4524_v9, %v4523_v52 }
 0x11e   :  { %v6905_v3 = vsub.s32 %v6817_v47, %v611_v15  ;;  %v6907_v31 = vadd.s32 %v815_v10, %v811_v29  ;;  %v4528_v13 = vor.u32 %v4527_v4, %v4526_v23  ;;  %v4531_v22 = vor.u32 %v4530_v37, %v4529_v21 }
 0x11f   :  { %v4516_v61 = vshrl.u32 %v12373_v55, %v4515_v28  ;;  %vm4535_vm10 = vcmp.lt.s32.totalorder %v4513_v35, 4  ;;  %v4540_v5 = vsel %vm4532_vm9, %v4519_v12, %v4522_v6  ;;  %v4548_v16 = vshll.u32 %v4508_v8, 8 }
 0x120   :  { %vm4533_vm11 = vcmp.lt.s32.totalorder %v4513_v35, 2  ;;  %vm4534_vm12 = vcmp.lt.s32.totalorder %v4513_v35, 3  ;;  %v4541_v44 = vsel %vm4535_vm10, %v4528_v13, 920167782  ;;  %v5766_v54 = vadd.s32 4294967169, %v864_v62 }
 0x121   :  { %v4537_v18 = vsel %vm4535_vm10, %v4525_v17, 2102212464  ;;  %v4542_v14 = vsel %vm4534_vm12, %v4525_v17, %v4541_v44  ;;  %v4544_v9 = vsel %vm4532_vm9, %v4522_v6, %v4525_v17  ;;  %v4545_v25 = vsel %vm4535_vm10, %v4531_v22, 1326507024 }
 0x122   :  { %v614_v47 = vsub.s32 0, %v6905_v3  ;;  %v817_v4 = vadd.s32 536870912, %v6907_v31  ;;  %v4543_v21 = vsel %vm4533_vm11, %v4540_v5, %v4542_v14  ;;  %v4546_v23 = vsel %vm4534_vm12, %v4528_v13, %v4545_v25 }
 0x123   :  { %v4536_v28 = vsel %vm4532_vm9, %v4516_v61, %v4519_v12  ;;  %v4547_v34 = vsel %vm4533_vm11, %v4544_v9, %v4546_v23  ;;  %v6917_v37 = vmul.u32.u64.low %v4548_v16, %v4543_v21  ;;  %v6918_v15 = vmul.u32.u64.high %v4548_v16, %v4543_v21, %v6917_v37 }
 0x124   :  { %v4538_v52 = vsel %vm4534_vm12, %v4522_v6, %v4537_v18  ;;  %v6921_v29 = vmul.u32.u64.low %v4548_v16, %v4547_v34  ;;  %v6922_v8 = vmul.u32.u64.high %v4548_v16, %v4547_v34, %v6921_v29  ;;  %v870_v22 = vadd.s32 1, %v5766_v54 }
 0x125   :  { %v6929_v5 = vsel %vm479_vm8, %v6871_v53, 920167782  ;;  %vm5897_vm13 = vcmp.lt.s32.totalorder %v5896_v39, 0  ;;  %v6932_v13 = vsub.s32 32, %v6878_v32  ;;  %v6936_v61 = vadd.s32 %v6666_v26, %v6672_v36 }
 0x126   :  { %12382 = vst [vmem:[#allocation36_spill] sm:$0xff] %v6929_v5  ;;  %v6939_v6 = vshrl.u32 %v6850_v40, 5  ;;  %vm871_vm14 = vcmp.gt.s32.totalorder %v870_v22, 0  ;;  %v6943_v62 = vadd.f32 %v6604_v56, %v6588_v42  ;;  %v4539_v12 = vsel %vm4533_vm11, %v4536_v28, %v4538_v52 }
 0x127   :  { %12383 = vst [vmem:[#allocation37_spill] sm:$0xff] %v6932_v13  ;;  %v4558_v17 = vadd.s32 1, %v6918_v15  ;;  %v12096_v44 = vand.u32 2147483647, %v6860_v51  ;;  %v872_v54 = vsel %vm871_vm14, %v870_v22, 0  ;;  %v6948_v18 = vsel %vm5897_vm13, 0, %v5896_v39 }
 0x128   :  { %12384 = vst [vmem:[#allocation38_spill] sm:$0xff] %v6939_v6  ;;  %12385 = vst [vmem:[#allocation39_spill] sm:$0xff] %v6943_v62  ;;  %v5755_v26 = vmin.u32 %v614_v47, %v6905_v3  ;;  %v6953_v36 = vshll.u32 %v12366_v11, %v6878_v32  ;;  %v6955_v40 = vshrl.u32 %v817_v4, 30  ;;  %v6959_v56 = vshrl.u32 %v12367_v43, %v6932_v13 }
 0x129   :  { %v6963_v35 = vshll.u32 %v12367_v43, %v6878_v32  ;;  %vm4557_vm15 = vc.u32 %v6922_v8, %v6917_v37  ;;  %v874_v39 = vand.u32 31, %v872_v54  ;;  %v6969_v14 = vadd.s32 %v6741_v24, %v6748_v20 }
 0x12a   :  { %12386 = vst [vmem:[#allocation40_spill] sm:$0xff] %v6955_v40  ;;  %v6973_v9 = vshrl.u32 %v12369_v27, %v6932_v13  ;;  %v4555_v25 = vmul.u32 %v4548_v16, %v4539_v12  ;;  %v4559_v47 = vsel %vm4557_vm15, %v4558_v17, %v6918_v15  ;;  %v4264_v4 = vsub.s32 4294967266, %v6948_v18  ;;  %v6989_v12 = vpop.f32.mrb[7].mxu0 }
 0x12b   :  { %v867_v21 = vand.u32 8388607, %v12096_v44  ;;  %v875_v23 = vsub.s32 32, %v874_v39  ;;  %v4607_v28 = vand.u32 2139095040, %v6943_v62  ;;  %v616_v34 = vclz %v5755_v26  ;;  %12387 = vst [vmem:[#allocation41_spill] sm:$0xff] %v6989_v12 }
 0x12c   :  { %v819_v52 = vshll.u32 %v6955_v40, 30  ;;  %v6981_v24 = vadd.s32 %v4559_v47, %v4555_v25  ;;  %v6983_v20 = vshrl.u32 %v872_v54, 5  ;;  %v877_v29 = vshll.u32 %v12373_v55, %v874_v39 }
 0x12d   :  { %v878_v16 = vshrl.u32 %v12381_v49, %v875_v23  ;;  %v880_v15 = vshll.u32 %v12381_v49, %v874_v39  ;;  %v881_v22 = vshrl.u32 %v12365_v0, %v875_v23  ;;  %v883_v17 = vshll.u32 %v12365_v0, %v874_v39 }
 0x12e   :  { %v884_v26 = vshrl.u32 %v12366_v11, %v875_v23  ;;  %v886_v44 = vshll.u32 %v12366_v11, %v874_v39  ;;  %v887_v25 = vshrl.u32 %v12367_v43, %v875_v23  ;;  %v868_v54 = vor.u32 8388608, %v867_v21 }
 0x12f   :  { %v879_v47 = vor.u32 %v878_v16, %v877_v29  ;;  %v882_v10 = vor.u32 %v881_v22, %v880_v15  ;;  %v4608_v40 = vshrl.u32 %v4607_v28, 23  ;;  %v889_v53 = vshll.u32 %v12367_v43, %v874_v39 }
 0x130   :  { %v885_v13 = vor.u32 %v884_v26, %v883_v17  ;;  %v888_v32 = vor.u32 %v887_v25, %v886_v44  ;;  %v890_v5 = vshrl.u32 %v12369_v27, %v875_v23  ;;  %v4260_v12 = vsub.s32 32, %v6948_v18 }
 0x131   :  { %v4265_v19 = vadd.s32 127, %v4264_v4  ;;  %v5756_v51 = vadd.s32 4294967294, %v616_v34  ;;  %v4561_v46 = vadd.s32 536870912, %v6981_v24  ;;  %v7000_v50 = vsub.s32 %v6907_v31, %v819_v52 }
 0x132   :  { %v891_v48 = vor.u32 %v890_v5, %v889_v53  ;;  %vm892_vm0 = vcmp.lt.s32.totalorder %v6983_v20, 1  ;;  %vm895_vm2 = vcmp.lt.s32.totalorder %v6983_v20, 4  ;;  %vm894_vm3 = vcmp.lt.s32.totalorder %v6983_v20, 3 }
 0x133   :  { %v900_v44 = vsel %vm892_vm0, %v879_v47, %v882_v10  ;;  %v901_v39 = vsel %vm895_vm2, %v888_v32, 920167782  ;;  %v5910_v21 = vadd.s32 4294967169, %v4608_v40  ;;  %vm893_vm4 = vcmp.lt.s32.totalorder %v6983_v20, 2 }
 0x134   :  { %v902_v4 = vsel %vm894_vm3, %v885_v13, %v901_v39  ;;  %v904_v31 = vsel %vm892_vm0, %v882_v10, %v885_v13  ;;  %v908_v53 = vshll.u32 %v868_v54, 8  ;;  %v7012_v5 = vshrl.u32 %v4561_v46, 30 }
 0x135   :  { %v903_v28 = vsel %vm893_vm4, %v900_v44, %v902_v4  ;;  %v905_v34 = vsel %vm895_vm2, %v891_v48, 1326507024  ;;  %v7018_v52 = vadd.f32 %v6607_v59, %v6585_v41  ;;  %v897_v40 = vsel %vm895_vm2, %v885_v13, 2102212464 }
 0x136   :  { %12388 = vst [vmem:[#allocation42_spill] sm:$0xff] %v7012_v5  ;;  %v906_v29 = vsel %vm894_vm3, %v888_v32, %v905_v34  ;;  %v7022_v16 = vmul.u32.u64.low %v908_v53, %v903_v28  ;;  %v7023_v15 = vmul.u32.u64.high %v908_v53, %v903_v28, %v7022_v16  ;;  %v4262_v22 = vshrl.u32 %v6936_v61, %v4260_v12 }
 0x137   :  { %12389 = vst [vmem:[#allocation43_spill] sm:$0xff] %v7018_v52  ;;  %v876_v46 = vshrl.u32 %v12373_v55, %v875_v23  ;;  %v907_v17 = vsel %vm893_vm4, %v904_v31, %v906_v29  ;;  %v4614_v48 = vadd.s32 1, %v5910_v21  ;;  %vm5757_vm5 = vcmp.lt.s32.totalorder %v5756_v51, 0 }
 0x138   :  { %12390 = vst [vmem:[#allocation44_spill] sm:$0xff] %v7022_v16  ;;  %v822_v59 = vsub.s32 0, %v7000_v50  ;;  %v7031_v26 = vmul.u32.u64.low %v908_v53, %v907_v17  ;;  %v7032_v13 = vmul.u32.u64.high %v908_v53, %v907_v17, %v7031_v26  ;;  %v4563_v32 = vshll.u32 %v7012_v5, 30 }
 0x139   :  { %v896_v25 = vsel %vm892_vm0, %v876_v46, %v879_v47  ;;  %v898_v61 = vsel %vm894_vm3, %v882_v10, %v897_v40  ;;  %vm4615_vm6 = vcmp.gt.s32.totalorder %v4614_v48, 0  ;;  %v4266_v23 = vshll.u32 %v4265_v19, 23  ;;  %v7072_v26 = vpop.f32.mrb[7].mxu1 }
 0x13a   :  { %v12112_v12 = vand.u32 2147483647, %v6943_v62  ;;  %v4616_v54 = vsel %vm4615_vm6, %v4614_v48, 0  ;;  %v1071_v44 = vand.u32 2139095040, %v7018_v52  ;;  %v4261_v39 = vshll.u32 %v6812_v38, %v6948_v18  ;;  %12392 = vst [vmem:[#allocation46_spill] sm:$0xff] %v7072_v26 }
 0x13b   :  { %v7043_v21 = vsel %vm5757_vm5, 0, %v5756_v51  ;;  %v918_v4 = vadd.s32 1, %v7023_v15  ;;  %v4618_v31 = vand.u32 31, %v4616_v54  ;;  %v7048_v47 = vor.u32 %v6959_v56, %v6953_v36 }
 0x13c   :  { %v899_v10 = vsel %vm893_vm4, %v896_v25, %v898_v61  ;;  %vm917_vm7 = vc.u32 %v7032_v13, %v7022_v16  ;;  %v7056_v28 = vor.u32 %v4262_v22, %v4261_v39  ;;  %v5763_v38 = vmin.u32 %v822_v59, %v7000_v50 }
 0x13d   :  { %12391 = vst [vmem:[#allocation45_spill] sm:$0xff] %v7048_v47  ;;  %v7060_v51 = vsub.s32 %v6981_v24, %v4563_v32  ;;  %v4619_v18 = vsub.s32 32, %v4618_v31  ;;  %v4267_v34 = vor.u32 4788187, %v4266_v23  ;;  %v624_v36 = vsub.s32 4294967266, %v7043_v21 }
 0x13e   :  { %v4611_v56 = vand.u32 8388607, %v12112_v12  ;;  %v1072_v40 = vshrl.u32 %v1071_v44, 23  ;;  %v915_v20 = vmul.u32 %v908_v53, %v899_v10  ;;  %v919_v29 = vsel %vm917_vm7, %v918_v4, %v7023_v15 }
 0x13f   :  { %v4621_v46 = vshll.u32 %v12373_v55, %v4618_v31  ;;  %v4624_v22 = vshll.u32 %v12381_v49, %v4618_v31  ;;  %v4622_v17 = vshrl.u32 %v12381_v49, %v4619_v18  ;;  %v4625_v24 = vshrl.u32 %v12365_v0, %v4619_v18 }
 0x140   :  { %v4627_v48 = vshll.u32 %v12365_v0, %v4618_v31  ;;  %v4628_v59 = vshrl.u32 %v12366_v11, %v4619_v18  ;;  %v824_v32 = vclz %v5763_v38  ;;  %v4566_v25 = vsub.s32 0, %v7060_v51 }
 0x141   :  { %v4630_v53 = vshll.u32 %v12366_v11, %v4618_v31  ;;  %v4631_v15 = vshrl.u32 %v12367_v43, %v4619_v18  ;;  %v4270_v61 = vcvt.s32.f32 %v7056_v28  ;;  %v7078_v23 = vadd.s32 %v919_v29, %v915_v20 }
 0x142   :  { %v7080_v44 = vshrl.u32 %v4616_v54, 5  ;;  %v5774_v39 = vadd.s32 4294967169, %v1072_v40  ;;  %v4623_v4 = vor.u32 %v4622_v17, %v4621_v46  ;;  %v4626_v10 = vor.u32 %v4625_v24, %v4624_v22 }
 0x143   :  { %v4632_v12 = vor.u32 %v4631_v15, %v4630_v53  ;;  %v4633_v19 = vshll.u32 %v12367_v43, %v4618_v31  ;;  %v4268_v5 = vand.u32 2147483647, %v4267_v34  ;;  %v4612_v38 = vor.u32 8388608, %v4611_v56 }
 0x144   :  { %v4629_v26 = vor.u32 %v4628_v59, %v4627_v48  ;;  %v4634_v62 = vshrl.u32 %v12369_v27, %v4619_v18  ;;  %v620_v57 = vsub.s32 32, %v7043_v21  ;;  %v625_v58 = vadd.s32 127, %v624_v36 }
 0x145   :  { %v5764_v16 = vadd.s32 4294967294, %v824_v32  ;;  %v5907_v28 = vmin.u32 %v4566_v25, %v7060_v51  ;;  %v921_v54 = vadd.s32 536870912, %v7078_v23  ;;  %vm4636_vm9 = vcmp.lt.s32.totalorder %v7080_v44, 1 }
 0x146   :  { %v4635_v20 = vor.u32 %v4634_v62, %v4633_v19  ;;  %vm4639_vm10 = vcmp.lt.s32.totalorder %v7080_v44, 4  ;;  %vm4638_vm11 = vcmp.lt.s32.totalorder %v7080_v44, 3  ;;  %v4644_v31 = vsel %vm4636_vm9, %v4623_v4, %v4626_v10 }
 0x147   :  { %v4645_v34 = vsel %vm4639_vm10, %v4632_v12, 920167782  ;;  %v1078_v56 = vadd.s32 1, %v5774_v39  ;;  %vm4637_vm12 = vcmp.lt.s32.totalorder %v7080_v44, 2  ;;  %v4648_v62 = vsel %vm4636_vm9, %v4626_v10, %v4629_v26 }
 0x148   :  { %v4646_v36 = vsel %vm4638_vm11, %v4629_v26, %v4645_v34  ;;  %v4652_v19 = vshll.u32 %v4612_v38, 8  ;;  %vm5765_vm13 = vcmp.lt.s32.totalorder %v5764_v16, 0  ;;  %v4568_v40 = vclz %v5907_v28 }
 0x149   :  { %v4647_v29 = vsel %vm4637_vm12, %v4644_v31, %v4646_v36  ;;  %v4649_v46 = vsel %vm4639_vm10, %v4635_v20, 1326507024  ;;  %v7103_v22 = vshrl.u32 %v921_v54, 30  ;;  %v626_v59 = vshll.u32 %v625_v58, 23 }
 0x14a   :  { %v4650_v17 = vsel %vm4638_vm11, %v4632_v12, %v4649_v46  ;;  %v7107_v24 = vmul.u32.u64.low %v4652_v19, %v4647_v29  ;;  %v7108_v48 = vmul.u32.u64.high %v4652_v19, %v4647_v29, %v7107_v24  ;;  %v4620_v32 = vshrl.u32 %v12373_v55, %v4619_v18 }
 0x14b   :  { %12393 = vst [vmem:[#allocation47_spill] sm:$0xff] %v7103_v22  ;;  %v4651_v25 = vsel %vm4637_vm12, %v4648_v62, %v4650_v17  ;;  %vm1079_vm14 = vcmp.gt.s32.totalorder %v1078_v56, 0  ;;  %v4641_v53 = vsel %vm4639_vm10, %v4629_v26, 2102212464  ;;  %v7119_v28 = vmul.f32 %v4270_v61, %v4268_v5 }
 0x14c   :  { %v7116_v15 = vmul.u32.u64.low %v4652_v19, %v4651_v25  ;;  %v7117_v39 = vmul.u32.u64.high %v4652_v19, %v4651_v25, %v7116_v15  ;;  %v1080_v38 = vsel %vm1079_vm14, %v1078_v56, 0  ;;  %v827_v12 = vsel %vm5765_vm13, 0, %v5764_v16 }
 0x14d   :  { %v5908_v54 = vadd.s32 4294967294, %v4568_v40  ;;  %v1082_v20 = vand.u32 31, %v1080_v38  ;;  %v621_v58 = vshll.u32 %v6905_v3, %v7043_v21  ;;  %v622_v18 = vshrl.u32 %v6969_v14, %v620_v57 }
 0x14e   :  { %v812_v31 = vadd.s32 %v6830_v1, %v6837_v7  ;;  %v923_v26 = vshll.u32 %v7103_v22, 30  ;;  %v4640_v34 = vsel %vm4636_vm9, %v4620_v32, %v4623_v4  ;;  %v4642_v5 = vsel %vm4638_vm11, %v4626_v10, %v4641_v53 }
 0x14f   :  { %v4662_v16 = vadd.s32 1, %v7108_v48  ;;  %v7133_v61 = vsub.s32 32, %v1082_v20  ;;  %v7135_v56 = vor.u32 4788187, %v626_v59  ;;  %v828_v3 = vsub.s32 32, %v827_v12 }
 0x150   :  { %vm4661_vm15 = vc.u32 %v7117_v39, %v7107_v24  ;;  %v12119_v57 = vand.u32 2147483647, %v7018_v52  ;;  %v832_v1 = vsub.s32 4294967266, %v827_v12  ;;  %vm5909_vm0 = vcmp.lt.s32.totalorder %v5908_v54, 0 }
 0x151   :  { %v1094_v7 = vshll.u32 %v12366_v11, %v1082_v20  ;;  %v7143_v14 = vadd.f32 %v6609_v60, %v6585_v41  ;;  %v7146_v21 = vsub.s32 %v7078_v23, %v923_v26  ;;  %v4643_v4 = vsel %vm4637_vm12, %v4640_v34, %v4642_v5  ;;  %v7170_v34 = vpop.f32.mrb[8].mxu0 }
 0x152   :  { %v7150_v10 = vshrl.u32 %v1080_v38, 5  ;;  %v1085_v36 = vshll.u32 %v12373_v55, %v1082_v20  ;;  %v4663_v62 = vsel %vm4661_vm15, %v4662_v16, %v7108_v48  ;;  %v1088_v40 = vshll.u32 %v12381_v49, %v1082_v20 }
 0x153   :  { %12394 = vst [vmem:[#allocation48_spill] sm:$0xff] %v7143_v14  ;;  %v1091_v29 = vshll.u32 %v12365_v0, %v1082_v20  ;;  %v1095_v60 = vshrl.u32 %v12367_v43, %v7133_v61  ;;  %v1086_v23 = vshrl.u32 %v12381_v49, %v7133_v61  ;;  %v1089_v44 = vshrl.u32 %v12365_v0, %v7133_v61 }
 0x154   :  { %v1092_v46 = vshrl.u32 %v12366_v11, %v7133_v61  ;;  %v1097_v17 = vshll.u32 %v12367_v43, %v1082_v20  ;;  %v829_v48 = vshll.u32 %v7000_v50, %v827_v12  ;;  %v4659_v59 = vmul.u32 %v4652_v19, %v4643_v4 }
 0x155   :  { %v1096_v32 = vor.u32 %v1095_v60, %v1094_v7  ;;  %v1098_v25 = vshrl.u32 %v12369_v27, %v7133_v61  ;;  %v830_v53 = vshrl.u32 %v812_v31, %v828_v3  ;;  %v833_v15 = vadd.s32 127, %v832_v1 }
 0x156   :  { %v4571_v38 = vsel %vm5909_vm0, 0, %v5908_v54  ;;  %v926_v26 = vsub.s32 0, %v7146_v21  ;;  %v7172_v5 = vadd.s32 %v4663_v62, %v4659_v59  ;;  %v1075_v20 = vand.u32 8388607, %v12119_v57 }
 0x157   :  { %v1099_v16 = vor.u32 %v1098_v25, %v1097_v17  ;;  %v4815_v50 = vand.u32 2139095040, %v7143_v14  ;;  %v7177_v19 = vor.u32 %v1086_v23, %v1085_v36  ;;  %v7179_v12 = vor.u32 %v1089_v44, %v1088_v40 }
 0x158   :  { %v1093_v31 = vor.u32 %v1092_v46, %v1091_v29  ;;  %vm1103_vm2 = vcmp.lt.s32.totalorder %v7150_v10, 4  ;;  %v623_v3 = vor.u32 %v622_v18, %v621_v58  ;;  %v4576_v1 = vsub.s32 4294967266, %v4571_v38 }
 0x159   :  { %v1109_v7 = vsel %vm1103_vm2, %v1096_v32, 920167782  ;;  %v628_v4 = vand.u32 2147483647, %v7135_v56  ;;  %v7186_v62 = vor.u32 %v830_v53, %v829_v48  ;;  %v834_v60 = vshll.u32 %v833_v15, 23 }
 0x15a   :  { %v5767_v36 = vmin.u32 %v926_v26, %v7146_v21  ;;  %vm1100_vm3 = vcmp.lt.s32.totalorder %v7150_v10, 1  ;;  %vm1102_vm4 = vcmp.lt.s32.totalorder %v7150_v10, 3  ;;  %v1113_v40 = vsel %vm1103_vm2, %v1099_v16, 1326507024 }
 0x15b   :  { %v4816_v29 = vshrl.u32 %v4815_v50, 23  ;;  %v4665_v58 = vadd.s32 536870912, %v7172_v5  ;;  %v1076_v18 = vor.u32 8388608, %v1075_v20  ;;  %v1108_v56 = vsel %vm1100_vm3, %v7177_v19, %v7179_v12 }
 0x15c   :  { %v1110_v23 = vsel %vm1102_vm4, %v1093_v31, %v1109_v7  ;;  %v630_v44 = vcvt.s32.f32 %v623_v3  ;;  %v4572_v46 = vsub.s32 32, %v4571_v38  ;;  %v4577_v17 = vadd.s32 127, %v4576_v1 }
 0x15d   :  { %v5918_v48 = vadd.s32 4294967169, %v4816_v29  ;;  %v4556_v59 = vadd.s32 %v6917_v37, %v6922_v8  ;;  %vm1101_vm5 = vcmp.lt.s32.totalorder %v7150_v10, 2  ;;  %v1112_v25 = vsel %vm1100_vm3, %v7179_v12, %v1093_v31 }
 0x15e   :  { %v1114_v53 = vsel %vm1102_vm4, %v1096_v32, %v1113_v40  ;;  %v7208_v15 = vor.u32 4788187, %v834_v60  ;;  %v928_v26 = vclz %v5767_v36  ;;  %v1111_v20 = vsel %vm1101_vm5, %v1108_v56, %v1110_v23 }
 0x15f   :  { %v4822_v16 = vadd.s32 1, %v5918_v48  ;;  %v7212_v50 = vmul.f32 %v630_v44, %v628_v4  ;;  %v7215_v8 = vshrl.u32 %v4665_v58, 30  ;;  %v7217_v3 = vshll.u32 %v1076_v18, 8 }
 0x160   :  { %v4574_v1 = vshrl.u32 %v4556_v59, %v4572_v46  ;;  %v4578_v7 = vshll.u32 %v4577_v17, 23  ;;  %v1115_v32 = vsel %vm1101_vm5, %v1112_v25, %v1114_v53  ;;  %v12118_v4 = vand.u32 2147483647, %v7143_v14 }
 0x161   :  { %12395 = vst [vmem:[#allocation49_spill] sm:$0xff] %v7215_v8  ;;  %vm4823_vm6 = vcmp.gt.s32.totalorder %v4822_v16, 0  ;;  %v7222_v60 = vmul.u32.u64.low %v7217_v3, %v1111_v20  ;;  %v7223_v36 = vmul.u32.u64.high %v7217_v3, %v1111_v20, %v7222_v60  ;;  %v4573_v58 = vshll.u32 %v7060_v51, %v4571_v38 }
 0x162   :  { %v4824_v40 = vsel %vm4823_vm6, %v4822_v16, 0  ;;  %v5768_v18 = vadd.s32 4294967294, %v928_v26  ;;  %v4667_v23 = vshll.u32 %v7215_v8, 30  ;;  %v1084_v44 = vshrl.u32 %v12373_v55, %v7133_v61 }
 0x163   :  { %v4826_v56 = vand.u32 31, %v4824_v40  ;;  %v7233_v46 = vmul.u32.u64.low %v7217_v3, %v1115_v32  ;;  %v7234_v17 = vmul.u32.u64.high %v7217_v3, %v1115_v32, %v7233_v46  ;;  %v7236_v48 = vor.u32 %v4574_v1, %v4573_v58 }
 0x164   :  { %v7238_v59 = vor.u32 4788187, %v4578_v7  ;;  %v7242_v53 = vadd.f32 %v6611_v63, %v6588_v42  ;;  %v1105_v51 = vsel %vm1103_vm2, %v1093_v31, 2102212464  ;;  %v4819_v38 = vand.u32 8388607, %v12118_v4 }
 0x165   :  { %v4827_v25 = vsub.s32 32, %v4826_v56  ;;  %v4829_v61 = vshll.u32 %v12373_v55, %v4826_v56  ;;  %v4832_v26 = vshll.u32 %v12381_v49, %v4826_v56  ;;  %v7250_v20 = vshrl.u32 %v4824_v40, 5  ;;  %v7255_v63 = vpop.f32.mrb[8].mxu1 }
 0x166   :  { %12396 = vst [vmem:[#allocation50_spill] sm:$0xff] %v7242_v53  ;;  %v4835_v7 = vshll.u32 %v12365_v0, %v4826_v56  ;;  %vm5769_vm7 = vcmp.lt.s32.totalorder %v5768_v18, 0  ;;  %v7258_v31 = vsub.s32 %v7172_v5, %v4667_v23  ;;  %v1104_v32 = vsel %vm1100_vm3, %v1084_v44, %v7177_v19 }
 0x167   :  { %v4830_v16 = vshrl.u32 %v12381_v49, %v4827_v25  ;;  %v4833_v1 = vshrl.u32 %v12365_v0, %v4827_v25  ;;  %v4836_v58 = vshrl.u32 %v12366_v11, %v4827_v25  ;;  %v1106_v40 = vsel %vm1102_vm4, %v7179_v12, %v1105_v51 }
 0x168   :  { %v4838_v46 = vshll.u32 %v12366_v11, %v4826_v56  ;;  %v4839_v4 = vshrl.u32 %v12367_v43, %v4827_v25  ;;  %v1175_v57 = vand.u32 2139095040, %v7242_v53  ;;  %v1126_v54 = vadd.s32 1, %v7223_v36 }
 0x169   :  { %v4831_v5 = vor.u32 %v4830_v16, %v4829_v61  ;;  %v4834_v23 = vor.u32 %v4833_v1, %v4832_v26  ;;  %v4837_v37 = vor.u32 %v4836_v58, %v4835_v7  ;;  %v4841_v19 = vshll.u32 %v12367_v43, %v4826_v56 }
 0x16a   :  { %v4840_v29 = vor.u32 %v4839_v4, %v4838_v46  ;;  %v4842_v44 = vshrl.u32 %v12369_v27, %v4827_v25  ;;  %vm4844_vm9 = vcmp.lt.s32.totalorder %v7250_v20, 1  ;;  %v4670_v12 = vsub.s32 0, %v7258_v31 }
 0x16b   :  { %v1107_v51 = vsel %vm1101_vm5, %v1104_v32, %v1106_v40  ;;  %vm1125_vm10 = vc.u32 %v7234_v17, %v7222_v60  ;;  %v4820_v8 = vor.u32 8388608, %v4819_v38  ;;  %vm4846_vm11 = vcmp.lt.s32.totalorder %v7250_v20, 3 }
 0x16c   :  { %v4843_v22 = vor.u32 %v4842_v44, %v4841_v19  ;;  %vm4847_vm12 = vcmp.lt.s32.totalorder %v7250_v20, 4  ;;  %v1176_v4 = vshrl.u32 %v1175_v57, 23  ;;  %vm4190_vm13 = vcmp.lt.s32.totalorder %v6591_v45, 0 }
 0x16d   :  { %v4580_v56 = vand.u32 2147483647, %v7238_v59  ;;  %v4582_v61 = vcvt.s32.f32 %v7236_v48  ;;  %vm4845_vm14 = vcmp.lt.s32.totalorder %v7250_v20, 2  ;;  %v4852_v10 = vsel %vm4844_vm9, %v4831_v5, %v4834_v23 }
 0x16e   :  { %v1127_v26 = vsel %vm1125_vm10, %v1126_v54, %v7223_v36  ;;  %v4853_v38 = vsel %vm4847_vm12, %v4840_v29, 920167782  ;;  %v4856_v16 = vsel %vm4844_vm9, %v4834_v23, %v4837_v37  ;;  %v4857_v57 = vsel %vm4847_vm12, %v4843_v22, 1326507024 }
 0x16f   :  { %v7295_v59 = vsel %vm5769_vm7, 0, %v5768_v18  ;;  %v5911_v48 = vmin.u32 %v4670_v12, %v7258_v31  ;;  %v1123_v1 = vmul.u32 %v7217_v3, %v1107_v51  ;;  %v4854_v7 = vsel %vm4846_vm11, %v4837_v37, %v4853_v38 }
 0x170   :  { %v4855_v54 = vsel %vm4845_vm14, %v4852_v10, %v4854_v7  ;;  %v4858_v36 = vsel %vm4846_vm11, %v4840_v29, %v4857_v57  ;;  %v4860_v32 = vshll.u32 %v4820_v8, 8  ;;  %v5778_v58 = vadd.s32 4294967169, %v1176_v4 }
 0x171   :  { %v7305_v40 = vadd.s32 %v1127_v26, %v1123_v1  ;;  %v4828_v22 = vshrl.u32 %v12373_v55, %v4827_v25  ;;  %v4849_v18 = vsel %vm4847_vm12, %v4837_v37, 2102212464  ;;  %v4859_v3 = vsel %vm4845_vm14, %v4856_v16, %v4858_v36  ;;  %v12407_v36 = vld [vmem:[#allocation22_spill] sm:$0xff] }
 0x172   :  { %v7312_v46 = vmul.u32.u64.low %v4860_v32, %v4859_v3  ;;  %v7313_v19 = vmul.u32.u64.high %v4860_v32, %v4859_v3, %v7312_v46  ;;  %v7315_v44 = vmul.u32.u64.low %v4860_v32, %v4855_v54  ;;  %v7316_v12 = vmul.u32.u64.high %v4860_v32, %v4855_v54, %v7315_v44 }
 0x173   :  { %v12397_v8 = vor.u32 %v6875_v33, %v6869_v30  ;;  %vm4327_vm15 = vcmp.lt.s32.totalorder %v6939_v6, 4  ;;  %v12399_v37 = vand.u32 2147483647, %v7208_v15  ;;  %v12400_v25 = vcvt.s32.f32 %v7186_v62 }
 0x174   :  { %v1182_v4 = vadd.s32 1, %v5778_v58  ;;  %v7336_v10 = vsel %vm4327_vm15, %v7048_v47, 920167782  ;;  %v12402_v30 = vor.u32 %v6973_v9, %v6963_v35  ;;  %v7345_v26 = vmul.f32 %v4582_v61, %v4580_v56 }
 0x175   :  { %v7324_v29 = vsel %vm479_vm8, %v12397_v8, 1326507024  ;;  %v7331_v51 = vmul.f32 %v12400_v25, %v12399_v37  ;;  %12401 = vst [vmem:[#allocation52_spill] sm:$0xff] %v7336_v10  ;;  %v936_v15 = vsub.s32 4294967266, %v7295_v59  ;;  %v4672_v62 = vclz %v5911_v48 }
 0x176   :  { %12398 = vst [vmem:[#allocation51_spill] sm:$0xff] %v7324_v29  ;;  %v7343_v33 = vsel %vm4327_vm15, %v12402_v30, 1326507024  ;;  %v4848_v38 = vsel %vm4844_vm9, %v4828_v22, %v4831_v5  ;;  %v4850_v16 = vsel %vm4846_vm11, %v4834_v23, %v4849_v18  ;;  %vm1183_vm0 = vcmp.gt.s32.totalorder %v1182_v4, 0  ;;  %v12406_v5 = vld [vmem:[#allocation44_spill] sm:$0xff] }
 0x177   :  { %12403 = vst [vmem:[#allocation53_spill] sm:$0xff] %v7343_v33  ;;  %v12404_v57 = vxor.u32 2147483648, %v7119_v28  ;;  %v1129_v56 = vadd.s32 536870912, %v7305_v40  ;;  %v4870_v61 = vadd.s32 1, %v7316_v12  ;;  %v916_v1 = vadd.s32 %v12406_v5, %v7032_v13 }
 0x178   :  { %vm4869_vm2 = vc.u32 %v7313_v19, %v7315_v44  ;;  %v1184_v23 = vsel %vm1183_vm0, %v1182_v4, 0  ;;  %v7372_v58 = vadd.f32 %v12407_v36, %v6588_v42  ;;  %v932_v22 = vsub.s32 32, %v7295_v59 }
 0x179   :  { %v7357_v35 = vsel %vm4190_vm13, %v12404_v57, %v7119_v28  ;;  %v4851_v28 = vsel %vm4845_vm14, %v4848_v38, %v4850_v16  ;;  %v1186_v54 = vand.u32 31, %v1184_v23  ;;  %v937_v18 = vadd.s32 127, %v936_v15 }
 0x17a   :  { %12405 = vst [vmem:[#allocation54_spill] sm:$0xff] %v7357_v35  ;;  %12408 = vst [vmem:[#allocation44_spill] sm:$0xff] %v7372_v58  ;;  %v5912_v3 = vadd.s32 4294967294, %v4672_v62  ;;  %v12129_v13 = vand.u32 2147483647, %v7242_v53  ;;  %v7376_v46 = vshrl.u32 %v1129_v56, 30  ;;  %v4871_v8 = vsel %vm4869_vm2, %v4870_v61, %v7316_v12 }
 0x17b   :  { %v1187_v37 = vsub.s32 32, %v1186_v54  ;;  %v1189_v25 = vshll.u32 %v12373_v55, %v1186_v54  ;;  %v4867_v20 = vmul.u32 %v4860_v32, %v4851_v28  ;;  %v1192_v4 = vshll.u32 %v12381_v49, %v1186_v54  ;;  %v7387_v56 = vpop.f32.mrb[9].mxu0 }
 0x17c   :  { %12409 = vst [vmem:[#allocation22_spill] sm:$0xff] %v7376_v46  ;;  %v1195_v30 = vshll.u32 %v12365_v0, %v1186_v54  ;;  %v1198_v38 = vshll.u32 %v12366_v11, %v1186_v54  ;;  %v4919_v57 = vand.u32 2139095040, %v7372_v58  ;;  %vm5913_vm3 = vcmp.lt.s32.totalorder %v5912_v3, 0 }
 0x17d   :  { %v1190_v16 = vshrl.u32 %v12381_v49, %v1187_v37  ;;  %v1193_v15 = vshrl.u32 %v12365_v0, %v1187_v37  ;;  %v1196_v62 = vshrl.u32 %v12366_v11, %v1187_v37  ;;  %v4872_v12 = vadd.s32 %v4871_v8, %v4867_v20 }
 0x17e   :  { %v7389_v61 = vshrl.u32 %v1184_v23, 5  ;;  %v1199_v32 = vshrl.u32 %v12367_v43, %v1187_v37  ;;  %v1131_v5 = vshll.u32 %v7376_v46, 30  ;;  %v1179_v28 = vand.u32 8388607, %v12129_v13 }
 0x17f   :  { %v1191_v36 = vor.u32 %v1190_v16, %v1189_v25  ;;  %v1201_v7 = vshll.u32 %v12367_v43, %v1186_v54  ;;  %v1194_v48 = vor.u32 %v1193_v15, %v1192_v4  ;;  %v1197_v9 = vor.u32 %v1196_v62, %v1195_v30 }
 0x180   :  { %v1200_v35 = vor.u32 %v1199_v32, %v1198_v38  ;;  %v1202_v45 = vshrl.u32 %v12369_v27, %v1187_v37  ;;  %v934_v47 = vshrl.u32 %v916_v1, %v932_v22  ;;  %v4660_v23 = vadd.s32 %v7107_v24, %v7117_v39 }
 0x181   :  { %v4675_v8 = vsel %vm5913_vm3, 0, %v5912_v3  ;;  %v4920_v20 = vshrl.u32 %v4919_v57, 23  ;;  %v938_v33 = vshll.u32 %v937_v18, 23  ;;  %v4873_v10 = vadd.s32 536870912, %v4872_v12 }
 0x182   :  { %v1203_v46 = vor.u32 %v1202_v45, %v1201_v7  ;;  %vm1207_vm4 = vcmp.lt.s32.totalorder %v7389_v61, 4  ;;  %v1180_v13 = vor.u32 8388608, %v1179_v28  ;;  %vm1204_vm5 = vcmp.lt.s32.totalorder %v7389_v61, 1 }
 0x183   :  { %vm1206_vm6 = vcmp.lt.s32.totalorder %v7389_v61, 3  ;;  %v1213_v54 = vsel %vm1207_vm4, %v1200_v35, 920167782  ;;  %v4680_v25 = vsub.s32 4294967266, %v4675_v8  ;;  %v7405_v1 = vsub.s32 %v7305_v40, %v1131_v5 }
 0x184   :  { %v1212_v24 = vsel %vm1204_vm5, %v1191_v36, %v1194_v48  ;;  %v1214_v45 = vsel %vm1206_vm6, %v1197_v9, %v1213_v54  ;;  %v933_v39 = vshll.u32 %v7146_v21, %v7295_v59  ;;  %v4676_v7 = vsub.s32 32, %v4675_v8 }
 0x185   :  { %v1217_v22 = vsel %vm1207_vm4, %v1203_v46, 1326507024  ;;  %v5922_v18 = vadd.s32 4294967169, %v4920_v20  ;;  %v7415_v3 = vshrl.u32 %v4873_v10, 30  ;;  %vm1205_vm7 = vcmp.lt.s32.totalorder %v7389_v61, 2  ;;  %v12414_v61 = vld [vmem:[#allocation21_spill] sm:$0xff] }
 0x186   :  { %v1216_v40 = vsel %vm1204_vm5, %v1194_v48, %v1197_v9  ;;  %v1218_v4 = vsel %vm1206_vm6, %v1200_v35, %v1217_v22  ;;  %v7422_v30 = vor.u32 %v934_v47, %v933_v39  ;;  %v7424_v38 = vor.u32 4788187, %v938_v33  ;;  %v12411_v22 = vld [vmem:[#allocation26_spill] sm:$0xff] }
 0x187   :  { %12410 = vst [vmem:[#allocation55_spill] sm:$0xff] %v7415_v3  ;;  %v1215_v21 = vsel %vm1205_vm7, %v1212_v24, %v1214_v45  ;;  %v4926_v59 = vadd.s32 1, %v5922_v18  ;;  %v4681_v46 = vadd.s32 127, %v4680_v25  ;;  %v1134_v10 = vsub.s32 0, %v7405_v1 }
 0x188   :  { %v7429_v16 = vshll.u32 %v1180_v13, 8  ;;  %v12130_v15 = vand.u32 2147483647, %v7372_v58  ;;  %v4678_v62 = vshrl.u32 %v4660_v23, %v4676_v7  ;;  %v1188_v57 = vshrl.u32 %v12373_v55, %v1187_v37 }
 0x189   :  { %v1219_v47 = vsel %vm1205_vm7, %v1216_v40, %v1218_v4  ;;  %vm4927_vm9 = vcmp.gt.s32.totalorder %v4926_v59, 0  ;;  %v4875_v33 = vshll.u32 %v7415_v3, 30  ;;  %v942_v13 = vcvt.s32.f32 %v7422_v30  ;;  %v12413_v3 = vld [vmem:[#allocation19_spill] sm:$0xff] }
 0x18a   :  { %v7437_v35 = vmul.u32.u64.low %v7429_v16, %v1215_v21  ;;  %v7438_v32 = vmul.u32.u64.high %v7429_v16, %v1215_v21, %v7437_v35  ;;  %v4928_v5 = vsel %vm4927_vm9, %v4926_v59, 0  ;;  %v4677_v28 = vshll.u32 %v7258_v31, %v4675_v8  ;;  %v7469_v59 = vpop.f32.mrb[9].mxu1 }
 0x18b   :  { %v1209_v23 = vsel %vm1207_vm4, %v1197_v9, 2102212464  ;;  %v4930_v37 = vand.u32 31, %v4928_v5  ;;  %v4682_v20 = vshll.u32 %v4681_v46, 23  ;;  %v5775_v54 = vmin.u32 %v1134_v10, %v7405_v1 }
 0x18c   :  { %v7447_v25 = vmul.u32.u64.low %v7429_v16, %v1219_v47  ;;  %v7448_v24 = vmul.u32.u64.high %v7429_v16, %v1219_v47, %v7447_v25  ;;  %v940_v45 = vand.u32 2147483647, %v7424_v38  ;;  %v4923_v39 = vand.u32 8388607, %v12130_v15 }
 0x18d   :  { %v4931_v7 = vsub.s32 32, %v4930_v37  ;;  %v7455_v31 = vadd.f32 %v12411_v22, %v6585_v41  ;;  %v7457_v8 = vor.u32 %v4678_v62, %v4677_v28  ;;  %v7459_v9 = vsub.s32 %v4872_v12, %v4875_v33 }
 0x18e   :  { %v1208_v18 = vsel %vm1204_vm5, %v1188_v57, %v1191_v36  ;;  %v1210_v40 = vsel %vm1206_vm6, %v1194_v48, %v1209_v23  ;;  %v4933_v4 = vshll.u32 %v12373_v55, %v4930_v37  ;;  %v4936_v38 = vshll.u32 %v12381_v49, %v4930_v37 }
 0x18f   :  { %12412 = vst [vmem:[#allocation26_spill] sm:$0xff] %v7455_v31  ;;  %v4934_v30 = vshrl.u32 %v12381_v49, %v4931_v7  ;;  %v4937_v21 = vshrl.u32 %v12365_v0, %v4931_v7  ;;  %v4683_v46 = vor.u32 4788187, %v4682_v20  ;;  %v1136_v10 = vclz %v5775_v54 }
 0x190   :  { %v7471_v12 = vshrl.u32 %v4928_v5, 5  ;;  %v4939_v62 = vshll.u32 %v12365_v0, %v4930_v37  ;;  %v4924_v36 = vor.u32 8388608, %v4923_v39  ;;  %v4940_v57 = vshrl.u32 %v12366_v11, %v4931_v7 }
 0x191   :  { %v4942_v48 = vshll.u32 %v12366_v11, %v4930_v37  ;;  %v1383_v47 = vand.u32 2139095040, %v7455_v31  ;;  %v4878_v33 = vsub.s32 0, %v7459_v9  ;;  %v1211_v28 = vsel %vm1205_vm7, %v1208_v18, %v1210_v40 }
 0x192   :  { %v1230_v23 = vadd.s32 1, %v7438_v32  ;;  %v4943_v20 = vshrl.u32 %v12367_v43, %v4931_v7  ;;  %v4935_v5 = vor.u32 %v4934_v30, %v4933_v4  ;;  %v4938_v54 = vor.u32 %v4937_v21, %v4936_v38  ;;  %v12416_v21 = vld [vmem:[#allocation30_spill] sm:$0xff] }
 0x193   :  { %v4945_v25 = vshll.u32 %v12367_v43, %v4930_v37  ;;  %v4946_v39 = vshrl.u32 %v12369_v27, %v4931_v7  ;;  %vm1229_vm10 = vc.u32 %v7448_v24, %v7437_v35  ;;  %v4941_v22 = vor.u32 %v4940_v57, %v4939_v62  ;;  %v12415_v37 = vld [vmem:[#allocation24_spill] sm:$0xff] }
 0x194   :  { %v4944_v15 = vor.u32 %v4943_v20, %v4942_v48  ;;  %vm4948_vm11 = vcmp.lt.s32.totalorder %v7471_v12, 1  ;;  %vm550_vm12 = vcmp.lt.s32.totalorder %v12413_v3, 0  ;;  %vm758_vm14 = vcmp.lt.s32.totalorder %v12414_v61, 0 }
 0x195   :  { %v4947_v18 = vor.u32 %v4946_v39, %v4945_v25  ;;  %vm4950_vm0 = vcmp.lt.s32.totalorder %v7471_v12, 3  ;;  %vm4951_vm2 = vcmp.lt.s32.totalorder %v7471_v12, 4  ;;  %v1384_v40 = vshrl.u32 %v1383_v47, 23 }
 0x196   :  { %vm4502_vm3 = vcmp.lt.s32.totalorder %v12415_v37, 0  ;;  %v943_v4 = vmul.f32 %v942_v13, %v940_v45  ;;  %v4686_v30 = vcvt.s32.f32 %v7457_v8  ;;  %v5776_v38 = vadd.s32 4294967294, %v1136_v10 }
 0x197   :  { %vm4949_vm4 = vcmp.lt.s32.totalorder %v7471_v12, 2  ;;  %vm862_vm5 = vcmp.lt.s32.totalorder %v12416_v21, 0  ;;  %v4684_v62 = vand.u32 2147483647, %v4683_v46  ;;  %v1231_v57 = vsel %vm1229_vm10, %v1230_v23, %v7438_v32  ;;  %v7595_v21 = vpop.f32.mrb[10].mxu0 }
 0x198   :  { %v4956_v48 = vsel %vm4948_vm11, %v4935_v5, %v4938_v54  ;;  %v4957_v47 = vsel %vm4951_vm2, %v4944_v15, 920167782  ;;  %v5919_v13 = vmin.u32 %v4878_v33, %v7459_v9  ;;  %v1227_v45 = vmul.u32 %v7429_v16, %v1211_v28 }
 0x199   :  { %v4958_v8 = vsel %vm4950_vm0, %v4941_v22, %v4957_v47  ;;  %v4960_v46 = vsel %vm4948_vm11, %v4938_v54, %v4941_v22  ;;  %v4961_v32 = vsel %vm4951_vm2, %v4947_v18, 1326507024  ;;  %v7513_v23 = vshll.u32 %v4924_v36, 8 }
 0x19a   :  { %v4959_v10 = vsel %vm4949_vm4, %v4956_v48, %v4958_v8  ;;  %v5786_v20 = vadd.s32 4294967169, %v1384_v40  ;;  %vm5777_vm6 = vcmp.lt.s32.totalorder %v5776_v38, 0  ;;  %v7515_v25 = vadd.s32 %v1231_v57, %v1227_v45 }
 0x19b   :  { %v4932_v16 = vshrl.u32 %v12373_v55, %v4931_v7  ;;  %v4962_v33 = vsel %vm4950_vm0, %v4944_v15, %v4961_v32  ;;  %v7523_v39 = vmul.u32.u64.low %v7513_v23, %v4959_v10  ;;  %v7524_v48 = vmul.u32.u64.high %v7513_v23, %v4959_v10, %v7523_v39 }
 0x19c   :  { %v4963_v28 = vsel %vm4949_vm4, %v4960_v46, %v4962_v33  ;;  %v1390_v18 = vadd.s32 1, %v5786_v20  ;;  %v944_v36 = vxor.u32 2147483648, %v943_v4  ;;  %v4953_v40 = vsel %vm4951_vm2, %v4941_v22, 2102212464 }
 0x19d   :  { %v7530_v57 = vmul.u32.u64.low %v7513_v23, %v4963_v28  ;;  %v7531_v47 = vmul.u32.u64.high %v7513_v23, %v4963_v28, %v7530_v57  ;;  %v4687_v7 = vmul.f32 %v4686_v30, %v4684_v62  ;;  %v7533_v45 = vsel %vm5777_vm6, 0, %v5776_v38 }
 0x19e   :  { %v4880_v15 = vclz %v5919_v13  ;;  %vm1391_vm7 = vcmp.gt.s32.totalorder %v1390_v18, 0  ;;  %v12417_v8 = vxor.u32 2147483648, %v7212_v50  ;;  %v12419_v10 = vxor.u32 2147483648, %v7331_v51 }
 0x19f   :  { %v1233_v30 = vadd.s32 536870912, %v7515_v25  ;;  %v1392_v38 = vsel %vm1391_vm7, %v1390_v18, 0  ;;  %v12421_v62 = vxor.u32 2147483648, %v7345_v26  ;;  %v4954_v32 = vsel %vm4950_vm0, %v4938_v54, %v4953_v40  ;;  %v12424_v18 = vld [vmem:[#allocation39_spill] sm:$0xff] }
 0x1a0   :  { %v7540_v46 = vsel %vm550_vm12, %v12417_v8, %v7212_v50  ;;  %v7547_v22 = vsel %vm758_vm14, %v12419_v10, %v7331_v51  ;;  %v4952_v50 = vsel %vm4948_vm11, %v4932_v16, %v4935_v5  ;;  %v1394_v20 = vand.u32 31, %v1392_v38  ;;  %v12425_v54 = vld [vmem:[#allocation35_spill] sm:$0xff] }
 0x1a1   :  { %12418 = vst [vmem:[#allocation56_spill] sm:$0xff] %v7540_v46  ;;  %12420 = vst [vmem:[#allocation57_spill] sm:$0xff] %v7547_v22  ;;  %v7555_v13 = vsel %vm4502_vm3, %v12421_v62, %v7345_v26  ;;  %v7563_v51 = vsel %vm862_vm5, %v944_v36, %v943_v4  ;;  %v7567_v33 = vadd.s32 %v7222_v60, %v7234_v17  ;;  %v1144_v28 = vsub.s32 4294967266, %v7533_v45 }
 0x1a2   :  { %12422 = vst [vmem:[#allocation58_spill] sm:$0xff] %v7555_v13  ;;  %12423 = vst [vmem:[#allocation59_spill] sm:$0xff] %v7563_v51  ;;  %v12134_v26 = vand.u32 2147483647, %v7455_v31  ;;  %vm12193_vm9 = vcmp.lt.s32.totalorder %v12424_v18, 0  ;;  %v4688_v57 = vxor.u32 2147483648, %v4687_v7  ;;  %v7574_v40 = vadd.f32 %v12425_v54, %v6585_v41 }
 0x1a3   :  { %v5920_v5 = vadd.s32 4294967294, %v4880_v15  ;;  %v1395_v16 = vsub.s32 32, %v1394_v20  ;;  %v7576_v8 = vshrl.u32 %v1233_v30, 30  ;;  %v4955_v4 = vsel %vm4949_vm4, %v4952_v50, %v4954_v32 }
 0x1a4   :  { %12426 = vst [vmem:[#allocation35_spill] sm:$0xff] %v7574_v40  ;;  %vm4973_vm10 = vc.u32 %v7531_v47, %v7523_v39  ;;  %v4974_v60 = vadd.s32 1, %v7524_v48  ;;  %v1397_v17 = vshll.u32 %v12373_v55, %v1394_v20  ;;  %v1400_v15 = vshll.u32 %v12381_v49, %v1394_v20 }
 0x1a5   :  { %12427 = vst [vmem:[#allocation60_spill] sm:$0xff] %v7576_v8  ;;  %v1398_v36 = vshrl.u32 %v12381_v49, %v1395_v16  ;;  %v1401_v10 = vshrl.u32 %v12365_v0, %v1395_v16  ;;  %v1145_v62 = vadd.s32 127, %v1144_v28  ;;  %v1387_v30 = vand.u32 8388607, %v12134_v26 }
 0x1a6   :  { %v7589_v54 = vshrl.u32 %v1392_v38, 5  ;;  %v1403_v12 = vshll.u32 %v12365_v0, %v1394_v20  ;;  %vm5921_vm11 = vcmp.lt.s32.totalorder %v5920_v5, 0  ;;  %v1404_v50 = vshrl.u32 %v12366_v11, %v1395_v16 }
 0x1a7   :  { %v1406_v32 = vshll.u32 %v12366_v11, %v1394_v20  ;;  %v5127_v51 = vand.u32 2139095040, %v7574_v40  ;;  %v1235_v13 = vshll.u32 %v7576_v8, 30  ;;  %v4971_v28 = vmul.u32 %v7513_v23, %v4955_v4 }
 0x1a8   :  { %v4975_v38 = vsel %vm4973_vm10, %v4974_v60, %v7524_v48  ;;  %v1407_v26 = vshrl.u32 %v12367_v43, %v1395_v16  ;;  %v1399_v37 = vor.u32 %v1398_v36, %v1397_v17  ;;  %v1402_v46 = vor.u32 %v1401_v10, %v1400_v15 }
 0x1a9   :  { %v1409_v3 = vshll.u32 %v12367_v43, %v1394_v20  ;;  %v1410_v22 = vshrl.u32 %v12369_v27, %v1395_v16  ;;  %v1388_v61 = vor.u32 8388608, %v1387_v30  ;;  %v1405_v6 = vor.u32 %v1404_v50, %v1403_v12 }
 0x1aa   :  { %v1408_v29 = vor.u32 %v1407_v26, %v1406_v32  ;;  %vm1412_vm0 = vcmp.lt.s32.totalorder %v7589_v54, 1  ;;  %vm1414_vm2 = vcmp.lt.s32.totalorder %v7589_v54, 3  ;;  %vm1415_vm4 = vcmp.lt.s32.totalorder %v7589_v54, 4 }
 0x1ab   :  { %v1411_v8 = vor.u32 %v1410_v22, %v1409_v3  ;;  %v5128_v23 = vshrl.u32 %v5127_v51, 23  ;;  %v7611_v48 = vsel %vm12193_vm9, %v4688_v57, %v4687_v7  ;;  %v1140_v4 = vsub.s32 32, %v7533_v45 }
 0x1ac   :  { %12428 = vst [vmem:[#allocation61_spill] sm:$0xff] %v7611_v48  ;;  %v7614_v20 = vadd.s32 %v4975_v38, %v4971_v28  ;;  %vm1413_vm6 = vcmp.lt.s32.totalorder %v7589_v54, 2  ;;  %v1141_v26 = vshll.u32 %v7405_v1, %v7533_v45  ;;  %v1146_v60 = vshll.u32 %v1145_v62, 23 }
 0x1ad   :  { %v1420_v3 = vsel %vm1412_vm0, %v1399_v37, %v1402_v46  ;;  %v1421_v22 = vsel %vm1415_vm4, %v1408_v29, 920167782  ;;  %v7624_v51 = vsel %vm5921_vm11, 0, %v5920_v5  ;;  %v7627_v7 = vsub.s32 %v7515_v25, %v1235_v13 }
 0x1ae   :  { %v1422_v57 = vsel %vm1414_vm2, %v1405_v6, %v1421_v22  ;;  %v1424_v17 = vsel %vm1412_vm0, %v1402_v46, %v1405_v6  ;;  %v1425_v45 = vsel %vm1415_vm4, %v1411_v8, 1326507024  ;;  %v1428_v36 = vshll.u32 %v1388_v61, 8 }
 0x1af   :  { %v1423_v1 = vsel %vm1413_vm6, %v1420_v3, %v1422_v57  ;;  %v5930_v15 = vadd.s32 4294967169, %v5128_v23  ;;  %v4977_v5 = vadd.s32 536870912, %v7614_v20  ;;  %v1396_v10 = vshrl.u32 %v12373_v55, %v1395_v16  ;;  %v12430_v57 = vld [vmem:[#allocation41_spill] sm:$0xff] }
 0x1b0   :  { %v1417_v25 = vsel %vm1415_vm4, %v1405_v6, 2102212464  ;;  %v1426_v13 = vsel %vm1414_vm2, %v1408_v29, %v1425_v45  ;;  %v7645_v30 = vmul.u32.u64.low %v1428_v36, %v1423_v1  ;;  %v7646_v12 = vmul.u32.u64.high %v1428_v36, %v1423_v1, %v7645_v30 }
 0x1b1   :  { %v1427_v62 = vsel %vm1413_vm6, %v1424_v17, %v1426_v13  ;;  %v5134_v8 = vadd.s32 1, %v5930_v15  ;;  %v1142_v61 = vshrl.u32 %v7567_v33, %v1140_v4  ;;  %v7650_v50 = vor.u32 4788187, %v1146_v60 }
 0x1b2   :  { %v7652_v32 = vmul.u32.u64.low %v1428_v36, %v1427_v62  ;;  %v7653_v16 = vmul.u32.u64.high %v1428_v36, %v1427_v62, %v7652_v32  ;;  %v4884_v6 = vsub.s32 32, %v7624_v51  ;;  %v1238_v28 = vsub.s32 0, %v7627_v7 }
 0x1b3   :  { %v12142_v29 = vand.u32 2147483647, %v7574_v40  ;;  %vm5135_vm7 = vcmp.gt.s32.totalorder %v5134_v8, 0  ;;  %v7658_v38 = vshrl.u32 %v4977_v5, 30  ;;  %v1416_v23 = vsel %vm1412_vm0, %v1396_v10, %v1399_v37 }
 0x1b4   :  { %v1418_v33 = vsel %vm1414_vm2, %v1402_v46, %v1417_v25  ;;  %v5136_v4 = vsel %vm5135_vm7, %v5134_v8, 0  ;;  %v4868_v60 = vadd.s32 %v7315_v44, %v7313_v19  ;;  %v1438_v3 = vadd.s32 1, %v7646_v12 }
 0x1b5   :  { %12429 = vst [vmem:[#allocation62_spill] sm:$0xff] %v7658_v38  ;;  %v5138_v22 = vand.u32 31, %v5136_v4  ;;  %v7669_v17 = vadd.f32 %v12430_v57, %v6588_v42  ;;  %v7671_v1 = vor.u32 %v1142_v61, %v1141_v26  ;;  %v4888_v37 = vsub.s32 4294967266, %v7624_v51 }
 0x1b6   :  { %vm1437_vm10 = vc.u32 %v7653_v16, %v7645_v30  ;;  %v4885_v46 = vshll.u32 %v7459_v9, %v7624_v51  ;;  %v5779_v19 = vmin.u32 %v1238_v28, %v7627_v7  ;;  %v1419_v44 = vsel %vm1413_vm6, %v1416_v23, %v1418_v33 }
 0x1b7   :  { %12431 = vst [vmem:[#allocation41_spill] sm:$0xff] %v7669_v17  ;;  %v5139_v15 = vsub.s32 32, %v5138_v22  ;;  %v4886_v5 = vshrl.u32 %v4868_v60, %v4884_v6  ;;  %v4979_v26 = vshll.u32 %v7658_v38, 30  ;;  %v1439_v10 = vsel %vm1437_vm10, %v1438_v3, %v7646_v12  ;;  %v7691_v6 = vpop.f32.mrb[10].mxu1 }
 0x1b8   :  { %v5131_v25 = vand.u32 8388607, %v12142_v29  ;;  %v5141_v13 = vshll.u32 %v12373_v55, %v5138_v22  ;;  %v5144_v9 = vshll.u32 %v12381_v49, %v5138_v22  ;;  %v4889_v8 = vadd.s32 127, %v4888_v37 }
 0x1b9   :  { %v5142_v62 = vshrl.u32 %v12381_v49, %v5139_v15  ;;  %v5145_v51 = vshrl.u32 %v12365_v0, %v5139_v15  ;;  %v1435_v54 = vmul.u32 %v1428_v36, %v1419_v44  ;;  %v5137_v61 = vshrl.u32 %v5136_v4, 5 }
 0x1ba   :  { %v5147_v32 = vshll.u32 %v12365_v0, %v5138_v22  ;;  %v1240_v28 = vclz %v5779_v19  ;;  %v5148_v12 = vshrl.u32 %v12366_v11, %v5139_v15  ;;  %v5150_v23 = vshll.u32 %v12366_v11, %v5138_v22 }
 0x1bb   :  { %v1487_v33 = vand.u32 2139095040, %v7669_v17  ;;  %v7697_v60 = vsub.s32 %v7614_v20, %v4979_v26  ;;  %v7699_v3 = vadd.s32 %v1439_v10, %v1435_v54  ;;  %v5132_v57 = vor.u32 8388608, %v5131_v25 }
 0x1bc   :  { %v5151_v36 = vshrl.u32 %v12367_v43, %v5139_v15  ;;  %v5143_v4 = vor.u32 %v5142_v62, %v5141_v13  ;;  %v5146_v37 = vor.u32 %v5145_v51, %v5144_v9  ;;  %v5153_v44 = vshll.u32 %v12367_v43, %v5138_v22 }
 0x1bd   :  { %v5154_v19 = vshrl.u32 %v12369_v27, %v5139_v15  ;;  %v4890_v29 = vshll.u32 %v4889_v8, 23  ;;  %v5149_v45 = vor.u32 %v5148_v12, %v5147_v32  ;;  %vm5156_vm11 = vcmp.lt.s32.totalorder %v5137_v61, 1 }
 0x1be   :  { %v5152_v38 = vor.u32 %v5151_v36, %v5150_v23  ;;  %vm5158_vm0 = vcmp.lt.s32.totalorder %v5137_v61, 3  ;;  %vm5159_vm2 = vcmp.lt.s32.totalorder %v5137_v61, 4  ;;  %v1488_v20 = vshrl.u32 %v1487_v33, 23 }
 0x1bf   :  { %v5155_v48 = vor.u32 %v5154_v19, %v5153_v44  ;;  %v5780_v26 = vadd.s32 4294967294, %v1240_v28  ;;  %v4982_v10 = vsub.s32 0, %v7697_v60  ;;  %v1441_v25 = vadd.s32 536870912, %v7699_v3 }
 0x1c0   :  { %vm5157_vm4 = vcmp.lt.s32.totalorder %v5137_v61, 2  ;;  %v7706_v13 = vor.u32 %v4886_v5, %v4885_v46  ;;  %v5164_v22 = vsel %vm5156_vm11, %v5143_v4, %v5146_v37  ;;  %v5165_v62 = vsel %vm5159_vm2, %v5152_v38, 920167782 }
 0x1c1   :  { %v5172_v9 = vshll.u32 %v5132_v57, 8  ;;  %v7710_v51 = vor.u32 4788187, %v4890_v29  ;;  %v5140_v8 = vshrl.u32 %v12373_v55, %v5139_v15  ;;  %v5166_v54 = vsel %vm5158_vm0, %v5149_v45, %v5165_v62 }
 0x1c2   :  { %v5168_v32 = vsel %vm5156_vm11, %v5146_v37, %v5149_v45  ;;  %v5161_v28 = vsel %vm5159_vm2, %v5149_v45, 2102212464  ;;  %v5167_v12 = vsel %vm5157_vm4, %v5164_v22, %v5166_v54  ;;  %v5169_v46 = vsel %vm5159_vm2, %v5155_v48, 1326507024 }
 0x1c3   :  { %v5790_v5 = vadd.s32 4294967169, %v1488_v20  ;;  %vm5781_vm6 = vcmp.lt.s32.totalorder %v5780_v26, 0  ;;  %v5923_v23 = vmin.u32 %v4982_v10, %v7697_v60  ;;  %v7719_v33 = vshrl.u32 %v1441_v25, 30 }
 0x1c4   :  { %v5170_v29 = vsel %vm5158_vm0, %v5152_v38, %v5169_v46  ;;  %v7723_v57 = vmul.u32.u64.low %v5172_v9, %v5167_v12  ;;  %v7724_v36 = vmul.u32.u64.high %v5172_v9, %v5167_v12, %v7723_v57  ;;  %v5160_v45 = vsel %vm5156_vm11, %v5140_v8, %v5143_v4  ;;  %v12433_v38 = vld [vmem:[#allocation46_spill] sm:$0xff] }
 0x1c5   :  { %12432 = vst [vmem:[#allocation63_spill] sm:$0xff] %v7719_v33  ;;  %v5171_v15 = vsel %vm5157_vm4, %v5168_v32, %v5170_v29  ;;  %v1494_v44 = vadd.s32 1, %v5790_v5  ;;  %v5162_v19 = vsel %vm5158_vm0, %v5146_v37, %v5161_v28  ;;  %v1150_v10 = vcvt.s32.f32 %v7671_v1 }
 0x1c6   :  { %v7729_v48 = vmul.u32.u64.low %v5172_v9, %v5171_v15  ;;  %v7730_v20 = vmul.u32.u64.high %v5172_v9, %v5171_v15, %v7729_v48  ;;  %v12145_v25 = vand.u32 2147483647, %v7669_v17  ;;  %v7736_v22 = vadd.f32 %v12433_v38, %v6588_v42 }
 0x1c7   :  { %vm1495_vm7 = vcmp.gt.s32.totalorder %v1494_v44, 0  ;;  %v7738_v62 = vsel %vm5781_vm6, 0, %v5780_v26  ;;  %v4984_v54 = vclz %v5923_v23  ;;  %v1443_v32 = vshll.u32 %v7719_v33, 30 }
 0x1c8   :  { %12434 = vst [vmem:[#allocation46_spill] sm:$0xff] %v7736_v22  ;;  %v1496_v4 = vsel %vm1495_vm7, %v1494_v44, 0  ;;  %v12435_v37 = vand.u32 2147483647, %v7650_v50  ;;  %v5163_v28 = vsel %vm5157_vm4, %v5160_v45, %v5162_v19  ;;  %v5182_v1 = vadd.s32 1, %v7724_v36  ;;  %v7769_v19 = vpop.f32.mrb[11].mxu0 }
 0x1c9   :  { %v1498_v12 = vand.u32 31, %v1496_v4  ;;  %v4892_v46 = vand.u32 2147483647, %v7710_v51  ;;  %v4894_v5 = vcvt.s32.f32 %v7706_v13  ;;  %v1228_v26 = vadd.s32 %v7437_v35, %v7448_v24  ;;  %12436 = vst [vmem:[#allocation64_spill] sm:$0xff] %v7769_v19 }
 0x1ca   :  { %v7743_v8 = vmul.f32 %v1150_v10, %v12435_v37  ;;  %vm5181_vm10 = vc.u32 %v7730_v20, %v7723_v57  ;;  %v1248_v23 = vsub.s32 4294967266, %v7738_v62  ;;  %v5231_v61 = vand.u32 2139095040, %v7736_v22 }
 0x1cb   :  { %v5183_v50 = vsel %vm5181_vm10, %v5182_v1, %v7724_v36  ;;  %v7755_v29 = vsub.s32 32, %v1498_v12  ;;  %v5924_v15 = vadd.s32 4294967294, %v4984_v54  ;;  %v7759_v44 = vsub.s32 %v7699_v3, %v1443_v32 }
 0x1cc   :  { %v5179_v51 = vmul.u32 %v5172_v9, %v5163_v28  ;;  %v1491_v13 = vand.u32 8388607, %v12145_v25  ;;  %v1501_v35 = vshll.u32 %v12373_v55, %v1498_v12  ;;  %v1504_v45 = vshll.u32 %v12381_v49, %v1498_v12 }
 0x1cd   :  { %v1502_v24 = vshrl.u32 %v12381_v49, %v7755_v29  ;;  %v1505_v36 = vshrl.u32 %v12365_v0, %v7755_v29  ;;  %v1244_v48 = vsub.s32 32, %v7738_v62  ;;  %v7774_v9 = vshrl.u32 %v1496_v4, 5 }
 0x1ce   :  { %v7772_v3 = vadd.s32 %v5183_v50, %v5179_v51  ;;  %v1507_v10 = vshll.u32 %v12365_v0, %v1498_v12  ;;  %v1249_v38 = vadd.s32 127, %v1248_v23  ;;  %v1508_v54 = vshrl.u32 %v12366_v11, %v7755_v29 }
 0x1cf   :  { %v1510_v32 = vshll.u32 %v12366_v11, %v1498_v12  ;;  %v5232_v37 = vshrl.u32 %v5231_v61, 23  ;;  %vm5925_vm11 = vcmp.lt.s32.totalorder %v5924_v15, 0  ;;  %v1446_v28 = vsub.s32 0, %v7759_v44 }
 0x1d0   :  { %v1492_v1 = vor.u32 8388608, %v1491_v13  ;;  %v1511_v25 = vshrl.u32 %v12367_v43, %v7755_v29  ;;  %v1503_v50 = vor.u32 %v1502_v24, %v1501_v35  ;;  %v1506_v51 = vor.u32 %v1505_v36, %v1504_v45 }
 0x1d1   :  { %v1513_v4 = vshll.u32 %v12367_v43, %v1498_v12  ;;  %v1514_v23 = vshrl.u32 %v12369_v27, %v7755_v29  ;;  %v5185_v33 = vadd.s32 536870912, %v7772_v3  ;;  %v1509_v18 = vor.u32 %v1508_v54, %v1507_v10 }
 0x1d2   :  { %v1512_v2 = vor.u32 %v1511_v25, %v1510_v32  ;;  %vm1516_vm0 = vcmp.lt.s32.totalorder %v7774_v9, 1  ;;  %vm1518_vm2 = vcmp.lt.s32.totalorder %v7774_v9, 3  ;;  %vm1519_vm4 = vcmp.lt.s32.totalorder %v7774_v9, 4 }
 0x1d3   :  { %v1515_v61 = vor.u32 %v1514_v23, %v1513_v4  ;;  %v5934_v13 = vadd.s32 4294967169, %v5232_v37  ;;  %v7790_v17 = vmul.f32 %v4894_v5, %v4892_v46  ;;  %v1250_v35 = vshll.u32 %v1249_v38, 23 }
 0x1d4   :  { %v4972_v12 = vadd.s32 %v7523_v39, %v7531_v47  ;;  %vm1517_vm6 = vcmp.lt.s32.totalorder %v7774_v9, 2  ;;  %v1246_v24 = vshrl.u32 %v1228_v26, %v1244_v48  ;;  %v7796_v45 = vsel %vm5925_vm11, 0, %v5924_v15 }
 0x1d5   :  { %v1524_v25 = vsel %vm1516_vm0, %v1503_v50, %v1506_v51  ;;  %v1525_v36 = vsel %vm1519_vm4, %v1512_v2, 920167782  ;;  %v5787_v10 = vmin.u32 %v1446_v28, %v7759_v44  ;;  %v7803_v46 = vshrl.u32 %v5185_v33, 30 }
 0x1d6   :  { %v1526_v5 = vsel %vm1518_vm2, %v1509_v18, %v1525_v36  ;;  %v1528_v39 = vsel %vm1516_vm0, %v1506_v51, %v1509_v18  ;;  %v1529_v26 = vsel %vm1519_vm4, %v1515_v61, 1326507024  ;;  %v7813_v15 = vshll.u32 %v1492_v1, 8 }
 0x1d7   :  { %12437 = vst [vmem:[#allocation65_spill] sm:$0xff] %v7803_v46  ;;  %v1527_v47 = vsel %vm1517_vm6, %v1524_v25, %v1526_v5  ;;  %v5238_v48 = vadd.s32 1, %v5934_v13  ;;  %v7815_v38 = vor.u32 4788187, %v1250_v35  ;;  %v4988_v33 = vsub.s32 32, %v7796_v45 }
 0x1d8   :  { %v1530_v54 = vsel %vm1518_vm2, %v1512_v2, %v1529_v26  ;;  %v12153_v32 = vand.u32 2147483647, %v7736_v22  ;;  %v7824_v28 = vmul.u32.u64.low %v7813_v15, %v1527_v47  ;;  %v7825_v4 = vmul.u32.u64.high %v7813_v15, %v1527_v47, %v7824_v28 }
 0x1d9   :  { %v1531_v37 = vsel %vm1517_vm6, %v1528_v39, %v1530_v54  ;;  %vm5239_vm7 = vcmp.gt.s32.totalorder %v5238_v48, 0  ;;  %v1448_v1 = vclz %v5787_v10  ;;  %v5187_v23 = vshll.u32 %v7803_v46, 30 }
 0x1da   :  { %v7830_v61 = vmul.u32.u64.low %v7813_v15, %v1531_v37  ;;  %v7831_v13 = vmul.u32.u64.high %v7813_v15, %v1531_v37, %v7830_v61  ;;  %v1245_v2 = vshll.u32 %v7627_v7, %v7738_v62  ;;  %v4992_v35 = vsub.s32 4294967266, %v7796_v45 }
 0x1db   :  { %v1500_v25 = vshrl.u32 %v12373_v55, %v7755_v29  ;;  %v5240_v36 = vsel %vm5239_vm7, %v5238_v48, 0  ;;  %v1521_v10 = vsel %vm1519_vm4, %v1509_v18, 2102212464  ;;  %v4989_v7 = vshll.u32 %v7697_v60, %v7796_v45 }
 0x1dc   :  { %v5242_v47 = vand.u32 31, %v5240_v36  ;;  %v7842_v26 = vor.u32 %v1246_v24, %v1245_v2  ;;  %v4990_v62 = vshrl.u32 %v4972_v12, %v4988_v33  ;;  %v5788_v37 = vadd.s32 4294967294, %v1448_v1 }
 0x1dd   :  { %v7848_v29 = vsub.s32 %v7772_v3, %v5187_v23  ;;  %v5235_v48 = vand.u32 8388607, %v12153_v32  ;;  %v4993_v39 = vadd.s32 127, %v4992_v35  ;;  %v1520_v18 = vsel %vm1516_vm0, %v1500_v25, %v1503_v50  ;;  %v7877_v35 = vpop.f32.mrb[11].mxu1 }
 0x1de   :  { %v7852_v61 = vsub.s32 32, %v5242_v47  ;;  %v1522_v24 = vsel %vm1518_vm2, %v1506_v51, %v1521_v10  ;;  %v7860_v60 = vadd.f32 %v7170_v34, %v6585_v41  ;;  %v1542_v12 = vadd.s32 1, %v7825_v4  ;;  %12439 = vst [vmem:[#allocation67_spill] sm:$0xff] %v7877_v35 }
 0x1df   :  { %v7863_v3 = vshrl.u32 %v5240_v36, 5  ;;  %v5245_v45 = vshll.u32 %v12373_v55, %v5242_v47  ;;  %v5248_v33 = vshll.u32 %v12381_v49, %v5242_v47  ;;  %vm1541_vm10 = vc.u32 %v7831_v13, %v7824_v28 }
 0x1e0   :  { %12438 = vst [vmem:[#allocation66_spill] sm:$0xff] %v7860_v60  ;;  %v5246_v50 = vshrl.u32 %v12381_v49, %v7852_v61  ;;  %v5249_v51 = vshrl.u32 %v12365_v0, %v7852_v61  ;;  %v5251_v34 = vshll.u32 %v12365_v0, %v5242_v47  ;;  %vm5789_vm11 = vcmp.lt.s32.totalorder %v5788_v37, 0 }
 0x1e1   :  { %v5190_v1 = vsub.s32 0, %v7848_v29  ;;  %v5236_v23 = vor.u32 8388608, %v5235_v48  ;;  %v5252_v2 = vshrl.u32 %v12366_v11, %v7852_v61  ;;  %v1523_v25 = vsel %vm1517_vm6, %v1520_v18, %v1522_v24 }
 0x1e2   :  { %v5254_v36 = vshll.u32 %v12366_v11, %v5242_v47  ;;  %v5255_v10 = vshrl.u32 %v12367_v43, %v7852_v61  ;;  %v1695_v32 = vand.u32 2139095040, %v7860_v60  ;;  %v1543_v5 = vsel %vm1541_vm10, %v1542_v12, %v7825_v4 }
 0x1e3   :  { %v7886_v54 = vor.u32 %v5246_v50, %v5245_v45  ;;  %v7888_v48 = vor.u32 %v5249_v51, %v5248_v33  ;;  %v5253_v46 = vor.u32 %v5252_v2, %v5251_v34  ;;  %v5257_v35 = vshll.u32 %v12367_v43, %v5242_v47 }
 0x1e4   :  { %v5256_v22 = vor.u32 %v5255_v10, %v5254_v36  ;;  %v5258_v9 = vshrl.u32 %v12369_v27, %v7852_v61  ;;  %vm5260_vm0 = vcmp.lt.s32.totalorder %v7863_v3, 1  ;;  %v4991_v18 = vor.u32 %v4990_v62, %v4989_v7 }
 0x1e5   :  { %v4994_v24 = vshll.u32 %v4993_v39, 23  ;;  %v1451_v19 = vsel %vm5789_vm11, 0, %v5788_v37  ;;  %v1539_v40 = vmul.u32 %v7813_v15, %v1523_v25  ;;  %vm5262_vm2 = vcmp.lt.s32.totalorder %v7863_v3, 3 }
 0x1e6   :  { %v5259_v4 = vor.u32 %v5258_v9, %v5257_v35  ;;  %vm5263_vm4 = vcmp.lt.s32.totalorder %v7863_v3, 4  ;;  %v1696_v12 = vshrl.u32 %v1695_v32, 23  ;;  %vm12170_vm6 = vcmp.lt.s32.totalorder %v7018_v52, 0 }
 0x1e7   :  { %vm12169_vm7 = vcmp.lt.s32.totalorder %v7143_v14, 0  ;;  %v5931_v47 = vmin.u32 %v5190_v1, %v7848_v29  ;;  %v7901_v45 = vadd.s32 %v1543_v5, %v1539_v40  ;;  %vm5261_vm10 = vcmp.lt.s32.totalorder %v7863_v3, 2 }
 0x1e8   :  { %v5268_v15 = vsel %vm5260_vm0, %v7886_v54, %v7888_v48  ;;  %v5269_v39 = vsel %vm5263_vm4, %v5256_v22, 920167782  ;;  %v5272_v32 = vsel %vm5260_vm0, %v7888_v48, %v5253_v46  ;;  %v5273_v7 = vsel %vm5263_vm4, %v5259_v4, 1326507024 }
 0x1e9   :  { %v7915_v62 = vshll.u32 %v5236_v23, 8  ;;  %v1254_v40 = vcvt.s32.f32 %v7842_v26  ;;  %v4995_v5 = vor.u32 4788187, %v4994_v24  ;;  %v1452_v37 = vsub.s32 32, %v1451_v19 }
 0x1ea   :  { %v5270_v33 = vsel %vm5262_vm2, %v5253_v46, %v5269_v39  ;;  %v1456_v50 = vsub.s32 4294967266, %v1451_v19  ;;  %v5274_v34 = vsel %vm5262_vm2, %v5256_v22, %v5273_v7  ;;  %v5798_v1 = vadd.s32 4294967169, %v1696_v12 }
 0x1eb   :  { %v5271_v51 = vsel %vm5261_vm10, %v5268_v15, %v5270_v33  ;;  %v12440_v2 = vand.u32 2147483647, %v7815_v38  ;;  %v5192_v23 = vclz %v5931_v47  ;;  %v1545_v26 = vadd.s32 536870912, %v7901_v45 }
 0x1ec   :  { %v5275_v25 = vsel %vm5261_vm10, %v5272_v32, %v5274_v34  ;;  %v4998_v36 = vcvt.s32.f32 %v4991_v18  ;;  %v1436_v10 = vadd.s32 %v7645_v30, %v7653_v16  ;;  %v4996_v22 = vand.u32 2147483647, %v4995_v5  ;;  %v12446_v34 = vld [vmem:[#allocation31_spill] sm:$0xff] }
 0x1ed   :  { %v7926_v35 = vmul.f32 %v1254_v40, %v12440_v2  ;;  %v7934_v9 = vmul.u32.u64.low %v7915_v62, %v5271_v51  ;;  %v7935_v24 = vmul.u32.u64.high %v7915_v62, %v5271_v51, %v7934_v9  ;;  %v1702_v12 = vadd.s32 1, %v5798_v1 }
 0x1ee   :  { %v7939_v38 = vmul.u32.u64.low %v7915_v62, %v5275_v25  ;;  %v7940_v4 = vmul.u32.u64.high %v7915_v62, %v5275_v25, %v7939_v38  ;;  %v1454_v47 = vshrl.u32 %v1436_v10, %v1452_v37  ;;  %v1457_v15 = vadd.s32 127, %v1456_v50 }
 0x1ef   :  { %v5244_v39 = vshrl.u32 %v12373_v55, %v7852_v61  ;;  %v12160_v18 = vand.u32 2147483647, %v7860_v60  ;;  %v5932_v32 = vadd.s32 4294967294, %v5192_v23  ;;  %v7945_v30 = vshrl.u32 %v1545_v26, 30 }
 0x1f0   :  { %v5265_v16 = vsel %vm5263_vm4, %v5253_v46, 2102212464  ;;  %vm1703_vm11 = vcmp.gt.s32.totalorder %v1702_v12, 0  ;;  %v12442_v7 = vxor.u32 2147483648, %v7743_v8  ;;  %v12444_v5 = vxor.u32 2147483648, %v7790_v17 }
 0x1f1   :  { %12441 = vst [vmem:[#allocation68_spill] sm:$0xff] %v7945_v30  ;;  %v1453_v37 = vshll.u32 %v7759_v44, %v1451_v19  ;;  %v1704_v33 = vsel %vm1703_vm11, %v1702_v12, 0  ;;  %v7965_v50 = vmul.f32 %v4998_v36, %v4996_v22  ;;  %v7969_v1 = vadd.f32 %v7255_v63, %v12446_v34 }
 0x1f2   :  { %v7954_v40 = vsel %vm12170_vm6, %v12442_v7, %v7743_v8  ;;  %v7961_v61 = vsel %vm12169_vm7, %v12444_v5, %v7790_v17  ;;  %v1706_v51 = vand.u32 31, %v1704_v33  ;;  %v5264_v2 = vsel %vm5260_vm0, %v5244_v39, %v7886_v54  ;;  %v8002_v7 = vpop.f32.mrb[12].mxu0 }
 0x1f3   :  { %12443 = vst [vmem:[#allocation69_spill] sm:$0xff] %v7954_v40  ;;  %12445 = vst [vmem:[#allocation70_spill] sm:$0xff] %v7961_v61  ;;  %v7971_v8 = vor.u32 %v1454_v47, %v1453_v37  ;;  %v5266_v17 = vsel %vm5262_vm2, %v7888_v48, %v5265_v16  ;;  %v7981_v44 = vadd.f32 %v7387_v56, %v6588_v42  ;;  %v1458_v19 = vshll.u32 %v1457_v15, 23 }
 0x1f4   :  { %12447 = vst [vmem:[#allocation31_spill] sm:$0xff] %v7969_v1  ;;  %vm5933_vm4 = vcmp.lt.s32.totalorder %v5932_v32, 0  ;;  %v1547_v23 = vshll.u32 %v7945_v30, 30  ;;  %v1699_v63 = vand.u32 8388607, %v12160_v18  ;;  %v5286_v26 = vadd.s32 1, %v7935_v24 }
 0x1f5   :  { %12448 = vst [vmem:[#allocation71_spill] sm:$0xff] %v7981_v44  ;;  %v1707_v25 = vsub.s32 32, %v1706_v51  ;;  %v1709_v54 = vshll.u32 %v12373_v55, %v1706_v51  ;;  %v1712_v36 = vshll.u32 %v12381_v49, %v1706_v51  ;;  %v5267_v48 = vsel %vm5261_vm10, %v5264_v2, %v5266_v17 }
 0x1f6   :  { %vm5285_vm0 = vc.u32 %v7940_v4, %v7934_v9  ;;  %v1715_v56 = vshll.u32 %v12365_v0, %v1706_v51  ;;  %v1718_v10 = vshll.u32 %v12366_v11, %v1706_v51  ;;  %v1705_v22 = vshrl.u32 %v1704_v33, 5 }
 0x1f7   :  { %v1710_v38 = vshrl.u32 %v12381_v49, %v1707_v25  ;;  %v1713_v12 = vshrl.u32 %v12365_v0, %v1707_v25  ;;  %v1716_v47 = vshrl.u32 %v12366_v11, %v1707_v25  ;;  %v7998_v15 = vor.u32 4788187, %v1458_v19 }
 0x1f8   :  { %v1700_v39 = vor.u32 8388608, %v1699_v63  ;;  %v1719_v3 = vshrl.u32 %v12367_v43, %v1707_v25  ;;  %v967_v16 = vand.u32 2139095040, %v7969_v1  ;;  %v5287_v5 = vsel %vm5285_vm0, %v5286_v26, %v7935_v24 }
 0x1f9   :  { %v1711_v37 = vor.u32 %v1710_v38, %v1709_v54  ;;  %v1714_v2 = vor.u32 %v1713_v12, %v1712_v36  ;;  %v1721_v33 = vshll.u32 %v12367_v43, %v1706_v51  ;;  %vm1174_vm2 = vcmp.lt.s32.totalorder %v7242_v53, 0 }
 0x1fa   :  { %v8008_v17 = vsel %vm5933_vm4, 0, %v5932_v32  ;;  %v5283_v19 = vmul.u32 %v7915_v62, %v5267_v48  ;;  %v1717_v63 = vor.u32 %v1716_v47, %v1715_v56  ;;  %v1720_v18 = vor.u32 %v1719_v3, %v1718_v10 }
 0x1fb   :  { %v8012_v46 = vsub.s32 %v7901_v45, %v1547_v23  ;;  %v1722_v30 = vshrl.u32 %v12369_v27, %v1707_v25  ;;  %vm1724_vm10 = vcmp.lt.s32.totalorder %v1705_v22, 1  ;;  %vm1726_vm11 = vcmp.lt.s32.totalorder %v1705_v22, 3 }
 0x1fc   :  { %v8015_v24 = vadd.s32 %v5287_v5, %v5283_v19  ;;  %vm1725_vm0 = vcmp.lt.s32.totalorder %v1705_v22, 2  ;;  %vm1727_vm1 = vcmp.lt.s32.totalorder %v1705_v22, 4  ;;  %v8017_v51 = vshll.u32 %v1700_v39, 8 }
 0x1fd   :  { %v1723_v26 = vor.u32 %v1722_v30, %v1721_v33  ;;  %v1732_v32 = vsel %vm1724_vm10, %v1711_v37, %v1714_v2  ;;  %v1733_v54 = vsel %vm1727_vm1, %v1720_v18, 920167782  ;;  %v968_v62 = vshrl.u32 %v967_v16, 23 }
 0x1fe   :  { %v5200_v36 = vsub.s32 4294967266, %v8008_v17  ;;  %v1708_v45 = vshrl.u32 %v12373_v55, %v1707_v25  ;;  %v1734_v23 = vsel %vm1726_vm11, %v1717_v63, %v1733_v54  ;;  %v12164_v48 = vand.u32 2147483647, %v7969_v1 }
 0x1ff   :  { %v1729_v56 = vsel %vm1727_vm1, %v1717_v63, 2102212464  ;;  %v1735_v10 = vsel %vm1725_vm0, %v1732_v32, %v1734_v23  ;;  %v1736_v38 = vsel %vm1724_vm10, %v1714_v2, %v1717_v63  ;;  %v1737_v12 = vsel %vm1727_vm1, %v1723_v26, 1326507024 }
 0x200   :  { %v1550_v30 = vsub.s32 0, %v8012_v46  ;;  %v5289_v47 = vadd.s32 536870912, %v8015_v24  ;;  %v1738_v39 = vsel %vm1726_vm11, %v1720_v18, %v1737_v12  ;;  %v1799_v3 = vand.u32 2139095040, %v7981_v44 }
 0x201   :  { %v1739_v25 = vsel %vm1725_vm0, %v1736_v38, %v1738_v39  ;;  %v8032_v16 = vmul.u32.u64.low %v8017_v51, %v1735_v10  ;;  %v8033_v5 = vmul.u32.u64.high %v8017_v51, %v1735_v10, %v8032_v16  ;;  %v5770_v33 = vadd.s32 4294967169, %v968_v62 }
 0x202   :  { %v1728_v19 = vsel %vm1724_vm10, %v1708_v45, %v1711_v37  ;;  %v1730_v63 = vsel %vm1726_vm11, %v1714_v2, %v1729_v56  ;;  %v8039_v26 = vmul.u32.u64.low %v8017_v51, %v1739_v25  ;;  %v8040_v32 = vmul.u32.u64.high %v8017_v51, %v1739_v25, %v8039_v26 }
 0x203   :  { %v12449_v18 = vxor.u32 2147483648, %v7926_v35  ;;  %v1460_v10 = vand.u32 2147483647, %v7998_v15  ;;  %v974_v62 = vadd.s32 1, %v5770_v33  ;;  %v1462_v37 = vcvt.s32.f32 %v7971_v8 }
 0x204   :  { %v5180_v2 = vadd.s32 %v7723_v57, %v7730_v20  ;;  %v5201_v45 = vadd.s32 127, %v5200_v36  ;;  %v5791_v56 = vmin.u32 %v1550_v30, %v8012_v46  ;;  %v1731_v38 = vsel %vm1725_vm0, %v1728_v19, %v1730_v63 }
 0x205   :  { %v8047_v54 = vsel %vm1174_vm2, %v12449_v18, %v7926_v35  ;;  %v1750_v12 = vadd.s32 1, %v8033_v5  ;;  %v971_v35 = vand.u32 8388607, %v12164_v48  ;;  %vm975_vm1 = vcmp.gt.s32.totalorder %v974_v62, 0 }
 0x206   :  { %12450 = vst [vmem:[#allocation72_spill] sm:$0xff] %v8047_v54  ;;  %v8059_v39 = vshrl.u32 %v5289_v47, 30  ;;  %vm1749_vm4 = vc.u32 %v8040_v32, %v8032_v16  ;;  %v976_v8 = vsel %vm975_vm1, %v974_v62, 0  ;;  %v1800_v15 = vshrl.u32 %v1799_v3, 23 }
 0x207   :  { %v8063_v25 = vmul.f32 %v1462_v37, %v1460_v10  ;;  %v5196_v57 = vsub.s32 32, %v8008_v17  ;;  %v5197_v20 = vshll.u32 %v7848_v29, %v8008_v17  ;;  %v978_v22 = vand.u32 31, %v976_v8  ;;  %v8075_v17 = vpop.f32.mrb[12].mxu1 }
 0x208   :  { %12451 = vst [vmem:[#allocation73_spill] sm:$0xff] %v8059_v39  ;;  %v5202_v36 = vshll.u32 %v5201_v45, 23  ;;  %v1552_v30 = vclz %v5791_v56  ;;  %v1747_v33 = vmul.u32 %v8017_v51, %v1731_v38  ;;  %v1751_v47 = vsel %vm1749_vm4, %v1750_v12, %v8033_v5 }
 0x209   :  { %v979_v19 = vsub.s32 32, %v978_v22  ;;  %v981_v63 = vshll.u32 %v12373_v55, %v978_v22  ;;  %v984_v26 = vshll.u32 %v12381_v49, %v978_v22  ;;  %v987_v3 = vshll.u32 %v12365_v0, %v978_v22 }
 0x20a   :  { %v5291_v18 = vshll.u32 %v8059_v39, 30  ;;  %v972_v10 = vor.u32 8388608, %v971_v35  ;;  %v990_v62 = vshll.u32 %v12366_v11, %v978_v22  ;;  %v5802_v29 = vadd.s32 4294967169, %v1800_v15 }
 0x20b   :  { %v977_v37 = vshrl.u32 %v976_v8, 5  ;;  %v982_v51 = vshrl.u32 %v12381_v49, %v979_v19  ;;  %v985_v5 = vshrl.u32 %v12365_v0, %v979_v19  ;;  %v988_v45 = vshrl.u32 %v12366_v11, %v979_v19 }
 0x20c   :  { %v5198_v56 = vshrl.u32 %v5180_v2, %v5196_v57  ;;  %v5203_v38 = vor.u32 4788187, %v5202_v36  ;;  %v8080_v12 = vadd.s32 %v1751_v47, %v1747_v33  ;;  %v991_v48 = vshrl.u32 %v12367_v43, %v979_v19 }
 0x20d   :  { %v983_v23 = vor.u32 %v982_v51, %v981_v63  ;;  %v986_v35 = vor.u32 %v985_v5, %v984_v26  ;;  %v989_v39 = vor.u32 %v988_v45, %v987_v3  ;;  %v993_v15 = vshll.u32 %v12367_v43, %v978_v22 }
 0x20e   :  { %v5792_v61 = vadd.s32 4294967294, %v1552_v30  ;;  %v8085_v8 = vsub.s32 %v8015_v24, %v5291_v18  ;;  %v992_v14 = vor.u32 %v991_v48, %v990_v62  ;;  %v1012_v40 = vshll.u32 %v972_v10, 8 }
 0x20f   :  { %vm12186_vm10 = vcmp.lt.s32.totalorder %v7372_v58, 0  ;;  %v994_v2 = vshrl.u32 %v12369_v27, %v979_v19  ;;  %vm996_vm11 = vcmp.lt.s32.totalorder %v977_v37, 1  ;;  %vm998_vm0 = vcmp.lt.s32.totalorder %v977_v37, 3 }
 0x210   :  { %v1806_v57 = vadd.s32 1, %v5802_v29  ;;  %v1753_v36 = vadd.s32 536870912, %v8080_v12  ;;  %v980_v33 = vshrl.u32 %v12373_v55, %v979_v19  ;;  %vm997_vm1 = vcmp.lt.s32.totalorder %v977_v37, 2 }
 0x211   :  { %vm999_vm4 = vcmp.lt.s32.totalorder %v977_v37, 4  ;;  %v995_v22 = vor.u32 %v994_v2, %v993_v15  ;;  %v1004_v24 = vsel %vm996_vm11, %v983_v23, %v986_v35  ;;  %v5199_v48 = vor.u32 %v5198_v56, %v5197_v20 }
 0x212   :  { %v1001_v30 = vsel %vm999_vm4, %v989_v39, 2102212464  ;;  %v1005_v47 = vsel %vm999_vm4, %v992_v14, 920167782  ;;  %v5204_v63 = vand.u32 2147483647, %v5203_v38  ;;  %v1008_v10 = vsel %vm996_vm11, %v986_v35, %v989_v39 }
 0x213   :  { %v5294_v26 = vsub.s32 0, %v8085_v8  ;;  %v1006_v3 = vsel %vm998_vm0, %v989_v39, %v1005_v47  ;;  %vm5793_vm7 = vcmp.lt.s32.totalorder %v5792_v61, 0  ;;  %v1009_v62 = vsel %vm999_vm4, %v995_v22, 1326507024 }
 0x214   :  { %v1007_v18 = vsel %vm997_vm1, %v1004_v24, %v1006_v3  ;;  %v8096_v19 = vshrl.u32 %v1753_v36, 30  ;;  %v1000_v29 = vsel %vm996_vm11, %v980_v33, %v983_v23  ;;  %v1002_v51 = vsel %vm998_vm0, %v986_v35, %v1001_v30 }
 0x215   :  { %v1010_v5 = vsel %vm998_vm0, %v992_v14, %v1009_v62  ;;  %v8102_v45 = vmul.u32.u64.low %v1012_v40, %v1007_v18  ;;  %v8103_v56 = vmul.u32.u64.high %v1012_v40, %v1007_v18, %v8102_v45  ;;  %vm1807_vm6 = vcmp.gt.s32.totalorder %v1806_v57, 0 }
 0x216   :  { %12452 = vst [vmem:[#allocation74_spill] sm:$0xff] %v8096_v19  ;;  %v1011_v20 = vsel %vm997_vm1, %v1008_v10, %v1010_v5  ;;  %v8106_v38 = vsel %vm5793_vm7, 0, %v5792_v61  ;;  %v5935_v39 = vmin.u32 %v5294_v26, %v8085_v8  ;;  %v1003_v23 = vsel %vm997_vm1, %v1000_v29, %v1002_v51 }
 0x217   :  { %v8109_v15 = vmul.u32.u64.low %v1012_v40, %v1011_v20  ;;  %v8110_v2 = vmul.u32.u64.high %v1012_v40, %v1011_v20, %v8109_v15  ;;  %v12171_v35 = vand.u32 2147483647, %v7981_v44  ;;  %v1808_v36 = vsel %vm1807_vm6, %v1806_v57, 0 }
 0x218   :  { %v8116_v14 = vadd.f32 %v7469_v59, %v12446_v34  ;;  %v12454_v33 = vxor.u32 2147483648, %v7965_v50  ;;  %v1755_v30 = vshll.u32 %v8096_v19, 30  ;;  %v1810_v37 = vand.u32 31, %v1808_v36 }
 0x219   :  { %v5206_v24 = vcvt.s32.f32 %v5199_v48  ;;  %v1540_v57 = vadd.s32 %v7824_v28, %v7831_v13  ;;  %v1560_v47 = vsub.s32 4294967266, %v8106_v38  ;;  %v1022_v59 = vadd.s32 1, %v8103_v56 }
 0x21a   :  { %12453 = vst [vmem:[#allocation75_spill] sm:$0xff] %v8116_v14  ;;  %v8123_v61 = vsel %vm12186_vm10, %v12454_v33, %v7965_v50  ;;  %v5296_v26 = vclz %v5935_v39  ;;  %v1019_v3 = vmul.u32 %v1012_v40, %v1003_v23  ;;  %vm1021_vm6 = vc.u32 %v8110_v2, %v8102_v45 }
 0x21b   :  { %12455 = vst [vmem:[#allocation76_spill] sm:$0xff] %v8123_v61  ;;  %v1811_v50 = vsub.s32 32, %v1810_v37  ;;  %v8133_v18 = vmul.f32 %v5206_v24, %v5204_v63  ;;  %v1023_v10 = vsel %vm1021_vm6, %v1022_v59, %v8103_v56  ;;  %v1803_v48 = vand.u32 8388607, %v12171_v35  ;;  %v8149_v56 = vpop.f32.mrb[13].mxu0 }
 0x21c   :  { %v655_v62 = vand.u32 2139095040, %v8116_v14  ;;  %v8140_v28 = vsub.s32 %v8080_v12, %v1755_v30  ;;  %v1024_v13 = vadd.s32 %v1023_v10, %v1019_v3  ;;  %v1813_v29 = vshll.u32 %v12373_v55, %v1810_v37 }
 0x21d   :  { %v1816_v40 = vshll.u32 %v12381_v49, %v1810_v37  ;;  %v8144_v51 = vshrl.u32 %v1808_v36, 5  ;;  %v1814_v63 = vshrl.u32 %v12381_v49, %v1811_v50  ;;  %v1817_v5 = vshrl.u32 %v12365_v0, %v1811_v50 }
 0x21e   :  { %v1819_v20 = vshll.u32 %v12365_v0, %v1810_v37  ;;  %v1561_v39 = vadd.s32 127, %v1560_v47  ;;  %v5936_v15 = vadd.s32 4294967294, %v5296_v26  ;;  %v1025_v23 = vadd.s32 536870912, %v1024_v13 }
 0x21f   :  { %v1820_v12 = vshrl.u32 %v12366_v11, %v1811_v50  ;;  %v1804_v33 = vor.u32 8388608, %v1803_v48  ;;  %v1822_v30 = vshll.u32 %v12366_v11, %v1810_v37  ;;  %v1823_v24 = vshrl.u32 %v12367_v43, %v1811_v50 }
 0x220   :  { %v656_v36 = vshrl.u32 %v655_v62, 23  ;;  %v1758_v59 = vsub.s32 0, %v8140_v28  ;;  %v1815_v3 = vor.u32 %v1814_v63, %v1813_v29  ;;  %v1818_v10 = vor.u32 %v1817_v5, %v1816_v40 }
 0x221   :  { %v1821_v35 = vor.u32 %v1820_v12, %v1819_v20  ;;  %v1824_v22 = vor.u32 %v1823_v24, %v1822_v30  ;;  %v1825_v19 = vshll.u32 %v12367_v43, %v1810_v37  ;;  %v1826_v47 = vshrl.u32 %v12369_v27, %v1811_v50 }
 0x222   :  { %vm1828_vm7 = vcmp.lt.s32.totalorder %v8144_v51, 1  ;;  %v1556_v26 = vsub.s32 32, %v8106_v38  ;;  %v1557_v48 = vshll.u32 %v8012_v46, %v8106_v38  ;;  %v1562_v52 = vshll.u32 %v1561_v39, 23 }
 0x223   :  { %v8161_v61 = vshrl.u32 %v1025_v23, 30  ;;  %v1827_v62 = vor.u32 %v1826_v47, %v1825_v19  ;;  %vm1830_vm11 = vcmp.lt.s32.totalorder %v8144_v51, 3  ;;  %vm1831_vm0 = vcmp.lt.s32.totalorder %v8144_v51, 4 }
 0x224   :  { %v5758_v29 = vadd.s32 4294967169, %v656_v36  ;;  %vm5937_vm1 = vcmp.lt.s32.totalorder %v5936_v15, 0  ;;  %v5799_v37 = vmin.u32 %v1758_v59, %v8140_v28  ;;  %vm1829_vm4 = vcmp.lt.s32.totalorder %v8144_v51, 2 }
 0x225   :  { %12456 = vst [vmem:[#allocation77_spill] sm:$0xff] %v8161_v61  ;;  %v1836_v40 = vsel %vm1828_vm7, %v1815_v3, %v1818_v10  ;;  %v1837_v46 = vsel %vm1831_vm0, %v1824_v22, 920167782  ;;  %v1840_v38 = vsel %vm1828_vm7, %v1818_v10, %v1821_v35  ;;  %v1841_v19 = vsel %vm1831_vm0, %v1827_v62, 1326507024 }
 0x226   :  { %v1844_v63 = vshll.u32 %v1804_v33, 8  ;;  %v1558_v5 = vshrl.u32 %v1540_v57, %v1556_v26  ;;  %v8175_v20 = vor.u32 4788187, %v1562_v52  ;;  %v1027_v39 = vshll.u32 %v8161_v61, 30 }
 0x227   :  { %v1838_v23 = vsel %vm1830_vm11, %v1821_v35, %v1837_v46  ;;  %v8180_v12 = vsel %vm5937_vm1, 0, %v5936_v15  ;;  %v1842_v24 = vsel %vm1830_vm11, %v1824_v22, %v1841_v19  ;;  %v662_v36 = vadd.s32 1, %v5758_v29 }
 0x228   :  { %v1839_v30 = vsel %vm1829_vm4, %v1836_v40, %v1838_v23  ;;  %v1760_v59 = vclz %v5799_v37  ;;  %v1812_v33 = vshrl.u32 %v12373_v55, %v1811_v50  ;;  %v1833_v52 = vsel %vm1831_vm0, %v1821_v35, 2102212464 }
 0x229   :  { %v1843_v57 = vsel %vm1829_vm4, %v1840_v38, %v1842_v24  ;;  %v8194_v15 = vmul.u32.u64.low %v1844_v63, %v1839_v30  ;;  %v8195_v62 = vmul.u32.u64.high %v1844_v63, %v1839_v30, %v8194_v15  ;;  %v5304_v40 = vsub.s32 4294967266, %v8180_v12 }
 0x22a   :  { %v8191_v47 = vmul.u32.u64.low %v1844_v63, %v1843_v57  ;;  %v8192_v26 = vmul.u32.u64.high %v1844_v63, %v1843_v57, %v8191_v47  ;;  %v8199_v22 = vsub.s32 %v1024_v13, %v1027_v39  ;;  %v12176_v29 = vand.u32 2147483647, %v8116_v14 }
 0x22b   :  { %vm663_vm6 = vcmp.gt.s32.totalorder %v662_v36, 0  ;;  %v8203_v35 = vor.u32 %v1558_v5, %v1557_v48  ;;  %v5284_v37 = vadd.s32 %v7934_v9, %v7940_v4  ;;  %v5800_v38 = vadd.s32 4294967294, %v1760_v59 }
 0x22c   :  { %v664_v46 = vsel %vm663_vm6, %v662_v36, 0  ;;  %v1832_v19 = vsel %vm1828_vm7, %v1812_v33, %v1815_v3  ;;  %v1834_v23 = vsel %vm1830_vm11, %v1818_v10, %v1833_v52  ;;  %v5300_v30 = vsub.s32 32, %v8180_v12 }
 0x22d   :  { %v666_v13 = vand.u32 31, %v664_v46  ;;  %vm1853_vm0 = vc.u32 %v8192_v26, %v8194_v15  ;;  %v1854_v48 = vadd.s32 1, %v8195_v62  ;;  %v5305_v5 = vadd.s32 127, %v5304_v40 }
 0x22e   :  { %v1030_v9 = vsub.s32 0, %v8199_v22  ;;  %v659_v4 = vand.u32 8388607, %v12176_v29  ;;  %v1835_v10 = vsel %vm1829_vm4, %v1832_v19, %v1834_v23  ;;  %v8227_v59 = vadd.f32 %v7595_v21, %v6585_v41 }
 0x22f   :  { %v8219_v3 = vsub.s32 32, %v666_v13  ;;  %v669_v24 = vshll.u32 %v12373_v55, %v666_v13  ;;  %v672_v36 = vshll.u32 %v12381_v49, %v666_v13  ;;  %vm5801_vm7 = vcmp.lt.s32.totalorder %v5800_v38, 0 }
 0x230   :  { %12457 = vst [vmem:[#allocation78_spill] sm:$0xff] %v8227_v59  ;;  %v1855_v33 = vsel %vm1853_vm0, %v1854_v48, %v8195_v62  ;;  %v8230_v52 = vshrl.u32 %v664_v46, 5  ;;  %v678_v57 = vshll.u32 %v12366_v11, %v666_v13  ;;  %v675_v40 = vshll.u32 %v12365_v0, %v666_v13  ;;  %v8245_v48 = vpop.f32.mrb[13].mxu1 }
 0x231   :  { %v670_v47 = vshrl.u32 %v12381_v49, %v8219_v3  ;;  %v673_v51 = vshrl.u32 %v12365_v0, %v8219_v3  ;;  %v676_v19 = vshrl.u32 %v12366_v11, %v8219_v3  ;;  %v5301_v21 = vshll.u32 %v8085_v8, %v8180_v12 }
 0x232   :  { %v5771_v62 = vmin.u32 %v1030_v9, %v8199_v22  ;;  %v1851_v46 = vmul.u32 %v1844_v63, %v1835_v10  ;;  %v679_v23 = vshrl.u32 %v12367_v43, %v8219_v3  ;;  %v5306_v29 = vshll.u32 %v5305_v5, 23 }
 0x233   :  { %v8247_v50 = vor.u32 %v670_v47, %v669_v24  ;;  %v8249_v39 = vor.u32 %v673_v51, %v672_v36  ;;  %v681_v61 = vshll.u32 %v12367_v43, %v666_v13  ;;  %v1763_v58 = vsel %vm5801_vm7, 0, %v5800_v38 }
 0x234   :  { %v8253_v54 = vadd.s32 %v1855_v33, %v1851_v46  ;;  %v660_v8 = vor.u32 8388608, %v659_v4  ;;  %v680_v12 = vor.u32 %v679_v23, %v678_v57  ;;  %v677_v9 = vor.u32 %v676_v19, %v675_v40 }
 0x235   :  { %v682_v63 = vshrl.u32 %v12369_v27, %v8219_v3  ;;  %vm684_vm11 = vcmp.lt.s32.totalorder %v8230_v52, 1  ;;  %v2007_v5 = vand.u32 2139095040, %v8227_v59  ;;  %v5302_v10 = vshrl.u32 %v5284_v37, %v5300_v30 }
 0x236   :  { %v1032_v24 = vclz %v5771_v62  ;;  %vm686_vm1 = vcmp.lt.s32.totalorder %v8230_v52, 3  ;;  %vm687_vm4 = vcmp.lt.s32.totalorder %v8230_v52, 4  ;;  %v1768_v13 = vsub.s32 4294967266, %v1763_v58 }
 0x237   :  { %v683_v38 = vor.u32 %v682_v63, %v681_v61  ;;  %vm685_vm6 = vcmp.lt.s32.totalorder %v8230_v52, 2  ;;  %v692_v4 = vsel %vm684_vm11, %v8247_v50, %v8249_v39  ;;  %v5307_v36 = vor.u32 4788187, %v5306_v29 }
 0x238   :  { %v1857_v33 = vadd.s32 536870912, %v8253_v54  ;;  %v693_v37 = vsel %vm687_vm4, %v680_v12, 920167782  ;;  %v8269_v30 = vshll.u32 %v660_v8, 8  ;;  %v696_v61 = vsel %vm684_vm11, %v8249_v39, %v677_v9 }
 0x239   :  { %v694_v57 = vsel %vm686_vm1, %v677_v9, %v693_v37  ;;  %v697_v47 = vsel %vm687_vm4, %v683_v38, 1326507024  ;;  %v2008_v51 = vshrl.u32 %v2007_v5, 23  ;;  %v1764_v40 = vsub.s32 32, %v1763_v58 }
 0x23a   :  { %v5772_v29 = vadd.s32 4294967294, %v1032_v24  ;;  %v695_v19 = vsel %vm685_vm6, %v692_v4, %v694_v57  ;;  %v698_v62 = vsel %vm686_vm1, %v680_v12, %v697_v47  ;;  %v5303_v46 = vor.u32 %v5302_v10, %v5301_v21 }
 0x23b   :  { %v1748_v23 = vadd.s32 %v8032_v16, %v8040_v32  ;;  %v1769_v8 = vadd.s32 127, %v1768_v13  ;;  %v699_v63 = vsel %vm685_vm6, %v696_v61, %v698_v62  ;;  %v8286_v37 = vshrl.u32 %v1857_v33, 30 }
 0x23c   :  { %v8289_v5 = vmul.u32.u64.low %v8269_v30, %v695_v19  ;;  %v8290_v38 = vmul.u32.u64.high %v8269_v30, %v695_v19, %v8289_v5  ;;  %v8295_v24 = vadd.f32 %v7691_v6, %v12446_v34  ;;  %v5308_v12 = vand.u32 2147483647, %v5307_v36 }
 0x23d   :  { %12458 = vst [vmem:[#allocation79_spill] sm:$0xff] %v8286_v37  ;;  %v8298_v21 = vmul.u32.u64.low %v8269_v30, %v699_v63  ;;  %v8299_v10 = vmul.u32.u64.high %v8269_v30, %v699_v63, %v8298_v21  ;;  %v5810_v16 = vadd.s32 4294967169, %v2008_v51  ;;  %v1566_v32 = vcvt.s32.f32 %v8203_v35 }
 0x23e   :  { %12459 = vst [vmem:[#allocation80_spill] sm:$0xff] %v8295_v24  ;;  %v1766_v13 = vshrl.u32 %v1748_v23, %v1764_v40  ;;  %vm5773_vm0 = vcmp.lt.s32.totalorder %v5772_v29, 0  ;;  %v12181_v4 = vand.u32 2147483647, %v8227_v59  ;;  %v5310_v33 = vcvt.s32.f32 %v5303_v46 }
 0x23f   :  { %v1770_v57 = vshll.u32 %v1769_v8, 23  ;;  %v668_v61 = vshrl.u32 %v12373_v55, %v8219_v3  ;;  %v2014_v47 = vadd.s32 1, %v5810_v16  ;;  %v1765_v6 = vshll.u32 %v8140_v28, %v1763_v58 }
 0x240   :  { %v1859_v36 = vshll.u32 %v8286_v37, 30  ;;  %v689_v19 = vsel %vm687_vm4, %v677_v9, 2102212464  ;;  %v1591_v51 = vand.u32 2139095040, %v8295_v24  ;;  %v12460_v35 = vand.u32 2147483647, %v8175_v20 }
 0x241   :  { %v8314_v62 = vmul.f32 %v5310_v33, %v5308_v12  ;;  %v8316_v46 = vsel %vm5773_vm0, 0, %v5772_v29  ;;  %vm2015_vm7 = vcmp.gt.s32.totalorder %v2014_v47, 0  ;;  %v8318_v3 = vor.u32 %v1766_v13, %v1765_v6  ;;  %v8348_v6 = vpop.f32.mrb[14].mxu0 }
 0x242   :  { %v8312_v40 = vmul.f32 %v1566_v32, %v12460_v35  ;;  %v1020_v58 = vadd.s32 %v8102_v45, %v8110_v2  ;;  %v2011_v28 = vand.u32 8388607, %v12181_v4  ;;  %v2016_v9 = vsel %vm2015_vm7, %v2014_v47, 0  ;;  %12461 = vst [vmem:[#allocation81_spill] sm:$0xff] %v8348_v6 }
 0x243   :  { %v8324_v23 = vor.u32 4788187, %v1770_v57  ;;  %v688_v20 = vsel %vm684_vm11, %v668_v61, %v8247_v50  ;;  %v690_v29 = vsel %vm686_vm1, %v8249_v39, %v689_v19  ;;  %v2018_v8 = vand.u32 31, %v2016_v9 }
 0x244   :  { %v1036_v63 = vsub.s32 32, %v8316_v46  ;;  %v8334_v12 = vsub.s32 %v8253_v54, %v1859_v36  ;;  %v710_v45 = vadd.s32 1, %v8290_v38  ;;  %v1592_v2 = vshrl.u32 %v1591_v51, 23 }
 0x245   :  { %vm709_vm4 = vc.u32 %v8299_v10, %v8289_v5  ;;  %v2019_v21 = vsub.s32 32, %v2018_v8  ;;  %v2021_v16 = vshll.u32 %v12373_v55, %v2018_v8  ;;  %v2024_v50 = vshll.u32 %v12381_v49, %v2018_v8 }
 0x246   :  { %v691_v39 = vsel %vm685_vm6, %v688_v20, %v690_v29  ;;  %v2012_v32 = vor.u32 8388608, %v2011_v28  ;;  %v2027_v13 = vshll.u32 %v12365_v0, %v2018_v8  ;;  %v2030_v54 = vshll.u32 %v12366_v11, %v2018_v8  ;;  %v12462_v29 = vld [vmem:[#allocation35_spill] sm:$0xff] }
 0x247   :  { %v2017_v33 = vshrl.u32 %v2016_v9, 5  ;;  %v2022_v57 = vshrl.u32 %v12381_v49, %v2019_v21  ;;  %v2025_v61 = vshrl.u32 %v12365_v0, %v2019_v21  ;;  %v2028_v47 = vshrl.u32 %v12366_v11, %v2019_v21 }
 0x248   :  { %v1040_v36 = vsub.s32 4294967266, %v8316_v46  ;;  %v711_v19 = vsel %vm709_vm4, %v710_v45, %v8290_v38  ;;  %v2031_v52 = vshrl.u32 %v12367_v43, %v2019_v21  ;;  %v5794_v51 = vadd.s32 4294967169, %v1592_v2 }
 0x249   :  { %v707_v35 = vmul.u32 %v8269_v30, %v691_v39  ;;  %v2023_v28 = vor.u32 %v2022_v57, %v2021_v16  ;;  %v2026_v20 = vor.u32 %v2025_v61, %v2024_v50  ;;  %v2033_v9 = vshll.u32 %v12367_v43, %v2018_v8 }
 0x24a   :  { %vm12192_vm11 = vcmp.lt.s32.totalorder %v7455_v31, 0  ;;  %vm12191_vm1 = vcmp.lt.s32.totalorder %v12462_v29, 0  ;;  %v1862_v4 = vsub.s32 0, %v8334_v12  ;;  %v2029_v37 = vor.u32 %v2028_v47, %v2027_v13 }
 0x24b   :  { %v2032_v53 = vor.u32 %v2031_v52, %v2030_v54  ;;  %v8358_v6 = vshll.u32 %v2012_v32, 8  ;;  %v8360_v38 = vadd.s32 %v711_v19, %v707_v35  ;;  %v2034_v45 = vshrl.u32 %v12369_v27, %v2019_v21 }
 0x24c   :  { %vm2036_vm6 = vcmp.lt.s32.totalorder %v2017_v33, 1  ;;  %vm2038_vm0 = vcmp.lt.s32.totalorder %v2017_v33, 3  ;;  %v2020_v30 = vshrl.u32 %v12373_v55, %v2019_v21  ;;  %vm2037_vm7 = vcmp.lt.s32.totalorder %v2017_v33, 2 }
 0x24d   :  { %vm2039_vm4 = vcmp.lt.s32.totalorder %v2017_v33, 4  ;;  %v1598_v8 = vadd.s32 1, %v5794_v51  ;;  %v2035_v2 = vor.u32 %v2034_v45, %v2033_v9  ;;  %v2044_v50 = vsel %vm2036_vm6, %v2023_v28, %v2026_v20 }
 0x24e   :  { %v2041_v16 = vsel %vm2039_vm4, %v2029_v37, 2102212464  ;;  %v2045_v39 = vsel %vm2039_vm4, %v2032_v53, 920167782  ;;  %v1041_v13 = vadd.s32 127, %v1040_v36  ;;  %v5803_v32 = vmin.u32 %v1862_v4, %v8334_v12 }
 0x24f   :  { %v2046_v54 = vsel %vm2038_vm0, %v2029_v37, %v2045_v39  ;;  %v12187_v57 = vand.u32 2147483647, %v8295_v24  ;;  %v713_v61 = vadd.s32 536870912, %v8360_v38  ;;  %v2048_v21 = vsel %vm2036_vm6, %v2026_v20, %v2029_v37 }
 0x250   :  { %v2047_v47 = vsel %vm2037_vm7, %v2044_v50, %v2046_v54  ;;  %v2049_v19 = vsel %vm2039_vm4, %v2035_v2, 1326507024  ;;  %v1038_v52 = vshrl.u32 %v1020_v58, %v1036_v63  ;;  %v2040_v51 = vsel %vm2036_vm6, %v2020_v30, %v2023_v28 }
 0x251   :  { %v2042_v35 = vsel %vm2038_vm0, %v2026_v20, %v2041_v16  ;;  %v2050_v36 = vsel %vm2038_vm0, %v2032_v53, %v2049_v19  ;;  %v8376_v9 = vmul.u32.u64.low %v8358_v6, %v2047_v47  ;;  %v8377_v45 = vmul.u32.u64.high %v8358_v6, %v2047_v47, %v8376_v9 }
 0x252   :  { %v2051_v4 = vsel %vm2037_vm7, %v2048_v21, %v2050_v36  ;;  %vm1599_vm10 = vcmp.gt.s32.totalorder %v1598_v8, 0  ;;  %v1042_v39 = vshll.u32 %v1041_v13, 23  ;;  %v1864_v50 = vclz %v5803_v32 }
 0x253   :  { %v8381_v37 = vmul.u32.u64.low %v8358_v6, %v2051_v4  ;;  %v8382_v2 = vmul.u32.u64.high %v8358_v6, %v2051_v4, %v8381_v37  ;;  %v12463_v58 = vxor.u32 2147483648, %v8063_v25  ;;  %v12465_v63 = vxor.u32 2147483648, %v8133_v18 }
 0x254   :  { %v8398_v20 = vshrl.u32 %v713_v61, 30  ;;  %v1600_v30 = vsel %vm1599_vm10, %v1598_v8, 0  ;;  %v1037_v13 = vshll.u32 %v8199_v22, %v8316_v46  ;;  %v2043_v32 = vsel %vm2037_vm7, %v2040_v51, %v2042_v35  ;;  %v8421_v35 = vpop.f32.mrb[14].mxu1 }
 0x255   :  { %v8389_v53 = vsel %vm12192_vm11, %v12463_v58, %v8063_v25  ;;  %v8396_v28 = vsel %vm12191_vm1, %v12465_v63, %v8133_v18  ;;  %v1602_v54 = vand.u32 31, %v1600_v30  ;;  %v1772_v47 = vand.u32 2147483647, %v8324_v23 }
 0x256   :  { %12464 = vst [vmem:[#allocation82_spill] sm:$0xff] %v8389_v53  ;;  %12466 = vst [vmem:[#allocation83_spill] sm:$0xff] %v8396_v28  ;;  %v1774_v21 = vcvt.s32.f32 %v8318_v3  ;;  %v2062_v18 = vadd.s32 1, %v8377_v45  ;;  %v1039_v19 = vor.u32 %v1038_v52, %v1037_v13  ;;  %v1043_v61 = vor.u32 4788187, %v1042_v39  ;;  %v12468_v52 = vld [vmem:[#allocation64_spill] sm:$0xff] }
 0x257   :  { %12467 = vst [vmem:[#allocation84_spill] sm:$0xff] %v8398_v20  ;;  %v5804_v36 = vadd.s32 4294967294, %v1864_v50  ;;  %v1595_v8 = vand.u32 8388607, %v12187_v57  ;;  %v715_v4 = vshll.u32 %v8398_v20, 30  ;;  %v2059_v22 = vmul.u32 %v8358_v6, %v2043_v32 }
 0x258   :  { %vm2061_vm10 = vc.u32 %v8382_v2, %v8376_v9  ;;  %v1603_v46 = vsub.s32 32, %v1602_v54  ;;  %v1605_v3 = vshll.u32 %v12373_v55, %v1602_v54  ;;  %v1608_v33 = vshll.u32 %v12381_v49, %v1602_v54 }
 0x259   :  { %v2063_v23 = vsel %vm2061_vm10, %v2062_v18, %v8377_v45  ;;  %v8419_v51 = vadd.f32 %v12468_v52, %v6588_v42  ;;  %v8423_v39 = vshrl.u32 %v1600_v30, 5  ;;  %v1611_v37 = vshll.u32 %v12365_v0, %v1602_v54  ;;  %v12470_v52 = vld [vmem:[#allocation41_spill] sm:$0xff] }
 0x25a   :  { %v1606_v6 = vshrl.u32 %v12381_v49, %v1603_v46  ;;  %v1609_v50 = vshrl.u32 %v12365_v0, %v1603_v46  ;;  %v1044_v58 = vand.u32 2147483647, %v1043_v61  ;;  %v1596_v45 = vor.u32 8388608, %v1595_v8  ;;  %v12471_v8 = vld [vmem:[#allocation46_spill] sm:$0xff] }
 0x25b   :  { %12469 = vst [vmem:[#allocation64_spill] sm:$0xff] %v8419_v51  ;;  %v1612_v63 = vshrl.u32 %v12366_v11, %v1603_v46  ;;  %v1614_v13 = vshll.u32 %v12366_v11, %v1602_v54  ;;  %vm5805_vm6 = vcmp.lt.s32.totalorder %v5804_v36, 0  ;;  %v8431_v32 = vsub.s32 %v8360_v38, %v715_v4 }
 0x25c   :  { %v8433_v18 = vadd.s32 %v2063_v23, %v2059_v22  ;;  %v1615_v30 = vshrl.u32 %v12367_v43, %v1603_v46  ;;  %vm12219_vm0 = vcmp.lt.s32.totalorder %v12470_v52, 0  ;;  %v1607_v57 = vor.u32 %v1606_v6, %v1605_v3 }
 0x25d   :  { %v1610_v25 = vor.u32 %v1609_v50, %v1608_v33  ;;  %v1617_v16 = vshll.u32 %v12367_v43, %v1602_v54  ;;  %v2111_v61 = vand.u32 2139095040, %v8419_v51  ;;  %vm12202_vm7 = vcmp.lt.s32.totalorder %v12471_v8, 0 }
 0x25e   :  { %v1613_v20 = vor.u32 %v1612_v63, %v1611_v37  ;;  %v1616_v28 = vor.u32 %v1615_v30, %v1614_v13  ;;  %v1618_v29 = vshrl.u32 %v12369_v27, %v1603_v46  ;;  %vm1620_vm4 = vcmp.lt.s32.totalorder %v8423_v39, 1 }
 0x25f   :  { %v1046_v38 = vcvt.s32.f32 %v1039_v19  ;;  %vm1622_vm10 = vcmp.lt.s32.totalorder %v8423_v39, 3  ;;  %vm1623_vm1 = vcmp.lt.s32.totalorder %v8423_v39, 4  ;;  %v8444_v4 = vshll.u32 %v1596_v45, 8 }
 0x260   :  { %v8447_v22 = vsel %vm5805_vm6, 0, %v5804_v36  ;;  %v2065_v54 = vadd.s32 536870912, %v8433_v18  ;;  %v1619_v23 = vor.u32 %v1618_v29, %v1617_v16  ;;  %vm1621_vm11 = vcmp.lt.s32.totalorder %v8423_v39, 2 }
 0x261   :  { %vm12217_vm9 = vcmp.lt.s32.totalorder %v7860_v60, 0  ;;  %v718_v3 = vsub.s32 0, %v8431_v32  ;;  %v1628_v19 = vsel %vm1620_vm4, %v1607_v57, %v1610_v25  ;;  %v1629_v33 = vsel %vm1623_vm1, %v1616_v28, 920167782 }
 0x262   :  { %v2112_v6 = vshrl.u32 %v2111_v61, 23  ;;  %v1775_v50 = vmul.f32 %v1774_v21, %v1772_v47  ;;  %vm12218_vm6 = vcmp.lt.s32.totalorder %v7969_v1, 0  ;;  %v1047_v36 = vmul.f32 %v1046_v38, %v1044_v58 }
 0x263   :  { %v1630_v29 = vsel %vm1622_vm10, %v1613_v20, %v1629_v33  ;;  %v1632_v16 = vsel %vm1620_vm4, %v1610_v25, %v1613_v20  ;;  %v1872_v37 = vsub.s32 4294967266, %v8447_v22  ;;  %v1604_v45 = vshrl.u32 %v12373_v55, %v1603_v46 }
 0x264   :  { %v1631_v63 = vsel %vm1621_vm11, %v1628_v19, %v1630_v29  ;;  %v1633_v13 = vsel %vm1623_vm1, %v1619_v23, 1326507024  ;;  %v8468_v47 = vshrl.u32 %v2065_v54, 30  ;;  %v5759_v61 = vmin.u32 %v718_v3, %v8431_v32 }
 0x265   :  { %v1634_v21 = vsel %vm1622_vm10, %v1616_v28, %v1633_v13  ;;  %v8473_v58 = vmul.u32.u64.low %v8444_v4, %v1631_v63  ;;  %v8474_v30 = vmul.u32.u64.high %v8444_v4, %v1631_v63, %v8473_v58  ;;  %v1625_v46 = vsel %vm1623_vm1, %v1613_v20, 2102212464 }
 0x266   :  { %12472 = vst [vmem:[#allocation85_spill] sm:$0xff] %v8468_v47  ;;  %v1635_v38 = vsel %vm1621_vm11, %v1632_v16, %v1634_v21  ;;  %v5814_v19 = vadd.s32 4294967169, %v2112_v6  ;;  %v12473_v54 = vxor.u32 2147483648, %v8312_v40  ;;  %v1776_v23 = vxor.u32 2147483648, %v1775_v50 }
 0x267   :  { %v8490_v33 = vmul.u32.u64.low %v8444_v4, %v1635_v38  ;;  %v8491_v29 = vmul.u32.u64.high %v8444_v4, %v1635_v38, %v8490_v33  ;;  %v12475_v3 = vxor.u32 2147483648, %v8314_v62  ;;  %v1048_v6 = vxor.u32 2147483648, %v1047_v36  ;;  %v12477_v38 = vld [vmem:[#allocation67_spill] sm:$0xff] }
 0x268   :  { %v8487_v28 = vsel %vm12219_vm0, %v12473_v54, %v8312_v40  ;;  %v12194_v16 = vand.u32 2147483647, %v8419_v51  ;;  %v2118_v63 = vadd.s32 1, %v5814_v19  ;;  %v2067_v13 = vshll.u32 %v8468_v47, 30 }
 0x269   :  { %12474 = vst [vmem:[#allocation86_spill] sm:$0xff] %v8487_v28  ;;  %v8498_v20 = vsel %vm12202_vm7, %v12475_v3, %v8314_v62  ;;  %v1624_v40 = vsel %vm1620_vm4, %v1604_v45, %v1607_v57  ;;  %v1626_v21 = vsel %vm1622_vm10, %v1610_v25, %v1625_v46  ;;  %v8508_v54 = vadd.f32 %v12477_v38, %v12446_v34 }
 0x26a   :  { %12476 = vst [vmem:[#allocation87_spill] sm:$0xff] %v8498_v20  ;;  %v1868_v33 = vsub.s32 32, %v8447_v22  ;;  %v8511_v62 = vadd.s32 127, %v1872_v37  ;;  %v720_v3 = vclz %v5759_v61  ;;  %vm2119_vm1 = vcmp.gt.s32.totalorder %v2118_v63, 0 }
 0x26b   :  { %12478 = vst [vmem:[#allocation67_spill] sm:$0xff] %v8508_v54  ;;  %v8515_v19 = vsel %vm12217_vm9, %v1776_v23, %v1775_v50  ;;  %v1852_v57 = vadd.s32 %v8194_v15, %v8192_v26  ;;  %v1646_v45 = vadd.s32 1, %v8474_v30  ;;  %v2120_v25 = vsel %vm2119_vm1, %v2118_v63, 0 }
 0x26c   :  { %12479 = vst [vmem:[#allocation88_spill] sm:$0xff] %v8515_v19  ;;  %v8522_v46 = vsel %vm12218_vm6, %v1048_v6, %v1047_v36  ;;  %v1627_v37 = vsel %vm1621_vm11, %v1624_v40, %v1626_v21  ;;  %vm1645_vm4 = vc.u32 %v8491_v29, %v8473_v58  ;;  %v2122_v61 = vand.u32 31, %v2120_v25 }
 0x26d   :  { %12480 = vst [vmem:[#allocation89_spill] sm:$0xff] %v8522_v46  ;;  %v1869_v50 = vshll.u32 %v8334_v12, %v8447_v22  ;;  %v8531_v23 = vsub.s32 %v8433_v18, %v2067_v13  ;;  %v2115_v26 = vand.u32 8388607, %v12194_v16  ;;  %v1279_v15 = vand.u32 2139095040, %v8508_v54  ;;  %v8541_v18 = vpop.f32.mrb[15].mxu0 }
 0x26e   :  { %v1870_v36 = vshrl.u32 %v1852_v57, %v1868_v33  ;;  %v1874_v6 = vshll.u32 %v8511_v62, 23  ;;  %v5760_v39 = vadd.s32 4294967294, %v720_v3  ;;  %v2123_v63 = vsub.s32 32, %v2122_v61 }
 0x26f   :  { %v1643_v40 = vmul.u32 %v8444_v4, %v1627_v37  ;;  %v1647_v21 = vsel %vm1645_vm4, %v1646_v45, %v8474_v30  ;;  %v2125_v38 = vshll.u32 %v12373_v55, %v2122_v61  ;;  %v2128_v12 = vshll.u32 %v12381_v49, %v2122_v61 }
 0x270   :  { %v2121_v22 = vshrl.u32 %v2120_v25, 5  ;;  %v2126_v13 = vshrl.u32 %v12381_v49, %v2123_v63  ;;  %v2129_v16 = vshrl.u32 %v12365_v0, %v2123_v63  ;;  %v2131_v33 = vshll.u32 %v12365_v0, %v2122_v61 }
 0x271   :  { %v2070_v62 = vsub.s32 0, %v8531_v23  ;;  %v2116_v3 = vor.u32 8388608, %v2115_v26  ;;  %v2132_v4 = vshrl.u32 %v12366_v11, %v2123_v63  ;;  %v1280_v57 = vshrl.u32 %v1279_v15, 23 }
 0x272   :  { %vm5761_vm11 = vcmp.lt.s32.totalorder %v5760_v39, 0  ;;  %v8548_v30 = vadd.s32 %v1647_v21, %v1643_v40  ;;  %v2134_v45 = vshll.u32 %v12366_v11, %v2122_v61  ;;  %v2135_v37 = vshrl.u32 %v12367_v43, %v2123_v63 }
 0x273   :  { %v2124_v25 = vshrl.u32 %v12373_v55, %v2123_v63  ;;  %v2127_v20 = vor.u32 %v2126_v13, %v2125_v38  ;;  %v2130_v8 = vor.u32 %v2129_v16, %v2128_v12  ;;  %v2133_v47 = vor.u32 %v2132_v4, %v2131_v33 }
 0x274   :  { %v2136_v19 = vor.u32 %v2135_v37, %v2134_v45  ;;  %v2137_v60 = vshll.u32 %v12367_v43, %v2122_v61  ;;  %v2138_v26 = vshrl.u32 %v12369_v27, %v2123_v63  ;;  %vm2140_vm10 = vcmp.lt.s32.totalorder %v2121_v22, 1 }
 0x275   :  { %v8555_v46 = vsel %vm5761_vm11, 0, %v5760_v39  ;;  %v5811_v15 = vmin.u32 %v2070_v62, %v8531_v23  ;;  %v2156_v40 = vshll.u32 %v2116_v3, 8  ;;  %v5782_v21 = vadd.s32 4294967169, %v1280_v57 }
 0x276   :  { %v1649_v1 = vadd.s32 536870912, %v8548_v30  ;;  %v2139_v28 = vor.u32 %v2138_v26, %v2137_v60  ;;  %vm2142_vm1 = vcmp.lt.s32.totalorder %v2121_v22, 3  ;;  %vm2143_vm4 = vcmp.lt.s32.totalorder %v2121_v22, 4 }
 0x277   :  { %vm2141_vm7 = vcmp.lt.s32.totalorder %v2121_v22, 2  ;;  %v2144_v16 = vsel %vm2140_vm10, %v2124_v25, %v2127_v20  ;;  %v2145_v38 = vsel %vm2143_vm4, %v2133_v47, 2102212464  ;;  %v2148_v12 = vsel %vm2140_vm10, %v2127_v20, %v2130_v8 }
 0x278   :  { %v2146_v61 = vsel %vm2142_vm1, %v2130_v8, %v2145_v38  ;;  %v2149_v13 = vsel %vm2143_vm4, %v2136_v19, 920167782  ;;  %v2152_v63 = vsel %vm2140_vm10, %v2130_v8, %v2133_v47  ;;  %v2153_v33 = vsel %vm2143_vm4, %v2139_v28, 1326507024 }
 0x279   :  { %v8560_v39 = vor.u32 %v1870_v36, %v1869_v50  ;;  %v2072_v4 = vclz %v5811_v15  ;;  %v2150_v62 = vsel %vm2142_vm1, %v2133_v47, %v2149_v13  ;;  %v12203_v3 = vand.u32 2147483647, %v8508_v54 }
 0x27a   :  { %v8564_v57 = vor.u32 4788187, %v1874_v6  ;;  %v2151_v60 = vsel %vm2141_vm7, %v2148_v12, %v2150_v62  ;;  %v2154_v45 = vsel %vm2142_vm1, %v2136_v19, %v2153_v33  ;;  %v1286_v37 = vadd.s32 1, %v5782_v21 }
 0x27b   :  { %v724_v20 = vsub.s32 32, %v8555_v46  ;;  %v8569_v25 = vshrl.u32 %v1649_v1, 30  ;;  %v2147_v8 = vsel %vm2141_vm7, %v2144_v16, %v2146_v61  ;;  %v2155_v28 = vsel %vm2141_vm7, %v2152_v63, %v2154_v45 }
 0x27c   :  { %v8573_v50 = vmul.u32.u64.low %v2156_v40, %v2155_v28  ;;  %v8574_v36 = vmul.u32.u64.high %v2156_v40, %v2155_v28, %v8573_v50  ;;  %v8576_v47 = vmul.u32.u64.low %v2156_v40, %v2151_v60  ;;  %v8577_v26 = vmul.u32.u64.high %v2156_v40, %v2151_v60, %v8576_v47 }
 0x27d   :  { %12481 = vst [vmem:[#allocation90_spill] sm:$0xff] %v8569_v25  ;;  %v728_v6 = vsub.s32 4294967266, %v8555_v46  ;;  %v5812_v15 = vadd.s32 4294967294, %v2072_v4  ;;  %v1283_v19 = vand.u32 8388607, %v12203_v3  ;;  %vm1287_vm11 = vcmp.gt.s32.totalorder %v1286_v37, 0 }
 0x27e   :  { %v708_v22 = vadd.s32 %v8289_v5, %v8299_v10  ;;  %v1288_v16 = vsel %vm1287_vm11, %v1286_v37, 0  ;;  %v1651_v38 = vshll.u32 %v8569_v25, 30  ;;  %v2163_v12 = vmul.u32 %v2156_v40, %v2147_v8  ;;  %v8601_v37 = vpop.f32.mrb[15].mxu1 }
 0x27f   :  { %v1290_v61 = vand.u32 31, %v1288_v16  ;;  %v8590_v13 = vadd.f32 %v8002_v7, %v6585_v41  ;;  %v725_v63 = vshll.u32 %v8431_v32, %v8555_v46  ;;  %vm2165_vm7 = vc.u32 %v8574_v36, %v8576_v47 }
 0x280   :  { %v726_v33 = vshrl.u32 %v708_v22, %v724_v20  ;;  %v2166_v4 = vadd.s32 1, %v8577_v26  ;;  %v729_v62 = vadd.s32 127, %v728_v6  ;;  %vm5813_vm10 = vcmp.lt.s32.totalorder %v5812_v15, 0 }
 0x281   :  { %12482 = vst [vmem:[#allocation91_spill] sm:$0xff] %v8590_v13  ;;  %v1284_v5 = vor.u32 8388608, %v1283_v19  ;;  %v1291_v10 = vsub.s32 32, %v1290_v61  ;;  %v1293_v60 = vshll.u32 %v12373_v55, %v1290_v61  ;;  %v1296_v7 = vshll.u32 %v12381_v49, %v1290_v61 }
 0x282   :  { %v2167_v40 = vsel %vm2165_vm7, %v2166_v4, %v8577_v26  ;;  %v1299_v45 = vshll.u32 %v12365_v0, %v1290_v61  ;;  %v8604_v32 = vsub.s32 %v8548_v30, %v1651_v38  ;;  %v1289_v20 = vshrl.u32 %v1288_v16, 5 }
 0x283   :  { %v2168_v46 = vadd.s32 %v2167_v40, %v2163_v12  ;;  %v2319_v8 = vand.u32 2139095040, %v8590_v13  ;;  %v1294_v28 = vshrl.u32 %v12381_v49, %v1291_v10  ;;  %v1297_v50 = vshrl.u32 %v12365_v0, %v1291_v10 }
 0x284   :  { %v1300_v26 = vshrl.u32 %v12366_v11, %v1291_v10  ;;  %v1302_v6 = vshll.u32 %v12366_v11, %v1290_v61  ;;  %v727_v19 = vor.u32 %v726_v33, %v725_v63  ;;  %v730_v22 = vshll.u32 %v729_v62, 23 }
 0x285   :  { %v2169_v4 = vadd.s32 536870912, %v2168_v46  ;;  %v1303_v3 = vshrl.u32 %v12367_v43, %v1291_v10  ;;  %v1295_v21 = vor.u32 %v1294_v28, %v1293_v60  ;;  %v1298_v30 = vor.u32 %v1297_v50, %v1296_v7 }
 0x286   :  { %v1301_v38 = vor.u32 %v1300_v26, %v1299_v45  ;;  %v1305_v16 = vshll.u32 %v12367_v43, %v1290_v61  ;;  %v2075_v12 = vsel %vm5813_vm10, 0, %v5812_v15  ;;  %v1654_v40 = vsub.s32 0, %v8604_v32 }
 0x287   :  { %v1304_v1 = vor.u32 %v1303_v3, %v1302_v6  ;;  %v1324_v25 = vshll.u32 %v1284_v5, 8  ;;  %v1306_v52 = vshrl.u32 %v12369_v27, %v1291_v10  ;;  %vm1308_vm1 = vcmp.lt.s32.totalorder %v1289_v20, 1 }
 0x288   :  { %vm1310_vm4 = vcmp.lt.s32.totalorder %v1289_v20, 3  ;;  %v2320_v63 = vshrl.u32 %v2319_v8, 23  ;;  %v8616_v33 = vshrl.u32 %v2169_v4, 30  ;;  %v1292_v62 = vshrl.u32 %v12373_v55, %v1291_v10 }
 0x289   :  { %vm1309_vm11 = vcmp.lt.s32.totalorder %v1289_v20, 2  ;;  %vm1311_vm7 = vcmp.lt.s32.totalorder %v1289_v20, 4  ;;  %v1307_v60 = vor.u32 %v1306_v52, %v1305_v16  ;;  %v1316_v61 = vsel %vm1308_vm1, %v1295_v21, %v1298_v30 }
 0x28a   :  { %12483 = vst [vmem:[#allocation92_spill] sm:$0xff] %v8616_v33  ;;  %v1313_v7 = vsel %vm1311_vm7, %v1301_v38, 2102212464  ;;  %v1317_v15 = vsel %vm1311_vm7, %v1304_v1, 920167782  ;;  %v2076_v28 = vsub.s32 32, %v2075_v12  ;;  %v1320_v8 = vsel %vm1308_vm1, %v1298_v30, %v1301_v38 }
 0x28b   :  { %v731_v45 = vor.u32 4788187, %v730_v22  ;;  %v2080_v3 = vsub.s32 4294967266, %v2075_v12  ;;  %v1318_v5 = vsel %vm1310_vm4, %v1301_v38, %v1317_v15  ;;  %v1321_v26 = vsel %vm1311_vm7, %v1307_v60, 1326507024 }
 0x28c   :  { %v1319_v50 = vsel %vm1309_vm11, %v1316_v61, %v1318_v5  ;;  %v5822_v6 = vadd.s32 4294967169, %v2320_v63  ;;  %v2171_v10 = vshll.u32 %v8616_v33, 30  ;;  %v1312_v4 = vsel %vm1308_vm1, %v1292_v62, %v1295_v21 }
 0x28d   :  { %v1314_v52 = vsel %vm1310_vm4, %v1298_v30, %v1313_v7  ;;  %v1322_v16 = vsel %vm1310_vm4, %v1304_v1, %v1321_v26  ;;  %v5795_v22 = vmin.u32 %v1654_v40, %v8604_v32  ;;  %v12484_v38 = vand.u32 2147483647, %v8564_v57 }
 0x28e   :  { %v1323_v53 = vsel %vm1309_vm11, %v1320_v8, %v1322_v16  ;;  %v8629_v31 = vmul.u32.u64.low %v1324_v25, %v1319_v50  ;;  %v8630_v15 = vmul.u32.u64.high %v1324_v25, %v1319_v50, %v8629_v31  ;;  %v12485_v63 = vcvt.s32.f32 %v8560_v39 }
 0x28f   :  { %v2081_v61 = vadd.s32 127, %v2080_v3  ;;  %v8639_v21 = vmul.u32.u64.low %v1324_v25, %v1323_v53  ;;  %v8640_v62 = vmul.u32.u64.high %v1324_v25, %v1323_v53, %v8639_v21  ;;  %v732_v30 = vand.u32 2147483647, %v731_v45 }
 0x290   :  { %v8637_v60 = vmul.f32 %v12485_v63, %v12484_v38  ;;  %v2060_v1 = vadd.s32 %v8376_v9, %v8382_v2  ;;  %v1315_v40 = vsel %vm1309_vm11, %v1312_v4, %v1314_v52  ;;  %v2326_v7 = vadd.s32 1, %v5822_v6 }
 0x291   :  { %v734_v5 = vcvt.s32.f32 %v727_v19  ;;  %v8645_v50 = vsub.s32 %v2168_v46, %v2171_v10  ;;  %v12209_v57 = vand.u32 2147483647, %v8590_v13  ;;  %v8650_v39 = vadd.f32 %v8075_v17, %v12446_v34 }
 0x292   :  { %v2078_v3 = vshrl.u32 %v2060_v1, %v2076_v28  ;;  %v1656_v8 = vclz %v5795_v22  ;;  %v1334_v53 = vadd.s32 1, %v8630_v15  ;;  %vm2327_vm10 = vcmp.gt.s32.totalorder %v2326_v7, 0 }
 0x293   :  { %12486 = vst [vmem:[#allocation93_spill] sm:$0xff] %v8650_v39  ;;  %v2082_v45 = vshll.u32 %v2081_v61, 23  ;;  %v1331_v26 = vmul.u32 %v1324_v25, %v1315_v40  ;;  %vm1333_vm1 = vc.u32 %v8640_v62, %v8629_v31  ;;  %v2328_v9 = vsel %vm2327_vm10, %v2326_v7, 0 }
 0x294   :  { %v8655_v2 = vmul.f32 %v734_v5, %v732_v30  ;;  %v2077_v46 = vshll.u32 %v8531_v23, %v2075_v12  ;;  %v1335_v20 = vsel %vm1333_vm1, %v1334_v53, %v8630_v15  ;;  %v2330_v19 = vand.u32 31, %v2328_v9 }
 0x295   :  { %v2174_v17 = vsub.s32 0, %v8645_v50  ;;  %v1336_v28 = vadd.s32 %v1335_v20, %v1331_v26  ;;  %v2323_v6 = vand.u32 8388607, %v12209_v57  ;;  %v2215_v10 = vand.u32 2139095040, %v8650_v39  ;;  %v8683_v20 = vpop.f32.mrb[16].mxu0 }
 0x296   :  { %v8663_v25 = vor.u32 %v2078_v3, %v2077_v46  ;;  %v1644_v4 = vadd.s32 %v8473_v58, %v8491_v29  ;;  %v5796_v52 = vadd.s32 4294967294, %v1656_v8  ;;  %v2331_v16 = vsub.s32 32, %v2330_v19 }
 0x297   :  { %v8667_v22 = vor.u32 4788187, %v2082_v45  ;;  %v1337_v23 = vadd.s32 536870912, %v1336_v28  ;;  %v2333_v12 = vshll.u32 %v12373_v55, %v2330_v19  ;;  %v2336_v15 = vshll.u32 %v12381_v49, %v2330_v19 }
 0x298   :  { %v2329_v38 = vshrl.u32 %v2328_v9, 5  ;;  %v2334_v63 = vshrl.u32 %v12381_v49, %v2331_v16  ;;  %v2337_v61 = vshrl.u32 %v12365_v0, %v2331_v16  ;;  %v2339_v21 = vshll.u32 %v12365_v0, %v2330_v19 }
 0x299   :  { %v5815_v30 = vmin.u32 %v2174_v17, %v8645_v50  ;;  %v2324_v1 = vor.u32 8388608, %v2323_v6  ;;  %v2340_v58 = vshrl.u32 %v12366_v11, %v2331_v16  ;;  %v2216_v29 = vshrl.u32 %v2215_v10, 23 }
 0x29a   :  { %vm5797_vm4 = vcmp.lt.s32.totalorder %v5796_v52, 0  ;;  %v8676_v40 = vshrl.u32 %v1337_v23, 30  ;;  %v2342_v7 = vshll.u32 %v12366_v11, %v2330_v19  ;;  %v2343_v5 = vshrl.u32 %v12367_v43, %v2331_v16 }
 0x29b   :  { %v2332_v3 = vshrl.u32 %v12373_v55, %v2331_v16  ;;  %v2335_v8 = vor.u32 %v2334_v63, %v2333_v12  ;;  %v2338_v53 = vor.u32 %v2337_v61, %v2336_v15  ;;  %v2341_v45 = vor.u32 %v2340_v58, %v2339_v21 }
 0x29c   :  { %12487 = vst [vmem:[#allocation94_spill] sm:$0xff] %v8676_v40  ;;  %v2344_v26 = vor.u32 %v2343_v5, %v2342_v7  ;;  %v2345_v9 = vshll.u32 %v12367_v43, %v2330_v19  ;;  %v2346_v46 = vshrl.u32 %v12369_v27, %v2331_v16  ;;  %vm2348_vm11 = vcmp.lt.s32.totalorder %v2329_v38, 1 }
 0x29d   :  { %v1659_v17 = vsel %vm5797_vm4, 0, %v5796_v52  ;;  %v2176_v6 = vclz %v5815_v30  ;;  %v2364_v10 = vshll.u32 %v2324_v1, 8  ;;  %v5818_v23 = vadd.s32 4294967169, %v2216_v29 }
 0x29e   :  { %v1339_v57 = vshll.u32 %v8676_v40, 30  ;;  %v2347_v33 = vor.u32 %v2346_v46, %v2345_v9  ;;  %vm2350_vm7 = vcmp.lt.s32.totalorder %v2329_v38, 3  ;;  %vm2351_vm10 = vcmp.lt.s32.totalorder %v2329_v38, 4 }
 0x29f   :  { %vm2349_vm1 = vcmp.lt.s32.totalorder %v2329_v38, 2  ;;  %v2352_v12 = vsel %vm2348_vm11, %v2332_v3, %v2335_v8  ;;  %v2353_v15 = vsel %vm2351_vm10, %v2341_v45, 2102212464  ;;  %v2356_v19 = vsel %vm2348_vm11, %v2335_v8, %v2338_v53 }
 0x2a0   :  { %v2354_v16 = vsel %vm2350_vm7, %v2338_v53, %v2353_v15  ;;  %v2357_v63 = vsel %vm2351_vm10, %v2344_v26, 920167782  ;;  %v2360_v61 = vsel %vm2348_vm11, %v2338_v53, %v2341_v45  ;;  %v2361_v52 = vsel %vm2351_vm10, %v2347_v33, 1326507024 }
 0x2a1   :  { %v2084_v21 = vand.u32 2147483647, %v8667_v22  ;;  %v1660_v30 = vsub.s32 32, %v1659_v17  ;;  %v2358_v1 = vsel %vm2350_vm7, %v2341_v45, %v2357_v63  ;;  %v12212_v58 = vand.u32 2147483647, %v8650_v39 }
 0x2a2   :  { %v1664_v29 = vsub.s32 4294967266, %v1659_v17  ;;  %v2359_v7 = vsel %vm2349_vm1, %v2356_v19, %v2358_v1  ;;  %v2362_v5 = vsel %vm2350_vm7, %v2344_v26, %v2361_v52  ;;  %v2222_v3 = vadd.s32 1, %v5818_v23 }
 0x2a3   :  { %v5816_v8 = vadd.s32 4294967294, %v2176_v6  ;;  %v8695_v9 = vsub.s32 %v1336_v28, %v1339_v57  ;;  %v2355_v46 = vsel %vm2349_vm1, %v2352_v12, %v2354_v16  ;;  %v2363_v33 = vsel %vm2349_vm1, %v2360_v61, %v2362_v5 }
 0x2a4   :  { %v8699_v53 = vmul.u32.u64.low %v2364_v10, %v2363_v33  ;;  %v8700_v22 = vmul.u32.u64.high %v2364_v10, %v2363_v33, %v8699_v53  ;;  %v8702_v15 = vmul.u32.u64.low %v2364_v10, %v2359_v7  ;;  %v8703_v45 = vmul.u32.u64.high %v2364_v10, %v2359_v7, %v8702_v15  ;;  %v8731_v33 = vpop.f32.mrb[16].mxu1 }
 0x2a5   :  { %v1662_v19 = vshrl.u32 %v1644_v4, %v1660_v30  ;;  %v2219_v26 = vand.u32 8388607, %v12212_v58  ;;  %vm2223_vm4 = vcmp.gt.s32.totalorder %v2222_v3, 0  ;;  %v2086_v28 = vcvt.s32.f32 %v8663_v25 }
 0x2a6   :  { %v1661_v38 = vshll.u32 %v8604_v32, %v1659_v17  ;;  %v2224_v6 = vsel %vm2223_vm4, %v2222_v3, 0  ;;  %vm5817_vm11 = vcmp.lt.s32.totalorder %v5816_v8, 0  ;;  %v1342_v23 = vsub.s32 0, %v8695_v9 }
 0x2a7   :  { %v2371_v12 = vmul.u32 %v2364_v10, %v2355_v46  ;;  %v2226_v16 = vand.u32 31, %v2224_v6  ;;  %v8713_v61 = vmul.f32 %v2086_v28, %v2084_v21  ;;  %v1665_v52 = vadd.s32 127, %v1664_v29 }
 0x2a8   :  { %vm2373_vm7 = vc.u32 %v8700_v22, %v8702_v15  ;;  %v2374_v4 = vadd.s32 1, %v8703_v45  ;;  %v8718_v30 = vor.u32 %v1662_v19, %v1661_v38  ;;  %v2220_v1 = vor.u32 8388608, %v2219_v26 }
 0x2a9   :  { %v2227_v25 = vsub.s32 32, %v2226_v16  ;;  %v8722_v32 = vadd.f32 %v8149_v56, %v6588_v42  ;;  %v2179_v17 = vsel %vm5817_vm11, 0, %v5816_v8  ;;  %v2229_v21 = vshll.u32 %v12373_v55, %v2226_v16 }
 0x2aa   :  { %v2375_v10 = vsel %vm2373_vm7, %v2374_v4, %v8703_v45  ;;  %v2232_v29 = vshll.u32 %v12381_v49, %v2226_v16  ;;  %v5783_v7 = vmin.u32 %v1342_v23, %v8695_v9  ;;  %v8728_v3 = vshrl.u32 %v2224_v6, 5 }
 0x2ab   :  { %12488 = vst [vmem:[#allocation95_spill] sm:$0xff] %v8722_v32  ;;  %v2376_v5 = vadd.s32 %v2375_v10, %v2371_v12  ;;  %v2235_v46 = vshll.u32 %v12365_v0, %v2226_v16  ;;  %v2230_v53 = vshrl.u32 %v12381_v49, %v2227_v25  ;;  %v2233_v56 = vshrl.u32 %v12365_v0, %v2227_v25 }
 0x2ac   :  { %v2236_v8 = vshrl.u32 %v12366_v11, %v2227_v25  ;;  %v2238_v45 = vshll.u32 %v12366_v11, %v2226_v16  ;;  %v1666_v19 = vshll.u32 %v1665_v52, 23  ;;  %v2184_v26 = vsub.s32 4294967266, %v2179_v17 }
 0x2ad   :  { %v2377_v28 = vadd.s32 536870912, %v2376_v5  ;;  %v2239_v38 = vshrl.u32 %v12367_v43, %v2227_v25  ;;  %v2231_v23 = vor.u32 %v2230_v53, %v2229_v21  ;;  %v2234_v6 = vor.u32 %v2233_v56, %v2232_v29 }
 0x2ae   :  { %v2241_v12 = vshll.u32 %v12367_v43, %v2226_v16  ;;  %v2423_v4 = vand.u32 2139095040, %v8722_v32  ;;  %v2180_v10 = vsub.s32 32, %v2179_v17  ;;  %v2237_v58 = vor.u32 %v2236_v8, %v2235_v46 }
 0x2af   :  { %v2240_v57 = vor.u32 %v2239_v38, %v2238_v45  ;;  %v8740_v63 = vshll.u32 %v2220_v1, 8  ;;  %v1344_v40 = vclz %v5783_v7  ;;  %v2242_v39 = vshrl.u32 %v12369_v27, %v2227_v25 }
 0x2b0   :  { %vm2244_vm10 = vcmp.lt.s32.totalorder %v8728_v3, 1  ;;  %vm2246_vm1 = vcmp.lt.s32.totalorder %v8728_v3, 3  ;;  %vm12252_vm4 = vcmp.lt.s32.totalorder %v7981_v44, 0  ;;  %vm12276_vm11 = vcmp.lt.s32.totalorder %v8116_v14, 0 }
 0x2b1   :  { %v2185_v52 = vadd.s32 127, %v2184_v26  ;;  %v8747_v16 = vshrl.u32 %v2377_v28, 30  ;;  %vm2245_vm7 = vcmp.lt.s32.totalorder %v8728_v3, 2  ;;  %vm2247_vm9 = vcmp.lt.s32.totalorder %v8728_v3, 4 }
 0x2b2   :  { %v2243_v1 = vor.u32 %v2242_v39, %v2241_v12  ;;  %v2252_v21 = vsel %vm2244_vm10, %v2231_v23, %v2234_v6  ;;  %v2253_v29 = vsel %vm2247_vm9, %v2240_v57, 920167782  ;;  %v2424_v7 = vshrl.u32 %v2423_v4, 23 }
 0x2b3   :  { %12489 = vst [vmem:[#allocation96_spill] sm:$0xff] %v8747_v16  ;;  %v1667_v46 = vor.u32 4788187, %v1666_v19  ;;  %v1670_v53 = vcvt.s32.f32 %v8718_v30  ;;  %v2164_v56 = vadd.s32 %v8576_v47, %v8574_v36  ;;  %v2254_v8 = vsel %vm2246_vm1, %v2237_v58, %v2253_v29 }
 0x2b4   :  { %v5784_v45 = vadd.s32 4294967294, %v1344_v40  ;;  %v2255_v39 = vsel %vm2245_vm7, %v2252_v21, %v2254_v8  ;;  %v2256_v26 = vsel %vm2244_vm10, %v2234_v6, %v2237_v58  ;;  %v2257_v28 = vsel %vm2247_vm9, %v2243_v1, 1326507024 }
 0x2b5   :  { %v2182_v38 = vshrl.u32 %v2164_v56, %v2180_v10  ;;  %v2186_v19 = vshll.u32 %v2185_v52, 23  ;;  %v2379_v30 = vshll.u32 %v8747_v16, 30  ;;  %v2258_v36 = vsel %vm2246_vm1, %v2240_v57, %v2257_v28 }
 0x2b6   :  { %v2259_v47 = vsel %vm2245_vm7, %v2256_v26, %v2258_v36  ;;  %v8772_v40 = vmul.u32.u64.low %v8740_v63, %v2255_v39  ;;  %v8773_v12 = vmul.u32.u64.high %v8740_v63, %v2255_v39, %v8772_v40  ;;  %v5826_v4 = vadd.s32 4294967169, %v2424_v7 }
 0x2b7   :  { %v1668_v21 = vand.u32 2147483647, %v1667_v46  ;;  %v2181_v29 = vshll.u32 %v8645_v50, %v2179_v17  ;;  %v8778_v10 = vmul.u32.u64.low %v8740_v63, %v2259_v47  ;;  %v8779_v52 = vmul.u32.u64.high %v8740_v63, %v2259_v47, %v8778_v10 }
 0x2b8   :  { %vm5785_vm6 = vcmp.lt.s32.totalorder %v5784_v45, 0  ;;  %v2228_v1 = vshrl.u32 %v12373_v55, %v2227_v25  ;;  %v2430_v57 = vadd.s32 1, %v5826_v4  ;;  %v8784_v56 = vadd.f32 %v8245_v48, %v12446_v34 }
 0x2b9   :  { %v8786_v8 = vor.u32 %v2182_v38, %v2181_v29  ;;  %v8788_v39 = vsub.s32 %v2376_v5, %v2379_v30  ;;  %v2249_v7 = vsel %vm2247_vm9, %v2237_v58, 2102212464  ;;  %v12220_v50 = vand.u32 2147483647, %v8722_v32 }
 0x2ba   :  { %12490 = vst [vmem:[#allocation97_spill] sm:$0xff] %v8784_v56  ;;  %v12491_v17 = vxor.u32 2147483648, %v8637_v60  ;;  %v12493_v48 = vxor.u32 2147483648, %v8655_v2  ;;  %v8807_v5 = vor.u32 4788187, %v2186_v19  ;;  %vm2431_vm0 = vcmp.gt.s32.totalorder %v2430_v57, 0 }
 0x2bb   :  { %v8810_v26 = vmul.f32 %v1670_v53, %v1668_v21  ;;  %v8812_v28 = vsel %vm5785_vm6, 0, %v5784_v45  ;;  %v2432_v38 = vsel %vm2431_vm0, %v2430_v57, 0  ;;  %v2248_v30 = vsel %vm2244_vm10, %v2228_v1, %v2231_v23  ;;  %v8828_v21 = vpop.f32.mrb[17].mxu0 }
 0x2bc   :  { %v8798_v25 = vsel %vm12252_vm4, %v12491_v17, %v8637_v60  ;;  %v8805_v46 = vsel %vm12276_vm11, %v12493_v48, %v8655_v2  ;;  %v1332_v60 = vadd.s32 %v8629_v31, %v8640_v62  ;;  %v2250_v2 = vsel %vm2246_vm1, %v2234_v6, %v2249_v7 }
 0x2bd   :  { %12492 = vst [vmem:[#allocation98_spill] sm:$0xff] %v8798_v25  ;;  %12494 = vst [vmem:[#allocation99_spill] sm:$0xff] %v8805_v46  ;;  %v2434_v36 = vand.u32 31, %v2432_v38  ;;  %v2190_v19 = vcvt.s32.f32 %v8786_v8  ;;  %v2382_v47 = vsub.s32 0, %v8788_v39  ;;  %v2427_v53 = vand.u32 8388607, %v12220_v50 }
 0x2be   :  { %v1903_v45 = vand.u32 2139095040, %v8784_v56  ;;  %v2188_v4 = vand.u32 2147483647, %v8807_v5  ;;  %v1348_v31 = vsub.s32 32, %v8812_v28  ;;  %v2270_v62 = vadd.s32 1, %v8773_v12 }
 0x2bf   :  { %v2435_v23 = vsub.s32 32, %v2434_v36  ;;  %v2251_v6 = vsel %vm2245_vm7, %v2248_v30, %v2250_v2  ;;  %vm2269_vm9 = vc.u32 %v8779_v52, %v8772_v40  ;;  %v2437_v29 = vshll.u32 %v12373_v55, %v2434_v36 }
 0x2c0   :  { %v2440_v10 = vshll.u32 %v12381_v49, %v2434_v36  ;;  %v2433_v1 = vshrl.u32 %v2432_v38, 5  ;;  %v2443_v7 = vshll.u32 %v12365_v0, %v2434_v36  ;;  %v5823_v17 = vmin.u32 %v2382_v47, %v8788_v39 }
 0x2c1   :  { %v2438_v57 = vshrl.u32 %v12381_v49, %v2435_v23  ;;  %v2441_v8 = vshrl.u32 %v12365_v0, %v2435_v23  ;;  %v2428_v48 = vor.u32 8388608, %v2427_v53  ;;  %v2444_v3 = vshrl.u32 %v12366_v11, %v2435_v23 }
 0x2c2   :  { %v1904_v5 = vshrl.u32 %v1903_v45, 23  ;;  %v2267_v30 = vmul.u32 %v8740_v63, %v2251_v6  ;;  %v2271_v2 = vsel %vm2269_vm9, %v2270_v62, %v8773_v12  ;;  %v2446_v50 = vshll.u32 %v12366_v11, %v2434_v36 }
 0x2c3   :  { %v2447_v38 = vshrl.u32 %v12367_v43, %v2435_v23  ;;  %v2436_v58 = vshrl.u32 %v12373_v55, %v2435_v23  ;;  %v2439_v16 = vor.u32 %v2438_v57, %v2437_v29  ;;  %v2442_v25 = vor.u32 %v2441_v8, %v2440_v10 }
 0x2c4   :  { %v2445_v44 = vor.u32 %v2444_v3, %v2443_v7  ;;  %v2449_v47 = vshll.u32 %v12367_v43, %v2434_v36  ;;  %v2450_v53 = vshrl.u32 %v12369_v27, %v2435_v23  ;;  %vm2452_vm0 = vcmp.lt.s32.totalorder %v2433_v1, 1  ;;  %v12495_v3 = vld [vmem:[#allocation81_spill] sm:$0xff] }
 0x2c5   :  { %v2448_v46 = vor.u32 %v2447_v38, %v2446_v50  ;;  %vm12230_vm6 = vcmp.lt.s32.totalorder %v8227_v59, 0  ;;  %v1352_v63 = vsub.s32 4294967266, %v8812_v28  ;;  %v2384_v12 = vclz %v5823_v17 }
 0x2c6   :  { %v2468_v45 = vshll.u32 %v2428_v48, 8  ;;  %v5806_v62 = vadd.s32 4294967169, %v1904_v5  ;;  %v8850_v6 = vadd.s32 %v2271_v2, %v2267_v30  ;;  %v2451_v14 = vor.u32 %v2450_v53, %v2449_v47 }
 0x2c7   :  { %vm2454_vm10 = vcmp.lt.s32.totalorder %v2433_v1, 3  ;;  %vm2455_vm1 = vcmp.lt.s32.totalorder %v2433_v1, 4  ;;  %vm2453_vm7 = vcmp.lt.s32.totalorder %v2433_v1, 2  ;;  %v2456_v50 = vsel %vm2452_vm0, %v2436_v58, %v2439_v16 }
 0x2c8   :  { %v2457_v29 = vsel %vm2455_vm1, %v2445_v44, 2102212464  ;;  %v2460_v36 = vsel %vm2452_vm0, %v2439_v16, %v2442_v25  ;;  %v2461_v10 = vsel %vm2455_vm1, %v2448_v46, 920167782  ;;  %v2464_v57 = vsel %vm2452_vm0, %v2442_v25, %v2445_v44 }
 0x2c9   :  { %v2458_v23 = vsel %vm2454_vm10, %v2442_v25, %v2457_v29  ;;  %v2465_v8 = vsel %vm2455_vm1, %v2451_v14, 1326507024  ;;  %v8856_v7 = vmul.f32 %v2190_v19, %v2188_v4  ;;  %v1353_v17 = vadd.s32 127, %v1352_v63 }
 0x2ca   :  { %v2462_v48 = vsel %vm2454_vm10, %v2445_v44, %v2461_v10  ;;  %v8861_v5 = vadd.f32 %v12495_v3, %v6585_v41  ;;  %v1350_v30 = vshrl.u32 %v1332_v60, %v1348_v31  ;;  %v2466_v16 = vsel %vm2454_vm10, %v2448_v46, %v2465_v8 }
 0x2cb   :  { %v2463_v58 = vsel %vm2453_vm7, %v2460_v36, %v2462_v48  ;;  %v1910_v2 = vadd.s32 1, %v5806_v62  ;;  %v5824_v38 = vadd.s32 4294967294, %v2384_v12  ;;  %v2273_v47 = vadd.s32 536870912, %v8850_v6 }
 0x2cc   :  { %12496 = vst [vmem:[#allocation81_spill] sm:$0xff] %v8861_v5  ;;  %v2459_v14 = vsel %vm2453_vm7, %v2456_v50, %v2458_v23  ;;  %v2467_v25 = vsel %vm2453_vm7, %v2464_v57, %v2466_v16  ;;  %v8871_v44 = vmul.u32.u64.low %v2468_v45, %v2463_v58  ;;  %v8872_v53 = vmul.u32.u64.high %v2468_v45, %v2463_v58, %v8871_v44 }
 0x2cd   :  { %v8868_v19 = vmul.u32.u64.low %v2468_v45, %v2467_v25  ;;  %v8869_v4 = vmul.u32.u64.high %v2468_v45, %v2467_v25, %v8868_v19  ;;  %v1354_v60 = vshll.u32 %v1353_v17, 23  ;;  %v12227_v31 = vand.u32 2147483647, %v8784_v56 }
 0x2ce   :  { %vm1911_vm9 = vcmp.gt.s32.totalorder %v1910_v2, 0  ;;  %v2631_v46 = vand.u32 2139095040, %v8861_v5  ;;  %v12497_v63 = vxor.u32 2147483648, %v8713_v61  ;;  %v1349_v62 = vshll.u32 %v8695_v9, %v8812_v28 }
 0x2cf   :  { %v1912_v50 = vsel %vm1911_vm9, %v1910_v2, 0  ;;  %vm5825_vm0 = vcmp.lt.s32.totalorder %v5824_v38, 0  ;;  %v8887_v29 = vshrl.u32 %v2273_v47, 30  ;;  %v2475_v36 = vmul.u32 %v2468_v45, %v2459_v14 }
 0x2d0   :  { %v8882_v1 = vsel %vm12230_vm6, %v12497_v63, %v8713_v61  ;;  %v1914_v23 = vand.u32 31, %v1912_v50  ;;  %v1351_v57 = vor.u32 %v1350_v30, %v1349_v62  ;;  %vm2477_vm10 = vc.u32 %v8869_v4, %v8871_v44 }
 0x2d1   :  { %12498 = vst [vmem:[#allocation100_spill] sm:$0xff] %v8882_v1  ;;  %12499 = vst [vmem:[#allocation101_spill] sm:$0xff] %v8887_v29  ;;  %v2478_v61 = vadd.s32 1, %v8872_v53  ;;  %v1355_v8 = vor.u32 4788187, %v1354_v60  ;;  %v2632_v9 = vshrl.u32 %v2631_v46, 23 }
 0x2d2   :  { %v1907_v17 = vand.u32 8388607, %v12227_v31  ;;  %v1915_v48 = vsub.s32 32, %v1914_v23  ;;  %v8895_v28 = vsel %vm5825_vm0, 0, %v5824_v38  ;;  %v1917_v45 = vshll.u32 %v12373_v55, %v1914_v23  ;;  %v8906_v60 = vpop.f32.mrb[17].mxu1 }
 0x2d3   :  { %v2479_v3 = vsel %vm2477_vm10, %v2478_v61, %v8872_v53  ;;  %v1920_v58 = vshll.u32 %v12381_v49, %v1914_v23  ;;  %v2275_v30 = vshll.u32 %v8887_v29, 30  ;;  %v1913_v2 = vshrl.u32 %v1912_v50, 5 }
 0x2d4   :  { %v2480_v16 = vadd.s32 %v2479_v3, %v2475_v36  ;;  %v1923_v47 = vshll.u32 %v12365_v0, %v1914_v23  ;;  %v1918_v14 = vshrl.u32 %v12381_v49, %v1915_v48  ;;  %v1921_v25 = vshrl.u32 %v12365_v0, %v1915_v48 }
 0x2d5   :  { %v1924_v19 = vshrl.u32 %v12366_v11, %v1915_v48  ;;  %v1926_v38 = vshll.u32 %v12366_v11, %v1914_v23  ;;  %v1356_v53 = vand.u32 2147483647, %v1355_v8  ;;  %v1908_v63 = vor.u32 8388608, %v1907_v17 }
 0x2d6   :  { %v2481_v46 = vadd.s32 536870912, %v2480_v16  ;;  %v1927_v62 = vshrl.u32 %v12367_v43, %v1915_v48  ;;  %v2388_v36 = vsub.s32 32, %v8895_v28  ;;  %v1919_v50 = vor.u32 %v1918_v14, %v1917_v45 }
 0x2d7   :  { %v1922_v61 = vor.u32 %v1921_v25, %v1920_v58  ;;  %v1929_v3 = vshll.u32 %v12367_v43, %v1914_v23  ;;  %vm12238_vm1 = vcmp.lt.s32.totalorder %v8295_v24, 0  ;;  %v8913_v31 = vsub.s32 %v8850_v6, %v2275_v30 }
 0x2d8   :  { %v1916_v10 = vshrl.u32 %v12373_v55, %v1915_v48  ;;  %v1925_v12 = vor.u32 %v1924_v19, %v1923_v47  ;;  %v1928_v29 = vor.u32 %v1927_v62, %v1926_v38  ;;  %v1930_v8 = vshrl.u32 %v12369_v27, %v1915_v48 }
 0x2d9   :  { %vm1932_vm7 = vcmp.lt.s32.totalorder %v1913_v2, 1  ;;  %vm1934_vm9 = vcmp.lt.s32.totalorder %v1913_v2, 3  ;;  %v5834_v17 = vadd.s32 4294967169, %v2632_v9  ;;  %vm12239_vm0 = vcmp.lt.s32.totalorder %v8419_v51, 0 }
 0x2da   :  { %v8918_v45 = vshrl.u32 %v2481_v46, 30  ;;  %vm1933_vm10 = vcmp.lt.s32.totalorder %v1913_v2, 2  ;;  %vm1935_vm6 = vcmp.lt.s32.totalorder %v1913_v2, 4  ;;  %v1948_v23 = vshll.u32 %v1908_v63, 8 }
 0x2db   :  { %v1931_v58 = vor.u32 %v1930_v8, %v1929_v3  ;;  %v1937_v14 = vsel %vm1935_vm6, %v1925_v12, 2102212464  ;;  %v1940_v6 = vsel %vm1932_vm7, %v1919_v50, %v1922_v61  ;;  %v1941_v30 = vsel %vm1935_vm6, %v1928_v29, 920167782 }
 0x2dc   :  { %12500 = vst [vmem:[#allocation102_spill] sm:$0xff] %v8918_v45  ;;  %v2278_v47 = vsub.s32 0, %v8913_v31  ;;  %v1936_v25 = vsel %vm1932_vm7, %v1916_v10, %v1919_v50  ;;  %v1938_v48 = vsel %vm1934_vm9, %v1922_v61, %v1937_v14  ;;  %v1942_v9 = vsel %vm1934_vm9, %v1925_v12, %v1941_v30 }
 0x2dd   :  { %v1943_v19 = vsel %vm1933_vm10, %v1940_v6, %v1942_v9  ;;  %v1944_v38 = vsel %vm1932_vm7, %v1922_v61, %v1925_v12  ;;  %v1945_v46 = vsel %vm1935_vm6, %v1931_v58, 1326507024  ;;  %v2638_v62 = vadd.s32 1, %v5834_v17 }
 0x2de   :  { %v1358_v63 = vcvt.s32.f32 %v1351_v57  ;;  %v2372_v3 = vadd.s32 %v8702_v15, %v8700_v22  ;;  %v2483_v8 = vshll.u32 %v8918_v45, 30  ;;  %v1946_v1 = vsel %vm1934_vm9, %v1928_v29, %v1945_v46 }
 0x2df   :  { %v1939_v10 = vsel %vm1933_vm10, %v1936_v25, %v1938_v48  ;;  %v1947_v50 = vsel %vm1933_vm10, %v1944_v38, %v1946_v1  ;;  %v8933_v14 = vmul.u32.u64.low %v1948_v23, %v1943_v19  ;;  %v8934_v30 = vmul.u32.u64.high %v1948_v23, %v1943_v19, %v8933_v14 }
 0x2e0   :  { %v8937_v6 = vmul.f32 %v1358_v63, %v1356_v53  ;;  %v2392_v12 = vsub.s32 4294967266, %v8895_v28  ;;  %v8940_v57 = vmul.u32.u64.low %v1948_v23, %v1947_v50  ;;  %v8941_v61 = vmul.u32.u64.high %v1948_v23, %v1947_v50, %v8940_v57 }
 0x2e1   :  { %v12501_v22 = vxor.u32 2147483648, %v8810_v26  ;;  %v2390_v29 = vshrl.u32 %v2372_v3, %v2388_v36  ;;  %v5819_v1 = vmin.u32 %v2278_v47, %v8913_v31  ;;  %vm2639_vm6 = vcmp.gt.s32.totalorder %v2638_v62, 0 }
 0x2e2   :  { %v8951_v2 = vsub.s32 %v2480_v16, %v2483_v8  ;;  %v1955_v53 = vmul.u32 %v1948_v23, %v1939_v10  ;;  %v12231_v17 = vand.u32 2147483647, %v8861_v5  ;;  %v2640_v58 = vsel %vm2639_vm6, %v2638_v62, 0 }
 0x2e3   :  { %v8948_v15 = vsel %vm12238_vm1, %v12501_v22, %v8810_v26  ;;  %v12503_v25 = vxor.u32 2147483648, %v8856_v7  ;;  %v2389_v26 = vshll.u32 %v8788_v39, %v8895_v28  ;;  %v1958_v36 = vadd.s32 1, %v8934_v30 }
 0x2e4   :  { %12502 = vst [vmem:[#allocation103_spill] sm:$0xff] %v8948_v15  ;;  %v2642_v47 = vand.u32 31, %v2640_v58  ;;  %v2393_v9 = vadd.s32 127, %v2392_v12  ;;  %vm1957_vm7 = vc.u32 %v8941_v61, %v8933_v14  ;;  %v8969_v23 = vadd.f32 %v8421_v35, %v12446_v34 }
 0x2e5   :  { %v8959_v48 = vsel %vm12239_vm0, %v12503_v25, %v8856_v7  ;;  %v8971_v19 = vor.u32 %v2390_v29, %v2389_v26  ;;  %v2280_v7 = vclz %v5819_v1  ;;  %v1959_v38 = vsel %vm1957_vm7, %v1958_v36, %v8934_v30 }
 0x2e6   :  { %12504 = vst [vmem:[#allocation104_spill] sm:$0xff] %v8959_v48  ;;  %12505 = vst [vmem:[#allocation105_spill] sm:$0xff] %v8969_v23  ;;  %v2643_v46 = vsub.s32 32, %v2642_v47  ;;  %v2486_v39 = vsub.s32 0, %v8951_v2  ;;  %v1960_v28 = vadd.s32 %v1959_v38, %v1955_v53  ;;  %v2635_v62 = vand.u32 8388607, %v12231_v17 }
 0x2e7   :  { %v2645_v63 = vshll.u32 %v12373_v55, %v2642_v47  ;;  %v2648_v8 = vshll.u32 %v12381_v49, %v2642_v47  ;;  %v2654_v10 = vshll.u32 %v12366_v11, %v2642_v47  ;;  %v2641_v12 = vshrl.u32 %v2640_v58, 5  ;;  %v8990_v17 = vpop.f32.mrb[18].mxu0 }
 0x2e8   :  { %v2646_v3 = vshrl.u32 %v12381_v49, %v2643_v46  ;;  %v2649_v35 = vshrl.u32 %v12365_v0, %v2643_v46  ;;  %v1961_v50 = vadd.s32 536870912, %v1960_v28  ;;  %v2651_v30 = vshll.u32 %v12365_v0, %v2642_v47 }
 0x2e9   :  { %v2839_v57 = vand.u32 2139095040, %v8969_v23  ;;  %v2394_v22 = vshll.u32 %v2393_v9, 23  ;;  %v5820_v29 = vadd.s32 4294967294, %v2280_v7  ;;  %v2652_v1 = vshrl.u32 %v12366_v11, %v2643_v46 }
 0x2ea   :  { %v2655_v53 = vshrl.u32 %v12367_v43, %v2643_v46  ;;  %v8986_v25 = vshrl.u32 %v1961_v50, 30  ;;  %v2636_v26 = vor.u32 8388608, %v2635_v62  ;;  %v2644_v36 = vshrl.u32 %v12373_v55, %v2643_v46 }
 0x2eb   :  { %v2657_v38 = vshll.u32 %v12367_v43, %v2642_v47  ;;  %v2647_v58 = vor.u32 %v2646_v3, %v2645_v63  ;;  %v2650_v16 = vor.u32 %v2649_v35, %v2648_v8  ;;  %v2658_v59 = vshrl.u32 %v12369_v27, %v2643_v46 }
 0x2ec   :  { %12506 = vst [vmem:[#allocation106_spill] sm:$0xff] %v8986_v25  ;;  %v2656_v45 = vor.u32 %v2655_v53, %v2654_v10  ;;  %v5827_v9 = vmin.u32 %v2486_v39, %v8951_v2  ;;  %v2653_v7 = vor.u32 %v2652_v1, %v2651_v30  ;;  %vm2660_vm9 = vcmp.lt.s32.totalorder %v2641_v12, 1 }
 0x2ed   :  { %v2840_v15 = vshrl.u32 %v2839_v57, 23  ;;  %v1963_v50 = vshll.u32 %v8986_v25, 30  ;;  %v2659_v24 = vor.u32 %v2658_v59, %v2657_v38  ;;  %vm2662_vm10 = vcmp.lt.s32.totalorder %v2641_v12, 3 }
 0x2ee   :  { %vm2663_vm6 = vcmp.lt.s32.totalorder %v2641_v12, 4  ;;  %vm12257_vm7 = vcmp.lt.s32.totalorder %v8508_v54, 0  ;;  %vm5821_vm1 = vcmp.lt.s32.totalorder %v5820_v29, 0  ;;  %vm2661_vm0 = vcmp.lt.s32.totalorder %v2641_v12, 2 }
 0x2ef   :  { %v2665_v47 = vsel %vm2663_vm6, %v2653_v7, 2102212464  ;;  %v2676_v62 = vshll.u32 %v2636_v26, 8  ;;  %v2664_v63 = vsel %vm2660_vm9, %v2644_v36, %v2647_v58  ;;  %v2668_v39 = vsel %vm2660_vm9, %v2647_v58, %v2650_v16 }
 0x2f0   :  { %v2666_v46 = vsel %vm2662_vm10, %v2650_v16, %v2665_v47  ;;  %v2669_v3 = vsel %vm2663_vm6, %v2656_v45, 920167782  ;;  %v2395_v8 = vor.u32 4788187, %v2394_v22  ;;  %v2488_v35 = vclz %v5827_v9 }
 0x2f1   :  { %v2670_v59 = vsel %vm2662_vm10, %v2653_v7, %v2669_v3  ;;  %v2672_v10 = vsel %vm2660_vm9, %v2650_v16, %v2653_v7  ;;  %v9003_v30 = vsub.s32 %v1960_v28, %v1963_v50  ;;  %v2673_v1 = vsel %vm2663_vm6, %v2659_v24, 1326507024 }
 0x2f2   :  { %v2671_v57 = vsel %vm2661_vm0, %v2668_v39, %v2670_v59  ;;  %v5842_v53 = vadd.s32 4294967169, %v2840_v15  ;;  %v9008_v26 = vsel %vm5821_vm1, 0, %v5820_v29  ;;  %v2667_v36 = vsel %vm2661_vm0, %v2664_v63, %v2666_v46 }
 0x2f3   :  { %v2674_v38 = vsel %vm2662_vm10, %v2656_v45, %v2673_v1  ;;  %v12240_v22 = vand.u32 2147483647, %v8969_v23  ;;  %v9014_v9 = vmul.u32.u64.low %v2676_v62, %v2671_v57  ;;  %v9015_v16 = vmul.u32.u64.high %v2676_v62, %v2671_v57, %v9014_v9 }
 0x2f4   :  { %v2675_v58 = vsel %vm2661_vm0, %v2672_v10, %v2674_v38  ;;  %v2846_v28 = vadd.s32 1, %v5842_v53  ;;  %v2396_v7 = vand.u32 2147483647, %v2395_v8  ;;  %v2398_v24 = vcvt.s32.f32 %v8971_v19 }
 0x2f5   :  { %v9019_v15 = vmul.u32.u64.low %v2676_v62, %v2675_v58  ;;  %v9020_v50 = vmul.u32.u64.high %v2676_v62, %v2675_v58, %v9019_v15  ;;  %v2284_v29 = vsub.s32 32, %v9008_v26  ;;  %v5828_v47 = vadd.s32 4294967294, %v2488_v35 }
 0x2f6   :  { %v1966_v45 = vsub.s32 0, %v9003_v30  ;;  %vm2847_vm1 = vcmp.gt.s32.totalorder %v2846_v28, 0  ;;  %v2288_v12 = vsub.s32 4294967266, %v9008_v26  ;;  %v2683_v63 = vmul.u32 %v2676_v62, %v2667_v36 }
 0x2f7   :  { %v2843_v46 = vand.u32 8388607, %v12240_v22  ;;  %v2848_v39 = vsel %vm2847_vm1, %v2846_v28, 0  ;;  %v12507_v3 = vxor.u32 2147483648, %v8937_v6  ;;  %v2268_v8 = vadd.s32 %v8772_v40, %v8779_v52 }
 0x2f8   :  { %v2686_v35 = vadd.s32 1, %v9015_v16  ;;  %v2850_v59 = vand.u32 31, %v2848_v39  ;;  %v9037_v10 = vmul.f32 %v2398_v24, %v2396_v7  ;;  %v2285_v62 = vshll.u32 %v8913_v31, %v9008_v26 }
 0x2f9   :  { %v9032_v19 = vsel %vm12257_vm7, %v12507_v3, %v8937_v6  ;;  %vm2685_vm0 = vc.u32 %v9020_v50, %v9014_v9  ;;  %v9045_v57 = vadd.f32 %v8541_v18, %v6588_v42  ;;  %vm5829_vm9 = vcmp.lt.s32.totalorder %v5828_v47, 0 }
 0x2fa   :  { %12508 = vst [vmem:[#allocation107_spill] sm:$0xff] %v9032_v19  ;;  %v5807_v6 = vmin.u32 %v1966_v45, %v9003_v30  ;;  %v2687_v40 = vsel %vm2685_vm0, %v2686_v35, %v9015_v16  ;;  %v2851_v52 = vsub.s32 32, %v2850_v59  ;;  %v2286_v1 = vshrl.u32 %v2268_v8, %v2284_v29 }
 0x2fb   :  { %12509 = vst [vmem:[#allocation108_spill] sm:$0xff] %v9045_v57  ;;  %v2289_v53 = vadd.s32 127, %v2288_v12  ;;  %v2688_v36 = vadd.s32 %v2687_v40, %v2683_v63  ;;  %v2844_v38 = vor.u32 8388608, %v2843_v46  ;;  %v2853_v58 = vshll.u32 %v12373_v55, %v2850_v59  ;;  %v9059_v63 = vpop.f32.mrb[18].mxu1 }
 0x2fc   :  { %v2854_v31 = vshrl.u32 %v12381_v49, %v2851_v52  ;;  %v2856_v26 = vshll.u32 %v12381_v49, %v2850_v59  ;;  %v2857_v28 = vshrl.u32 %v12365_v0, %v2851_v52  ;;  %v9053_v18 = vsel %vm5829_vm9, 0, %v5828_v47 }
 0x2fd   :  { %v2689_v7 = vadd.s32 536870912, %v2688_v36  ;;  %v2849_v24 = vshrl.u32 %v2848_v39, 5  ;;  %v2859_v15 = vshll.u32 %v12365_v0, %v2850_v59  ;;  %v1968_v16 = vclz %v5807_v6 }
 0x2fe   :  { %v2860_v29 = vshrl.u32 %v12366_v11, %v2851_v52  ;;  %v2862_v45 = vshll.u32 %v12366_v11, %v2850_v59  ;;  %v2735_v12 = vand.u32 2139095040, %v9045_v57  ;;  %v2852_v3 = vshrl.u32 %v12373_v55, %v2851_v52 }
 0x2ff   :  { %v9061_v46 = vshrl.u32 %v2689_v7, 30  ;;  %v2863_v47 = vshrl.u32 %v12367_v43, %v2851_v52  ;;  %v9065_v8 = vshll.u32 %v2844_v38, 8  ;;  %v2855_v39 = vor.u32 %v2854_v31, %v2853_v58 }
 0x300   :  { %v2858_v35 = vor.u32 %v2857_v28, %v2856_v26  ;;  %v2865_v6 = vshll.u32 %v12367_v43, %v2850_v59  ;;  %v2866_v40 = vshrl.u32 %v12369_v27, %v2851_v52  ;;  %v2861_v25 = vor.u32 %v2860_v29, %v2859_v15 }
 0x301   :  { %12510 = vst [vmem:[#allocation109_spill] sm:$0xff] %v9061_v46  ;;  %v2691_v22 = vshll.u32 %v9061_v46, 30  ;;  %v2864_v48 = vor.u32 %v2863_v47, %v2862_v45  ;;  %vm2868_vm10 = vcmp.lt.s32.totalorder %v2849_v24, 1  ;;  %vm2870_vm6 = vcmp.lt.s32.totalorder %v2849_v24, 3 }
 0x302   :  { %v2867_v51 = vor.u32 %v2866_v40, %v2865_v6  ;;  %vm2871_vm1 = vcmp.lt.s32.totalorder %v2849_v24, 4  ;;  %v2736_v7 = vshrl.u32 %v2735_v12, 23  ;;  %v5808_v19 = vadd.s32 4294967294, %v1968_v16 }
 0x303   :  { %v9070_v54 = vsub.s32 %v2688_v36, %v2691_v22  ;;  %vm2869_vm0 = vcmp.lt.s32.totalorder %v2849_v24, 2  ;;  %v2873_v38 = vsel %vm2871_vm1, %v2861_v25, 2102212464  ;;  %v2872_v58 = vsel %vm2868_vm10, %v2852_v3, %v2855_v39 }
 0x304   :  { %v2874_v59 = vsel %vm2870_vm6, %v2858_v35, %v2873_v38  ;;  %v2876_v52 = vsel %vm2868_vm10, %v2855_v39, %v2858_v35  ;;  %v2877_v31 = vsel %vm2871_vm1, %v2864_v48, 920167782  ;;  %v9077_v26 = vor.u32 %v2286_v1, %v2285_v62 }
 0x305   :  { %v2290_v28 = vshll.u32 %v2289_v53, 23  ;;  %v2878_v15 = vsel %vm2870_vm6, %v2861_v25, %v2877_v31  ;;  %v2880_v16 = vsel %vm2868_vm10, %v2858_v35, %v2861_v25  ;;  %v2496_v22 = vsub.s32 4294967266, %v9053_v18 }
 0x306   :  { %v2879_v36 = vsel %vm2869_vm0, %v2876_v52, %v2878_v15  ;;  %v2881_v29 = vsel %vm2871_vm1, %v2867_v51, 1326507024  ;;  %v5838_v45 = vadd.s32 4294967169, %v2736_v7  ;;  %vm5809_vm9 = vcmp.lt.s32.totalorder %v5808_v19, 0 }
 0x307   :  { %v2694_v12 = vsub.s32 0, %v9070_v54  ;;  %v2875_v3 = vsel %vm2869_vm0, %v2872_v58, %v2874_v59  ;;  %v2882_v62 = vsel %vm2870_vm6, %v2864_v48, %v2881_v29  ;;  %v9093_v39 = vor.u32 4788187, %v2290_v28 }
 0x308   :  { %v2883_v1 = vsel %vm2869_vm0, %v2880_v16, %v2882_v62  ;;  %v9089_v53 = vmul.u32.u64.low %v9065_v8, %v2879_v36  ;;  %v9090_v47 = vmul.u32.u64.high %v9065_v8, %v2879_v36, %v9089_v53  ;;  %v2742_v25 = vadd.s32 1, %v5838_v45 }
 0x309   :  { %v9096_v51 = vmul.u32.u64.low %v9065_v8, %v2883_v1  ;;  %v9097_v35 = vmul.u32.u64.high %v9065_v8, %v2883_v1, %v9096_v51  ;;  %v12247_v6 = vand.u32 2147483647, %v9045_v57  ;;  %v2492_v48 = vsub.s32 32, %v9053_v18 }
 0x30a   :  { %v2497_v24 = vadd.s32 127, %v2496_v22  ;;  %vm2743_vm10 = vcmp.gt.s32.totalorder %v2742_v25, 0  ;;  %v9102_v7 = vsel %vm5809_vm9, 0, %v5808_v19  ;;  %v5835_v38 = vmin.u32 %v2694_v12, %v9070_v54 }
 0x30b   :  { %v2891_v58 = vmul.u32 %v9065_v8, %v2875_v3  ;;  %v2744_v59 = vsel %vm2743_vm10, %v2742_v25, 0  ;;  %v2476_v31 = vadd.s32 %v8871_v44, %v8869_v4  ;;  %v2894_v28 = vadd.s32 1, %v9090_v47  ;;  %v9126_v8 = vpop.f32.mrb[19].mxu0 }
 0x30c   :  { %v2746_v15 = vand.u32 31, %v2744_v59  ;;  %v1956_v22 = vadd.s32 %v8933_v14, %v8941_v61  ;;  %vm2893_vm6 = vc.u32 %v9097_v35, %v9089_v53  ;;  %v2739_v19 = vand.u32 8388607, %v12247_v6  ;;  %12511 = vst [vmem:[#allocation110_spill] sm:$0xff] %v9126_v8 }
 0x30d   :  { %v1976_v36 = vsub.s32 4294967266, %v9102_v7  ;;  %v2895_v4 = vsel %vm2893_vm6, %v2894_v28, %v9090_v47  ;;  %v2494_v29 = vshrl.u32 %v2476_v31, %v2492_v48  ;;  %v2498_v45 = vshll.u32 %v2497_v24, 23 }
 0x30e   :  { %v2747_v44 = vsub.s32 32, %v2746_v15  ;;  %v2696_v12 = vclz %v5835_v38  ;;  %v2896_v3 = vadd.s32 %v2895_v4, %v2891_v58  ;;  %v2749_v14 = vshll.u32 %v12373_v55, %v2746_v15 }
 0x30f   :  { %v2752_v62 = vshll.u32 %v12381_v49, %v2746_v15  ;;  %v2740_v51 = vor.u32 8388608, %v2739_v19  ;;  %v2745_v6 = vshrl.u32 %v2744_v59, 5  ;;  %v2755_v40 = vshll.u32 %v12365_v0, %v2746_v15 }
 0x310   :  { %v2750_v61 = vshrl.u32 %v12381_v49, %v2747_v44  ;;  %v2753_v1 = vshrl.u32 %v12365_v0, %v2747_v44  ;;  %v2897_v25 = vadd.s32 536870912, %v2896_v3  ;;  %v1972_v47 = vsub.s32 32, %v9102_v7 }
 0x311   :  { %v1977_v48 = vadd.s32 127, %v1976_v36  ;;  %v2756_v24 = vshrl.u32 %v12366_v11, %v2747_v44  ;;  %v2758_v38 = vshll.u32 %v12366_v11, %v2746_v15  ;;  %v5836_v58 = vadd.s32 4294967294, %v2696_v12 }
 0x312   :  { %v9131_v31 = vshrl.u32 %v2897_v25, 30  ;;  %v2748_v28 = vshrl.u32 %v12373_v55, %v2747_v44  ;;  %v2759_v4 = vshrl.u32 %v12367_v43, %v2747_v44  ;;  %v2751_v19 = vor.u32 %v2750_v61, %v2749_v14 }
 0x313   :  { %v2754_v59 = vor.u32 %v2753_v1, %v2752_v62  ;;  %v2761_v52 = vshll.u32 %v12367_v43, %v2746_v15  ;;  %v2762_v16 = vshrl.u32 %v12369_v27, %v2747_v44  ;;  %v2757_v46 = vor.u32 %v2756_v24, %v2755_v40 }
 0x314   :  { %12512 = vst [vmem:[#allocation111_spill] sm:$0xff] %v9131_v31  ;;  %v2760_v57 = vor.u32 %v2759_v4, %v2758_v38  ;;  %vm2764_vm1 = vcmp.lt.s32.totalorder %v2745_v6, 1  ;;  %v2780_v36 = vshll.u32 %v2740_v51, 8  ;;  %vm2766_vm0 = vcmp.lt.s32.totalorder %v2745_v6, 3 }
 0x315   :  { %v2763_v8 = vor.u32 %v2762_v16, %v2761_v52  ;;  %vm2767_vm9 = vcmp.lt.s32.totalorder %v2745_v6, 4  ;;  %v9139_v12 = vadd.f32 %v8601_v37, %v12446_v34  ;;  %vm5837_vm10 = vcmp.lt.s32.totalorder %v5836_v58, 0 }
 0x316   :  { %v2899_v25 = vshll.u32 %v9131_v31, 30  ;;  %vm2765_vm6 = vcmp.lt.s32.totalorder %v2745_v6, 2  ;;  %v2769_v14 = vsel %vm2767_vm9, %v2757_v46, 2102212464  ;;  %v2768_v15 = vsel %vm2764_vm1, %v2748_v28, %v2751_v19 }
 0x317   :  { %v2770_v40 = vsel %vm2766_vm0, %v2754_v59, %v2769_v14  ;;  %v2772_v44 = vsel %vm2764_vm1, %v2751_v19, %v2754_v59  ;;  %v2773_v52 = vsel %vm2767_vm9, %v2760_v57, 920167782  ;;  %v2499_v16 = vor.u32 4788187, %v2498_v45 }
 0x318   :  { %v1974_v61 = vshrl.u32 %v1956_v22, %v1972_v47  ;;  %v2774_v62 = vsel %vm2766_vm0, %v2757_v46, %v2773_v52  ;;  %v2776_v37 = vsel %vm2764_vm1, %v2754_v59, %v2757_v46  ;;  %v1978_v1 = vshll.u32 %v1977_v48, 23 }
 0x319   :  { %v2775_v51 = vsel %vm2765_vm6, %v2772_v44, %v2774_v62  ;;  %v2777_v24 = vsel %vm2767_vm9, %v2763_v8, 1326507024  ;;  %v2527_v38 = vand.u32 2139095040, %v9139_v12  ;;  %vm12256_vm4 = vcmp.lt.s32.totalorder %v8590_v13, 0 }
 0x31a   :  { %v2699_v28 = vsel %vm5837_vm10, 0, %v5836_v58  ;;  %v9154_v4 = vsub.s32 %v2896_v3, %v2899_v25  ;;  %v2771_v45 = vsel %vm2765_vm6, %v2768_v15, %v2770_v40  ;;  %v2778_v22 = vsel %vm2766_vm0, %v2760_v57, %v2777_v24 }
 0x31b   :  { %v2779_v47 = vsel %vm2765_vm6, %v2776_v37, %v2778_v22  ;;  %v9159_v46 = vmul.u32.u64.low %v2780_v36, %v2775_v51  ;;  %v9160_v48 = vmul.u32.u64.high %v2780_v36, %v2775_v51, %v9159_v46  ;;  %v2528_v19 = vshrl.u32 %v2527_v38, 23 }
 0x31c   :  { %v12513_v8 = vand.u32 2147483647, %v9093_v39  ;;  %v12514_v59 = vcvt.s32.f32 %v9077_v26  ;;  %v9169_v58 = vmul.u32.u64.low %v2780_v36, %v2779_v47  ;;  %v9170_v3 = vmul.u32.u64.high %v2780_v36, %v2779_v47, %v9169_v58 }
 0x31d   :  { %v9174_v25 = vadd.f32 %v8683_v20, %v6585_v41  ;;  %v12516_v57 = vshll.u32 %v8951_v2, %v9053_v18  ;;  %v1973_v15 = vshll.u32 %v9003_v30, %v9102_v7  ;;  %v1979_v40 = vor.u32 4788187, %v1978_v1 }
 0x31e   :  { %v9167_v14 = vmul.f32 %v12514_v59, %v12513_v8  ;;  %v5830_v39 = vadd.s32 4294967169, %v2528_v19  ;;  %v2700_v44 = vsub.s32 32, %v2699_v28  ;;  %v2704_v26 = vsub.s32 4294967266, %v2699_v28 }
 0x31f   :  { %12515 = vst [vmem:[#allocation112_spill] sm:$0xff] %v9174_v25  ;;  %v2495_v6 = vor.u32 %v2494_v29, %v12516_v57  ;;  %v2902_v52 = vsub.s32 0, %v9154_v4  ;;  %v2787_v62 = vmul.u32 %v2780_v36, %v2771_v45  ;;  %v2500_v37 = vand.u32 2147483647, %v2499_v16 }
 0x320   :  { %v1975_v51 = vor.u32 %v1974_v61, %v1973_v15  ;;  %v2790_v24 = vadd.s32 1, %v9160_v48  ;;  %v2534_v20 = vadd.s32 1, %v5830_v39  ;;  %v2684_v38 = vadd.s32 %v9014_v9, %v9020_v50  ;;  %v9210_v15 = vpop.f32.mrb[19].mxu1 }
 0x321   :  { %vm2789_vm1 = vc.u32 %v9170_v3, %v9159_v46  ;;  %v12253_v2 = vand.u32 2147483647, %v9139_v12  ;;  %v2943_v30 = vand.u32 2139095040, %v9174_v25  ;;  %v2502_v18 = vcvt.s32.f32 %v2495_v6 }
 0x322   :  { %v1980_v7 = vand.u32 2147483647, %v1979_v40  ;;  %v2791_v29 = vsel %vm2789_vm1, %v2790_v24, %v9160_v48  ;;  %vm2535_vm0 = vcmp.gt.s32.totalorder %v2534_v20, 0  ;;  %v2702_v36 = vshrl.u32 %v2684_v38, %v2700_v44 }
 0x323   :  { %v2705_v16 = vadd.s32 127, %v2704_v26  ;;  %v5843_v61 = vmin.u32 %v2902_v52, %v9154_v4  ;;  %v2792_v1 = vadd.s32 %v2791_v29, %v2787_v62  ;;  %v12517_v9 = vxor.u32 2147483648, %v9037_v10 }
 0x324   :  { %v1982_v22 = vcvt.s32.f32 %v1975_v51  ;;  %v2536_v47 = vsel %vm2535_vm0, %v2534_v20, 0  ;;  %v9199_v19 = vmul.f32 %v2502_v18, %v2500_v37  ;;  %v2701_v48 = vshll.u32 %v9070_v54, %v2699_v28 }
 0x325   :  { %v9196_v50 = vsel %vm12256_vm4, %v12517_v9, %v9037_v10  ;;  %v2531_v8 = vand.u32 8388607, %v12253_v2  ;;  %v2944_v59 = vshrl.u32 %v2943_v30, 23  ;;  %v2793_v57 = vadd.s32 536870912, %v2792_v1 }
 0x326   :  { %12518 = vst [vmem:[#allocation113_spill] sm:$0xff] %v9196_v50  ;;  %v9204_v58 = vmul.f32 %v1982_v22, %v1980_v7  ;;  %v2538_v6 = vand.u32 31, %v2536_v47  ;;  %v9208_v10 = vadd.f32 %v8731_v33, %v12446_v34  ;;  %v9212_v40 = vor.u32 %v2702_v36, %v2701_v48 }
 0x327   :  { %v2706_v39 = vshll.u32 %v2705_v16, 23  ;;  %v2904_v44 = vclz %v5843_v61  ;;  %v2537_v26 = vshrl.u32 %v2536_v47, 5  ;;  %v2532_v37 = vor.u32 8388608, %v2531_v8  ;;  %v12521_v16 = vld [vmem:[#allocation93_spill] sm:$0xff] }
 0x328   :  { %12519 = vst [vmem:[#allocation114_spill] sm:$0xff] %v9208_v10  ;;  %v2539_v54 = vsub.s32 32, %v2538_v6  ;;  %v2541_v28 = vshll.u32 %v12373_v55, %v2538_v6  ;;  %v2544_v52 = vshll.u32 %v12381_v49, %v2538_v6  ;;  %v2547_v62 = vshll.u32 %v12365_v0, %v2538_v6 }
 0x329   :  { %v2550_v51 = vshll.u32 %v12366_v11, %v2538_v6  ;;  %v5846_v24 = vadd.s32 4294967169, %v2944_v59  ;;  %v9219_v20 = vshrl.u32 %v2793_v57, 30  ;;  %v2553_v36 = vshll.u32 %v12367_v43, %v2538_v6 }
 0x32a   :  { %v2542_v38 = vshrl.u32 %v12381_v49, %v2539_v54  ;;  %v2545_v30 = vshrl.u32 %v12365_v0, %v2539_v54  ;;  %v2548_v18 = vshrl.u32 %v12366_v11, %v2539_v54  ;;  %v2540_v7 = vshrl.u32 %v12373_v55, %v2539_v54 }
 0x32b   :  { %12520 = vst [vmem:[#allocation115_spill] sm:$0xff] %v9219_v20  ;;  %v2551_v29 = vshrl.u32 %v12367_v43, %v2539_v54  ;;  %vm2556_vm9 = vcmp.lt.s32.totalorder %v2537_v26, 1  ;;  %vm12263_vm10 = vcmp.lt.s32.totalorder %v12521_v16, 0  ;;  %v2554_v47 = vshrl.u32 %v12369_v27, %v2539_v54 }
 0x32c   :  { %v2543_v61 = vor.u32 %v2542_v38, %v2541_v28  ;;  %v2546_v9 = vor.u32 %v2545_v30, %v2544_v52  ;;  %v2549_v22 = vor.u32 %v2548_v18, %v2547_v62  ;;  %v5844_v48 = vadd.s32 4294967294, %v2904_v44 }
 0x32d   :  { %v2552_v8 = vor.u32 %v2551_v29, %v2550_v51  ;;  %v2572_v59 = vshll.u32 %v2532_v37, 8  ;;  %v2950_v57 = vadd.s32 1, %v5846_v24  ;;  %v2795_v2 = vshll.u32 %v9219_v20, 30 }
 0x32e   :  { %v2555_v45 = vor.u32 %v2554_v47, %v2553_v36  ;;  %vm2558_vm6 = vcmp.lt.s32.totalorder %v2537_v26, 3  ;;  %vm2559_vm1 = vcmp.lt.s32.totalorder %v2537_v26, 4  ;;  %vm2557_vm0 = vcmp.lt.s32.totalorder %v2537_v26, 2  ;;  %v9285_v26 = vpop.f32.mrb[20].mxu0 }
 0x32f   :  { %v2560_v6 = vsel %vm2556_vm9, %v2540_v7, %v2543_v61  ;;  %v2561_v33 = vsel %vm2559_vm1, %v2549_v22, 2102212464  ;;  %v2564_v31 = vsel %vm2556_vm9, %v2543_v61, %v2546_v9  ;;  %v2565_v52 = vsel %vm2559_vm1, %v2552_v8, 920167782  ;;  %12526 = vst [vmem:[#allocation118_spill] sm:$0xff] %v9285_v26 }
 0x330   :  { %v2562_v28 = vsel %vm2558_vm6, %v2546_v9, %v2561_v33  ;;  %v2568_v54 = vsel %vm2556_vm9, %v2546_v9, %v2549_v22  ;;  %v2569_v44 = vsel %vm2559_vm1, %v2555_v45, 1326507024  ;;  %v9234_v62 = vor.u32 4788187, %v2706_v39 }
 0x331   :  { %vm5845_vm4 = vcmp.lt.s32.totalorder %v5844_v48, 0  ;;  %v2566_v37 = vsel %vm2558_vm6, %v2549_v22, %v2565_v52  ;;  %v3463_v51 = vand.u32 2139095040, %v9208_v10  ;;  %v9238_v24 = vsub.s32 %v2792_v1, %v2795_v2 }
 0x332   :  { %v2567_v38 = vsel %vm2557_vm0, %v2564_v31, %v2566_v37  ;;  %v2570_v30 = vsel %vm2558_vm6, %v2552_v8, %v2569_v44  ;;  %vm2951_vm7 = vcmp.gt.s32.totalorder %v2950_v57, 0  ;;  %v2563_v33 = vsel %vm2557_vm0, %v2560_v6, %v2562_v28 }
 0x333   :  { %v2571_v18 = vsel %vm2557_vm0, %v2568_v54, %v2570_v30  ;;  %v9244_v7 = vmul.u32.u64.low %v2572_v59, %v2567_v38  ;;  %v9245_v45 = vmul.u32.u64.high %v2572_v59, %v2567_v38, %v9244_v7  ;;  %v12522_v36 = vand.u32 2147483647, %v9174_v25 }
 0x334   :  { %v9248_v39 = vmul.u32.u64.low %v2572_v59, %v2571_v18  ;;  %v9249_v29 = vmul.u32.u64.high %v2572_v59, %v2571_v18, %v9248_v39  ;;  %v2952_v1 = vsel %vm2951_vm7, %v2950_v57, 0  ;;  %v12523_v31 = vxor.u32 2147483648, %v9167_v14 }
 0x335   :  { %v2947_v2 = vand.u32 8388607, %v12522_v36  ;;  %v2954_v22 = vand.u32 31, %v2952_v1  ;;  %v9264_v8 = vsel %vm5845_vm4, 0, %v5844_v48  ;;  %v2579_v6 = vmul.u32 %v2572_v59, %v2563_v33 }
 0x336   :  { %v9258_v61 = vsel %vm12263_vm10, %v12523_v31, %v9167_v14  ;;  %v9268_v57 = vadd.f32 %v8828_v21, %v6588_v42  ;;  %v2798_v14 = vsub.s32 0, %v9238_v24  ;;  %v2582_v52 = vadd.s32 1, %v9245_v45 }
 0x337   :  { %12524 = vst [vmem:[#allocation116_spill] sm:$0xff] %v9258_v61  ;;  %v3464_v54 = vshrl.u32 %v3463_v51, 23  ;;  %vm2581_vm7 = vc.u32 %v9249_v29, %v9244_v7  ;;  %v2948_v44 = vor.u32 8388608, %v2947_v2  ;;  %v2955_v37 = vsub.s32 32, %v2954_v22 }
 0x338   :  { %12525 = vst [vmem:[#allocation117_spill] sm:$0xff] %v9268_v57  ;;  %v2912_v59 = vsub.s32 4294967266, %v9264_v8  ;;  %v2583_v38 = vsel %vm2581_vm7, %v2582_v52, %v9245_v45  ;;  %v2957_v21 = vshll.u32 %v12373_v55, %v2954_v22  ;;  %v2960_v30 = vshll.u32 %v12381_v49, %v2954_v22 }
 0x339   :  { %v2584_v33 = vadd.s32 %v2583_v38, %v2579_v6  ;;  %v2953_v18 = vshrl.u32 %v2952_v1, 5  ;;  %v2958_v39 = vshrl.u32 %v12381_v49, %v2955_v37  ;;  %v2961_v51 = vshrl.u32 %v12365_v0, %v2955_v37 }
 0x33a   :  { %v5839_v36 = vmin.u32 %v2798_v14, %v9238_v24  ;;  %v2963_v2 = vshll.u32 %v12365_v0, %v2954_v22  ;;  %v2964_v31 = vshrl.u32 %v12366_v11, %v2955_v37  ;;  %v5866_v9 = vadd.s32 4294967169, %v3464_v54 }
 0x33b   :  { %v2585_v45 = vadd.s32 536870912, %v2584_v33  ;;  %v2956_v52 = vshrl.u32 %v12373_v55, %v2955_v37  ;;  %v2966_v48 = vshll.u32 %v12366_v11, %v2954_v22  ;;  %v2988_v6 = vshll.u32 %v2948_v44, 8 }
 0x33c   :  { %v2959_v1 = vor.u32 %v2958_v39, %v2957_v21  ;;  %v2962_v38 = vor.u32 %v2961_v51, %v2960_v30  ;;  %v2965_v47 = vor.u32 %v2964_v31, %v2963_v2  ;;  %v2967_v28 = vshrl.u32 %v12367_v43, %v2955_v37 }
 0x33d   :  { %v9290_v20 = vshrl.u32 %v2585_v45, 30  ;;  %v2969_v14 = vshll.u32 %v12367_v43, %v2954_v22  ;;  %v2970_v61 = vshrl.u32 %v12369_v27, %v2955_v37  ;;  %vm2972_vm4 = vcmp.lt.s32.totalorder %v2953_v18, 1 }
 0x33e   :  { %v2800_v54 = vclz %v5839_v36  ;;  %v2968_v16 = vor.u32 %v2967_v28, %v2966_v48  ;;  %vm2974_vm9 = vcmp.lt.s32.totalorder %v2953_v18, 3  ;;  %v3470_v50 = vadd.s32 1, %v5866_v9 }
 0x33f   :  { %12527 = vst [vmem:[#allocation119_spill] sm:$0xff] %v9290_v20  ;;  %v2587_v13 = vshll.u32 %v9290_v20, 30  ;;  %v2971_v26 = vor.u32 %v2970_v61, %v2969_v14  ;;  %vm2973_vm6 = vcmp.lt.s32.totalorder %v2953_v18, 2  ;;  %vm2975_vm1 = vcmp.lt.s32.totalorder %v2953_v18, 4 }
 0x340   :  { %v2976_v44 = vsel %vm2972_vm4, %v2956_v52, %v2959_v1  ;;  %v2977_v21 = vsel %vm2975_vm1, %v2965_v47, 2102212464  ;;  %v2980_v30 = vsel %vm2972_vm4, %v2959_v1, %v2962_v38  ;;  %v2981_v39 = vsel %vm2975_vm1, %v2968_v16, 920167782 }
 0x341   :  { %v9297_v51 = vsub.s32 %v2584_v33, %v2587_v13  ;;  %v2978_v22 = vsel %vm2974_vm9, %v2962_v38, %v2977_v21  ;;  %v2982_v37 = vsel %vm2974_vm9, %v2965_v47, %v2981_v39  ;;  %v2984_v28 = vsel %vm2972_vm4, %v2962_v38, %v2965_v47 }
 0x342   :  { %v2908_v9 = vsub.s32 32, %v9264_v8  ;;  %v2913_v48 = vadd.s32 127, %v2912_v59  ;;  %v2983_v61 = vsel %vm2973_vm6, %v2980_v30, %v2982_v37  ;;  %v2985_v36 = vsel %vm2975_vm1, %v2971_v26, 1326507024 }
 0x343   :  { %v5840_v2 = vadd.s32 4294967294, %v2800_v54  ;;  %v2986_v31 = vsel %vm2974_vm9, %v2968_v16, %v2985_v36  ;;  %v9305_v45 = vmul.u32.u64.low %v2988_v6, %v2983_v61  ;;  %v9306_v52 = vmul.u32.u64.high %v2988_v6, %v2983_v61, %v9305_v45 }
 0x344   :  { %v2590_v13 = vsub.s32 0, %v9297_v51  ;;  %v2979_v33 = vsel %vm2973_vm6, %v2976_v44, %v2978_v22  ;;  %v2987_v1 = vsel %vm2973_vm6, %v2984_v28, %v2986_v31  ;;  %vm3471_vm0 = vcmp.gt.s32.totalorder %v3470_v50, 0 }
 0x345   :  { %v2892_v47 = vadd.s32 %v9089_v53, %v9097_v35  ;;  %v9314_v59 = vmul.u32.u64.low %v2988_v6, %v2987_v1  ;;  %v9315_v38 = vmul.u32.u64.high %v2988_v6, %v2987_v1, %v9314_v59  ;;  %v3472_v26 = vsel %vm3471_vm0, %v3470_v50, 0 }
 0x346   :  { %v12528_v16 = vand.u32 2147483647, %v9234_v62  ;;  %v12529_v14 = vcvt.s32.f32 %v9212_v40  ;;  %v2909_v21 = vshll.u32 %v9154_v4, %v9264_v8  ;;  %v3474_v44 = vand.u32 31, %v3472_v26 }
 0x347   :  { %v9327_v18 = vadd.f32 %v8906_v60, %v12446_v34  ;;  %v2910_v30 = vshrl.u32 %v2892_v47, %v2908_v9  ;;  %v2995_v53 = vmul.u32 %v2988_v6, %v2979_v33  ;;  %v2998_v35 = vadd.s32 1, %v9306_v52 }
 0x348   :  { %v9321_v54 = vmul.f32 %v12529_v14, %v12528_v16  ;;  %v12530_v50 = vand.u32 2147483647, %v9208_v10  ;;  %v2914_v62 = vshll.u32 %v2913_v48, 23  ;;  %vm5841_vm7 = vcmp.lt.s32.totalorder %v5840_v2, 0  ;;  %v9349_v14 = vpop.f32.mrb[20].mxu1 }
 0x349   :  { %v5831_v40 = vmin.u32 %v2590_v13, %v9297_v51  ;;  %v3475_v22 = vsub.s32 32, %v3474_v44  ;;  %vm2997_vm4 = vc.u32 %v9315_v38, %v9305_v45  ;;  %v3473_v4 = vshrl.u32 %v3472_v26, 5 }
 0x34a   :  { %v3467_v39 = vand.u32 8388607, %v12530_v50  ;;  %v3477_v8 = vshll.u32 %v12373_v55, %v3474_v44  ;;  %v3480_v60 = vshll.u32 %v12381_v49, %v3474_v44  ;;  %v2999_v6 = vsel %vm2997_vm4, %v2998_v35, %v9306_v52 }
 0x34b   :  { %v3478_v37 = vshrl.u32 %v12381_v49, %v3475_v22  ;;  %v3481_v28 = vshrl.u32 %v12365_v0, %v3475_v22  ;;  %v3486_v9 = vshll.u32 %v12366_v11, %v3474_v44  ;;  %v3000_v48 = vadd.s32 %v2999_v6, %v2995_v53 }
 0x34c   :  { %v3483_v61 = vshll.u32 %v12365_v0, %v3474_v44  ;;  %v3484_v36 = vshrl.u32 %v12366_v11, %v3475_v22  ;;  %v3487_v31 = vshrl.u32 %v12367_v43, %v3475_v22  ;;  %v2911_v13 = vor.u32 %v2910_v30, %v2909_v21 }
 0x34d   :  { %v9345_v33 = vsel %vm5841_vm7, 0, %v5840_v2  ;;  %v3468_v1 = vor.u32 8388608, %v3467_v39  ;;  %v3489_v52 = vshll.u32 %v12367_v43, %v3474_v44  ;;  %v2915_v47 = vor.u32 4788187, %v2914_v62 }
 0x34e   :  { %v2592_v59 = vclz %v5831_v40  ;;  %v3001_v26 = vadd.s32 536870912, %v3000_v48  ;;  %v3476_v16 = vshrl.u32 %v12373_v55, %v3475_v22  ;;  %v3479_v53 = vor.u32 %v3478_v37, %v3477_v8 }
 0x34f   :  { %v3482_v35 = vor.u32 %v3481_v28, %v3480_v60  ;;  %v3488_v50 = vor.u32 %v3487_v31, %v3486_v9  ;;  %v3490_v6 = vshrl.u32 %v12369_v27, %v3475_v22  ;;  %vm12273_vm9 = vcmp.lt.s32.totalorder %v8722_v32, 0 }
 0x350   :  { %vm12275_vm6 = vcmp.lt.s32.totalorder %v8784_v56, 0  ;;  %v2808_v2 = vsub.s32 4294967266, %v9345_v33  ;;  %v9355_v21 = vshrl.u32 %v3001_v26, 30  ;;  %v3485_v44 = vor.u32 %v3484_v36, %v3483_v61 }
 0x351   :  { %vm3492_vm1 = vcmp.lt.s32.totalorder %v3473_v4, 1  ;;  %v3491_v30 = vor.u32 %v3490_v6, %v3489_v52  ;;  %vm3495_vm0 = vcmp.lt.s32.totalorder %v3473_v4, 4  ;;  %v3508_v39 = vshll.u32 %v3468_v1, 8 }
 0x352   :  { %12531 = vst [vmem:[#allocation120_spill] sm:$0xff] %v9355_v21  ;;  %v3047_v62 = vand.u32 2139095040, %v9268_v57  ;;  %v5832_v40 = vadd.s32 4294967294, %v2592_v59  ;;  %vm3493_vm7 = vcmp.lt.s32.totalorder %v3473_v4, 2  ;;  %vm3494_vm4 = vcmp.lt.s32.totalorder %v3473_v4, 3 }
 0x353   :  { %v3497_v22 = vsel %vm3495_vm0, %v3485_v44, 2102212464  ;;  %v3496_v8 = vsel %vm3492_vm1, %v3476_v16, %v3479_v53  ;;  %v3500_v37 = vsel %vm3492_vm1, %v3479_v53, %v3482_v35  ;;  %v3501_v28 = vsel %vm3495_vm0, %v3488_v50, 920167782 }
 0x354   :  { %v3498_v60 = vsel %vm3494_vm4, %v3482_v35, %v3497_v22  ;;  %v2916_v9 = vand.u32 2147483647, %v2915_v47  ;;  %v2804_v61 = vsub.s32 32, %v9345_v33  ;;  %v3003_v36 = vshll.u32 %v9355_v21, 30 }
 0x355   :  { %v3504_v31 = vsel %vm3492_vm1, %v3482_v35, %v3485_v44  ;;  %v2809_v1 = vadd.s32 127, %v2808_v2  ;;  %v3502_v52 = vsel %vm3494_vm4, %v3485_v44, %v3501_v28  ;;  %v3505_v59 = vsel %vm3495_vm0, %v3491_v30, 1326507024 }
 0x356   :  { %v3048_v26 = vshrl.u32 %v3047_v62, 23  ;;  %vm5833_vm10 = vcmp.lt.s32.totalorder %v5832_v40, 0  ;;  %v3499_v16 = vsel %vm3493_vm7, %v3496_v8, %v3498_v60  ;;  %v3503_v53 = vsel %vm3493_vm7, %v3500_v37, %v3502_v52 }
 0x357   :  { %v3506_v6 = vsel %vm3494_vm4, %v3488_v50, %v3505_v59  ;;  %v9372_v22 = vmul.u32.u64.low %v3508_v39, %v3503_v53  ;;  %v9373_v20 = vmul.u32.u64.high %v3508_v39, %v3503_v53, %v9372_v22  ;;  %v2918_v2 = vcvt.s32.f32 %v2911_v13 }
 0x358   :  { %v3507_v47 = vsel %vm3493_vm7, %v3504_v31, %v3506_v6  ;;  %v5850_v35 = vadd.s32 4294967169, %v3048_v26  ;;  %v9376_v21 = vsub.s32 %v3000_v48, %v3003_v36  ;;  %v12532_v62 = vxor.u32 2147483648, %v9199_v19 }
 0x359   :  { %v9378_v44 = vmul.u32.u64.low %v3508_v39, %v3507_v47  ;;  %v9379_v30 = vmul.u32.u64.high %v3508_v39, %v3507_v47, %v9378_v44  ;;  %v12534_v4 = vxor.u32 2147483648, %v9204_v58  ;;  %v2788_v48 = vadd.s32 %v9159_v46, %v9170_v3 }
 0x35a   :  { %v9386_v8 = vsel %vm12273_vm9, %v12532_v62, %v9199_v19  ;;  %v3054_v13 = vadd.s32 1, %v5850_v35  ;;  %v9397_v60 = vmul.f32 %v2918_v2, %v2916_v9  ;;  %v9400_v37 = vsel %vm5833_vm10, 0, %v5832_v40 }
 0x35b   :  { %12533 = vst [vmem:[#allocation121_spill] sm:$0xff] %v9386_v8  ;;  %v9393_v50 = vsel %vm12275_vm6, %v12534_v4, %v9204_v58  ;;  %v3515_v28 = vmul.u32 %v3508_v39, %v3499_v16  ;;  %v12268_v19 = vand.u32 2147483647, %v9268_v57  ;;  %v2806_v36 = vshrl.u32 %v2788_v48, %v2804_v61 }
 0x35c   :  { %12535 = vst [vmem:[#allocation122_spill] sm:$0xff] %v9393_v50  ;;  %v2810_v31 = vshll.u32 %v2809_v1, 23  ;;  %v3518_v52 = vadd.s32 1, %v9373_v20  ;;  %vm3055_vm1 = vcmp.gt.s32.totalorder %v3054_v13, 0  ;;  %v3006_v59 = vsub.s32 0, %v9376_v21 }
 0x35d   :  { %vm3517_vm0 = vc.u32 %v9379_v30, %v9372_v22  ;;  %v3151_v46 = vand.u32 2139095040, %v9327_v18  ;;  %v2805_v3 = vshll.u32 %v9238_v24, %v9345_v33  ;;  %v2600_v39 = vsub.s32 4294967266, %v9400_v37 }
 0x35e   :  { %v3519_v40 = vsel %vm3517_vm0, %v3518_v52, %v9373_v20  ;;  %v3056_v9 = vsel %vm3055_vm1, %v3054_v13, 0  ;;  %v3051_v26 = vand.u32 8388607, %v12268_v19  ;;  %v9418_v6 = vor.u32 4788187, %v2810_v31  ;;  %v9429_v13 = vpop.f32.mrb[21].mxu0 }
 0x35f   :  { %v3520_v1 = vadd.s32 %v3519_v40, %v3515_v28  ;;  %v3058_v16 = vand.u32 31, %v3056_v9  ;;  %v9416_v53 = vor.u32 %v2806_v36, %v2805_v3  ;;  %v2580_v47 = vadd.s32 %v9244_v7, %v9249_v29 }
 0x360   :  { %v12274_v24 = vand.u32 2147483647, %v9327_v18  ;;  %v2596_v33 = vsub.s32 32, %v9400_v37  ;;  %v5847_v20 = vmin.u32 %v3006_v59, %v9376_v21  ;;  %v3152_v2 = vshrl.u32 %v3151_v46, 23 }
 0x361   :  { %v3521_v35 = vadd.s32 536870912, %v3520_v1  ;;  %v9425_v44 = vadd.s32 127, %v2600_v39  ;;  %v3059_v62 = vsub.s32 32, %v3058_v16  ;;  %v3061_v4 = vshll.u32 %v12373_v55, %v3058_v16 }
 0x362   :  { %v3064_v48 = vshll.u32 %v12381_v49, %v3058_v16  ;;  %v3052_v7 = vor.u32 8388608, %v3051_v26  ;;  %v3067_v29 = vshll.u32 %v12365_v0, %v3058_v16  ;;  %v3070_v36 = vshll.u32 %v12366_v11, %v3058_v16 }
 0x363   :  { %v9431_v28 = vshrl.u32 %v3521_v35, 30  ;;  %v3057_v31 = vshrl.u32 %v3056_v9, 5  ;;  %v3062_v52 = vshrl.u32 %v12381_v49, %v3059_v62  ;;  %v3065_v59 = vshrl.u32 %v12365_v0, %v3059_v62 }
 0x364   :  { %v3068_v46 = vshrl.u32 %v12366_v11, %v3059_v62  ;;  %v3008_v3 = vclz %v5847_v20  ;;  %v3071_v40 = vshrl.u32 %v12367_v43, %v3059_v62  ;;  %v5854_v19 = vadd.s32 4294967169, %v3152_v2 }
 0x365   :  { %12536 = vst [vmem:[#allocation123_spill] sm:$0xff] %v9431_v28  ;;  %v3523_v39 = vshll.u32 %v9431_v28, 30  ;;  %v3063_v35 = vor.u32 %v3062_v52, %v3061_v4  ;;  %v3066_v61 = vor.u32 %v3065_v59, %v3064_v48  ;;  %v3073_v26 = vshll.u32 %v12367_v43, %v3058_v16 }
 0x366   :  { %v3155_v58 = vand.u32 8388607, %v12274_v24  ;;  %vm12295_vm10 = vcmp.lt.s32.totalorder %v8861_v5, 0  ;;  %vm12288_vm7 = vcmp.lt.s32.totalorder %v8969_v23, 0  ;;  %v3060_v20 = vshrl.u32 %v12373_v55, %v3059_v62 }
 0x367   :  { %v9445_v9 = vsub.s32 %v3520_v1, %v3523_v39  ;;  %v3069_v8 = vor.u32 %v3068_v46, %v3067_v29  ;;  %v3072_v28 = vor.u32 %v3071_v40, %v3070_v36  ;;  %v3074_v32 = vshrl.u32 %v12369_v27, %v3059_v62 }
 0x368   :  { %vm3076_vm4 = vcmp.lt.s32.totalorder %v3057_v31, 1  ;;  %vm3078_vm1 = vcmp.lt.s32.totalorder %v3057_v31, 3  ;;  %v3092_v2 = vshll.u32 %v3052_v7, 8  ;;  %v5848_v4 = vadd.s32 4294967294, %v3008_v3 }
 0x369   :  { %vm3077_vm0 = vcmp.lt.s32.totalorder %v3057_v31, 2  ;;  %vm3079_vm9 = vcmp.lt.s32.totalorder %v3057_v31, 4  ;;  %v3158_v16 = vadd.s32 1, %v5854_v19  ;;  %v3075_v48 = vor.u32 %v3074_v32, %v3073_v26 }
 0x36a   :  { %v3081_v52 = vsel %vm3079_vm9, %v3069_v8, 2102212464  ;;  %v3084_v59 = vsel %vm3076_vm4, %v3063_v35, %v3066_v61  ;;  %v3085_v24 = vsel %vm3079_vm9, %v3072_v28, 920167782  ;;  %v2598_v1 = vshrl.u32 %v2580_v47, %v2596_v33 }
 0x36b   :  { %v3526_v39 = vsub.s32 0, %v9445_v9  ;;  %v3080_v29 = vsel %vm3076_vm4, %v3060_v20, %v3063_v35  ;;  %v3086_v36 = vsel %vm3078_vm1, %v3069_v8, %v3085_v24  ;;  %v3082_v62 = vsel %vm3078_vm1, %v3066_v61, %v3081_v52 }
 0x36c   :  { %v3087_v7 = vsel %vm3077_vm0, %v3084_v59, %v3086_v36  ;;  %v3088_v46 = vsel %vm3076_vm4, %v3066_v61, %v3069_v8  ;;  %v3089_v3 = vsel %vm3079_vm9, %v3075_v48, 1326507024  ;;  %v2602_v32 = vshll.u32 %v9425_v44, 23 }
 0x36d   :  { %vm5849_vm6 = vcmp.lt.s32.totalorder %v5848_v4, 0  ;;  %v3090_v19 = vsel %vm3078_vm1, %v3072_v28, %v3089_v3  ;;  %v3156_v40 = vor.u32 8388608, %v3155_v58  ;;  %vm3159_vm11 = vcmp.gt.s32.totalorder %v3158_v16, 0  ;;  %v9510_v3 = vpop.f32.mrb[21].mxu1 }
 0x36e   :  { %v3091_v47 = vsel %vm3077_vm0, %v3088_v46, %v3090_v19  ;;  %v9459_v33 = vmul.u32.u64.low %v3092_v2, %v3087_v7  ;;  %v9460_v26 = vmul.u32.u64.high %v3092_v2, %v3087_v7, %v9459_v33  ;;  %v5867_v24 = vmin.u32 %v3526_v39, %v9445_v9 }
 0x36f   :  { %v3083_v35 = vsel %vm3077_vm0, %v3080_v29, %v3082_v62  ;;  %v9465_v20 = vmul.u32.u64.low %v3092_v2, %v3091_v47  ;;  %v9466_v8 = vmul.u32.u64.high %v3092_v2, %v3091_v47, %v9465_v20  ;;  %v12537_v61 = vxor.u32 2147483648, %v9321_v54 }
 0x370   :  { %v12539_v44 = vxor.u32 2147483648, %v9397_v60  ;;  %v3160_v48 = vsel %vm3159_vm11, %v3158_v16, 0  ;;  %v2597_v59 = vshll.u32 %v9297_v51, %v9400_v37  ;;  %v9487_v39 = vsel %vm5849_vm6, 0, %v5848_v4 }
 0x371   :  { %v9473_v58 = vsel %vm12295_vm10, %v12537_v61, %v9321_v54  ;;  %v3162_v54 = vand.u32 31, %v3160_v48  ;;  %v2996_v29 = vadd.s32 %v9305_v45, %v9315_v38  ;;  %v3099_v36 = vmul.u32 %v3092_v2, %v3083_v35 }
 0x372   :  { %12538 = vst [vmem:[#allocation124_spill] sm:$0xff] %v9473_v58  ;;  %v9480_v28 = vsel %vm12288_vm7, %v12539_v44, %v9397_v60  ;;  %v3102_v62 = vadd.s32 1, %v9460_v26  ;;  %v9494_v60 = vadd.f32 %v8990_v17, %v6585_v41  ;;  %v9496_v16 = vor.u32 %v2598_v1, %v2597_v59 }
 0x373   :  { %12540 = vst [vmem:[#allocation125_spill] sm:$0xff] %v9480_v28  ;;  %v9498_v7 = vor.u32 4788187, %v2602_v32  ;;  %v3528_v46 = vclz %v5867_v24  ;;  %v9500_v51 = vshll.u32 %v3156_v40, 8  ;;  %v3012_v37 = vsub.s32 32, %v9487_v39 }
 0x374   :  { %12541 = vst [vmem:[#allocation126_spill] sm:$0xff] %v9494_v60  ;;  %vm3101_vm11 = vc.u32 %v9466_v8, %v9459_v33  ;;  %v3163_v45 = vsub.s32 32, %v3162_v54  ;;  %v3165_v17 = vshll.u32 %v12373_v55, %v3162_v54  ;;  %v3168_v4 = vshll.u32 %v12381_v49, %v3162_v54 }
 0x375   :  { %v3103_v2 = vsel %vm3101_vm11, %v3102_v62, %v9460_v26  ;;  %v3171_v1 = vshll.u32 %v12365_v0, %v3162_v54  ;;  %v3161_v19 = vshrl.u32 %v3160_v48, 5  ;;  %v3013_v24 = vshll.u32 %v9376_v21, %v9487_v39 }
 0x376   :  { %v3104_v32 = vadd.s32 %v3103_v2, %v3099_v36  ;;  %v3166_v40 = vshrl.u32 %v12381_v49, %v3163_v45  ;;  %v3169_v47 = vshrl.u32 %v12365_v0, %v3163_v45  ;;  %v5868_v35 = vadd.s32 4294967294, %v3528_v46 }
 0x377   :  { %v3172_v26 = vshrl.u32 %v12366_v11, %v3163_v45  ;;  %v3174_v20 = vshll.u32 %v12366_v11, %v3162_v54  ;;  %v3164_v44 = vshrl.u32 %v12373_v55, %v3163_v45  ;;  %v3175_v59 = vshrl.u32 %v12367_v43, %v3163_v45 }
 0x378   :  { %v3105_v61 = vadd.s32 536870912, %v3104_v32  ;;  %v3255_v36 = vand.u32 2139095040, %v9494_v60  ;;  %v3167_v48 = vor.u32 %v3166_v40, %v3165_v17  ;;  %v3170_v62 = vor.u32 %v3169_v47, %v3168_v4 }
 0x379   :  { %v3173_v2 = vor.u32 %v3172_v26, %v3171_v1  ;;  %v3177_v38 = vshll.u32 %v12367_v43, %v3162_v54  ;;  %v3176_v21 = vor.u32 %v3175_v59, %v3174_v20  ;;  %v3178_v46 = vshrl.u32 %v12369_v27, %v3163_v45 }
 0x37a   :  { %v9522_v31 = vshrl.u32 %v3105_v61, 30  ;;  %vm3180_vm9 = vcmp.lt.s32.totalorder %v3161_v19, 1  ;;  %v3016_v52 = vsub.s32 4294967266, %v9487_v39  ;;  %vm5869_vm6 = vcmp.lt.s32.totalorder %v5868_v35, 0 }
 0x37b   :  { %vm3182_vm4 = vcmp.lt.s32.totalorder %v3161_v19, 3  ;;  %vm3183_vm1 = vcmp.lt.s32.totalorder %v3161_v19, 4  ;;  %v3179_v23 = vor.u32 %v3178_v46, %v3177_v38  ;;  %vm3181_vm0 = vcmp.lt.s32.totalorder %v3161_v19, 2 }
 0x37c   :  { %12542 = vst [vmem:[#allocation127_spill] sm:$0xff] %v9522_v31  ;;  %v3107_v28 = vshll.u32 %v9522_v31, 30  ;;  %v3185_v17 = vsel %vm3183_vm1, %v3173_v2, 2102212464  ;;  %v3184_v4 = vsel %vm3180_vm9, %v3164_v44, %v3167_v48  ;;  %v3188_v54 = vsel %vm3180_vm9, %v3167_v48, %v3170_v62 }
 0x37d   :  { %v3189_v1 = vsel %vm3183_vm1, %v3176_v21, 920167782  ;;  %v3256_v40 = vshrl.u32 %v3255_v36, 23  ;;  %v3186_v39 = vsel %vm3182_vm4, %v3170_v62, %v3185_v17  ;;  %v3192_v26 = vsel %vm3180_vm9, %v3170_v62, %v3173_v2 }
 0x37e   :  { %v9531_v45 = vsub.s32 %v3104_v32, %v3107_v28  ;;  %v3190_v47 = vsel %vm3182_vm4, %v3173_v2, %v3189_v1  ;;  %v3014_v20 = vshrl.u32 %v2996_v29, %v3012_v37  ;;  %v3017_v38 = vadd.s32 127, %v3016_v52 }
 0x37f   :  { %v3191_v61 = vsel %vm3181_vm0, %v3188_v54, %v3190_v47  ;;  %v3193_v59 = vsel %vm3183_vm1, %v3179_v23, 1326507024  ;;  %v9546_v32 = vsel %vm5869_vm6, 0, %v5868_v35  ;;  %v3187_v62 = vsel %vm3181_vm0, %v3184_v4, %v3186_v39 }
 0x380   :  { %v3110_v44 = vsub.s32 0, %v9531_v45  ;;  %v3194_v48 = vsel %vm3182_vm4, %v3176_v21, %v3193_v59  ;;  %v9541_v36 = vmul.u32.u64.low %v9500_v51, %v3191_v61  ;;  %v9542_v28 = vmul.u32.u64.high %v9500_v51, %v3191_v61, %v9541_v36 }
 0x381   :  { %v3195_v52 = vsel %vm3181_vm0, %v3192_v26, %v3194_v48  ;;  %v5858_v29 = vadd.s32 4294967169, %v3256_v40  ;;  %v2604_v37 = vand.u32 2147483647, %v9498_v7  ;;  %v2606_v46 = vcvt.s32.f32 %v9496_v16 }
 0x382   :  { %v5851_v23 = vmin.u32 %v3110_v44, %v9531_v45  ;;  %v9553_v2 = vmul.u32.u64.low %v9500_v51, %v3195_v52  ;;  %v9554_v21 = vmul.u32.u64.high %v9500_v51, %v3195_v52, %v9553_v2  ;;  %v9557_v17 = vor.u32 %v3014_v20, %v3013_v24 }
 0x383   :  { %v3018_v54 = vshll.u32 %v3017_v38, 23  ;;  %v3262_v35 = vadd.s32 1, %v5858_v29  ;;  %v3536_v1 = vsub.s32 4294967266, %v9546_v32  ;;  %v3203_v19 = vmul.u32 %v9500_v51, %v3187_v62 }
 0x384   :  { %v3206_v4 = vadd.s32 1, %v9542_v28  ;;  %v9564_v7 = vadd.f32 %v9059_v63, %v12446_v34  ;;  %v12543_v40 = vand.u32 2147483647, %v9418_v6  ;;  %v12544_v39 = vcvt.s32.f32 %v9416_v53 }
 0x385   :  { %v3112_v16 = vclz %v5851_v23  ;;  %v12545_v24 = vand.u32 2147483647, %v9494_v60  ;;  %vm3263_vm11 = vcmp.gt.s32.totalorder %v3262_v35, 0  ;;  %v9574_v20 = vmul.f32 %v2606_v46, %v2604_v37 }
 0x386   :  { %v9570_v47 = vmul.f32 %v12544_v39, %v12543_v40  ;;  %v3532_v51 = vsub.s32 32, %v9546_v32  ;;  %vm3205_vm9 = vc.u32 %v9554_v21, %v9541_v36  ;;  %v3264_v63 = vsel %vm3263_vm11, %v3262_v35, 0  ;;  %v9596_v40 = vpop.f32.mrb[22].mxu0 }
 0x387   :  { %v3259_v26 = vand.u32 8388607, %v12545_v24  ;;  %v9579_v38 = vor.u32 4788187, %v3018_v54  ;;  %v3516_v53 = vadd.s32 %v9372_v22, %v9379_v30  ;;  %v3207_v6 = vsel %vm3205_vm9, %v3206_v4, %v9542_v28 }
 0x388   :  { %v3266_v61 = vand.u32 31, %v3264_v63  ;;  %v3537_v44 = vadd.s32 127, %v3536_v1  ;;  %v3208_v48 = vadd.s32 %v3207_v6, %v3203_v19  ;;  %v4087_v62 = vand.u32 2139095040, %v9564_v7 }
 0x389   :  { %v3533_v52 = vshll.u32 %v9445_v9, %v9546_v32  ;;  %v5852_v29 = vadd.s32 4294967294, %v3112_v16  ;;  %v3260_v37 = vor.u32 8388608, %v3259_v26  ;;  %v3534_v2 = vshrl.u32 %v3516_v53, %v3532_v51 }
 0x38a   :  { %v3267_v23 = vsub.s32 32, %v3266_v61  ;;  %v3209_v46 = vadd.s32 536870912, %v3208_v48  ;;  %v3269_v54 = vshll.u32 %v12373_v55, %v3266_v61  ;;  %v3272_v22 = vshll.u32 %v12381_v49, %v3266_v61 }
 0x38b   :  { %v3265_v30 = vshrl.u32 %v3264_v63, 5  ;;  %v3275_v1 = vshll.u32 %v12365_v0, %v3266_v61  ;;  %v3538_v19 = vshll.u32 %v3537_v44, 23  ;;  %v4088_v32 = vshrl.u32 %v4087_v62, 23 }
 0x38c   :  { %v3270_v28 = vshrl.u32 %v12381_v49, %v3267_v23  ;;  %v3273_v35 = vshrl.u32 %v12365_v0, %v3267_v23  ;;  %v9593_v4 = vshrl.u32 %v3209_v46, 30  ;;  %v3276_v9 = vshrl.u32 %v12366_v11, %v3267_v23 }
 0x38d   :  { %vm5853_vm6 = vcmp.lt.s32.totalorder %v5852_v29, 0  ;;  %v3268_v39 = vshrl.u32 %v12373_v55, %v3267_v23  ;;  %v3278_v16 = vshll.u32 %v12366_v11, %v3266_v61  ;;  %v3279_v24 = vshrl.u32 %v12367_v43, %v3267_v23 }
 0x38e   :  { %12546 = vst [vmem:[#allocation128_spill] sm:$0xff] %v9593_v4  ;;  %v3211_v26 = vshll.u32 %v9593_v4, 30  ;;  %v3271_v51 = vor.u32 %v3270_v28, %v3269_v54  ;;  %v3274_v63 = vor.u32 %v3273_v35, %v3272_v22  ;;  %v3277_v53 = vor.u32 %v3276_v9, %v3275_v1 }
 0x38f   :  { %v3280_v6 = vor.u32 %v3279_v24, %v3278_v16  ;;  %v3281_v44 = vshll.u32 %v12367_v43, %v3266_v61  ;;  %v3282_v46 = vshrl.u32 %v12369_v27, %v3267_v23  ;;  %vm3284_vm4 = vcmp.lt.s32.totalorder %v3265_v30, 1 }
 0x390   :  { %v9604_v62 = vsel %vm5853_vm6, 0, %v5852_v29  ;;  %v3300_v59 = vshll.u32 %v3260_v37, 8  ;;  %v12283_v31 = vand.u32 2147483647, %v9564_v7  ;;  %v5890_v58 = vadd.s32 4294967169, %v4088_v32 }
 0x391   :  { %v9607_v5 = vsub.s32 %v3208_v48, %v3211_v26  ;;  %v3283_v50 = vor.u32 %v3282_v46, %v3281_v44  ;;  %vm3286_vm1 = vcmp.lt.s32.totalorder %v3265_v30, 3  ;;  %vm3287_vm0 = vcmp.lt.s32.totalorder %v3265_v30, 4 }
 0x392   :  { %vm3285_vm11 = vcmp.lt.s32.totalorder %v3265_v30, 2  ;;  %v3288_v54 = vsel %vm3284_vm4, %v3268_v39, %v3271_v51  ;;  %v3289_v22 = vsel %vm3287_vm0, %v3277_v53, 2102212464  ;;  %v3292_v28 = vsel %vm3284_vm4, %v3271_v51, %v3274_v63 }
 0x393   :  { %v3290_v61 = vsel %vm3286_vm1, %v3274_v63, %v3289_v22  ;;  %v3293_v35 = vsel %vm3287_vm0, %v3280_v6, 920167782  ;;  %v3296_v23 = vsel %vm3284_vm4, %v3274_v63, %v3277_v53  ;;  %v3297_v1 = vsel %vm3287_vm0, %v3283_v50, 1326507024 }
 0x394   :  { %v3020_v29 = vand.u32 2147483647, %v9579_v38  ;;  %v9611_v37 = vor.u32 %v3534_v2, %v3533_v52  ;;  %v3120_v9 = vsub.s32 4294967266, %v9604_v62  ;;  %v3294_v48 = vsel %vm3286_vm1, %v3277_v53, %v3293_v35 }
 0x395   :  { %v3214_v32 = vsub.s32 0, %v9607_v5  ;;  %v3295_v16 = vsel %vm3285_vm11, %v3292_v28, %v3294_v48  ;;  %v3298_v39 = vsel %vm3286_vm1, %v3280_v6, %v3297_v1  ;;  %v4094_v24 = vadd.s32 1, %v5890_v58  ;;  %v12547_v58 = vld [vmem:[#allocation110_spill] sm:$0xff] }
 0x396   :  { %v9618_v26 = vor.u32 4788187, %v3538_v19  ;;  %v3291_v51 = vsel %vm3285_vm11, %v3288_v54, %v3290_v61  ;;  %v3299_v50 = vsel %vm3285_vm11, %v3296_v23, %v3298_v39  ;;  %v4091_v38 = vand.u32 8388607, %v12283_v31 }
 0x397   :  { %v9624_v52 = vmul.u32.u64.low %v3300_v59, %v3299_v50  ;;  %v9625_v2 = vmul.u32.u64.high %v3300_v59, %v3299_v50, %v9624_v52  ;;  %v9627_v63 = vmul.u32.u64.low %v3300_v59, %v3295_v16  ;;  %v9628_v53 = vmul.u32.u64.high %v3300_v59, %v3295_v16, %v9627_v63 }
 0x398   :  { %v3121_v6 = vadd.s32 127, %v3120_v9  ;;  %vm4095_vm9 = vcmp.gt.s32.totalorder %v4094_v24, 0  ;;  %v9634_v19 = vadd.f32 %v12547_v58, %v6588_v42  ;;  %v12548_v46 = vcvt.s32.f32 %v9557_v17 }
 0x399   :  { %v5855_v22 = vmin.u32 %v3214_v32, %v9607_v5  ;;  %v4096_v28 = vsel %vm4095_vm9, %v4094_v24, 0  ;;  %v3542_v61 = vcvt.s32.f32 %v9611_v37  ;;  %v3100_v35 = vadd.s32 %v9459_v33, %v9466_v8 }
 0x39a   :  { %v9639_v54 = vmul.f32 %v12548_v46, %v3020_v29  ;;  %v3307_v23 = vmul.u32 %v3300_v59, %v3291_v51  ;;  %v4098_v1 = vand.u32 31, %v4096_v28  ;;  %v3540_v9 = vand.u32 2147483647, %v9618_v26  ;;  %v9654_v59 = vpop.f32.mrb[22].mxu1 }
 0x39b   :  { %vm3309_vm6 = vc.u32 %v9625_v2, %v9627_v63  ;;  %v3310_v48 = vadd.s32 1, %v9628_v53  ;;  %v4092_v17 = vor.u32 8388608, %v4091_v38  ;;  %v3116_v29 = vsub.s32 32, %v9604_v62 }
 0x39c   :  { %v3122_v16 = vshll.u32 %v3121_v6, 23  ;;  %v4099_v32 = vsub.s32 32, %v4098_v1  ;;  %v3359_v39 = vand.u32 2139095040, %v9634_v19  ;;  %v3216_v37 = vclz %v5855_v22 }
 0x39d   :  { %v3311_v24 = vsel %vm3309_vm6, %v3310_v48, %v9628_v53  ;;  %v4101_v33 = vshll.u32 %v12373_v55, %v4098_v1  ;;  %v4104_v8 = vshll.u32 %v12381_v49, %v4098_v1  ;;  %v3117_v26 = vshll.u32 %v9531_v45, %v9604_v62 }
 0x39e   :  { %v3312_v51 = vadd.s32 %v3311_v24, %v3307_v23  ;;  %v4097_v50 = vshrl.u32 %v4096_v28, 5  ;;  %v4107_v38 = vshll.u32 %v12365_v0, %v4098_v1  ;;  %v4102_v52 = vshrl.u32 %v12381_v49, %v4099_v32  ;;  %v12549_v28 = vld [vmem:[#allocation108_spill] sm:$0xff] }
 0x39f   :  { %v4105_v6 = vshrl.u32 %v12365_v0, %v4099_v32  ;;  %v4108_v58 = vshrl.u32 %v12366_v11, %v4099_v32  ;;  %v4110_v53 = vshll.u32 %v12366_v11, %v4098_v1  ;;  %v3118_v46 = vshrl.u32 %v3100_v35, %v3116_v29 }
 0x3a0   :  { %v3123_v22 = vor.u32 4788187, %v3122_v16  ;;  %v3313_v48 = vadd.s32 536870912, %v3312_v51  ;;  %v4111_v31 = vshrl.u32 %v12367_v43, %v4099_v32  ;;  %v5856_v30 = vadd.s32 4294967294, %v3216_v37 }
 0x3a1   :  { %v4103_v44 = vor.u32 %v4102_v52, %v4101_v33  ;;  %v4106_v45 = vor.u32 %v4105_v6, %v4104_v8  ;;  %v4113_v62 = vshll.u32 %v12367_v43, %v4098_v1  ;;  %vm12296_vm4 = vcmp.lt.s32.totalorder %v12549_v28, 0 }
 0x3a2   :  { %vm12339_vm1 = vcmp.lt.s32.totalorder %v9139_v12, 0  ;;  %v9667_v23 = vshrl.u32 %v3313_v48, 30  ;;  %v4100_v24 = vshrl.u32 %v12373_v55, %v4099_v32  ;;  %v4109_v4 = vor.u32 %v4108_v58, %v4107_v38 }
 0x3a3   :  { %v4112_v56 = vor.u32 %v4111_v31, %v4110_v53  ;;  %v4114_v35 = vshrl.u32 %v12369_v27, %v4099_v32  ;;  %vm4116_vm0 = vcmp.lt.s32.totalorder %v4097_v50, 1  ;;  %vm4118_vm11 = vcmp.lt.s32.totalorder %v4097_v50, 3 }
 0x3a4   :  { %12550 = vst [vmem:[#allocation110_spill] sm:$0xff] %v9667_v23  ;;  %v3360_v29 = vshrl.u32 %v3359_v39, 23  ;;  %v3315_v16 = vshll.u32 %v9667_v23, 30  ;;  %vm4117_vm9 = vcmp.lt.s32.totalorder %v4097_v50, 2  ;;  %vm4119_vm6 = vcmp.lt.s32.totalorder %v4097_v50, 4 }
 0x3a5   :  { %v4132_v1 = vshll.u32 %v4092_v17, 8  ;;  %v4115_v37 = vor.u32 %v4114_v35, %v4113_v62  ;;  %v4121_v33 = vsel %vm4119_vm6, %v4109_v4, 2102212464  ;;  %v4124_v8 = vsel %vm4116_vm0, %v4103_v44, %v4106_v45 }
 0x3a6   :  { %v4125_v52 = vsel %vm4119_vm6, %v4112_v56, 920167782  ;;  %vm5857_vm7 = vcmp.lt.s32.totalorder %v5856_v30, 0  ;;  %v4120_v6 = vsel %vm4116_vm0, %v4100_v24, %v4103_v44  ;;  %v4122_v31 = vsel %vm4118_vm11, %v4106_v45, %v4121_v33 }
 0x3a7   :  { %v4126_v32 = vsel %vm4118_vm11, %v4109_v4, %v4125_v52  ;;  %v4128_v39 = vsel %vm4116_vm0, %v4106_v45, %v4109_v4  ;;  %v4129_v58 = vsel %vm4119_vm6, %v4115_v37, 1326507024  ;;  %v5862_v53 = vadd.s32 4294967169, %v3360_v29 }
 0x3a8   :  { %v4127_v38 = vsel %vm4117_vm9, %v4124_v8, %v4126_v32  ;;  %v9678_v48 = vmul.f32 %v3542_v61, %v3540_v9  ;;  %v3119_v17 = vor.u32 %v3118_v46, %v3117_v26  ;;  %v9680_v62 = vsub.s32 %v3312_v51, %v3315_v16 }
 0x3a9   :  { %v4130_v35 = vsel %vm4118_vm11, %v4112_v56, %v4129_v58  ;;  %v4123_v23 = vsel %vm4117_vm9, %v4120_v6, %v4122_v31  ;;  %v9685_v24 = vmul.u32.u64.low %v4132_v1, %v4127_v38  ;;  %v9686_v33 = vmul.u32.u64.high %v4132_v1, %v4127_v38, %v9685_v24 }
 0x3aa   :  { %v4131_v44 = vsel %vm4117_vm9, %v4128_v39, %v4130_v35  ;;  %v9689_v8 = vsel %vm5857_vm7, 0, %v5856_v30  ;;  %v12291_v61 = vand.u32 2147483647, %v9634_v19  ;;  %v12551_v9 = vxor.u32 2147483648, %v9570_v47 }
 0x3ab   :  { %v9691_v4 = vmul.u32.u64.low %v4132_v1, %v4131_v44  ;;  %v9692_v45 = vmul.u32.u64.high %v4132_v1, %v4131_v44, %v9691_v4  ;;  %v12553_v26 = vxor.u32 2147483648, %v9574_v20  ;;  %v3124_v30 = vand.u32 2147483647, %v3123_v22 }
 0x3ac   :  { %v9700_v56 = vsel %vm12296_vm4, %v12551_v9, %v9570_v47  ;;  %v3366_v50 = vadd.s32 1, %v5862_v53  ;;  %v3318_v29 = vsub.s32 0, %v9680_v62  ;;  %v4139_v16 = vmul.u32 %v4132_v1, %v4123_v23 }
 0x3ad   :  { %12552 = vst [vmem:[#allocation129_spill] sm:$0xff] %v9700_v56  ;;  %v9707_v51 = vsel %vm12339_vm1, %v12553_v26, %v9574_v20  ;;  %v9713_v37 = vadd.f32 %v9210_v15, %v12446_v34  ;;  %v3126_v47 = vcvt.s32.f32 %v3119_v17  ;;  %v3224_v52 = vsub.s32 4294967266, %v9689_v8 }
 0x3ae   :  { %12554 = vst [vmem:[#allocation130_spill] sm:$0xff] %v9707_v51  ;;  %v4142_v6 = vadd.s32 1, %v9686_v33  ;;  %vm3367_vm7 = vcmp.gt.s32.totalorder %v3366_v50, 0  ;;  %vm4141_vm0 = vc.u32 %v9692_v45, %v9685_v24  ;;  %v3363_v22 = vand.u32 8388607, %v12291_v61 }
 0x3af   :  { %v3368_v31 = vsel %vm3367_vm7, %v3366_v50, 0  ;;  %v9722_v23 = vmul.f32 %v3126_v47, %v3124_v30  ;;  %v3204_v15 = vadd.s32 %v9541_v36, %v9554_v21  ;;  %v5859_v38 = vmin.u32 %v3318_v29, %v9680_v62 }
 0x3b0   :  { %v4143_v1 = vsel %vm4141_vm0, %v4142_v6, %v9686_v33  ;;  %v3370_v32 = vand.u32 31, %v3368_v31  ;;  %v3775_v53 = vand.u32 2139095040, %v9713_v37  ;;  %v3220_v17 = vsub.s32 32, %v9689_v8 }
 0x3b1   :  { %v4144_v39 = vadd.s32 %v4143_v1, %v4139_v16  ;;  %v3221_v35 = vshll.u32 %v9607_v5, %v9689_v8  ;;  %v3225_v44 = vadd.s32 127, %v3224_v52  ;;  %v3364_v26 = vor.u32 8388608, %v3363_v22 }
 0x3b2   :  { %v3371_v4 = vsub.s32 32, %v3370_v32  ;;  %v3373_v36 = vshll.u32 %v12373_v55, %v3370_v32  ;;  %v3376_v21 = vshll.u32 %v12381_v49, %v3370_v32  ;;  %v3369_v33 = vshrl.u32 %v3368_v31, 5  ;;  %v9744_v31 = vpop.f32.mrb[23].mxu0 }
 0x3b3   :  { %v4145_v9 = vadd.s32 536870912, %v4144_v39  ;;  %v3379_v29 = vshll.u32 %v12365_v0, %v3370_v32  ;;  %v3320_v16 = vclz %v5859_v38  ;;  %v3776_v8 = vshrl.u32 %v3775_v53, 23 }
 0x3b4   :  { %v3374_v30 = vshrl.u32 %v12381_v49, %v3371_v4  ;;  %v3377_v50 = vshrl.u32 %v12365_v0, %v3371_v4  ;;  %v3380_v5 = vshrl.u32 %v12366_v11, %v3371_v4  ;;  %v3222_v52 = vshrl.u32 %v3204_v15, %v3220_v17 }
 0x3b5   :  { %v9738_v47 = vshrl.u32 %v4145_v9, 30  ;;  %v3372_v6 = vshrl.u32 %v12373_v55, %v3371_v4  ;;  %v3382_v22 = vshll.u32 %v12366_v11, %v3370_v32  ;;  %v3383_v1 = vshrl.u32 %v12367_v43, %v3371_v4 }
 0x3b6   :  { %v3375_v20 = vor.u32 %v3374_v30, %v3373_v36  ;;  %v3378_v46 = vor.u32 %v3377_v50, %v3376_v21  ;;  %v3381_v58 = vor.u32 %v3380_v5, %v3379_v29  ;;  %vm12308_vm11 = vcmp.lt.s32.totalorder %v9174_v25, 0 }
 0x3b7   :  { %12555 = vst [vmem:[#allocation131_spill] sm:$0xff] %v9738_v47  ;;  %v4147_v61 = vshll.u32 %v9738_v47, 30  ;;  %vm12307_vm9 = vcmp.lt.s32.totalorder %v9208_v10, 0  ;;  %v3384_v38 = vor.u32 %v3383_v1, %v3382_v22  ;;  %v3385_v15 = vshll.u32 %v12367_v43, %v3370_v32 }
 0x3b8   :  { %v3386_v53 = vshrl.u32 %v12369_v27, %v3371_v4  ;;  %vm3388_vm6 = vcmp.lt.s32.totalorder %v3369_v33, 1  ;;  %vm12301_vm7 = vcmp.lt.s32.totalorder %v9268_v57, 0  ;;  %v3226_v17 = vshll.u32 %v3225_v44, 23 }
 0x3b9   :  { %v5860_v9 = vadd.s32 4294967294, %v3320_v16  ;;  %v3404_v56 = vshll.u32 %v3364_v26, 8  ;;  %v5878_v28 = vadd.s32 4294967169, %v3776_v8  ;;  %v9752_v47 = vsub.s32 %v4144_v39, %v4147_v61 }
 0x3ba   :  { %v3387_v36 = vor.u32 %v3386_v53, %v3385_v15  ;;  %vm3390_vm0 = vcmp.lt.s32.totalorder %v3369_v33, 3  ;;  %vm3391_vm10 = vcmp.lt.s32.totalorder %v3369_v33, 4  ;;  %vm3389_vm4 = vcmp.lt.s32.totalorder %v3369_v33, 2 }
 0x3bb   :  { %v3392_v21 = vsel %vm3388_vm6, %v3372_v6, %v3375_v20  ;;  %v3393_v30 = vsel %vm3391_vm10, %v3381_v58, 2102212464  ;;  %v3396_v32 = vsel %vm3388_vm6, %v3375_v20, %v3378_v46  ;;  %v3397_v50 = vsel %vm3391_vm10, %v3384_v38, 920167782 }
 0x3bc   :  { %v3394_v4 = vsel %vm3390_vm0, %v3378_v46, %v3393_v30  ;;  %v3400_v29 = vsel %vm3388_vm6, %v3378_v46, %v3381_v58  ;;  %v3401_v44 = vsel %vm3391_vm10, %v3387_v36, 1326507024  ;;  %v3128_v26 = vxor.u32 2147483648, %v9722_v23 }
 0x3bd   :  { %v9759_v16 = vor.u32 %v3222_v52, %v3221_v35  ;;  %v3398_v61 = vsel %vm3390_vm0, %v3381_v58, %v3397_v50  ;;  %v12556_v39 = vand.u32 2147483647, %v9713_v37  ;;  %v4150_v8 = vsub.s32 0, %v9752_v47 }
 0x3be   :  { %v3399_v6 = vsel %vm3389_vm4, %v3396_v32, %v3398_v61  ;;  %v3402_v20 = vsel %vm3390_vm0, %v3384_v38, %v3401_v44  ;;  %v3782_v22 = vadd.s32 1, %v5878_v28  ;;  %v9767_v1 = vor.u32 4788187, %v3226_v17 }
 0x3bf   :  { %v3779_v5 = vand.u32 8388607, %v12556_v39  ;;  %vm5861_vm6 = vcmp.lt.s32.totalorder %v5860_v9, 0  ;;  %v3395_v46 = vsel %vm3389_vm4, %v3392_v21, %v3394_v4  ;;  %v3403_v35 = vsel %vm3389_vm4, %v3400_v29, %v3402_v20 }
 0x3c0   :  { %v9771_v52 = vmul.u32.u64.low %v3404_v56, %v3403_v35  ;;  %v9772_v15 = vmul.u32.u64.high %v3404_v56, %v3403_v35, %v9771_v52  ;;  %v9774_v58 = vmul.u32.u64.low %v3404_v56, %v3399_v6  ;;  %v9775_v53 = vmul.u32.u64.high %v3404_v56, %v3399_v6, %v9774_v58  ;;  %v9820_v35 = vpop.f32.mrb[23].mxu1 }
 0x3c1   :  { %v12557_v36 = vxor.u32 2147483648, %v9639_v54  ;;  %v12559_v38 = vxor.u32 2147483648, %v9678_v48  ;;  %v3780_v17 = vor.u32 8388608, %v3779_v5  ;;  %vm3783_vm10 = vcmp.gt.s32.totalorder %v3782_v22, 0 }
 0x3c2   :  { %v9795_v21 = vsel %vm12301_vm7, %v3128_v26, %v9722_v23  ;;  %v9797_v30 = vsel %vm5861_vm6, 0, %v5860_v9  ;;  %v5891_v32 = vmin.u32 %v4150_v8, %v9752_v47  ;;  %v3308_v4 = vadd.s32 %v9627_v63, %v9625_v2 }
 0x3c3   :  { %v9783_v28 = vsel %vm12308_vm11, %v12557_v36, %v9639_v54  ;;  %v9790_v33 = vsel %vm12307_vm9, %v12559_v38, %v9678_v48  ;;  %12561 = vst [vmem:[#allocation134_spill] sm:$0xff] %v9795_v21  ;;  %v3784_v54 = vsel %vm3783_vm10, %v3782_v22, 0  ;;  %v3411_v50 = vmul.u32 %v3404_v56, %v3395_v46  ;;  %v12562_v48 = vld [vmem:[#allocation118_spill] sm:$0xff] }
 0x3c4   :  { %12558 = vst [vmem:[#allocation132_spill] sm:$0xff] %v9783_v28  ;;  %12560 = vst [vmem:[#allocation133_spill] sm:$0xff] %v9790_v33  ;;  %v3786_v29 = vand.u32 31, %v3784_v54  ;;  %v9804_v44 = vadd.f32 %v12562_v48, %v6585_v41  ;;  %v3230_v39 = vcvt.s32.f32 %v9759_v16  ;;  %vm3413_vm4 = vc.u32 %v9772_v15, %v9774_v58 }
 0x3c5   :  { %v3414_v23 = vadd.s32 1, %v9775_v53  ;;  %v3324_v9 = vsub.s32 32, %v9797_v30  ;;  %v3328_v26 = vsub.s32 4294967266, %v9797_v30  ;;  %v9813_v63 = vshll.u32 %v3780_v17, 8 }
 0x3c6   :  { %v3787_v2 = vsub.s32 32, %v3786_v29  ;;  %v4152_v56 = vclz %v5891_v32  ;;  %v3789_v8 = vshll.u32 %v12373_v55, %v3786_v29  ;;  %v3792_v6 = vshll.u32 %v12381_v49, %v3786_v29 }
 0x3c7   :  { %v3415_v5 = vsel %vm3413_vm4, %v3414_v23, %v9775_v53  ;;  %v3785_v20 = vshrl.u32 %v3784_v54, 5  ;;  %v3795_v22 = vshll.u32 %v12365_v0, %v3786_v29  ;;  %v3567_v46 = vand.u32 2139095040, %v9804_v44 }
 0x3c8   :  { %v3416_v16 = vadd.s32 %v3415_v5, %v3411_v50  ;;  %v3790_v52 = vshrl.u32 %v12381_v49, %v3787_v2  ;;  %v3793_v36 = vshrl.u32 %v12365_v0, %v3787_v2  ;;  %v3796_v38 = vshrl.u32 %v12366_v11, %v3787_v2 }
 0x3c9   :  { %v3798_v53 = vshll.u32 %v12366_v11, %v3786_v29  ;;  %v3326_v17 = vshrl.u32 %v3308_v4, %v3324_v9  ;;  %v3788_v48 = vshrl.u32 %v12373_v55, %v3787_v2  ;;  %v3799_v54 = vshrl.u32 %v12367_v43, %v3787_v2 }
 0x3ca   :  { %v3417_v32 = vadd.s32 536870912, %v3416_v16  ;;  %v3329_v50 = vadd.s32 127, %v3328_v26  ;;  %v3791_v23 = vor.u32 %v3790_v52, %v3789_v8  ;;  %v3794_v5 = vor.u32 %v3793_v36, %v3792_v6 }
 0x3cb   :  { %v3801_v61 = vshll.u32 %v12367_v43, %v3786_v29  ;;  %v5892_v21 = vadd.s32 4294967294, %v4152_v56  ;;  %v3797_v33 = vor.u32 %v3796_v38, %v3795_v22  ;;  %v3800_v10 = vor.u32 %v3799_v54, %v3798_v53 }
 0x3cc   :  { %v9829_v57 = vshrl.u32 %v3417_v32, 30  ;;  %v3802_v28 = vshrl.u32 %v12369_v27, %v3787_v2  ;;  %vm3804_vm0 = vcmp.lt.s32.totalorder %v3785_v20, 1  ;;  %vm3806_vm6 = vcmp.lt.s32.totalorder %v3785_v20, 3 }
 0x3cd   :  { %v3568_v4 = vshrl.u32 %v3567_v46, 23  ;;  %vm3805_vm10 = vcmp.lt.s32.totalorder %v3785_v20, 2  ;;  %vm3807_vm4 = vcmp.lt.s32.totalorder %v3785_v20, 4  ;;  %v3808_v26 = vsel %vm3804_vm0, %v3788_v48, %v3791_v23 }
 0x3ce   :  { %12563 = vst [vmem:[#allocation118_spill] sm:$0xff] %v9829_v57  ;;  %v3419_v9 = vshll.u32 %v9829_v57, 30  ;;  %v3803_v8 = vor.u32 %v3802_v28, %v3801_v61  ;;  %v3809_v6 = vsel %vm3807_vm4, %v3797_v33, 2102212464  ;;  %v3812_v29 = vsel %vm3804_vm0, %v3791_v23, %v3794_v5 }
 0x3cf   :  { %v3813_v56 = vsel %vm3807_vm4, %v3800_v10, 920167782  ;;  %v3330_v52 = vshll.u32 %v3329_v50, 23  ;;  %v3810_v22 = vsel %vm3806_vm6, %v3794_v5, %v3809_v6  ;;  %vm5893_vm7 = vcmp.lt.s32.totalorder %v5892_v21, 0 }
 0x3d0   :  { %v9835_v36 = vsub.s32 %v3416_v16, %v3419_v9  ;;  %v3814_v2 = vsel %vm3806_vm6, %v3797_v33, %v3813_v56  ;;  %v3816_v38 = vsel %vm3804_vm0, %v3794_v5, %v3797_v33  ;;  %v3817_v53 = vsel %vm3807_vm4, %v3803_v8, 1326507024 }
 0x3d1   :  { %v3815_v46 = vsel %vm3805_vm10, %v3812_v29, %v3814_v2  ;;  %v3325_v28 = vshll.u32 %v9680_v62, %v9797_v30  ;;  %v3811_v32 = vsel %vm3805_vm10, %v3808_v26, %v3810_v22  ;;  %v3818_v16 = vsel %vm3806_vm6, %v3800_v10, %v3817_v53 }
 0x3d2   :  { %v3422_v61 = vsub.s32 0, %v9835_v36  ;;  %v3819_v48 = vsel %vm3805_vm10, %v3816_v38, %v3818_v16  ;;  %v9848_v54 = vmul.u32.u64.low %v9813_v63, %v3815_v46  ;;  %v9849_v50 = vmul.u32.u64.high %v9813_v63, %v3815_v46, %v9848_v54 }
 0x3d3   :  { %v5870_v23 = vadd.s32 4294967169, %v3568_v4  ;;  %v9852_v9 = vsel %vm5893_vm7, 0, %v5892_v21  ;;  %v9856_v62 = vmul.u32.u64.low %v9813_v63, %v3819_v48  ;;  %v9857_v30 = vmul.u32.u64.high %v9813_v63, %v3819_v48, %v9856_v62 }
 0x3d4   :  { %v5863_v33 = vmin.u32 %v3422_v61, %v9835_v36  ;;  %v12564_v5 = vand.u32 2147483647, %v9767_v1  ;;  %v9863_v10 = vor.u32 %v3326_v17, %v3325_v28  ;;  %v9865_v20 = vor.u32 4788187, %v3330_v52 }
 0x3d5   :  { %v3574_v8 = vadd.s32 1, %v5870_v23  ;;  %v3827_v6 = vmul.u32 %v9813_v63, %v3811_v32  ;;  %v12302_v21 = vand.u32 2147483647, %v9804_v44  ;;  %v9871_v4 = vadd.f32 %v9349_v14, %v12446_v34 }
 0x3d6   :  { %v9861_v26 = vmul.f32 %v3230_v39, %v12564_v5  ;;  %v9875_v29 = vadd.f32 %v9429_v13, %v6588_v42  ;;  %v4156_v1 = vsub.s32 32, %v9852_v9  ;;  %v3424_v39 = vclz %v5863_v33 }
 0x3d7   :  { %v3830_v17 = vadd.s32 1, %v9849_v50  ;;  %vm3575_vm7 = vcmp.gt.s32.totalorder %v3574_v8, 0  ;;  %v4140_v56 = vadd.s32 %v9685_v24, %v9692_v45  ;;  %v4160_v63 = vsub.s32 4294967266, %v9852_v9 }
 0x3d8   :  { %vm3829_vm0 = vc.u32 %v9857_v30, %v9848_v54  ;;  %v3576_v14 = vsel %vm3575_vm7, %v3574_v8, 0  ;;  %v3332_v52 = vand.u32 2147483647, %v9865_v20  ;;  %v3334_v13 = vcvt.s32.f32 %v9863_v10 }
 0x3d9   :  { %v3831_v22 = vsel %vm3829_vm0, %v3830_v17, %v9849_v50  ;;  %v3578_v2 = vand.u32 31, %v3576_v14  ;;  %v3571_v38 = vand.u32 8388607, %v12302_v21  ;;  %v4711_v24 = vand.u32 2139095040, %v9871_v4 }
 0x3da   :  { %v3832_v46 = vadd.s32 %v3831_v22, %v3827_v6  ;;  %v4157_v45 = vshll.u32 %v9752_v47, %v9852_v9  ;;  %v4158_v28 = vshrl.u32 %v4140_v56, %v4156_v1  ;;  %v5864_v61 = vadd.s32 4294967294, %v3424_v39 }
 0x3db   :  { %v3579_v32 = vsub.s32 32, %v3578_v2  ;;  %v4161_v16 = vadd.s32 127, %v4160_v63  ;;  %v3581_v23 = vshll.u32 %v12373_v55, %v3578_v2  ;;  %v3584_v50 = vshll.u32 %v12381_v49, %v3578_v2 }
 0x3dc   :  { %v3833_v48 = vadd.s32 536870912, %v3832_v46  ;;  %v3577_v33 = vshrl.u32 %v3576_v14, 5  ;;  %v3587_v10 = vshll.u32 %v12365_v0, %v3578_v2  ;;  %v3572_v8 = vor.u32 8388608, %v3571_v38 }
 0x3dd   :  { %v3582_v62 = vshrl.u32 %v12381_v49, %v3579_v32  ;;  %v3585_v5 = vshrl.u32 %v12365_v0, %v3579_v32  ;;  %v3588_v47 = vshrl.u32 %v12366_v11, %v3579_v32  ;;  %v4712_v9 = vshrl.u32 %v4711_v24, 23 }
 0x3de   :  { %v9898_v20 = vshrl.u32 %v3833_v48, 30  ;;  %vm5865_vm6 = vcmp.lt.s32.totalorder %v5864_v61, 0  ;;  %v3580_v6 = vshrl.u32 %v12373_v55, %v3579_v32  ;;  %v3590_v1 = vshll.u32 %v12366_v11, %v3578_v2 }
 0x3df   :  { %v3591_v39 = vshrl.u32 %v12367_v43, %v3579_v32  ;;  %v3583_v56 = vor.u32 %v3582_v62, %v3581_v23  ;;  %v3586_v63 = vor.u32 %v3585_v5, %v3584_v50  ;;  %v3589_v14 = vor.u32 %v3588_v47, %v3587_v10 }
 0x3e0   :  { %v3835_v17 = vshll.u32 %v9898_v20, 30  ;;  %v3593_v48 = vshll.u32 %v12367_v43, %v3578_v2  ;;  %v3594_v38 = vshrl.u32 %v12369_v27, %v3579_v32  ;;  %vm3596_vm10 = vcmp.lt.s32.totalorder %v3577_v33, 1 }
 0x3e1   :  { %v3592_v22 = vor.u32 %v3591_v39, %v3590_v1  ;;  %v4162_v21 = vshll.u32 %v4161_v16, 23  ;;  %v3612_v53 = vshll.u32 %v3572_v8, 8  ;;  %v5914_v57 = vadd.s32 4294967169, %v4712_v9 }
 0x3e2   :  { %v9907_v24 = vsub.s32 %v3832_v46, %v3835_v17  ;;  %v3427_v25 = vsel %vm5865_vm6, 0, %v5864_v61  ;;  %v3595_v51 = vor.u32 %v3594_v38, %v3593_v48  ;;  %vm3598_vm4 = vcmp.lt.s32.totalorder %v3577_v33, 3 }
 0x3e3   :  { %vm3599_vm7 = vcmp.lt.s32.totalorder %v3577_v33, 4  ;;  %vm3597_vm0 = vcmp.lt.s32.totalorder %v3577_v33, 2  ;;  %v3600_v23 = vsel %vm3596_vm10, %v3580_v6, %v3583_v56  ;;  %v3604_v62 = vsel %vm3596_vm10, %v3583_v56, %v3586_v63 }
 0x3e4   :  { %v3601_v50 = vsel %vm3599_vm7, %v3589_v14, 2102212464  ;;  %v3605_v2 = vsel %vm3599_vm7, %v3592_v22, 920167782  ;;  %v3608_v10 = vsel %vm3596_vm10, %v3586_v63, %v3589_v14  ;;  %v3609_v32 = vsel %vm3599_vm7, %v3595_v51, 1326507024 }
 0x3e5   :  { %v3602_v5 = vsel %vm3598_vm4, %v3586_v63, %v3601_v50  ;;  %v9911_v47 = vmul.f32 %v3334_v13, %v3332_v52  ;;  %v9913_v46 = vor.u32 %v4158_v28, %v4157_v45  ;;  %v3838_v16 = vsub.s32 0, %v9907_v24 }
 0x3e6   :  { %v3606_v61 = vsel %vm3598_vm4, %v3589_v14, %v3605_v2  ;;  %v9917_v8 = vor.u32 4788187, %v4162_v21  ;;  %v3610_v6 = vsel %vm3598_vm4, %v3592_v22, %v3609_v32  ;;  %v4718_v1 = vadd.s32 1, %v5914_v57 }
 0x3e7   :  { %v3607_v9 = vsel %vm3597_vm0, %v3604_v62, %v3606_v61  ;;  %v3428_v39 = vsub.s32 32, %v3427_v25  ;;  %v3603_v17 = vsel %vm3597_vm0, %v3600_v23, %v3602_v5  ;;  %v3611_v51 = vsel %vm3597_vm0, %v3608_v10, %v3610_v6 }
 0x3e8   :  { %v12565_v52 = vand.u32 2147483647, %v9871_v4  ;;  %v9925_v45 = vmul.u32.u64.low %v3612_v53, %v3611_v51  ;;  %v9926_v28 = vmul.u32.u64.high %v3612_v53, %v3611_v51, %v9925_v45  ;;  %v3412_v21 = vadd.s32 %v9774_v58, %v9772_v15 }
 0x3e9   :  { %v9928_v56 = vmul.u32.u64.low %v3612_v53, %v3607_v9  ;;  %v9929_v63 = vmul.u32.u64.high %v3612_v53, %v3607_v9, %v9928_v56  ;;  %v3432_v14 = vsub.s32 4294967266, %v3427_v25  ;;  %v5879_v57 = vmin.u32 %v3838_v16, %v9907_v24 }
 0x3ea   :  { %v4715_v13 = vand.u32 8388607, %v12565_v52  ;;  %vm4719_vm6 = vcmp.gt.s32.totalorder %v4718_v1, 0  ;;  %v3232_v33 = vxor.u32 2147483648, %v9861_v26  ;;  %v3336_v22 = vxor.u32 2147483648, %v9911_v47 }
 0x3eb   :  { %v4720_v48 = vsel %vm4719_vm6, %v4718_v1, 0  ;;  %v3671_v38 = vand.u32 2139095040, %v9875_v29  ;;  %v4166_v23 = vcvt.s32.f32 %v9913_v46  ;;  %v3430_v50 = vshrl.u32 %v3412_v21, %v3428_v39 }
 0x3ec   :  { %v3619_v62 = vmul.u32 %v3612_v53, %v3603_v17  ;;  %v4722_v5 = vand.u32 31, %v4720_v48  ;;  %v4164_v2 = vand.u32 2147483647, %v9917_v8  ;;  %vm3621_vm10 = vc.u32 %v9926_v28, %v9928_v56 }
 0x3ed   :  { %v3622_v15 = vadd.s32 1, %v9929_v63  ;;  %v4716_v58 = vor.u32 8388608, %v4715_v13  ;;  %v3429_v10 = vshll.u32 %v9835_v36, %v3427_v25  ;;  %v3433_v32 = vadd.s32 127, %v3432_v14 }
 0x3ee   :  { %v3840_v16 = vclz %v5879_v57  ;;  %v4723_v61 = vsub.s32 32, %v4722_v5  ;;  %v4725_v46 = vshll.u32 %v12373_v55, %v4722_v5  ;;  %v4728_v53 = vshll.u32 %v12381_v49, %v4722_v5 }
 0x3ef   :  { %v3623_v9 = vsel %vm3621_vm10, %v3622_v15, %v9929_v63  ;;  %v3672_v6 = vshrl.u32 %v3671_v38, 23  ;;  %v9947_v1 = vor.u32 %v3430_v50, %v3429_v10  ;;  %v4721_v39 = vshrl.u32 %v4720_v48, 5 }
 0x3f0   :  { %v3624_v8 = vadd.s32 %v3623_v9, %v3619_v62  ;;  %v4731_v17 = vshll.u32 %v12365_v0, %v4722_v5  ;;  %v4726_v51 = vshrl.u32 %v12381_v49, %v4723_v61  ;;  %v4729_v25 = vshrl.u32 %v12365_v0, %v4723_v61 }
 0x3f1   :  { %v4732_v36 = vshrl.u32 %v12366_v11, %v4723_v61  ;;  %v4734_v52 = vshll.u32 %v12366_v11, %v4722_v5  ;;  %v3434_v13 = vshll.u32 %v3433_v32, 23  ;;  %v5880_v45 = vadd.s32 4294967294, %v3840_v16 }
 0x3f2   :  { %v3625_v63 = vadd.s32 536870912, %v3624_v8  ;;  %v4735_v21 = vshrl.u32 %v12367_v43, %v4723_v61  ;;  %v4727_v14 = vor.u32 %v4726_v51, %v4725_v46  ;;  %v4730_v57 = vor.u32 %v4729_v25, %v4728_v53 }
 0x3f3   :  { %v4737_v38 = vshll.u32 %v12367_v43, %v4722_v5  ;;  %v4756_v48 = vshll.u32 %v4716_v58, 8  ;;  %vm12331_vm4 = vcmp.lt.s32.totalorder %v9327_v18, 0  ;;  %vm12314_vm7 = vcmp.lt.s32.totalorder %v9494_v60, 0 }
 0x3f4   :  { %v9958_v50 = vshrl.u32 %v3625_v63, 30  ;;  %v4724_v62 = vshrl.u32 %v12373_v55, %v4723_v61  ;;  %v4733_v15 = vor.u32 %v4732_v36, %v4731_v17  ;;  %v4736_v10 = vor.u32 %v4735_v21, %v4734_v52 }
 0x3f5   :  { %v4738_v32 = vshrl.u32 %v12369_v27, %v4723_v61  ;;  %vm4740_vm0 = vcmp.lt.s32.totalorder %v4721_v39, 1  ;;  %vm4742_vm6 = vcmp.lt.s32.totalorder %v4721_v39, 3  ;;  %v5874_v16 = vadd.s32 4294967169, %v3672_v6 }
 0x3f6   :  { %12566 = vst [vmem:[#allocation135_spill] sm:$0xff] %v9958_v50  ;;  %vm5881_vm10 = vcmp.lt.s32.totalorder %v5880_v45, 0  ;;  %v3627_v9 = vshll.u32 %v9958_v50, 30  ;;  %vm4741_vm9 = vcmp.lt.s32.totalorder %v4721_v39, 2  ;;  %vm4743_vm11 = vcmp.lt.s32.totalorder %v4721_v39, 4 }
 0x3f7   :  { %v4739_v5 = vor.u32 %v4738_v32, %v4737_v38  ;;  %v4745_v58 = vsel %vm4743_vm11, %v4733_v15, 2102212464  ;;  %v4748_v46 = vsel %vm4740_vm0, %v4727_v14, %v4730_v57  ;;  %v4749_v53 = vsel %vm4743_vm11, %v4736_v10, 920167782 }
 0x3f8   :  { %v3435_v51 = vor.u32 4788187, %v3434_v13  ;;  %v4744_v25 = vsel %vm4740_vm0, %v4724_v62, %v4727_v14  ;;  %v4746_v17 = vsel %vm4742_vm6, %v4730_v57, %v4745_v58  ;;  %v4750_v61 = vsel %vm4742_vm6, %v4733_v15, %v4749_v53 }
 0x3f9   :  { %v4751_v36 = vsel %vm4741_vm9, %v4748_v46, %v4750_v61  ;;  %v4752_v6 = vsel %vm4740_vm0, %v4730_v57, %v4733_v15  ;;  %v4753_v52 = vsel %vm4743_vm11, %v4739_v5, 1326507024  ;;  %v3678_v63 = vadd.s32 1, %v5874_v16 }
 0x3fa   :  { %v9969_v21 = vmul.f32 %v4166_v23, %v4164_v2  ;;  %v9972_v38 = vsel %vm5881_vm10, 0, %v5880_v45  ;;  %v9974_v32 = vsub.s32 %v3624_v8, %v3627_v9  ;;  %v4754_v13 = vsel %vm4742_vm6, %v4736_v10, %v4753_v52 }
 0x3fb   :  { %v4747_v14 = vsel %vm4741_vm9, %v4744_v25, %v4746_v17  ;;  %v4755_v62 = vsel %vm4741_vm9, %v4752_v6, %v4754_v13  ;;  %v9979_v58 = vmul.u32.u64.low %v4756_v48, %v4751_v36  ;;  %v9980_v53 = vmul.u32.u64.high %v4756_v48, %v4751_v36, %v9979_v58 }
 0x3fc   :  { %v3436_v57 = vand.u32 2147483647, %v3435_v51  ;;  %v9983_v15 = vmul.u32.u64.low %v4756_v48, %v4755_v62  ;;  %v9984_v16 = vmul.u32.u64.high %v4756_v48, %v4755_v62, %v9983_v15  ;;  %v12309_v23 = vand.u32 2147483647, %v9875_v29 }
 0x3fd   :  { %v9992_v2 = vsel %vm12331_vm4, %v3232_v33, %v9861_v26  ;;  %v9999_v8 = vsel %vm12314_vm7, %v3336_v22, %v9911_v47  ;;  %v3438_v39 = vcvt.s32.f32 %v9947_v1  ;;  %vm3679_vm11 = vcmp.gt.s32.totalorder %v3678_v63, 0 }
 0x3fe   :  { %12567 = vst [vmem:[#allocation136_spill] sm:$0xff] %v9999_v8  ;;  %v3844_v45 = vsub.s32 32, %v9972_v38  ;;  %v3630_v10 = vsub.s32 0, %v9974_v32  ;;  %v4763_v9 = vmul.u32 %v4756_v48, %v4747_v14  ;;  %v3680_v5 = vsel %vm3679_vm11, %v3678_v63, 0 }
 0x3ff   :  { %v3828_v26 = vadd.s32 %v9848_v54, %v9857_v30  ;;  %v4766_v33 = vadd.s32 1, %v9980_v53  ;;  %v3682_v51 = vand.u32 31, %v3680_v5  ;;  %v10008_v25 = vmul.f32 %v3438_v39, %v3436_v57 }
 0x400   :  { %vm4765_vm9 = vc.u32 %v9984_v16, %v9979_v58  ;;  %v3675_v47 = vand.u32 8388607, %v12309_v23  ;;  %v10016_v22 = vadd.f32 %v9510_v3, %v12446_v34  ;;  %v3848_v54 = vsub.s32 4294967266, %v9972_v38 }
 0x401   :  { %v4767_v30 = vsel %vm4765_vm9, %v4766_v33, %v9980_v53  ;;  %v3683_v48 = vsub.s32 32, %v3682_v51  ;;  %v10022_v17 = vshrl.u32 %v3828_v26, %v3844_v45  ;;  %v5871_v61 = vmin.u32 %v3630_v10, %v9974_v32 }
 0x402   :  { %v4768_v36 = vadd.s32 %v4767_v30, %v4763_v9  ;;  %v3685_v6 = vshll.u32 %v12373_v55, %v3682_v51  ;;  %v3688_v3 = vshll.u32 %v12381_v49, %v3682_v51  ;;  %v3694_v13 = vshll.u32 %v12366_v11, %v3682_v51 }
 0x403   :  { %v3686_v52 = vshrl.u32 %v12381_v49, %v3683_v48  ;;  %v3689_v63 = vshrl.u32 %v12365_v0, %v3683_v48  ;;  %v3676_v62 = vor.u32 8388608, %v3675_v47  ;;  %v3681_v57 = vshrl.u32 %v3680_v5, 5 }
 0x404   :  { %v4769_v14 = vadd.s32 536870912, %v4768_v36  ;;  %v3691_v53 = vshll.u32 %v12365_v0, %v3682_v51  ;;  %v3849_v15 = vadd.s32 127, %v3848_v54  ;;  %v3692_v39 = vshrl.u32 %v12366_v11, %v3683_v48 }
 0x405   :  { %v3695_v45 = vshrl.u32 %v12367_v43, %v3683_v48  ;;  %v4399_v10 = vand.u32 2139095040, %v10016_v22  ;;  %v3632_v9 = vclz %v5871_v61  ;;  %v3684_v33 = vshrl.u32 %v12373_v55, %v3683_v48 }
 0x406   :  { %v10034_v26 = vshrl.u32 %v4769_v14, 30  ;;  %v3697_v30 = vshll.u32 %v12367_v43, %v3682_v51  ;;  %vm12318_vm0 = vcmp.lt.s32.totalorder %v9564_v7, 0  ;;  %v3687_v47 = vor.u32 %v3686_v52, %v3685_v6 }
 0x407   :  { %v3690_v5 = vor.u32 %v3689_v63, %v3688_v3  ;;  %v3696_v23 = vor.u32 %v3695_v45, %v3694_v13  ;;  %v3698_v54 = vshrl.u32 %v12369_v27, %v3683_v48  ;;  %v3693_v46 = vor.u32 %v3692_v39, %v3691_v53 }
 0x408   :  { %12568 = vst [vmem:[#allocation137_spill] sm:$0xff] %v10034_v26  ;;  %v4771_v1 = vshll.u32 %v10034_v26, 30  ;;  %vm3700_vm6 = vcmp.lt.s32.totalorder %v3681_v57, 1  ;;  %v3716_v50 = vshll.u32 %v3676_v62, 8  ;;  %vm3702_vm10 = vcmp.lt.s32.totalorder %v3681_v57, 3 }
 0x409   :  { %v3699_v8 = vor.u32 %v3698_v54, %v3697_v30  ;;  %vm3703_vm11 = vcmp.lt.s32.totalorder %v3681_v57, 4  ;;  %v4400_v61 = vshrl.u32 %v4399_v10, 23  ;;  %v5872_v14 = vadd.s32 4294967294, %v3632_v9 }
 0x40a   :  { %v10041_v60 = vsub.s32 %v4768_v36, %v4771_v1  ;;  %vm3701_vm9 = vcmp.lt.s32.totalorder %v3681_v57, 2  ;;  %v3705_v51 = vsel %vm3703_vm11, %v3693_v46, 2102212464  ;;  %v3704_v6 = vsel %vm3700_vm6, %v3684_v33, %v3687_v47 }
 0x40b   :  { %v3706_v52 = vsel %vm3702_vm10, %v3690_v5, %v3705_v51  ;;  %v3708_v48 = vsel %vm3700_vm6, %v3687_v47, %v3690_v5  ;;  %v3709_v3 = vsel %vm3703_vm11, %v3696_v23, 920167782  ;;  %v3850_v63 = vshll.u32 %v3849_v15, 23 }
 0x40c   :  { %v4774_v13 = vsub.s32 0, %v10041_v60  ;;  %v3710_v62 = vsel %vm3702_vm10, %v3693_v46, %v3709_v3  ;;  %v3712_v53 = vsel %vm3700_vm6, %v3690_v5, %v3693_v46  ;;  %v3713_v1 = vsel %vm3703_vm11, %v3699_v8, 1326507024 }
 0x40d   :  { %v3711_v39 = vsel %vm3701_vm9, %v3708_v48, %v3710_v62  ;;  %v12315_v36 = vand.u32 2147483647, %v10016_v22  ;;  %v5902_v45 = vadd.s32 4294967169, %v4400_v61  ;;  %vm5873_vm7 = vcmp.lt.s32.totalorder %v5872_v14, 0 }
 0x40e   :  { %v5915_v10 = vmin.u32 %v4774_v13, %v10041_v60  ;;  %v3707_v9 = vsel %vm3701_vm9, %v3704_v6, %v3706_v52  ;;  %v3714_v33 = vsel %vm3702_vm10, %v3696_v23, %v3713_v1  ;;  %v12569_v8 = vxor.u32 2147483648, %v9969_v21 }
 0x40f   :  { %v3715_v15 = vsel %vm3701_vm9, %v3712_v53, %v3714_v33  ;;  %v10055_v30 = vmul.u32.u64.low %v3716_v50, %v3711_v39  ;;  %v10056_v47 = vmul.u32.u64.high %v3716_v50, %v3711_v39, %v10055_v30  ;;  %v4406_v46 = vadd.s32 1, %v5902_v45 }
 0x410   :  { %v10064_v5 = vsel %vm12318_vm0, %v12569_v8, %v9969_v21  ;;  %v10066_v54 = vor.u32 4788187, %v3850_v63  ;;  %v10068_v61 = vmul.u32.u64.low %v3716_v50, %v3715_v15  ;;  %v10069_v51 = vmul.u32.u64.high %v3716_v50, %v3715_v15, %v10068_v61 }
 0x411   :  { %12570 = vst [vmem:[#allocation138_spill] sm:$0xff] %v10064_v5  ;;  %v10072_v57 = vsel %vm5873_vm7, 0, %v5872_v14  ;;  %v4403_v6 = vand.u32 8388607, %v12315_v36  ;;  %vm4407_vm6 = vcmp.gt.s32.totalorder %v4406_v46, 0  ;;  %v4776_v52 = vclz %v5915_v10 }
 0x412   :  { %v3723_v48 = vmul.u32 %v3716_v50, %v3707_v9  ;;  %v4408_v3 = vsel %vm4407_vm6, %v4406_v46, 0  ;;  %v10078_v21 = vadd.f32 %v9596_v40, %v6585_v41  ;;  %v12571_v63 = vshll.u32 %v9907_v24, %v9972_v38 }
 0x413   :  { %v3620_v14 = vadd.s32 %v9928_v56, %v9926_v28  ;;  %v3726_v62 = vadd.s32 1, %v10056_v47  ;;  %v4410_v53 = vand.u32 31, %v4408_v3  ;;  %v3640_v50 = vsub.s32 4294967266, %v10072_v57 }
 0x414   :  { %v10084_v13 = vor.u32 %v10022_v17, %v12571_v63  ;;  %vm3725_vm7 = vc.u32 %v10069_v51, %v10055_v30  ;;  %v10096_v40 = vadd.s32 %v9979_v58, %v9984_v16  ;;  %v4404_v38 = vor.u32 8388608, %v4403_v6 }
 0x415   :  { %v3727_v24 = vsel %vm3725_vm7, %v3726_v62, %v10056_v47  ;;  %v4411_v28 = vsub.s32 32, %v4410_v53  ;;  %v3636_v56 = vsub.s32 32, %v10072_v57  ;;  %v5916_v1 = vadd.s32 4294967294, %v4776_v52 }
 0x416   :  { %v3728_v45 = vadd.s32 %v3727_v24, %v3723_v48  ;;  %v4413_v10 = vshll.u32 %v12373_v55, %v4410_v53  ;;  %v4416_v33 = vshll.u32 %v12381_v49, %v4410_v53  ;;  %v3641_v16 = vadd.s32 127, %v3640_v50 }
 0x417   :  { %v4414_v9 = vshrl.u32 %v12381_v49, %v4411_v28  ;;  %v4417_v58 = vshrl.u32 %v12365_v0, %v4411_v28  ;;  %v4409_v47 = vshrl.u32 %v4408_v3, 5  ;;  %v4419_v46 = vshll.u32 %v12365_v0, %v4410_v53 }
 0x418   :  { %v3729_v15 = vadd.s32 536870912, %v3728_v45  ;;  %v4420_v8 = vshrl.u32 %v12366_v11, %v4411_v28  ;;  %v4422_v61 = vshll.u32 %v12366_v11, %v4410_v53  ;;  %v10109_v6 = vshll.u32 %v4404_v38, 8 }
 0x419   :  { %v3879_v52 = vand.u32 2139095040, %v10078_v21  ;;  %vm5917_vm10 = vcmp.lt.s32.totalorder %v5916_v1, 0  ;;  %v4412_v63 = vshrl.u32 %v12373_v55, %v4411_v28  ;;  %v4423_v62 = vshrl.u32 %v12367_v43, %v4411_v28 }
 0x41a   :  { %v10112_v48 = vshrl.u32 %v3729_v15, 30  ;;  %v4415_v50 = vor.u32 %v4414_v9, %v4413_v10  ;;  %v4418_v24 = vor.u32 %v4417_v58, %v4416_v33  ;;  %v4425_v3 = vshll.u32 %v12367_v43, %v4410_v53 }
 0x41b   :  { %v4426_v36 = vshrl.u32 %v12369_v27, %v4411_v28  ;;  %v4421_v39 = vor.u32 %v4420_v8, %v4419_v46  ;;  %v4424_v38 = vor.u32 %v4423_v62, %v4422_v61  ;;  %vm4428_vm11 = vcmp.lt.s32.totalorder %v4409_v47, 1 }
 0x41c   :  { %12572 = vst [vmem:[#allocation139_spill] sm:$0xff] %v10112_v48  ;;  %v3731_v17 = vshll.u32 %v10112_v48, 30  ;;  %vm4430_vm9 = vcmp.lt.s32.totalorder %v4409_v47, 3  ;;  %vm4431_vm6 = vcmp.lt.s32.totalorder %v4409_v47, 4  ;;  %v3880_v15 = vshrl.u32 %v3879_v52, 23 }
 0x41d   :  { %v4427_v23 = vor.u32 %v4426_v36, %v4425_v3  ;;  %vm12325_vm7 = vcmp.lt.s32.totalorder %v9634_v19, 0  ;;  %v4779_v41 = vsel %vm5917_vm10, 0, %v5916_v1  ;;  %vm4429_vm0 = vcmp.lt.s32.totalorder %v4409_v47, 2 }
 0x41e   :  { %v10121_v26 = vsub.s32 %v3728_v45, %v3731_v17  ;;  %v4433_v53 = vsel %vm4431_vm6, %v4421_v39, 2102212464  ;;  %v4432_v28 = vsel %vm4428_vm11, %v4412_v63, %v4415_v50  ;;  %v4436_v9 = vsel %vm4428_vm11, %v4415_v50, %v4418_v24 }
 0x41f   :  { %v4434_v10 = vsel %vm4430_vm9, %v4418_v24, %v4433_v53  ;;  %v4437_v36 = vsel %vm4431_vm6, %v4424_v38, 920167782  ;;  %v3642_v33 = vshll.u32 %v3641_v16, 23  ;;  %v4440_v1 = vsel %vm4428_vm11, %v4418_v24, %v4421_v39 }
 0x420   :  { %v3734_v58 = vsub.s32 0, %v10121_v26  ;;  %v4438_v46 = vsel %vm4430_vm9, %v4421_v39, %v4437_v36  ;;  %v4784_v17 = vsub.s32 4294967266, %v4779_v41  ;;  %v4441_v8 = vsel %vm4431_vm6, %v4427_v23, 1326507024 }
 0x421   :  { %v4439_v45 = vsel %vm4429_vm0, %v4436_v9, %v4438_v46  ;;  %v5882_v61 = vadd.s32 4294967169, %v3880_v15  ;;  %v3638_v52 = vshrl.u32 %v3620_v14, %v3636_v56  ;;  %v4435_v62 = vsel %vm4429_vm0, %v4432_v28, %v4434_v10 }
 0x422   :  { %v5875_v63 = vmin.u32 %v3734_v58, %v10121_v26  ;;  %v4442_v50 = vsel %vm4430_vm9, %v4424_v38, %v4441_v8  ;;  %v10138_v3 = vmul.u32.u64.low %v10109_v6, %v4439_v45  ;;  %v10139_v53 = vmul.u32.u64.high %v10109_v6, %v4439_v45, %v10138_v3 }
 0x423   :  { %v4443_v16 = vsel %vm4429_vm0, %v4440_v1, %v4442_v50  ;;  %v3886_v39 = vadd.s32 1, %v5882_v61  ;;  %v4780_v24 = vsub.s32 32, %v4779_v41  ;;  %v3854_v14 = vcvt.s32.f32 %v10084_v13 }
 0x424   :  { %v3736_v9 = vclz %v5875_v63  ;;  %v10143_v23 = vmul.u32.u64.low %v10109_v6, %v4443_v16  ;;  %v10144_v15 = vmul.u32.u64.high %v10109_v6, %v4443_v16, %v10143_v23  ;;  %v10147_v56 = vor.u32 4788187, %v3642_v33 }
 0x425   :  { %v4785_v28 = vadd.s32 127, %v4784_v17  ;;  %vm3887_vm10 = vcmp.gt.s32.totalorder %v3886_v39, 0  ;;  %v4451_v38 = vmul.u32 %v10109_v6, %v4435_v62  ;;  %v12573_v10 = vand.u32 2147483647, %v10078_v21 }
 0x426   :  { %v5876_v47 = vadd.s32 4294967294, %v3736_v9  ;;  %v3888_v58 = vsel %vm3887_vm10, %v3886_v39, 0  ;;  %v12574_v46 = vxor.u32 2147483648, %v10008_v25  ;;  %v12575_v13 = vand.u32 2147483647, %v10066_v54 }
 0x427   :  { %v3883_v36 = vand.u32 8388607, %v12573_v10  ;;  %v4454_v17 = vadd.s32 1, %v10139_v53  ;;  %v3890_v45 = vand.u32 31, %v3888_v58  ;;  %v12576_v6 = vshll.u32 %v9974_v32, %v10072_v57 }
 0x428   :  { %v10157_v1 = vsel %vm12325_vm7, %v12574_v46, %v10008_v25  ;;  %v10161_v33 = vmul.f32 %v3854_v14, %v12575_v13  ;;  %v4781_v61 = vshll.u32 %v10041_v60, %v4779_v41  ;;  %v4782_v63 = vshrl.u32 %v10096_v40, %v4780_v24 }
 0x429   :  { %v10167_v8 = vor.u32 %v3638_v52, %v12576_v6  ;;  %vm4453_vm0 = vc.u32 %v10144_v15, %v10138_v3  ;;  %v3644_v25 = vand.u32 2147483647, %v10147_v56  ;;  %v4786_v54 = vshll.u32 %v4785_v28, 23 }
 0x42a   :  { %v4455_v62 = vsel %vm4453_vm0, %v4454_v17, %v10139_v53  ;;  %v3891_v50 = vsub.s32 32, %v3890_v45  ;;  %v3724_v16 = vadd.s32 %v10055_v30, %v10069_v51  ;;  %vm5877_vm11 = vcmp.lt.s32.totalorder %v5876_v47, 0 }
 0x42b   :  { %v4456_v32 = vadd.s32 %v4455_v62, %v4451_v38  ;;  %v3884_v57 = vor.u32 8388608, %v3883_v36  ;;  %v3893_v52 = vshll.u32 %v12373_v55, %v3890_v45  ;;  %v3896_v41 = vshll.u32 %v12381_v49, %v3890_v45 }
 0x42c   :  { %v3894_v60 = vshrl.u32 %v12381_v49, %v3891_v50  ;;  %v3897_v40 = vshrl.u32 %v12365_v0, %v3891_v50  ;;  %v10181_v39 = vor.u32 %v4782_v63, %v4781_v61  ;;  %v3889_v9 = vshrl.u32 %v3888_v58, 5 }
 0x42d   :  { %v4457_v24 = vadd.s32 536870912, %v4456_v32  ;;  %v3899_v53 = vshll.u32 %v12365_v0, %v3890_v45  ;;  %v10184_v23 = vor.u32 4788187, %v4786_v54  ;;  %v3900_v30 = vshrl.u32 %v12366_v11, %v3891_v50 }
 0x42e   :  { %v3902_v51 = vshll.u32 %v12366_v11, %v3890_v45  ;;  %v10190_v14 = vadd.f32 %v9654_v59, %v12446_v34  ;;  %v3739_v28 = vsel %vm5877_vm11, 0, %v5876_v47  ;;  %v3892_v10 = vshrl.u32 %v12373_v55, %v3891_v50 }
 0x42f   :  { %v10192_v38 = vshrl.u32 %v4457_v24, 30  ;;  %v3903_v36 = vshrl.u32 %v12367_v43, %v3891_v50  ;;  %v3895_v58 = vor.u32 %v3894_v60, %v3893_v52  ;;  %v3898_v46 = vor.u32 %v3897_v40, %v3896_v41 }
 0x430   :  { %12577 = vst [vmem:[#allocation140_spill] sm:$0xff] %v10190_v14  ;;  %v3905_v13 = vshll.u32 %v12367_v43, %v3890_v45  ;;  %v3906_v17 = vshrl.u32 %v12369_v27, %v3891_v50  ;;  %v3901_v61 = vor.u32 %v3900_v30, %v3899_v53  ;;  %vm3908_vm9 = vcmp.lt.s32.totalorder %v3889_v9, 1 }
 0x431   :  { %12578 = vst [vmem:[#allocation141_spill] sm:$0xff] %v10192_v38  ;;  %v4459_v6 = vshll.u32 %v10192_v38, 30  ;;  %v3904_v63 = vor.u32 %v3903_v36, %v3902_v51  ;;  %v3744_v59 = vsub.s32 4294967266, %v3739_v28  ;;  %vm3910_vm6 = vcmp.lt.s32.totalorder %v3889_v9, 3 }
 0x432   :  { %v3907_v54 = vor.u32 %v3906_v17, %v3905_v13  ;;  %vm3911_vm10 = vcmp.lt.s32.totalorder %v3889_v9, 4  ;;  %vm3909_vm0 = vcmp.lt.s32.totalorder %v3889_v9, 2  ;;  %v3924_v24 = vshll.u32 %v3884_v57, 8 }
 0x433   :  { %v10199_v47 = vsub.s32 %v4456_v32, %v4459_v6  ;;  %v3913_v62 = vsel %vm3911_vm10, %v3901_v61, 2102212464  ;;  %v3912_v52 = vsel %vm3908_vm9, %v3892_v10, %v3895_v58  ;;  %v3916_v50 = vsel %vm3908_vm9, %v3895_v58, %v3898_v46 }
 0x434   :  { %v3914_v45 = vsel %vm3910_vm6, %v3898_v46, %v3913_v62  ;;  %v3917_v60 = vsel %vm3911_vm10, %v3904_v63, 920167782  ;;  %v3740_v41 = vsub.s32 32, %v3739_v28  ;;  %v3920_v30 = vsel %vm3908_vm9, %v3898_v46, %v3901_v61 }
 0x435   :  { %v4462_v40 = vsub.s32 0, %v10199_v47  ;;  %v3918_v53 = vsel %vm3910_vm6, %v3901_v61, %v3917_v60  ;;  %v3745_v51 = vadd.s32 127, %v3744_v59  ;;  %v3921_v36 = vsel %vm3911_vm10, %v3907_v54, 1326507024 }
 0x436   :  { %v3919_v32 = vsel %vm3909_vm0, %v3916_v50, %v3918_v53  ;;  %v5335_v57 = vand.u32 2139095040, %v10190_v14  ;;  %v3915_v13 = vsel %vm3909_vm0, %v3912_v52, %v3914_v45  ;;  %v3922_v58 = vsel %vm3910_vm6, %v3904_v63, %v3921_v36 }
 0x437   :  { %v5903_v10 = vmin.u32 %v4462_v40, %v10199_v47  ;;  %v12319_v17 = vand.u32 2147483647, %v10190_v14  ;;  %v3923_v6 = vsel %vm3909_vm0, %v3920_v30, %v3922_v58  ;;  %v10223_v50 = vadd.f32 %v9744_v31, %v6588_v42 }
 0x438   :  { %v10214_v62 = vmul.u32.u64.low %v3924_v24, %v3919_v32  ;;  %v10215_v60 = vmul.u32.u64.high %v3924_v24, %v3919_v32, %v10214_v62  ;;  %v5336_v46 = vshrl.u32 %v5335_v57, 23  ;;  %v3741_v52 = vshll.u32 %v10121_v26, %v3739_v28 }
 0x439   :  { %v4464_v61 = vclz %v5903_v10  ;;  %v10218_v59 = vmul.u32.u64.low %v3924_v24, %v3923_v6  ;;  %v10219_v54 = vmul.u32.u64.high %v3924_v24, %v3923_v6, %v10218_v59  ;;  %v3742_v63 = vshrl.u32 %v3724_v16, %v3740_v41 }
 0x43a   :  { %v3746_v45 = vshll.u32 %v3745_v51, 23  ;;  %v5938_v40 = vadd.s32 4294967169, %v5336_v46  ;;  %v3931_v53 = vmul.u32 %v3924_v24, %v3915_v13  ;;  %v5339_v30 = vand.u32 8388607, %v12319_v17 }
 0x43b   :  { %v5904_v9 = vadd.s32 4294967294, %v4464_v61  ;;  %v12320_v32 = vand.u32 2147483647, %v10223_v50  ;;  %v4788_v36 = vand.u32 2147483647, %v10184_v23  ;;  %v4790_v57 = vcvt.s32.f32 %v10181_v39 }
 0x43c   :  { %v3934_v10 = vadd.s32 1, %v10215_v60  ;;  %v5342_v42 = vadd.s32 1, %v5938_v40  ;;  %v3646_v31 = vcvt.s32.f32 %v10167_v8  ;;  %vm3933_vm9 = vc.u32 %v10219_v54, %v10214_v62 }
 0x43d   :  { %vm5905_vm11 = vcmp.lt.s32.totalorder %v5904_v9, 0  ;;  %v3983_v26 = vand.u32 2139095040, %v10223_v50  ;;  %v10236_v16 = vor.u32 %v3742_v63, %v3741_v52  ;;  %v10238_v28 = vor.u32 4788187, %v3746_v45 }
 0x43e   :  { %v3935_v24 = vsel %vm3933_vm9, %v3934_v10, %v10215_v60  ;;  %vm5343_vm6 = vcmp.gt.s32.totalorder %v5342_v42, 0  ;;  %v5340_v41 = vor.u32 8388608, %v5339_v30  ;;  %v10244_v8 = vand.u32 8388607, %v12320_v32 }
 0x43f   :  { %v3936_v23 = vadd.s32 %v3935_v24, %v3931_v53  ;;  %v10248_v51 = vmul.f32 %v3646_v31, %v3644_v25  ;;  %v10250_v13 = vmul.f32 %v4790_v57, %v4788_v36  ;;  %v10252_v58 = vsel %vm5905_vm11, 0, %v5904_v9 }
 0x440   :  { %v5344_v6 = vsel %vm5343_vm6, %v5342_v42, 0  ;;  %v4452_v60 = vadd.s32 %v10138_v3, %v10144_v15  ;;  %v3984_v61 = vshrl.u32 %v3983_v26, 23  ;;  %v10258_v59 = vadd.f32 %v9820_v35, %v12446_v34 }
 0x441   :  { %v3937_v46 = vadd.s32 536870912, %v3936_v23  ;;  %v5345_v25 = vshrl.u32 %v5344_v6, 5  ;;  %v5346_v63 = vand.u32 31, %v5344_v6  ;;  %v4468_v45 = vsub.s32 32, %v10252_v58 }
 0x442   :  { %v10265_v9 = vshll.u32 %v5340_v41, 8  ;;  %v4472_v30 = vsub.s32 4294967266, %v10252_v58  ;;  %v5886_v10 = vadd.s32 4294967169, %v3984_v61  ;;  %vm12330_vm0 = vcmp.lt.s32.totalorder %v9713_v37, 0 }
 0x443   :  { %v10263_v40 = vshrl.u32 %v3937_v46, 30  ;;  %v5347_v15 = vsub.s32 32, %v5346_v63  ;;  %v5349_v53 = vshll.u32 %v12373_v55, %v5346_v63  ;;  %v5352_v34 = vshll.u32 %v12381_v49, %v5346_v63 }
 0x444   :  { %v5355_v35 = vshll.u32 %v12365_v0, %v5346_v63  ;;  %v5358_v57 = vshll.u32 %v12366_v11, %v5346_v63  ;;  %vm5364_vm10 = vcmp.lt.s32.totalorder %v5345_v25, 1  ;;  %v5361_v46 = vshll.u32 %v12367_v43, %v5346_v63 }
 0x445   :  { %12579 = vst [vmem:[#allocation142_spill] sm:$0xff] %v10263_v40  ;;  %v3939_v36 = vshll.u32 %v10263_v40, 30  ;;  %v5350_v42 = vshrl.u32 %v12381_v49, %v5347_v15  ;;  %v5353_v31 = vshrl.u32 %v12365_v0, %v5347_v15  ;;  %v5356_v26 = vshrl.u32 %v12366_v11, %v5347_v15 }
 0x446   :  { %v5348_v41 = vshrl.u32 %v12373_v55, %v5347_v15  ;;  %v5359_v6 = vshrl.u32 %v12367_v43, %v5347_v15  ;;  %v5362_v3 = vshrl.u32 %v12369_v27, %v5347_v15  ;;  %v4473_v56 = vadd.s32 127, %v4472_v30 }
 0x447   :  { %v10277_v24 = vsub.s32 %v3936_v23, %v3939_v36  ;;  %v5351_v17 = vor.u32 %v5350_v42, %v5349_v53  ;;  %v5354_v32 = vor.u32 %v5353_v31, %v5352_v34  ;;  %v5357_v61 = vor.u32 %v5356_v26, %v5355_v35 }
 0x448   :  { %v5360_v39 = vor.u32 %v5359_v6, %v5358_v57  ;;  %v3990_v40 = vadd.s32 1, %v5886_v10  ;;  %v5363_v23 = vor.u32 %v5362_v3, %v5361_v46  ;;  %vm5365_vm11 = vcmp.lt.s32.totalorder %v5345_v25, 2 }
 0x449   :  { %v3942_v52 = vsub.s32 0, %v10277_v24  ;;  %vm5366_vm9 = vcmp.lt.s32.totalorder %v5345_v25, 3  ;;  %vm5367_vm6 = vcmp.lt.s32.totalorder %v5345_v25, 4  ;;  %v5368_v63 = vsel %vm5364_vm10, %v5348_v41, %v5351_v17 }
 0x44a   :  { %v5369_v48 = vsel %vm5367_vm6, %v5357_v61, 2102212464  ;;  %v5372_v53 = vsel %vm5364_vm10, %v5351_v17, %v5354_v32  ;;  %v5373_v35 = vsel %vm5367_vm6, %v5360_v39, 920167782  ;;  %v5376_v15 = vsel %vm5364_vm10, %v5354_v32, %v5357_v61 }
 0x44b   :  { %v5883_v36 = vmin.u32 %v3942_v52, %v10277_v24  ;;  %v5370_v34 = vsel %vm5366_vm9, %v5354_v32, %v5369_v48  ;;  %v5377_v30 = vsel %vm5367_vm6, %v5363_v23, 1326507024  ;;  %v4469_v57 = vshll.u32 %v10199_v47, %v10252_v58 }
 0x44c   :  { %v4470_v3 = vshrl.u32 %v4452_v60, %v4468_v45  ;;  %v5374_v10 = vsel %vm5366_vm9, %v5357_v61, %v5373_v35  ;;  %v5023_v42 = vand.u32 2139095040, %v10258_v59  ;;  %v4474_v52 = vshll.u32 %v4473_v56, 23 }
 0x44d   :  { %v5375_v31 = vsel %vm5365_vm11, %v5372_v53, %v5374_v10  ;;  %v5378_v26 = vsel %vm5366_vm9, %v5360_v39, %v5377_v30  ;;  %vm3991_vm7 = vcmp.gt.s32.totalorder %v3990_v40, 0  ;;  %v5371_v48 = vsel %vm5365_vm11, %v5368_v63, %v5370_v34  ;;  %v12583_v53 = vld [vmem:[#allocation20_spill] sm:$0xff] }
 0x44e   :  { %v5379_v17 = vsel %vm5365_vm11, %v5376_v15, %v5378_v26  ;;  %v10299_v32 = vmul.u32.u64.low %v10265_v9, %v5375_v31  ;;  %v10300_v41 = vmul.u32.u64.high %v10265_v9, %v5375_v31, %v10299_v32  ;;  %v3944_v47 = vclz %v5883_v36 }
 0x44f   :  { %v10304_v58 = vmul.u32.u64.low %v10265_v9, %v5379_v17  ;;  %v10305_v60 = vmul.u32.u64.high %v10265_v9, %v5379_v17, %v10304_v58  ;;  %v3992_v56 = vsel %vm3991_vm7, %v3990_v40, 0  ;;  %v12580_v45 = vxor.u32 2147483648, %v10161_v33 }
 0x450   :  { %v4471_v6 = vor.u32 %v4470_v3, %v4469_v57  ;;  %v3994_v46 = vand.u32 31, %v3992_v56  ;;  %v12581_v23 = vand.u32 2147483647, %v10238_v28  ;;  %v12582_v36 = vcvt.s32.f32 %v10236_v16 }
 0x451   :  { %v10312_v39 = vsel %vm12330_vm0, %v12580_v45, %v10161_v33  ;;  %v5387_v40 = vmul.u32 %v10265_v9, %v5371_v48  ;;  %v4475_v35 = vor.u32 4788187, %v4474_v52  ;;  %v5390_v33 = vadd.s32 1, %v10300_v41 }
 0x452   :  { %v10320_v63 = vmul.f32 %v12582_v36, %v12581_v23  ;;  %v5024_v30 = vshrl.u32 %v5023_v42, 23  ;;  %v5884_v57 = vadd.s32 4294967294, %v3944_v47  ;;  %vm5389_vm7 = vc.u32 %v10305_v60, %v10299_v32 }
 0x453   :  { %v3995_v3 = vsub.s32 32, %v3994_v46  ;;  %v12584_v28 = vor.u32 8388608, %v10244_v8  ;;  %v4478_v10 = vcvt.s32.f32 %v4471_v6  ;;  %v5391_v9 = vsel %vm5389_vm7, %v5390_v33, %v10300_v41 }
 0x454   :  { %v3997_v31 = vshll.u32 %v12373_v55, %v3994_v46  ;;  %v4000_v52 = vshll.u32 %v12381_v49, %v3994_v46  ;;  %v5392_v26 = vadd.s32 %v5391_v9, %v5387_v40  ;;  %v3993_v48 = vshrl.u32 %v3992_v56, 5 }
 0x455   :  { %v10330_v16 = vshll.u32 %v12584_v28, 8  ;;  %v3998_v42 = vshrl.u32 %v12381_v49, %v3995_v3  ;;  %v4001_v17 = vshrl.u32 %v12365_v0, %v3995_v3  ;;  %v4476_v47 = vand.u32 2147483647, %v4475_v35 }
 0x456   :  { %v4003_v58 = vshll.u32 %v12365_v0, %v3994_v46  ;;  %v4004_v8 = vshrl.u32 %v12366_v11, %v3995_v3  ;;  %v5926_v45 = vadd.s32 4294967169, %v5024_v30  ;;  %vm5885_vm10 = vcmp.lt.s32.totalorder %v5884_v57, 0 }
 0x457   :  { %v5393_v6 = vadd.s32 536870912, %v5392_v26  ;;  %v3996_v41 = vshrl.u32 %v12373_v55, %v3995_v3  ;;  %v4006_v23 = vshll.u32 %v12366_v11, %v3994_v46  ;;  %v3999_v36 = vor.u32 %v3998_v42, %v3997_v31 }
 0x458   :  { %v4002_v33 = vor.u32 %v4001_v17, %v4000_v52  ;;  %v4005_v40 = vor.u32 %v4004_v8, %v4003_v58  ;;  %v4007_v56 = vshrl.u32 %v12367_v43, %v3995_v3  ;;  %v4009_v35 = vshll.u32 %v12367_v43, %v3994_v46 }
 0x459   :  { %v10342_v28 = vshrl.u32 %v5393_v6, 30  ;;  %v4010_v9 = vshrl.u32 %v12369_v27, %v3995_v3  ;;  %vm4012_vm11 = vcmp.lt.s32.totalorder %v3993_v48, 1  ;;  %v10346_v61 = vsel %vm5885_vm10, 0, %v5884_v57 }
 0x45a   :  { %v4008_v30 = vor.u32 %v4007_v56, %v4006_v23  ;;  %vm4014_vm9 = vcmp.lt.s32.totalorder %v3993_v48, 3  ;;  %v5030_v25 = vadd.s32 1, %v5926_v45  ;;  %vm4013_vm6 = vcmp.lt.s32.totalorder %v3993_v48, 2 }
 0x45b   :  { %12585 = vst [vmem:[#allocation20_spill] sm:$0xff] %v10342_v28  ;;  %v5395_v34 = vshll.u32 %v10342_v28, 30  ;;  %v4011_v15 = vor.u32 %v4010_v9, %v4009_v35  ;;  %vm4015_vm7 = vcmp.lt.s32.totalorder %v3993_v48, 4  ;;  %v4016_v31 = vsel %vm4012_vm11, %v3996_v41, %v3999_v36 }
 0x45c   :  { %v4017_v52 = vsel %vm4015_vm7, %v4005_v40, 2102212464  ;;  %v4020_v42 = vsel %vm4012_vm11, %v3999_v36, %v4002_v33  ;;  %v4021_v17 = vsel %vm4015_vm7, %v4008_v30, 920167782  ;;  %v4024_v58 = vsel %vm4012_vm11, %v4002_v33, %v4005_v40 }
 0x45d   :  { %v10351_v46 = vsub.s32 %v5392_v26, %v5395_v34  ;;  %v4018_v3 = vsel %vm4014_vm9, %v4002_v33, %v4017_v52  ;;  %v4022_v57 = vsel %vm4014_vm9, %v4005_v40, %v4021_v17  ;;  %v10356_v8 = vmul.f32 %v4478_v10, %v4476_v47 }
 0x45e   :  { %v4023_v45 = vsel %vm4013_vm6, %v4020_v42, %v4022_v57  ;;  %v4025_v6 = vsel %vm4015_vm7, %v4011_v15, 1326507024  ;;  %v12586_v23 = vand.u32 2147483647, %v10258_v59  ;;  %v3952_v35 = vsub.s32 4294967266, %v10346_v61 }
 0x45f   :  { %v5398_v56 = vsub.s32 0, %v10351_v46  ;;  %v4026_v36 = vsel %vm4014_vm9, %v4008_v30, %v4025_v6  ;;  %v10364_v34 = vmul.u32.u64.low %v10330_v16, %v4023_v45  ;;  %v10365_v26 = vmul.u32.u64.high %v10330_v16, %v4023_v45, %v10364_v34 }
 0x460   :  { %v5027_v41 = vand.u32 8388607, %v12586_v23  ;;  %v4019_v10 = vsel %vm4013_vm6, %v4016_v31, %v4018_v3  ;;  %v4027_v47 = vsel %vm4013_vm6, %v4024_v58, %v4026_v36  ;;  %vm5031_vm10 = vcmp.gt.s32.totalorder %v5030_v25, 0 }
 0x461   :  { %v5939_v15 = vmin.u32 %v5398_v56, %v10351_v46  ;;  %v10373_v33 = vmul.u32.u64.low %v10330_v16, %v4027_v47  ;;  %v10374_v40 = vmul.u32.u64.high %v10330_v16, %v4027_v47, %v10373_v33  ;;  %v5032_v9 = vsel %vm5031_vm10, %v5030_v25, 0 }
 0x462   :  { %v3932_v42 = vadd.s32 %v10214_v62, %v10219_v54  ;;  %v5034_v17 = vand.u32 31, %v5032_v9  ;;  %v4035_v48 = vmul.u32 %v10330_v16, %v4019_v10  ;;  %v4038_v31 = vadd.s32 1, %v10365_v26 }
 0x463   :  { %v5400_v57 = vclz %v5939_v15  ;;  %v5028_v3 = vor.u32 8388608, %v5027_v41  ;;  %v3948_v58 = vsub.s32 32, %v10346_v61  ;;  %v3953_v45 = vadd.s32 127, %v3952_v35 }
 0x464   :  { %v5033_v6 = vshrl.u32 %v5032_v9, 5  ;;  %v5035_v23 = vsub.s32 32, %v5034_v17  ;;  %vm4037_vm11 = vc.u32 %v10374_v40, %v10364_v34  ;;  %v5037_v25 = vshll.u32 %v12373_v55, %v5034_v17 }
 0x465   :  { %v5040_v56 = vshll.u32 %v12381_v49, %v5034_v17  ;;  %v5043_v62 = vshll.u32 %v12365_v0, %v5034_v17  ;;  %v4039_v54 = vsel %vm4037_vm11, %v4038_v31, %v10365_v26  ;;  %v5046_v36 = vshll.u32 %v12366_v11, %v5034_v17 }
 0x466   :  { %v5038_v16 = vshrl.u32 %v12381_v49, %v5035_v23  ;;  %v5041_v41 = vshrl.u32 %v12365_v0, %v5035_v23  ;;  %v5940_v35 = vadd.s32 4294967294, %v5400_v57  ;;  %v4040_v10 = vadd.s32 %v4039_v54, %v4035_v48 }
 0x467   :  { %v5044_v47 = vshrl.u32 %v12366_v11, %v5035_v23  ;;  %v5047_v15 = vshrl.u32 %v12367_v43, %v5035_v23  ;;  %v3949_v33 = vshll.u32 %v10277_v24, %v10346_v61  ;;  %v3950_v9 = vshrl.u32 %v3932_v42, %v3948_v58 }
 0x468   :  { %v3954_v52 = vshll.u32 %v3953_v45, 23  ;;  %v5049_v30 = vshll.u32 %v12367_v43, %v5034_v17  ;;  %v10399_v26 = vadd.s32 %v10299_v32, %v10305_v60  ;;  %v4041_v31 = vadd.s32 536870912, %v4040_v10 }
 0x469   :  { %v5036_v28 = vshrl.u32 %v12373_v55, %v5035_v23  ;;  %v12587_v57 = vand.u32 2147483647, %v12583_v53  ;;  %v5039_v54 = vor.u32 %v5038_v16, %v5037_v25  ;;  %v5042_v38 = vor.u32 %v5041_v41, %v5040_v56 }
 0x46a   :  { %v5048_v5 = vor.u32 %v5047_v15, %v5046_v36  ;;  %v5050_v24 = vshrl.u32 %v12369_v27, %v5035_v23  ;;  %vm5941_vm9 = vcmp.lt.s32.totalorder %v5940_v35, 0  ;;  %v10407_v61 = vshrl.u32 %v4041_v31, 30  ;;  %v12588_v36 = vld [vmem:[#allocation27_spill] sm:$0xff] }
 0x46b   :  { %v10404_v48 = vand.u32 8388607, %v12587_v57  ;;  %v5045_v43 = vor.u32 %v5044_v47, %v5043_v62  ;;  %vm5052_vm6 = vcmp.lt.s32.totalorder %v5033_v6, 1  ;;  %v10409_v42 = vor.u32 %v3950_v9, %v3949_v33 }
 0x46c   :  { %v10411_v32 = vor.u32 4788187, %v3954_v52  ;;  %v5051_v60 = vor.u32 %v5050_v24, %v5049_v30  ;;  %vm5055_vm7 = vcmp.lt.s32.totalorder %v5033_v6, 4  ;;  %v4043_v17 = vshll.u32 %v10407_v61, 30 }
 0x46d   :  { %vm5054_vm10 = vcmp.lt.s32.totalorder %v5033_v6, 3  ;;  %v5057_v58 = vsel %vm5055_vm7, %v5045_v43, 2102212464  ;;  %v5068_v45 = vshll.u32 %v5028_v3, 8  ;;  %v10414_v25 = vsel %vm5941_vm9, 0, %v5940_v35  ;;  %v12589_v35 = vld [vmem:[#allocation28_spill] sm:$0xff] }
 0x46e   :  { %vm5053_vm11 = vcmp.lt.s32.totalorder %v5033_v6, 2  ;;  %v5060_v27 = vsel %vm5052_vm6, %v5039_v54, %v5042_v38  ;;  %v5061_v23 = vsel %vm5055_vm7, %v5048_v5, 920167782  ;;  %v10417_v56 = vsub.s32 %v4040_v10, %v4043_v17 }
 0x46f   :  { %v5056_v62 = vsel %vm5052_vm6, %v5036_v28, %v5039_v54  ;;  %v5058_v52 = vsel %vm5054_vm10, %v5042_v38, %v5057_v58  ;;  %v5064_v30 = vsel %vm5052_vm6, %v5042_v38, %v5045_v43  ;;  %v5062_v16 = vsel %vm5054_vm10, %v5045_v43, %v5061_v23 }
 0x470   :  { %v5065_v41 = vsel %vm5055_vm7, %v5051_v60, 1326507024  ;;  %v461_v3 = vshll.u32 %v12373_v55, %v12588_v36  ;;  %v462_v47 = vshrl.u32 %v12381_v49, %v12589_v35  ;;  %v5408_v15 = vsub.s32 4294967266, %v10414_v25 }
 0x471   :  { %v4046_v10 = vsub.s32 0, %v10417_v56  ;;  %v5063_v33 = vsel %vm5053_vm11, %v5060_v27, %v5062_v16  ;;  %v5066_v28 = vsel %vm5054_vm10, %v5048_v5, %v5065_v41  ;;  %v5059_v9 = vsel %vm5053_vm11, %v5056_v62, %v5058_v52 }
 0x472   :  { %v5067_v38 = vsel %vm5053_vm11, %v5064_v30, %v5066_v28  ;;  %v10433_v31 = vmul.u32.u64.low %v5068_v45, %v5063_v33  ;;  %v10434_v57 = vmul.u32.u64.high %v5068_v45, %v5063_v33, %v10433_v31  ;;  %v463_v60 = vor.u32 %v462_v47, %v461_v3 }
 0x473   :  { %v5887_v54 = vmin.u32 %v4046_v10, %v10417_v56  ;;  %v10438_v24 = vmul.u32.u64.low %v5068_v45, %v5067_v38  ;;  %v10439_v43 = vmul.u32.u64.high %v5068_v45, %v5067_v38, %v10438_v24  ;;  %v464_v17 = vshll.u32 %v12381_v49, %v12588_v36 }
 0x474   :  { %v465_v5 = vshrl.u32 %v12365_v0, %v12589_v35  ;;  %v467_v6 = vshll.u32 %v12365_v0, %v12588_v36  ;;  %v468_v58 = vshrl.u32 %v12366_v11, %v12589_v35  ;;  %v3956_v27 = vand.u32 2147483647, %v10411_v32 }
 0x475   :  { %v3958_v23 = vcvt.s32.f32 %v10409_v42  ;;  %v4048_v62 = vclz %v5887_v54  ;;  %v5075_v52 = vmul.u32 %v5068_v45, %v5059_v9  ;;  %vm12338_vm9 = vcmp.lt.s32.totalorder %v9804_v44, 0  ;;  %v12590_v42 = vld [vmem:[#allocation32_spill] sm:$0xff] }
 0x476   :  { %v5404_v30 = vsub.s32 32, %v10414_v25  ;;  %v5078_v16 = vadd.s32 1, %v10434_v57  ;;  %v466_v41 = vor.u32 %v465_v5, %v464_v17  ;;  %v469_v3 = vor.u32 %v468_v58, %v467_v6  ;;  %v12591_v9 = vld [vmem:[#allocation36_spill] sm:$0xff] }
 0x477   :  { %vm12333_vm6 = vcmp.lt.s32.totalorder %v9871_v4, 0  ;;  %vm12332_vm7 = vcmp.lt.s32.totalorder %v9875_v29, 0  ;;  %v5409_v36 = vadd.s32 127, %v5408_v15  ;;  %v5888_v47 = vadd.s32 4294967294, %v4048_v62 }
 0x478   :  { %vm5077_vm10 = vc.u32 %v10439_v43, %v10433_v31  ;;  %vm476_vm11 = vcmp.lt.s32.totalorder %v12590_v42, 1  ;;  %v452_v45 = vor.u32 8388608, %v10404_v48  ;;  %vm478_vm0 = vcmp.lt.s32.totalorder %v12590_v42, 3 }
 0x479   :  { %v5079_v32 = vsel %vm5077_vm10, %v5078_v16, %v10434_v57  ;;  %v484_v10 = vsel %vm476_vm11, %v463_v60, %v466_v41  ;;  %v460_v28 = vshrl.u32 %v12373_v55, %v12589_v35  ;;  %v481_v15 = vsel %vm479_vm8, %v469_v3, 2102212464  ;;  %v12594_v16 = vld [vmem:[#allocation23_spill] sm:$0xff] }
 0x47a   :  { %v5080_v33 = vadd.s32 %v5079_v32, %v5075_v52  ;;  %v486_v38 = vsel %vm478_vm0, %v469_v3, %v12591_v9  ;;  %v5405_v57 = vshll.u32 %v10351_v46, %v10414_v25  ;;  %vm5889_vm10 = vcmp.lt.s32.totalorder %v5888_v47, 0  ;;  %v12592_v46 = vld [vmem:[#allocation51_spill] sm:$0xff]  ;;  %v12593_v25 = vld [vmem:[#allocation33_spill] sm:$0xff] }
 0x47b   :  { %vm477_vm4 = vcmp.lt.s32.totalorder %v12590_v42, 2  ;;  %v488_v48 = vsel %vm476_vm11, %v466_v41, %v469_v3  ;;  %v5406_v54 = vshrl.u32 %v10399_v26, %v5404_v30  ;;  %v5410_v24 = vshll.u32 %v5409_v36, 23 }
 0x47c   :  { %v5081_v35 = vadd.s32 536870912, %v5080_v33  ;;  %v487_v17 = vsel %vm477_vm4, %v484_v10, %v486_v38  ;;  %v480_v5 = vsel %vm476_vm11, %v460_v28, %v463_v60  ;;  %v482_v6 = vsel %vm478_vm0, %v466_v41, %v481_v15 }
 0x47d   :  { %v490_v58 = vsel %vm478_vm0, %v12593_v25, %v12592_v46  ;;  %v492_v62 = vshll.u32 %v452_v45, 8  ;;  %v10487_v52 = vsel %vm5889_vm10, 0, %v5888_v47  ;;  %v4292_v3 = vand.u32 2147483647, %v12594_v16 }
 0x47e   :  { %v10489_v26 = vshrl.u32 %v5081_v35, 30  ;;  %v491_v30 = vsel %vm477_vm4, %v488_v48, %v490_v58  ;;  %v12595_v10 = vxor.u32 2147483648, %v10248_v51  ;;  %vm12335_vm8 = vcmp.lt.s32.totalorder %v10016_v22, 0 }
 0x47f   :  { %v10494_v36 = vmul.u32.u64.low %v492_v62, %v491_v30  ;;  %v10495_v60 = vmul.u32.u64.high %v492_v62, %v491_v30, %v10494_v36  ;;  %v10497_v32 = vmul.u32.u64.low %v492_v62, %v487_v17  ;;  %v10498_v41 = vmul.u32.u64.high %v492_v62, %v487_v17, %v10497_v32 }
 0x480   :  { %v10506_v47 = vsel %vm12338_vm9, %v12595_v10, %v10248_v51  ;;  %v5083_v45 = vshll.u32 %v10489_v26, 30  ;;  %v483_v28 = vsel %vm477_vm4, %v480_v5, %v482_v6  ;;  %v12596_v15 = vxor.u32 2147483648, %v10250_v13 }
 0x481   :  { %v12597_v38 = vxor.u32 2147483648, %v10320_v63  ;;  %v12598_v48 = vxor.u32 2147483648, %v10356_v8  ;;  %v10533_v35 = vmul.f32 %v3958_v23, %v3956_v27  ;;  %v10535_v17 = vor.u32 %v5406_v54, %v5405_v57  ;;  %v12599_v23 = vld [vmem:[#allocation34_spill] sm:$0xff]  ;;  %v12600_v54 = vld [vmem:[#allocation37_spill] sm:$0xff] }
 0x482   :  { %v10517_v9 = vsel %vm12333_vm6, %v12596_v15, %v10250_v13  ;;  %v10537_v13 = vor.u32 4788187, %v5410_v24  ;;  %v4056_v5 = vsub.s32 4294967266, %v10487_v52  ;;  %v10540_v6 = vsub.s32 %v5080_v33, %v5083_v45 }
 0x483   :  { %v10524_v51 = vsel %vm12332_vm7, %v12597_v38, %v10320_v63  ;;  %v10531_v42 = vsel %vm12335_vm8, %v12598_v48, %v10356_v8  ;;  %v499_v46 = vmul.u32 %v492_v62, %v483_v28  ;;  %vm501_vm4 = vc.u32 %v10495_v60, %v10497_v32 }
 0x484   :  { %v502_v63 = vadd.s32 1, %v10498_v41  ;;  %v4299_v8 = vand.u32 8388607, %v4292_v3  ;;  %v5086_v27 = vsub.s32 0, %v10540_v6  ;;  %v4309_v57 = vshll.u32 %v12373_v55, %v12599_v23 }
 0x485   :  { %v4310_v24 = vshrl.u32 %v12381_v49, %v12600_v54  ;;  %v4312_v33 = vshll.u32 %v12381_v49, %v12599_v23  ;;  %v4313_v58 = vshrl.u32 %v12365_v0, %v12600_v54  ;;  %v4315_v62 = vshll.u32 %v12365_v0, %v12599_v23 }
 0x486   :  { %v503_v25 = vsel %vm501_vm4, %v502_v63, %v10498_v41  ;;  %v4316_v30 = vshrl.u32 %v12366_v11, %v12600_v54  ;;  %v3960_v36 = vxor.u32 2147483648, %v10533_v35  ;;  %v4036_v10 = vadd.s32 %v10364_v34, %v10374_v40 }
 0x487   :  { %v5927_v45 = vmin.u32 %v5086_v27, %v10540_v6  ;;  %v504_v28 = vadd.s32 %v503_v25, %v499_v46  ;;  %v5414_v49 = vcvt.s32.f32 %v10535_v17  ;;  %v4311_v41 = vor.u32 %v4310_v24, %v4309_v57  ;;  %v12601_v27 = vld [vmem:[#allocation38_spill] sm:$0xff]  ;;  %v12602_v57 = vld [vmem:[#allocation52_spill] sm:$0xff] }
 0x488   :  { %v4314_v15 = vor.u32 %v4313_v58, %v4312_v33  ;;  %v4317_v38 = vor.u32 %v4316_v30, %v4315_v62  ;;  %v5412_v48 = vand.u32 2147483647, %v10537_v13  ;;  %v4052_v0 = vsub.s32 32, %v10487_v52 }
 0x489   :  { %v5088_v63 = vclz %v5927_v45  ;;  %v505_v23 = vadd.s32 536870912, %v504_v28  ;;  %vm12334_vm0 = vcmp.lt.s32.totalorder %v10078_v21, 0  ;;  %v4053_v11 = vshll.u32 %v10417_v56, %v10487_v52  ;;  %v12603_v52 = vld [vmem:[#allocation53_spill] sm:$0xff] }
 0x48a   :  { %v4057_v34 = vadd.s32 127, %v4056_v5  ;;  %v4300_v40 = vor.u32 8388608, %v4299_v8  ;;  %vm4324_vm11 = vcmp.lt.s32.totalorder %v12601_v27, 1  ;;  %vm4325_vm10 = vcmp.lt.s32.totalorder %v12601_v27, 2  ;;  %v12604_v5 = vld [vmem:[#allocation45_spill] sm:$0xff] }
 0x48b   :  { %v5928_v46 = vadd.s32 4294967294, %v5088_v63  ;;  %v506_v17 = vshrl.u32 %v505_v23, 30  ;;  %vm4326_vm4 = vcmp.lt.s32.totalorder %v12601_v27, 3  ;;  %v4332_v13 = vsel %vm4324_vm11, %v4311_v41, %v4314_v15 }
 0x48c   :  { %v4334_v24 = vsel %vm4326_vm4, %v4317_v38, %v12602_v57  ;;  %v4336_v56 = vsel %vm4324_vm11, %v4314_v15, %v4317_v38  ;;  %v4338_v8 = vsel %vm4326_vm4, %v12604_v5, %v12603_v52  ;;  %v4054_v33 = vshrl.u32 %v4036_v10, %v4052_v0 }
 0x48d   :  { %vm5929_vm7 = vcmp.lt.s32.totalorder %v5928_v46, 0  ;;  %v507_v25 = vshll.u32 %v506_v17, 30  ;;  %v4339_v58 = vsel %vm4325_vm10, %v4336_v56, %v4338_v8  ;;  %v4058_v62 = vshll.u32 %v4057_v34, 23 }
 0x48e   :  { %v5091_v30 = vsel %vm5929_vm7, 0, %v5928_v46  ;;  %v4329_v45 = vsel %vm4327_vm15, %v4317_v38, 2102212464  ;;  %v4340_v63 = vshll.u32 %v4300_v40, 8  ;;  %vm446_vm6 = vcmp.lt.s32.totalorder %v12583_v53, 0 }
 0x48f   :  { %v5096_v23 = vsub.s32 4294967266, %v5091_v30  ;;  %v10590_v57 = vsub.s32 %v504_v28, %v507_v25  ;;  %v4308_v52 = vshrl.u32 %v12373_v55, %v12600_v54  ;;  %v4335_v10 = vsel %vm4325_vm10, %v4332_v13, %v4334_v24 }
 0x490   :  { %v5076_v0 = vadd.s32 %v10433_v31, %v10439_v43  ;;  %v5092_v34 = vsub.s32 32, %v5091_v30  ;;  %v10598_v46 = vmul.u32.u64.low %v4340_v63, %v4339_v58  ;;  %v10599_v56 = vmul.u32.u64.high %v4340_v63, %v4339_v58, %v10598_v46 }
 0x491   :  { %v4055_v38 = vor.u32 %v4054_v33, %v4053_v11  ;;  %v510_v40 = vsub.s32 0, %v10590_v57  ;;  %v4328_v28 = vsel %vm4324_vm11, %v4308_v52, %v4311_v41  ;;  %v4330_v5 = vsel %vm4326_vm4, %v4314_v15, %v4329_v45 }
 0x492   :  { %v4059_v55 = vor.u32 4788187, %v4058_v62  ;;  %v5097_v54 = vadd.s32 127, %v5096_v23  ;;  %v10606_v8 = vmul.u32.u64.low %v4340_v63, %v4335_v10  ;;  %v10607_v13 = vmul.u32.u64.high %v4340_v63, %v4335_v10, %v10606_v8 }
 0x493   :  { %v10613_v31 = vsel %vm12334_vm0, %v3960_v36, %v10533_v35  ;;  %v10615_v43 = vmul.f32 %v5414_v49, %v5412_v48  ;;  %v12606_v11 = vand.u32 2147483647, %v12583_v53  ;;  %v5751_v15 = vmin.u32 %v510_v40, %v10590_v57  ;;  %v12609_v36 = vld [vmem:[#allocation18_spill] sm:$0xff] }
 0x494   :  { %12605 = vst [vmem:[#allocation27_spill] sm:$0xff] %v10613_v31  ;;  %v5093_v24 = vshll.u32 %v10540_v6, %v5091_v30  ;;  %v5094_v33 = vshrl.u32 %v5076_v0, %v5092_v34  ;;  %v530_v25 = vsub.s32 4, %v506_v17  ;;  %v4331_v58 = vsel %vm4325_vm10, %v4328_v28, %v4330_v5  ;;  %v12613_v30 = vld [vmem:[#allocation54_spill] sm:$0xff]  ;;  %v12614_v34 = vld [vmem:[#allocation25_spill] sm:$0xff] }
 0x495   :  { %vm10619_vm15 = vcmp.le.f32.partialorder %v12606_v11, 0.7853982  ;;  %v4062_v62 = vcvt.s32.f32 %v4055_v38  ;;  %v512_v35 = vclz %v5751_v15  ;;  %vm4349_vm7 = vc.u32 %v10599_v56, %v10606_v8 }
 0x496   :  { %v12610_v49 = vand.u32 2147483647, %v12609_v36  ;;  %v4060_v45 = vand.u32 2147483647, %v4059_v55  ;;  %v5098_v23 = vshll.u32 %v5097_v54, 23  ;;  %v4350_v6 = vadd.s32 1, %v10607_v13 }
 0x497   :  { %v5416_v52 = vxor.u32 2147483648, %v10615_v43  ;;  %v5752_v10 = vadd.s32 4294967294, %v512_v35  ;;  %v4347_v0 = vmul.u32 %v4340_v63, %v4331_v58  ;;  %v4274_v46 = vsub.s32 4, %v12614_v34  ;;  %v12615_v54 = vld [vmem:[#allocation40_spill] sm:$0xff] }
 0x498   :  { %vm10631_vm11 = vcmp.le.f32.partialorder %v12610_v49, 0.7853982  ;;  %v5095_v38 = vor.u32 %v5094_v33, %v5093_v24  ;;  %v500_v40 = vadd.s32 %v10497_v32, %v10495_v60  ;;  %v531_v28 = vsel %vm446_vm6, %v530_v25, %v506_v17  ;;  %v12616_v17 = vld [vmem:[#allocation21_spill] sm:$0xff] }
 0x499   :  { %v4276_v27 = vsel %vm10631_vm11, %v12609_v36, %v12613_v30  ;;  %v4351_v5 = vsel %vm4349_vm7, %v4350_v6, %v10607_v13  ;;  %vm5753_vm10 = vcmp.lt.s32.totalorder %v5752_v10, 0  ;;  %vm4294_vm4 = vcmp.lt.s32.totalorder %v12594_v16, 0  ;;  %v12620_v49 = vld [vmem:[#allocation57_spill] sm:$0xff] }
 0x49a   :  { %v4352_v55 = vadd.s32 %v4351_v5, %v4347_v0  ;;  %6188 = vcosq.f32 %v4276_v27  ;;  %v842_v11 = vsub.s32 4, %v12615_v54  ;;  %v4063_v15 = vmul.f32 %v4062_v62, %v4060_v45  ;;  %v12621_v5 = vld [vmem:[#allocation19_spill] sm:$0xff] }
 0x49b   :  { %v5099_v63 = vor.u32 4788187, %v5098_v23  ;;  %v515_v58 = vsel %vm5753_vm10, 0, %v5752_v10  ;;  %6190 = vsinq.f32 %v4276_v27  ;;  %vm12336_vm0 = vcmp.lt.s32.totalorder %v10190_v14, 0 }
 0x49c   :  { %v516_v24 = vsub.s32 32, %v515_v58  ;;  %v520_v60 = vsub.s32 4294967266, %v515_v58  ;;  %v4275_v32 = vsel %vm4190_vm13, %v4274_v46, %v12614_v34  ;;  %v12617_v13 = vand.u32 2147483647, %v12616_v17 }
 0x49d   :  { %vm12337_vm8 = vcmp.lt.s32.totalorder %v10223_v50, 0  ;;  %v5102_v25 = vcvt.s32.f32 %v5095_v38  ;;  %v533_v62 = vsel %vm10619_vm15, 0, %v531_v28  ;;  %v4353_v35 = vadd.s32 536870912, %v4352_v55 }
 0x49e   :  { %vm10655_vm7 = vcmp.le.f32.partialorder %v12617_v13, 0.7853982  ;;  %v517_v23 = vshll.u32 %v10590_v57, %v515_v58  ;;  %v518_v6 = vshrl.u32 %v500_v40, %v516_v24  ;;  %v521_v30 = vadd.s32 127, %v520_v60 }
 0x49f   :  { %v844_v45 = vsel %vm10655_vm7, %v12616_v17, %v12620_v49  ;;  %v843_v27 = vsel %vm758_vm14, %v842_v11, %v12615_v54  ;;  %v5100_v10 = vand.u32 2147483647, %v5099_v63  ;;  %v4354_v0 = vshrl.u32 %v4353_v35, 30  ;;  %v12625_v54 = vld [vmem:[#allocation29_spill] sm:$0xff]  ;;  %v12626_v63 = vld [vmem:[#allocation56_spill] sm:$0xff] }
 0x4a0   :  { %v4277_v34 = vsel %vm10631_vm11, 0, %v4275_v32  ;;  %v845_v46 = vsel %vm10655_vm7, 0, %v843_v27  ;;  %v519_v38 = vor.u32 %v518_v6, %v517_v23  ;;  %v522_v28 = vshll.u32 %v521_v30, 23 }
 0x4a1   :  { %6192 = vcosq.f32 %v844_v45  ;;  %v12622_v13 = vand.u32 2147483647, %v12621_v5  ;;  %v4355_v40 = vshll.u32 %v4354_v0, 30  ;;  %v4378_v58 = vsub.s32 4, %v4354_v0 }
 0x4a2   :  { %v634_v11 = vsub.s32 4, %v12625_v54  ;;  %v4064_v24 = vxor.u32 2147483648, %v4063_v15  ;;  %v523_v60 = vor.u32 4788187, %v522_v28  ;;  %v4281_v32 = vadd.s32 3, %v4277_v34 }
 0x4a3   :  { %vm10676_vm13 = vcmp.le.f32.partialorder %v12622_v13, 0.7853982  ;;  %6194 = vsinq.f32 %v844_v45  ;;  %v537_v33 = vadd.s32 3, %v533_v62  ;;  %v10685_v35 = vsub.s32 %v4352_v55, %v4355_v40 }
 0x4a4   :  { %v636_v48 = vsel %vm10676_vm13, %v12621_v5, %v12626_v63  ;;  %v4379_v49 = vsel %vm4294_vm4, %v4378_v58, %v4354_v0  ;;  %v6189_v23 = vpop.eup %6188  ;;  %v524_v6 = vand.u32 2147483647, %v523_v60  ;;  %v526_v30 = vcvt.s32.f32 %v519_v38 }
 0x4a5   :  { %6196 = vcosq.f32 %v636_v48  ;;  %v849_v27 = vadd.s32 3, %v845_v46  ;;  %v635_v13 = vsel %vm550_vm12, %v634_v11, %v12625_v54  ;;  %v6191_v63 = vpop.eup %6190  ;;  %v10695_v45 = vsel %vm12336_vm0, %v5416_v52, %v10615_v43 }
 0x4a6   :  { %12627 = vst [vmem:[#allocation28_spill] sm:$0xff] %v10695_v45  ;;  %v10697_v55 = vmul.f32 %v5102_v25, %v5100_v10  ;;  %vm10701_vm14 = vcmp.le.f32.partialorder %v4292_v3, 0.7853982  ;;  %v4358_v0 = vsub.s32 0, %v10685_v35  ;;  %v10708_v34 = vsel %vm12337_vm8, %v4064_v24, %v4063_v15  ;;  %v12641_v15 = vld [vmem:[#allocation59_spill] sm:$0xff] }
 0x4a7   :  { %v527_v46 = vmul.f32 %v526_v30, %v524_v6  ;;  %v4381_v38 = vsel %vm10701_vm14, 0, %v4379_v49  ;;  %v10712_v43 = vand.u32 3, %v4281_v32  ;;  %v10714_v52 = vand.u32 3, %v537_v33  ;;  %v12630_v49 = vld [vmem:[#allocation42_spill] sm:$0xff] }
 0x4a8   :  { %v5899_v25 = vmin.u32 %v4358_v0, %v10685_v35  ;;  %v637_v3 = vsel %vm10676_vm13, 0, %v635_v13  ;;  %6198 = vsinq.f32 %v636_v48  ;;  %v4285_v28 = vxor.u32 2147483648, %v6191_v63 }
 0x4a9   :  { %v528_v10 = vxor.u32 2147483648, %v527_v46  ;;  %v4288_v40 = vxor.u32 2147483648, %v6189_v23  ;;  %v10719_v58 = vand.u32 3, %v849_v27  ;;  %v4348_v54 = vadd.s32 %v10606_v8, %v10599_v56 }
 0x4aa   :  { %v4360_v11 = vclz %v5899_v25  ;;  %v4385_v24 = vadd.s32 3, %v4381_v38  ;;  %vm4283_vm12 = vcmp.lt.s32.totalorder %v10712_v43, 2  ;;  %vm4284_vm11 = vcmp.eq.s32.totalorder %v10712_v43, 0  ;;  %v12631_v38 = vld [vmem:[#allocation24_spill] sm:$0xff] }
 0x4ab   :  { %v6193_v60 = vpop.eup %6192  ;;  %v529_v32 = vsel %vm446_vm6, %v528_v10, %v527_v46  ;;  %v641_v57 = vadd.s32 3, %v637_v3  ;;  %vm4287_vm10 = vcmp.eq.s32.totalorder %v10712_v43, 2  ;;  %v4586_v56 = vsub.s32 4, %v12630_v49 }
 0x4ac   :  { %v532_v48 = vsel %vm10619_vm15, %v12583_v53, %v529_v32  ;;  %v5900_v33 = vadd.s32 4294967294, %v4360_v11  ;;  %v4286_v6 = vsel %vm4284_vm11, %v6189_v23, %v4285_v28  ;;  %v4289_v30 = vsel %vm4287_vm10, %v4288_v40, %v6191_v63  ;;  %v12640_v28 = vld [vmem:[#allocation47_spill] sm:$0xff] }
 0x4ad   :  { %v6195_v8 = vpop.eup %6194  ;;  %6200 = vcosq.f32 %v532_v48  ;;  %vm852_vm6 = vcmp.eq.s32.totalorder %v10719_v58, 0  ;;  %v10734_v13 = vand.u32 3, %v4385_v24  ;;  %vm855_vm13 = vcmp.eq.s32.totalorder %v10719_v58, 2  ;;  %v12635_v24 = vld [vmem:[#allocation58_spill] sm:$0xff] }
 0x4ae   :  { %6202 = vsinq.f32 %v532_v48  ;;  %vm5901_vm7 = vcmp.lt.s32.totalorder %v5900_v33, 0  ;;  %v856_v0 = vxor.u32 2147483648, %v6193_v60  ;;  %v642_v46 = vand.u32 3, %v641_v57 }
 0x4af   :  { %v6197_v27 = vpop.eup %6196  ;;  %v4363_v41 = vsel %vm5901_vm7, 0, %v5900_v33  ;;  %v4587_v25 = vsel %vm4502_vm3, %v4586_v56, %v12630_v49  ;;  %v853_v23 = vxor.u32 2147483648, %v6195_v8  ;;  %v12632_v63 = vand.u32 2147483647, %v12631_v38 }
 0x4b0   :  { %v4364_v3 = vsub.s32 32, %v4363_v41  ;;  %v4368_v10 = vsub.s32 4294967266, %v4363_v41  ;;  %vm543_vm11 = vcmp.eq.s32.totalorder %v10714_v52, 2  ;;  %v4365_v40 = vshll.u32 %v10685_v35, %v4363_v41  ;;  %v12636_v35 = vld [vmem:[#allocation30_spill] sm:$0xff] }
 0x4b1   :  { %vm10742_vm15 = vcmp.le.f32.partialorder %v12632_v63, 0.7853982  ;;  %v648_v11 = vxor.u32 2147483648, %v6197_v27  ;;  %vm540_vm3 = vcmp.eq.s32.totalorder %v10714_v52, 0  ;;  %vm4280_vm10 = vweird.f32 %v12609_v36 }
 0x4b2   :  { %v4588_v32 = vsel %vm10742_vm15, %v12631_v38, %v12635_v24  ;;  %v4589_v57 = vsel %vm10742_vm15, 0, %v4587_v25  ;;  %v6199_v48 = vpop.eup %6198  ;;  %v4366_v33 = vshrl.u32 %v4348_v54, %v4364_v3  ;;  %v4369_v49 = vadd.s32 127, %v4368_v10 }
 0x4b3   :  { %vm851_vm7 = vcmp.lt.s32.totalorder %v10719_v58, 2  ;;  %6204 = vcosq.f32 %v4588_v32  ;;  %v12637_v56 = vand.u32 2147483647, %v12636_v35  ;;  %vm539_vm8 = vcmp.lt.s32.totalorder %v10714_v52, 2 }
 0x4b4   :  { %v645_v63 = vxor.u32 2147483648, %v6199_v48  ;;  %6206 = vsinq.f32 %v4588_v32  ;;  %v4593_v25 = vadd.s32 3, %v4589_v57  ;;  %v946_v24 = vsub.s32 4, %v12640_v28 }
 0x4b5   :  { %vm10759_vm0 = vcmp.le.f32.partialorder %v12637_v56, 0.7853982  ;;  %vm536_vm15 = vweird.f32 %v12583_v53  ;;  %v4367_v54 = vor.u32 %v4366_v33, %v4365_v40  ;;  %v4370_v3 = vshll.u32 %v4369_v49, 23 }
 0x4b6   :  { %v4290_v10 = vsel %vm4283_vm12, %v4286_v6, %v4289_v30  ;;  %v948_v56 = vsel %vm10759_vm0, %v12636_v35, %v12641_v15  ;;  %v857_v45 = vsel %vm855_vm13, %v856_v0, %v6195_v8  ;;  %vm643_vm9 = vcmp.lt.s32.totalorder %v642_v46, 2 }
 0x4b7   :  { %v947_v32 = vsel %vm862_vm5, %v946_v24, %v12640_v28  ;;  %6208 = vcosq.f32 %v948_v56  ;;  %v4371_v57 = vor.u32 4788187, %v4370_v3  ;;  %v854_v40 = vsel %vm852_vm6, %v6193_v60, %v853_v23  ;;  %v6201_v43 = vpop.eup %6200  ;;  %v12642_v3 = vld [vmem:[#allocation50_spill] sm:$0xff] }
 0x4b8   :  { %vm644_vm1 = vcmp.eq.s32.totalorder %v642_v46, 0  ;;  %vm647_vm12 = vcmp.eq.s32.totalorder %v642_v46, 2  ;;  %v10779_v33 = vand.u32 3, %v4593_v25  ;;  %v949_v15 = vsel %vm10759_vm0, 0, %v947_v32  ;;  %v6203_v8 = vpop.eup %6202 }
 0x4b9   :  { %v646_v6 = vsel %vm644_vm1, %v6197_v27, %v645_v63  ;;  %v649_v30 = vsel %vm647_vm12, %v648_v11, %v6199_v48  ;;  %v544_v0 = vxor.u32 2147483648, %v6201_v43  ;;  %v4372_v49 = vand.u32 2147483647, %v4371_v57  ;;  %v12646_v27 = vld [vmem:[#allocation60_spill] sm:$0xff] }
 0x4ba   :  { %v4374_v14 = vcvt.s32.f32 %v4367_v54  ;;  %6210 = vsinq.f32 %v948_v56  ;;  %v541_v28 = vxor.u32 2147483648, %v6203_v8  ;;  %v953_v24 = vadd.s32 3, %v949_v15  ;;  %v12647_v63 = vld [vmem:[#allocation72_spill] sm:$0xff] }
 0x4bb   :  { %v12643_v31 = vand.u32 2147483647, %v12642_v3  ;;  %v1258_v23 = vsub.s32 4, %v12646_v27  ;;  %v545_v11 = vsel %vm543_vm11, %v544_v0, %v6203_v8  ;;  %v650_v41 = vsel %vm643_vm9, %v646_v6, %v649_v30  ;;  %v12648_v30 = vld [vmem:[#allocation39_spill] sm:$0xff]  ;;  %v12652_v0 = vld [vmem:[#allocation49_spill] sm:$0xff] }
 0x4bc   :  { %v4375_v48 = vmul.f32 %v4374_v14, %v4372_v49  ;;  %v542_v54 = vsel %vm540_vm3, %v6201_v43, %v541_v28  ;;  %v858_v56 = vsel %vm851_vm7, %v854_v40, %v857_v45  ;;  %vm640_vm1 = vweird.f32 %v12621_v5 }
 0x4bd   :  { %vm10785_vm5 = vcmp.le.f32.partialorder %v12643_v31, 0.7853982  ;;  %v4291_v31 = vsel %vm4280_vm10, nan, %v4290_v10  ;;  %v6205_v32 = vpop.eup %6204  ;;  %v546_v14 = vsel %vm539_vm8, %v542_v54, %v545_v11  ;;  %v1259_v57 = vsel %vm1174_vm2, %v1258_v23, %v12646_v27 }
 0x4be   :  { %v1260_v25 = vsel %vm10785_vm5, %v12642_v3, %v12647_v63  ;;  %v4376_v46 = vxor.u32 2147483648, %v4375_v48  ;;  %v6207_v6 = vpop.eup %6206  ;;  %v547_v36 = vsel %vm536_vm15, nan, %v546_v14  ;;  %vm848_vm9 = vweird.f32 %v12616_v17  ;;  %v12655_v14 = vld [vmem:[#allocation44_spill] sm:$0xff] }
 0x4bf   :  { %6212 = vcosq.f32 %v1260_v25  ;;  %v651_v58 = vsel %vm640_vm1, nan, %v650_v41  ;;  %vm4595_vm0 = vcmp.lt.s32.totalorder %v10779_v33, 2  ;;  %v954_v5 = vand.u32 3, %v953_v24  ;;  %5484 = vrot.lane.b32.xlu0 %v547_v36, %s6387_s1  ;;  %v12653_v24 = vld [vmem:[#allocation61_spill] sm:$0xff] }
 0x4c0   :  { %v4377_v45 = vsel %vm4294_vm4, %v4376_v46, %v4375_v48  ;;  %v4597_v52 = vxor.u32 2147483648, %v6207_v6  ;;  %v4600_v10 = vxor.u32 2147483648, %v6205_v32  ;;  %6214 = vsinq.f32 %v1260_v25 }
 0x4c1   :  { %v6209_v40 = vpop.eup %6208  ;;  %v4380_v53 = vsel %vm10701_vm14, %v12594_v16, %v4377_v45  ;;  %v1261_v43 = vsel %vm10785_vm5, 0, %v1259_v57  ;;  %v12649_v15 = vand.u32 2147483647, %v12648_v30  ;;  %v4690_v49 = vsub.s32 4, %v12652_v0  ;;  %v12660_v45 = vld [vmem:[#allocation76_spill] sm:$0xff] }
 0x4c2   :  { %6216 = vcosq.f32 %v4380_v53  ;;  %vm4596_vm8 = vcmp.eq.s32.totalorder %v10779_v33, 0  ;;  %v960_v28 = vxor.u32 2147483648, %v6209_v40  ;;  %vm4599_vm4 = vcmp.eq.s32.totalorder %v10779_v33, 2 }
 0x4c3   :  { %vm10823_vm2 = vcmp.le.f32.partialorder %v12649_v15, 0.7853982  ;;  %6218 = vsinq.f32 %v4380_v53  ;;  %vm956_vm14 = vcmp.eq.s32.totalorder %v954_v5, 0  ;;  %vm12654_vm6 = vcmp.lt.s32.totalorder %v12648_v30, 0  ;;  %5556 = vrot.lane.b32.xlu0 %v4291_v31, %s6387_s1  ;;  %v12659_v31 = vld [vmem:[#allocation62_spill] sm:$0xff] }
 0x4c4   :  { %v4692_v62 = vsel %vm10823_vm2, %v12648_v30, %v12653_v24  ;;  %v4691_v60 = vsel %vm12654_vm6, %v4690_v49, %v12652_v0  ;;  %v6211_v27 = vpop.eup %6210  ;;  %v4598_v23 = vsel %vm4596_vm8, %v6205_v32, %v4597_v52  ;;  %v4601_v11 = vsel %vm4599_vm4, %v4600_v10, %v6207_v6  ;;  %v12674_v49 = vld [vmem:[#allocation82_spill] sm:$0xff] }
 0x4c5   :  { %vm959_vm13 = vcmp.eq.s32.totalorder %v954_v5, 2  ;;  %v1265_v48 = vadd.s32 3, %v1261_v43  ;;  %v957_v41 = vxor.u32 2147483648, %v6211_v27  ;;  %v4693_v25 = vsel %vm10823_vm2, 0, %v4691_v60 }
 0x4c6   :  { %v961_v63 = vsel %vm959_vm13, %v960_v28, %v6211_v27  ;;  %6220 = vcosq.f32 %v4692_v62  ;;  %vm4391_vm11 = vcmp.eq.s32.totalorder %v10734_v13, 2  ;;  %v4697_v54 = vadd.s32 3, %v4693_v25  ;;  %v12668_v27 = vld [vmem:[#allocation69_spill] sm:$0xff] }
 0x4c7   :  { %6222 = vsinq.f32 %v4692_v62  ;;  %v12656_v46 = vand.u32 2147483647, %v12655_v14  ;;  %v5002_v32 = vsub.s32 4, %v12659_v31  ;;  %vm4388_vm10 = vcmp.eq.s32.totalorder %v10734_v13, 0  ;;  %5486 = vrot.lane.b32.xlu0 %v651_v58, %s6387_s1  ;;  %v12663_v58 = vld [vmem:[#allocation43_spill] sm:$0xff] }
 0x4c8   :  { %v4602_v6 = vsel %vm4595_vm0, %v4598_v23, %v4601_v11  ;;  %vm955_vm7 = vcmp.lt.s32.totalorder %v954_v5, 2  ;;  %v958_v36 = vsel %vm956_vm14, %v6209_v40, %v957_v41  ;;  %vm4387_vm15 = vcmp.lt.s32.totalorder %v10734_v13, 2  ;;  %v12662_v40 = vld [vmem:[#allocation22_spill] sm:$0xff] }
 0x4c9   :  { %vm10843_vm3 = vcmp.le.f32.partialorder %v12656_v46, 0.7853982  ;;  %v6213_v10 = vpop.eup %6212  ;;  %v10859_v53 = vsel %vm848_vm9, nan, %v858_v56  ;;  %v962_v43 = vsel %vm955_vm7, %v958_v36, %v961_v63  ;;  %v1266_v33 = vand.u32 3, %v1265_v48 }
 0x4ca   :  { %v5004_v52 = vsel %vm10843_vm3, %v12655_v14, %v12660_v45  ;;  %vm12661_vm12 = vcmp.lt.s32.totalorder %v12655_v14, 0  ;;  %vm4384_vm5 = vweird.f32 %v12594_v16  ;;  %vm4592_vm1 = vweird.f32 %v12631_v38  ;;  %v6215_v17 = vpop.eup %6214 }
 0x4cb   :  { %v5003_v5 = vsel %vm12661_vm12, %v5002_v32, %v12659_v31  ;;  %vm952_vm0 = vweird.f32 %v12636_v35  ;;  %6224 = vcosq.f32 %v5004_v52  ;;  %v1154_v15 = vsub.s32 4, %v12662_v40 }
 0x4cc   :  { %v10869_v56 = vsel %vm4592_vm1, nan, %v4602_v6  ;;  %v4698_v8 = vand.u32 3, %v4697_v54  ;;  %6226 = vsinq.f32 %v5004_v52  ;;  %v12664_v0 = vand.u32 2147483647, %v12663_v58  ;;  %v6217_v62 = vpop.eup %6216  ;;  %v12669_v52 = vld [vmem:[#allocation26_spill] sm:$0xff] }
 0x4cd   :  { %v963_v28 = vsel %vm952_vm0, nan, %v962_v43  ;;  %v1272_v24 = vxor.u32 2147483648, %v6213_v10  ;;  %v5005_v38 = vsel %vm10843_vm3, 0, %v5003_v5  ;;  %vm12667_vm2 = vcmp.lt.s32.totalorder %v12663_v58, 0  ;;  %v6219_v48 = vpop.eup %6218 }
 0x4ce   :  { %vm10873_vm9 = vcmp.le.f32.partialorder %v12664_v0, 0.7853982  ;;  %v1155_v35 = vsel %vm12667_vm2, %v1154_v15, %v12662_v40  ;;  %5492 = vrot.lane.b32.xlu0 %v963_v28, %s6387_s1  ;;  %vm1267_vm8 = vcmp.lt.s32.totalorder %v1266_v33, 2  ;;  %v1269_v60 = vxor.u32 2147483648, %v6215_v17  ;;  %v12673_v0 = vld [vmem:[#allocation63_spill] sm:$0xff] }
 0x4cf   :  { %vm4696_vm4 = vweird.f32 %v12648_v30  ;;  %v1156_v23 = vsel %vm10873_vm9, %v12663_v58, %v12668_v27  ;;  %v1157_v11 = vsel %vm10873_vm9, 0, %v1155_v35  ;;  %v4392_v41 = vxor.u32 2147483648, %v6217_v62  ;;  %v12681_v30 = vld [vmem:[#allocation70_spill] sm:$0xff] }
 0x4d0   :  { %vm1268_vm14 = vcmp.eq.s32.totalorder %v1266_v33, 0  ;;  %vm1271_vm6 = vcmp.eq.s32.totalorder %v1266_v33, 2  ;;  %6228 = vcosq.f32 %v1156_v23  ;;  %v4389_v63 = vxor.u32 2147483648, %v6219_v48  ;;  %v6221_v54 = vpop.eup %6220  ;;  %v12676_v33 = vld [vmem:[#allocation48_spill] sm:$0xff] }
 0x4d1   :  { %vm4699_vm13 = vcmp.lt.s32.totalorder %v4698_v8, 2  ;;  %v5009_v25 = vadd.s32 3, %v5005_v38  ;;  %6230 = vsinq.f32 %v1156_v23  ;;  %v4393_v46 = vsel %vm4391_vm11, %v4392_v41, %v6219_v48  ;;  %v6223_v32 = vpop.eup %6222 }
 0x4d2   :  { %v1273_v57 = vsel %vm1271_vm6, %v1272_v24, %v6215_v17  ;;  %vm4703_vm3 = vcmp.eq.s32.totalorder %v4698_v8, 2  ;;  %v1161_v31 = vadd.s32 3, %v1157_v11  ;;  %v4390_v6 = vsel %vm4388_vm10, %v6217_v62, %v4389_v63 }
 0x4d3   :  { %v1270_v36 = vsel %vm1268_vm14, %v6213_v10, %v1269_v60  ;;  %v4704_v45 = vxor.u32 2147483648, %v6221_v54  ;;  %v12670_v43 = vand.u32 2147483647, %v12669_v52  ;;  %v4394_v40 = vsel %vm4387_vm15, %v4390_v6, %v4393_v46  ;;  %v12680_v46 = vld [vmem:[#allocation55_spill] sm:$0xff] }
 0x4d4   :  { %v4701_v15 = vxor.u32 2147483648, %v6223_v32  ;;  %v1466_v17 = vsub.s32 4, %v12673_v0  ;;  %v4395_v10 = vsel %vm4384_vm5, nan, %v4394_v40  ;;  %vm4700_vm11 = vcmp.eq.s32.totalorder %v4698_v8, 0 }
 0x4d5   :  { %vm10896_vm7 = vcmp.le.f32.partialorder %v12670_v43, 0.7853982  ;;  %v4705_v24 = vsel %vm4703_vm3, %v4704_v45, %v6223_v32  ;;  %v5010_v38 = vand.u32 3, %v5009_v25  ;;  %v6225_v35 = vpop.eup %6224  ;;  %5558 = vrot.lane.b32.xlu1 %v4395_v10, %s6387_s1  ;;  %vm1264_vm10 = vweird.f32 %v12642_v3 }
 0x4d6   :  { %v1468_v28 = vsel %vm10896_vm7, %v12669_v52, %v12674_v49  ;;  %v4702_v13 = vsel %vm4700_vm11, %v6221_v54, %v4701_v15  ;;  %v1162_v62 = vand.u32 3, %v1161_v31  ;;  %vm12675_vm15 = vcmp.lt.s32.totalorder %v12669_v52, 0  ;;  %v6227_v27 = vpop.eup %6226 }
 0x4d7   :  { %v1467_v60 = vsel %vm12675_vm15, %v1466_v17, %v12673_v0  ;;  %6232 = vcosq.f32 %v1468_v28  ;;  %v1274_v23 = vsel %vm1267_vm8, %v1270_v36, %v1273_v57  ;;  %v4706_v16 = vsel %vm4699_vm13, %v4702_v13, %v4705_v24  ;;  %v12683_v17 = vld [vmem:[#allocation35_spill] sm:$0xff] }
 0x4d8   :  { %vm1160_vm12 = vweird.f32 %v12663_v58  ;;  %v1469_v11 = vsel %vm10896_vm7, 0, %v1467_v60  ;;  %6234 = vsinq.f32 %v1468_v28  ;;  %v4707_v48 = vsel %vm4696_vm4, nan, %v4706_v16  ;;  %v12688_v60 = vld [vmem:[#allocation83_spill] sm:$0xff] }
 0x4d9   :  { %v5013_v41 = vxor.u32 2147483648, %v6227_v27  ;;  %v5016_v63 = vxor.u32 2147483648, %v6225_v35  ;;  %v1473_v25 = vadd.s32 3, %v1469_v11  ;;  %5564 = vrot.lane.b32.xlu0 %v4707_v48, %s6387_s1  ;;  %vm5011_vm5 = vcmp.lt.s32.totalorder %v5010_v38, 2  ;;  %5490 = vrot.lane.b32.xlu1 %v10859_v53, %s6387_s1 }
 0x4da   :  { %vm5012_vm1 = vcmp.eq.s32.totalorder %v5010_v38, 0  ;;  %v12677_v54 = vand.u32 2147483647, %v12676_v33  ;;  %v4898_v57 = vsub.s32 4, %v12680_v46  ;;  %v6229_v31 = vpop.eup %6228  ;;  %vm5015_vm9 = vcmp.eq.s32.totalorder %v5010_v38, 2 }
 0x4db   :  { %vm1163_vm2 = vcmp.lt.s32.totalorder %v1162_v62, 2  ;;  %vm1164_vm8 = vcmp.eq.s32.totalorder %v1162_v62, 0  ;;  %v6231_v6 = vpop.eup %6230  ;;  %vm1167_vm4 = vcmp.eq.s32.totalorder %v1162_v62, 2  ;;  %v1168_v36 = vxor.u32 2147483648, %v6229_v31 }
 0x4dc   :  { %vm10924_vm0 = vcmp.le.f32.partialorder %v12677_v54, 0.7853982  ;;  %vm12682_vm14 = vcmp.lt.s32.totalorder %v12676_v33, 0  ;;  %vm5008_vm6 = vweird.f32 %v12655_v14  ;;  %v5014_v43 = vsel %vm5012_vm1, %v6225_v35, %v5013_v41  ;;  %v12687_v35 = vld [vmem:[#allocation65_spill] sm:$0xff] }
 0x4dd   :  { %v4900_v32 = vsel %vm10924_vm0, %v12676_v33, %v12681_v30  ;;  %v4899_v45 = vsel %vm12682_vm14, %v4898_v57, %v12680_v46  ;;  %v5017_v53 = vsel %vm5015_vm9, %v5016_v63, %v6227_v27  ;;  %v1165_v5 = vxor.u32 2147483648, %v6231_v6  ;;  %5562 = vrot.lane.b32.xlu1 %v10869_v56, %s6387_s1  ;;  %v12695_v46 = vld [vmem:[#allocation86_spill] sm:$0xff] }
 0x4de   :  { %6236 = vcosq.f32 %v4900_v32  ;;  %v1474_v40 = vand.u32 3, %v1473_v25  ;;  %v1169_v15 = vsel %vm1167_vm4, %v1168_v36, %v6231_v6  ;;  %v4901_v0 = vsel %vm10924_vm0, 0, %v4899_v45  ;;  %v12690_v25 = vld [vmem:[#allocation41_spill] sm:$0xff] }
 0x4df   :  { %6238 = vsinq.f32 %v4900_v32  ;;  %v12684_v49 = vand.u32 2147483647, %v12683_v17  ;;  %v1166_v10 = vsel %vm1164_vm8, %v6229_v31, %v1165_v5  ;;  %v4905_v24 = vadd.s32 3, %v4901_v0 }
 0x4e0   :  { %v5210_v13 = vsub.s32 4, %v12687_v35  ;;  %v1275_v16 = vsel %vm1264_vm10, nan, %v1274_v23  ;;  %v5018_v11 = vsel %vm5011_vm5, %v5014_v43, %v5017_v53  ;;  %v1170_v48 = vsel %vm1163_vm2, %v1166_v10, %v1169_v15  ;;  %v12694_v23 = vld [vmem:[#allocation68_spill] sm:$0xff] }
 0x4e1   :  { %vm10943_vm13 = vcmp.le.f32.partialorder %v12684_v49, 0.7853982  ;;  %v6233_v41 = vpop.eup %6232  ;;  %v1171_v56 = vsel %vm1160_vm12, nan, %v1170_v48  ;;  %vm1472_vm3 = vweird.f32 %v12669_v52  ;;  %vm12689_vm7 = vcmp.lt.s32.totalorder %v12683_v17, 0  ;;  %5498 = vrot.lane.b32.xlu1 %v1275_v16, %s6387_s1  ;;  %v12697_v49 = vld [vmem:[#allocation31_spill] sm:$0xff]  ;;  %v12704_v52 = vld [vmem:[#allocation66_spill] sm:$0xff] }
 0x4e2   :  { %v5212_v27 = vsel %vm10943_vm13, %v12683_v17, %v12688_v60  ;;  %v5211_v63 = vsel %vm12689_vm7, %v5210_v13, %v12687_v35  ;;  %v12691_v54 = vand.u32 2147483647, %v12690_v25  ;;  %v6235_v38 = vpop.eup %6234  ;;  %5496 = vrot.lane.b32.xlu0 %v1171_v56, %s6387_s1  ;;  %v1480_v62 = vxor.u32 2147483648, %v6233_v41  ;;  %v12701_v35 = vld [vmem:[#allocation77_spill] sm:$0xff] }
 0x4e3   :  { %6240 = vcosq.f32 %v5212_v27  ;;  %v5213_v58 = vsel %vm10943_vm13, 0, %v5211_v63  ;;  %v1570_v8 = vsub.s32 4, %v12694_v23  ;;  %vm1476_vm10 = vcmp.eq.s32.totalorder %v1474_v40, 0  ;;  %v12702_v60 = vld [vmem:[#allocation89_spill] sm:$0xff] }
 0x4e4   :  { %6242 = vsinq.f32 %v5212_v27  ;;  %vm10967_vm11 = vcmp.le.f32.partialorder %v12691_v54, 0.7853982  ;;  %v1477_v31 = vxor.u32 2147483648, %v6235_v38  ;;  %vm1479_vm15 = vcmp.eq.s32.totalorder %v1474_v40, 2 }
 0x4e5   :  { %v1572_v57 = vsel %vm10967_vm11, %v12690_v25, %v12695_v46  ;;  %v4906_v30 = vand.u32 3, %v4905_v24  ;;  %v1481_v32 = vsel %vm1479_vm15, %v1480_v62, %v6235_v38  ;;  %vm4904_vm12 = vweird.f32 %v12676_v33 }
 0x4e6   :  { %v5217_v6 = vadd.s32 3, %v5213_v58  ;;  %vm12696_vm5 = vcmp.lt.s32.totalorder %v12690_v25, 0  ;;  %6244 = vcosq.f32 %v1572_v57  ;;  %vm1475_vm1 = vcmp.lt.s32.totalorder %v1474_v40, 2 }
 0x4e7   :  { %v1571_v36 = vsel %vm12696_vm5, %v1570_v8, %v12694_v23  ;;  %v1478_v45 = vsel %vm1476_vm10, %v6233_v41, %v1477_v31  ;;  %6246 = vsinq.f32 %v1572_v57  ;;  %v5019_v5 = vsel %vm5008_vm6, nan, %v5018_v11 }
 0x4e8   :  { %v1573_v43 = vsel %vm10967_vm11, 0, %v1571_v36  ;;  %v6237_v53 = vpop.eup %6236  ;;  %v1482_v15 = vsel %vm1475_vm1, %v1478_v45, %v1481_v32  ;;  %v5218_v0 = vand.u32 3, %v5217_v6  ;;  %v12698_v28 = vand.u32 2147483647, %v12697_v49  ;;  %5570 = vrot.lane.b32.xlu1 %v5019_v5, %s6387_s1  ;;  %v12708_v6 = vld [vmem:[#allocation74_spill] sm:$0xff]  ;;  %v12709_v45 = vld [vmem:[#allocation88_spill] sm:$0xff] }
 0x4e9   :  { %v4912_v40 = vxor.u32 2147483648, %v6237_v53  ;;  %v1577_v24 = vadd.s32 3, %v1573_v43  ;;  %v1050_v13 = vsub.s32 4, %v12701_v35  ;;  %v6239_v27 = vpop.eup %6238  ;;  %vm4907_vm9 = vcmp.lt.s32.totalorder %v4906_v30, 2 }
 0x4ea   :  { %vm10990_vm0 = vcmp.le.f32.partialorder %v12698_v28, 0.7853982  ;;  %vm4908_vm2 = vcmp.eq.s32.totalorder %v4906_v30, 0  ;;  %vm4911_vm8 = vcmp.eq.s32.totalorder %v4906_v30, 2  ;;  %vm5216_vm4 = vweird.f32 %v12683_v17  ;;  %v12715_v17 = vld [vmem:[#allocation84_spill] sm:$0xff] }
 0x4eb   :  { %v1052_v14 = vsel %vm10990_vm0, %v12697_v49, %v12702_v60  ;;  %v4909_v16 = vxor.u32 2147483648, %v6239_v27  ;;  %v4913_v11 = vsel %vm4911_vm8, %v4912_v40, %v6239_v27  ;;  %vm12703_vm14 = vcmp.lt.s32.totalorder %v12697_v49, 0 }
 0x4ec   :  { %v1051_v48 = vsel %vm12703_vm14, %v1050_v13, %v12701_v35  ;;  %6248 = vcosq.f32 %v1052_v14  ;;  %v1483_v56 = vsel %vm1472_vm3, nan, %v1482_v15  ;;  %vm5220_vm6 = vcmp.eq.s32.totalorder %v5218_v0, 0  ;;  %v12711_v13 = vld [vmem:[#allocation75_spill] sm:$0xff] }
 0x4ed   :  { %v6241_v41 = vpop.eup %6240  ;;  %vm5223_vm13 = vcmp.eq.s32.totalorder %v5218_v0, 2  ;;  %v1053_v63 = vsel %vm10990_vm0, 0, %v1051_v48  ;;  %5502 = vrot.lane.b32.xlu1 %v1483_v56, %s6387_s1  ;;  %v4910_v3 = vsel %vm4908_vm2, %v6237_v53, %v4909_v16  ;;  %vm1576_vm7 = vweird.f32 %v12690_v25  ;;  %v12716_v48 = vld [vmem:[#allocation99_spill] sm:$0xff] }
 0x4ee   :  { %v6243_v54 = vpop.eup %6242  ;;  %v5224_v38 = vxor.u32 2147483648, %v6241_v41  ;;  %v1578_v62 = vand.u32 3, %v1577_v24  ;;  %6250 = vsinq.f32 %v1052_v14  ;;  %v4914_v58 = vsel %vm4907_vm9, %v4910_v3, %v4913_v11 }
 0x4ef   :  { %v5221_v23 = vxor.u32 2147483648, %v6243_v54  ;;  %v1057_v8 = vadd.s32 3, %v1053_v63  ;;  %v12705_v46 = vand.u32 2147483647, %v12704_v52  ;;  %vm5022_vm11 = vcmp.lt.s32.totalorder %v10258_v59, 0 }
 0x4f0   :  { %v4915_v31 = vsel %vm4904_vm12, nan, %v4914_v58  ;;  %v5225_v32 = vsel %vm5223_vm13, %v5224_v38, %v6243_v54  ;;  %v1778_v36 = vsub.s32 4, %v12708_v6  ;;  %v6245_v43 = vpop.eup %6244  ;;  %vm5219_vm10 = vcmp.lt.s32.totalorder %v5218_v0, 2  ;;  %v12717_v54 = vld [vmem:[#allocation67_spill] sm:$0xff] }
 0x4f1   :  { %vm11013_vm3 = vcmp.le.f32.partialorder %v12705_v46, 0.7853982  ;;  %5568 = vrot.lane.b32.xlu0 %v4915_v31, %s6387_s1  ;;  %v5222_v53 = vsel %vm5220_vm6, %v6241_v41, %v5221_v23  ;;  %v1058_v5 = vand.u32 3, %v1057_v8  ;;  %v6247_v15 = vpop.eup %6246  ;;  %v1584_v33 = vxor.u32 2147483648, %v6245_v43  ;;  %v12722_v31 = vld [vmem:[#allocation94_spill] sm:$0xff] }
 0x4f2   :  { %v1780_v30 = vsel %vm11013_vm3, %v12704_v52, %v12709_v45  ;;  %v5226_v28 = vsel %vm5219_vm10, %v5222_v53, %v5225_v32  ;;  %vm12710_vm15 = vcmp.lt.s32.totalorder %v12704_v52, 0  ;;  %vm1579_vm12 = vcmp.lt.s32.totalorder %v1578_v62, 2 }
 0x4f3   :  { %6252 = vcosq.f32 %v1780_v30  ;;  %v1779_v10 = vsel %vm12710_vm15, %v1778_v36, %v12708_v6  ;;  %v5227_v40 = vsel %vm5216_vm4, nan, %v5226_v28  ;;  %v1581_v24 = vxor.u32 2147483648, %v6247_v15  ;;  %v12723_v6 = vld [vmem:[#allocation107_spill] sm:$0xff] }
 0x4f4   :  { %6254 = vsinq.f32 %v1780_v30  ;;  %vm1583_vm5 = vcmp.eq.s32.totalorder %v1578_v62, 2  ;;  %5574 = vrot.lane.b32.xlu1 %v5227_v40, %s6387_s1  ;;  %vm1580_vm1 = vcmp.eq.s32.totalorder %v1578_v62, 0  ;;  %v1781_v35 = vsel %vm11013_vm3, 0, %v1779_v10 }
 0x4f5   :  { %v1585_v0 = vsel %vm1583_vm5, %v1584_v33, %v6247_v15  ;;  %v12712_v60 = vand.u32 2147483647, %v12711_v13  ;;  %v1582_v27 = vsel %vm1580_vm1, %v6245_v43, %v1581_v24  ;;  %v1785_v16 = vadd.s32 3, %v1781_v35 }
 0x4f6   :  { %v738_v11 = vsub.s32 4, %v12715_v17  ;;  %v6249_v56 = vpop.eup %6248  ;;  %v1586_v63 = vsel %vm1579_vm12, %v1582_v27, %v1585_v0  ;;  %vm1063_vm9 = vcmp.eq.s32.totalorder %v1058_v5, 2  ;;  %v12718_v3 = vand.u32 2147483647, %v12717_v54  ;;  %v12726_v27 = vld [vmem:[#allocation79_spill] sm:$0xff] }
 0x4f7   :  { %vm11037_vm0 = vcmp.le.f32.partialorder %v12712_v60, 0.7853982  ;;  %v1587_v62 = vsel %vm1576_vm7, nan, %v1586_v63  ;;  %v1064_v58 = vxor.u32 2147483648, %v6249_v56  ;;  %v1786_v23 = vand.u32 3, %v1785_v16 }
 0x4f8   :  { %v740_v41 = vsel %vm11037_vm0, %v12711_v13, %v12716_v48  ;;  %vm11048_vm2 = vcmp.le.f32.partialorder %v12718_v3, 0.7853982  ;;  %vm12721_vm8 = vcmp.lt.s32.totalorder %v12711_v13, 0  ;;  %v6251_v46 = vpop.eup %6250  ;;  %5504 = vrot.lane.b32.xlu0 %v1587_v62, %s6387_s1  ;;  %v1362_v32 = vsub.s32 4, %v12722_v31 }
 0x4f9   :  { %6256 = vcosq.f32 %v740_v41  ;;  %v739_v8 = vsel %vm12721_vm8, %v738_v11, %v12715_v17  ;;  %v1364_v25 = vsel %vm11048_vm2, %v12717_v54, %v12723_v6  ;;  %v12724_v36 = vxor.u32 2147483648, %v10697_v55  ;;  %v12727_v17 = vld [vmem:[#allocation71_spill] sm:$0xff] }
 0x4fa   :  { %v741_v57 = vsel %vm11037_vm0, 0, %v739_v8  ;;  %6258 = vsinq.f32 %v740_v41  ;;  %vm1056_vm4 = vweird.f32 %v12697_v49  ;;  %v1061_v30 = vxor.u32 2147483648, %v6251_v46 }
 0x4fb   :  { %v11070_v45 = vsel %vm5022_vm11, %v12724_v36, %v10697_v55  ;;  %v1065_v43 = vsel %vm1063_vm9, %v1064_v58, %v6251_v46  ;;  %vm1060_vm14 = vcmp.eq.s32.totalorder %v1058_v5, 0  ;;  %v745_v53 = vadd.s32 3, %v741_v57  ;;  %v12733_v57 = vld [vmem:[#allocation64_spill] sm:$0xff] }
 0x4fc   :  { %vm12725_vm6 = vcmp.lt.s32.totalorder %v12717_v54, 0  ;;  %6260 = vcosq.f32 %v1364_v25  ;;  %vm1059_vm13 = vcmp.lt.s32.totalorder %v1058_v5, 2  ;;  %v1062_v33 = vsel %vm1060_vm14, %v6249_v56, %v1061_v30  ;;  %v12732_v56 = vld [vmem:[#allocation98_spill] sm:$0xff]  ;;  %v12737_v36 = vld [vmem:[#allocation92_spill] sm:$0xff] }
 0x4fd   :  { %v1363_v15 = vsel %vm12725_vm6, %v1362_v32, %v12722_v31  ;;  %v6253_v28 = vpop.eup %6252  ;;  %6262 = vsinq.f32 %v1364_v25  ;;  %v1066_v40 = vsel %vm1059_vm13, %v1062_v33, %v1065_v43  ;;  %vm1791_vm7 = vcmp.eq.s32.totalorder %v1786_v23, 2  ;;  %v12738_v43 = vld [vmem:[#allocation104_spill] sm:$0xff]  ;;  %v12752_v32 = vld [vmem:[#allocation113_spill] sm:$0xff] }
 0x4fe   :  { %v1365_v10 = vsel %vm11048_vm2, 0, %v1363_v15  ;;  %v6255_v55 = vpop.eup %6254  ;;  %v1792_v24 = vxor.u32 2147483648, %v6253_v28  ;;  %v1067_v35 = vsel %vm1056_vm4, nan, %v1066_v40  ;;  %v746_v14 = vand.u32 3, %v745_v53 }
 0x4ff   :  { %v1369_v0 = vadd.s32 3, %v1365_v10  ;;  %v1789_v60 = vxor.u32 2147483648, %v6255_v55  ;;  %v1882_v16 = vsub.s32 4, %v12726_v27  ;;  %5494 = vrot.lane.b32.xlu1 %v1067_v35, %s6387_s1  ;;  %vm1784_vm3 = vweird.f32 %v12704_v52 }
 0x500   :  { %vm1788_vm10 = vcmp.eq.s32.totalorder %v1786_v23, 0  ;;  %v1793_v5 = vsel %vm1791_vm7, %v1792_v24, %v6255_v55  ;;  %v12728_v11 = vand.u32 2147483647, %v12727_v17  ;;  %vm1787_vm12 = vcmp.lt.s32.totalorder %v1786_v23, 2 }
 0x501   :  { %v1790_v41 = vsel %vm1788_vm10, %v6253_v28, %v1789_v60  ;;  %vm12731_vm5 = vcmp.lt.s32.totalorder %v12727_v17, 0  ;;  %v1370_v38 = vand.u32 3, %v1369_v0  ;;  %vm744_vm1 = vweird.f32 %v12711_v13 }
 0x502   :  { %vm11086_vm15 = vcmp.le.f32.partialorder %v12728_v11, 0.7853982  ;;  %v1883_v49 = vsel %vm12731_vm5, %v1882_v16, %v12726_v27  ;;  %v1794_v3 = vsel %vm1787_vm12, %v1790_v41, %v1793_v5  ;;  %vm747_vm0 = vcmp.lt.s32.totalorder %v746_v14, 2  ;;  %v12740_v16 = vld [vmem:[#allocation80_spill] sm:$0xff]  ;;  %v12744_v41 = vld [vmem:[#allocation90_spill] sm:$0xff] }
 0x503   :  { %v1884_v63 = vsel %vm11086_vm15, %v12727_v17, %v12732_v56  ;;  %v6257_v52 = vpop.eup %6256  ;;  %v1885_v62 = vsel %vm11086_vm15, 0, %v1883_v49  ;;  %v1795_v58 = vsel %vm1784_vm3, nan, %v1794_v3  ;;  %vm751_vm9 = vcmp.eq.s32.totalorder %v746_v14, 2  ;;  %v12745_v56 = vld [vmem:[#allocation103_spill] sm:$0xff] }
 0x504   :  { %6264 = vcosq.f32 %v1884_v63  ;;  %v752_v23 = vxor.u32 2147483648, %v6257_v52  ;;  %v6259_v8 = vpop.eup %6258  ;;  %5508 = vrot.lane.b32.xlu0 %v1795_v58, %s6387_s1  ;;  %v1889_v46 = vadd.s32 3, %v1885_v62  ;;  %v12734_v31 = vand.u32 2147483647, %v12733_v57  ;;  %v12747_v58 = vld [vmem:[#allocation91_spill] sm:$0xff] }
 0x505   :  { %6266 = vsinq.f32 %v1884_v63  ;;  %v749_v6 = vxor.u32 2147483648, %v6259_v8  ;;  %v2194_v30 = vsub.s32 4, %v12737_v36  ;;  %vm748_vm8 = vcmp.eq.s32.totalorder %v746_v14, 0 }
 0x506   :  { %vm11103_vm2 = vcmp.le.f32.partialorder %v12734_v31, 0.7853982  ;;  %v753_v25 = vsel %vm751_vm9, %v752_v23, %v6259_v8  ;;  %v6261_v15 = vpop.eup %6260  ;;  %vm1371_vm4 = vcmp.lt.s32.totalorder %v1370_v38, 2  ;;  %vm1372_vm14 = vcmp.eq.s32.totalorder %v1370_v38, 0 }
 0x507   :  { %v2196_v53 = vsel %vm11103_vm2, %v12733_v57, %v12738_v43  ;;  %v6263_v28 = vpop.eup %6262  ;;  %v750_v33 = vsel %vm748_vm8, %v6257_v52, %v749_v6  ;;  %v1376_v10 = vxor.u32 2147483648, %v6261_v15  ;;  %vm12739_vm6 = vcmp.lt.s32.totalorder %v12733_v57, 0 }
 0x508   :  { %6268 = vcosq.f32 %v2196_v53  ;;  %v2195_v55 = vsel %vm12739_vm6, %v2194_v30, %v12737_v36  ;;  %v754_v40 = vsel %vm747_vm0, %v750_v33, %v753_v25  ;;  %v1373_v24 = vxor.u32 2147483648, %v6263_v28 }
 0x509   :  { %6270 = vsinq.f32 %v2196_v53  ;;  %vm1375_vm13 = vcmp.eq.s32.totalorder %v1370_v38, 2  ;;  %v1890_v0 = vand.u32 3, %v1889_v46  ;;  %v755_v35 = vsel %vm744_vm1, nan, %v754_v40  ;;  %v12751_v46 = vld [vmem:[#allocation96_spill] sm:$0xff] }
 0x50a   :  { %v1377_v60 = vsel %vm1375_vm13, %v1376_v10, %v6263_v28  ;;  %v2197_v27 = vsel %vm11103_vm2, 0, %v2195_v55  ;;  %v12741_v5 = vand.u32 2147483647, %v12740_v16  ;;  %5488 = vrot.lane.b32.xlu1 %v755_v35, %s6387_s1  ;;  %v1374_v14 = vsel %vm1372_vm14, %v6261_v15, %v1373_v24 }
 0x50b   :  { %v2201_v48 = vadd.s32 3, %v2197_v27  ;;  %v1674_v49 = vsub.s32 4, %v12744_v41  ;;  %vm1368_vm3 = vweird.f32 %v12717_v54  ;;  %v1378_v63 = vsel %vm1371_vm4, %v1374_v14, %v1377_v60 }
 0x50c   :  { %vm11122_vm7 = vcmp.le.f32.partialorder %v12741_v5, 0.7853982  ;;  %vm1888_vm10 = vweird.f32 %v12727_v17  ;;  %v1379_v3 = vsel %vm1368_vm3, nan, %v1378_v63  ;;  %vm12746_vm15 = vcmp.lt.s32.totalorder %v12740_v16, 0 }
 0x50d   :  { %v1676_v13 = vsel %vm11122_vm7, %v12740_v16, %v12745_v56  ;;  %v1675_v62 = vsel %vm12746_vm15, %v1674_v49, %v12744_v41  ;;  %v12748_v23 = vand.u32 2147483647, %v12747_v58  ;;  %5500 = vrot.lane.b32.xlu0 %v1379_v3, %s6387_s1  ;;  %v2402_v31 = vsub.s32 4, %v12751_v46  ;;  %v12758_v49 = vld [vmem:[#allocation85_spill] sm:$0xff] }
 0x50e   :  { %6272 = vcosq.f32 %v1676_v13  ;;  %v6265_v52 = vpop.eup %6264  ;;  %v1677_v38 = vsel %vm11122_vm7, 0, %v1675_v62  ;;  %vm1895_vm5 = vcmp.eq.s32.totalorder %v1890_v0, 2  ;;  %vm2200_vm1 = vweird.f32 %v12733_v57 }
 0x50f   :  { %6274 = vsinq.f32 %v1676_v13  ;;  %vm11141_vm12 = vcmp.le.f32.partialorder %v12748_v23, 0.7853982  ;;  %v1896_v54 = vxor.u32 2147483648, %v6265_v52  ;;  %v6267_v25 = vpop.eup %6266  ;;  %v2202_v36 = vand.u32 3, %v2201_v48  ;;  %v12759_v13 = vld [vmem:[#allocation100_spill] sm:$0xff]  ;;  %v12782_v48 = vld [vmem:[#allocation13_spill] sm:$0xff] }
 0x510   :  { %v2404_v6 = vsel %vm11141_vm12, %v12747_v58, %v12752_v32  ;;  %v1681_v30 = vadd.s32 3, %v1677_v38  ;;  %v1893_v43 = vxor.u32 2147483648, %v6267_v25  ;;  %vm12753_vm0 = vcmp.lt.s32.totalorder %v12747_v58, 0 }
 0x511   :  { %v1897_v53 = vsel %vm1895_vm5, %v1896_v54, %v6267_v25  ;;  %v2403_v15 = vsel %vm12753_vm0, %v2402_v31, %v12751_v46  ;;  %6276 = vcosq.f32 %v2404_v6  ;;  %vm1891_vm9 = vcmp.lt.s32.totalorder %v1890_v0, 2  ;;  %v12761_v31 = vld [vmem:[#allocation97_spill] sm:$0xff] }
 0x512   :  { %v6269_v28 = vpop.eup %6268  ;;  %vm1892_vm2 = vcmp.eq.s32.totalorder %v1890_v0, 0  ;;  %v2405_v33 = vsel %vm11141_vm12, 0, %v2403_v15  ;;  %6278 = vsinq.f32 %v2404_v6  ;;  %v1682_v24 = vand.u32 3, %v1681_v30  ;;  %v12754_v0 = vld [vmem:[#allocation78_spill] sm:$0xff] }
 0x513   :  { %v6271_v10 = vpop.eup %6270  ;;  %v1894_v55 = vsel %vm1892_vm2, %v6265_v52, %v1893_v43  ;;  %v2208_v40 = vxor.u32 2147483648, %v6269_v28  ;;  %v2409_v35 = vadd.s32 3, %v2405_v33  ;;  %vm2207_vm8 = vcmp.eq.s32.totalorder %v2202_v36, 2  ;;  %v12766_v43 = vld [vmem:[#allocation122_spill] sm:$0xff] }
 0x514   :  { %v1898_v60 = vsel %vm1891_vm9, %v1894_v55, %v1897_v53  ;;  %v2205_v27 = vxor.u32 2147483648, %v6271_v10  ;;  %vm1680_vm4 = vweird.f32 %v12740_v16  ;;  %vm2204_vm14 = vcmp.eq.s32.totalorder %v2202_v36, 0 }
 0x515   :  { %v1899_v5 = vsel %vm1888_vm10, nan, %v1898_v60  ;;  %v2209_v11 = vsel %vm2207_vm8, %v2208_v40, %v6271_v10  ;;  %v12755_v14 = vand.u32 2147483647, %v12754_v0  ;;  %vm2203_vm13 = vcmp.lt.s32.totalorder %v2202_v36, 2  ;;  %v12765_v36 = vld [vmem:[#allocation106_spill] sm:$0xff]  ;;  %v12770_v60 = vld [vmem:[#allocation4_spill] sm:$0xff] }
 0x516   :  { %5510 = vrot.lane.b32.xlu1 %v1899_v5, %s6387_s1  ;;  %v2206_v41 = vsel %vm2204_vm14, %v6269_v28, %v2205_v27  ;;  %v2090_v56 = vsub.s32 4, %v12758_v49  ;;  %vm1684_vm7 = vcmp.eq.s32.totalorder %v1682_v24, 0  ;;  %vm1687_vm3 = vcmp.eq.s32.totalorder %v1682_v24, 2  ;;  %v12774_v27 = vld [vmem:[#allocation8_spill] sm:$0xff]  ;;  %v12776_v5 = vld [vmem:[#allocation10_spill] sm:$0xff] }
 0x517   :  { %vm11164_vm6 = vcmp.le.f32.partialorder %v12755_v14, 0.7853982  ;;  %v2210_v52 = vsel %vm2203_vm13, %v2206_v41, %v2209_v11  ;;  %v2410_v3 = vand.u32 3, %v2409_v35  ;;  %vm12760_vm10 = vcmp.lt.s32.totalorder %v12754_v0, 0  ;;  %v12768_v35 = vld [vmem:[#allocation2_spill] sm:$0xff]  ;;  %v12778_v11 = vld [vmem:[#allocation11_spill] sm:$0xff] }
 0x518   :  { %v2092_v17 = vsel %vm11164_vm6, %v12754_v0, %v12759_v13  ;;  %v6273_v63 = vpop.eup %6272  ;;  %v2211_v23 = vsel %vm2200_vm1, nan, %v2210_v52  ;;  %v2091_v54 = vsel %vm12760_vm10, %v2090_v56, %v12758_v49  ;;  %v12762_v32 = vand.u32 2147483647, %v12761_v31  ;;  %v12780_v14 = vld [vmem:[#allocation12_spill] sm:$0xff]  ;;  %v12784_v41 = vld [vmem:[#allocation14_spill] sm:$0xff]  ;;  %v12786_v49 = vld [vmem:[#allocation15_spill] sm:$0xff] }
 0x519   :  { %v6275_v62 = vpop.eup %6274  ;;  %v1688_v8 = vxor.u32 2147483648, %v6273_v63  ;;  %6280 = vcosq.f32 %v2092_v17  ;;  %5516 = vrot.lane.b32.xlu0 %v2211_v23, %s6387_s1  ;;  %v2093_v46 = vsel %vm11164_vm6, 0, %v2091_v54  ;;  %v1986_v30 = vsub.s32 4, %v12765_v36  ;;  %v12788_v56 = vld [vmem:[#allocation16_spill] sm:$0xff]  ;;  %v12790_v13 = vld [vmem:[#allocation17_spill] sm:$0xff]  ;;  %v12796_v52 = vld [vmem:[#allocation7_spill] sm:$0xff] }
 0x51a   :  { %v1685_v38 = vxor.u32 2147483648, %v6275_v62  ;;  %6282 = vsinq.f32 %v2092_v17  ;;  %vm11184_vm15 = vcmp.le.f32.partialorder %v12762_v32, 0.7853982  ;;  %v2097_v25 = vadd.s32 3, %v2093_v46  ;;  %v12792_v17 = vld [vmem:[#allocation3_spill] sm:$0xff]  ;;  %v12800_v32 = vld [vmem:[#allocation93_spill] sm:$0xff] }
 0x51b   :  { %v1689_v57 = vsel %vm1687_vm3, %v1688_v8, %v6275_v62  ;;  %v1988_v53 = vsel %vm11184_vm15, %v12761_v31, %v12766_v43  ;;  %v6277_v15 = vpop.eup %6276  ;;  %vm1683_vm12 = vcmp.lt.s32.totalorder %v1682_v24, 2  ;;  %vm2411_vm5 = vcmp.lt.s32.totalorder %v2410_v3, 2  ;;  %v12772_v24 = vld [vmem:[#allocation6_spill] sm:$0xff]  ;;  %v12798_v62 = vld [vmem:[#allocation9_spill] sm:$0xff] }
 0x51c   :  { %v1686_v28 = vsel %vm1684_vm7, %v6273_v63, %v1685_v38  ;;  %6284 = vcosq.f32 %v1988_v53  ;;  %v6279_v33 = vpop.eup %6278  ;;  %vm2415_vm1 = vcmp.eq.s32.totalorder %v2410_v3, 2  ;;  %v2416_v55 = vxor.u32 2147483648, %v6277_v15  ;;  %v12794_v63 = vld [vmem:[#allocation5_spill] sm:$0xff] }
 0x51d   :  { %v1690_v10 = vsel %vm1683_vm12, %v1686_v28, %v1689_v57  ;;  %vm12767_vm0 = vcmp.lt.s32.totalorder %v12761_v31, 0  ;;  %vm12769_vm9 = vcmask 23552   ;;  %v2413_v8 = vxor.u32 2147483648, %v6279_v33  ;;  %v12804_v43 = vld [vmem:[#allocation101_spill] sm:$0xff] }
 0x51e   :  { %v1987_v40 = vsel %vm12767_vm0, %v1986_v30, %v12765_v36  ;;  %428 = vst.msk [vmem:[%s12050_s2] sm:$0xff] %vm12769_vm9, %v12768_v35  ;;  %vm12771_vm2 = vmmov %vm12769_vm9  ;;  %v1691_v23 = vsel %vm1680_vm4, nan, %v1690_v10  ;;  %6286 = vsinq.f32 %v1988_v53  ;;  %v2417_v38 = vsel %vm2415_vm1, %v2416_v55, %v6279_v33  ;;  %v12805_v10 = vld [vmem:[#allocation116_spill] sm:$0xff]  ;;  %v12817_v36 = vld [vmem:[#allocation102_spill] sm:$0xff] }
 0x51f   :  { %429 = vst.msk [vmem:[%s12050_s2 + $0x18] sm:$0xff] %vm12771_vm2, %v12770_v60  ;;  %vm12773_vm8 = vmmov %vm12771_vm2  ;;  %v1989_v54 = vsel %vm11184_vm15, 0, %v1987_v40  ;;  %5506 = vrot.lane.b32.xlu1 %v1691_v23, %s6387_s1  ;;  %v2098_v46 = vand.u32 3, %v2097_v25  ;;  %v12801_v57 = vand.u32 2147483647, %v12800_v32  ;;  %v2298_v28 = vsub.s32 4, %v12804_v43 }
 0x520   :  { %430 = vst.msk [vmem:[%s12050_s2 + $0x30] sm:$0xff] %vm12773_vm8, %v12772_v24  ;;  %vm12775_vm14 = vmmov %vm12771_vm2  ;;  %v1993_v16 = vadd.s32 3, %v1989_v54  ;;  %vm2408_vm4 = vweird.f32 %v12747_v58  ;;  %v12806_v25 = vand.u32 2147483647, %v9139_v12  ;;  %vm12809_vm1 = vcmp.lt.s32.totalorder %v12800_v32, 0  ;;  %v12811_v24 = vld [vmem:[#allocation130_spill] sm:$0xff] }
 0x521   :  { %431 = vst.msk [vmem:[%s12050_s2 + $0x48] sm:$0xff] %vm12775_vm14, %v12774_v27  ;;  %vm12777_vm6 = vmmov %vm12771_vm2  ;;  %v2299_v40 = vsel %vm12809_vm1, %v2298_v28, %v12804_v43 }
 0x522   :  { %432 = vst.msk [vmem:[%s12050_s2 + $0x60] sm:$0xff] %vm12777_vm6, %v12776_v5  ;;  %vm12779_vm13 = vmmov %vm12771_vm2  ;;  %vm11298_vm15 = vcmp.le.f32.partialorder %v12806_v25, 0.7853982  ;;  %v1994_v55 = vand.u32 3, %v1993_v16  ;;  %v12818_v16 = vld [vmem:[#allocation121_spill] sm:$0xff] }
 0x523   :  { %433 = vst.msk [vmem:[%s12050_s2 + $0x78] sm:$0xff] %vm12779_vm13, %v12778_v11  ;;  %vm12781_vm7 = vmmov %vm12771_vm2  ;;  %vm2412_vm13 = vcmp.eq.s32.totalorder %v2410_v3, 0  ;;  %v6281_v35 = vpop.eup %6280  ;;  %v12810_v3 = vld [vmem:[#allocation119_spill] sm:$0xff]  ;;  %v2612_v27 = vsel %vm11298_vm15, %v9139_v12, %v12811_v24 }
 0x524   :  { %434 = vst.msk [vmem:[%s12050_s2 + $0x90] sm:$0xff] %vm12781_vm7, %v12780_v14  ;;  %vm12783_vm3 = vmmov %vm12771_vm2  ;;  %vm11285_vm7 = vcmp.le.f32.partialorder %v12801_v57, 0.7853982  ;;  %v2414_v30 = vsel %vm2412_vm13, %v6277_v15, %v2413_v8  ;;  %v2610_v60 = vsub.s32 4, %v12810_v3  ;;  %v6283_v5 = vpop.eup %6282  ;;  %v2104_v11 = vxor.u32 2147483648, %v6281_v35 }
 0x525   :  { %435 = vst.msk [vmem:[%s12050_s2 + $0xa8] sm:$0xff] %vm12783_vm3, %v12782_v48  ;;  %vm12785_vm10 = vmmov %vm12771_vm2  ;;  %v2300_v6 = vsel %vm11285_vm7, %v12800_v32, %v12805_v10  ;;  %v2418_v53 = vsel %vm2411_vm5, %v2414_v30, %v2417_v38  ;;  %vm2096_vm3 = vweird.f32 %v12754_v0  ;;  %v2301_v58 = vsel %vm11285_vm7, 0, %v2299_v40 }
 0x526   :  { %436 = vst.msk [vmem:[%s12050_s2 + $0xc0] sm:$0xff] %vm12785_vm10, %v12784_v41  ;;  %vm12787_vm12 = vmmov %vm12771_vm2  ;;  %6288 = vcosq.f32 %v2300_v6  ;;  %v2419_v15 = vsel %vm2408_vm4, nan, %v2418_v53  ;;  %vm2099_vm5 = vcmp.lt.s32.totalorder %v2098_v46, 2  ;;  %vm2100_vm10 = vcmp.eq.s32.totalorder %v2098_v46, 0 }
 0x527   :  { %437 = vst.msk [vmem:[%s12050_s2 + $0xd8] sm:$0xff] %vm12787_vm12, %v12786_v49  ;;  %vm12789_vm0 = vmmov %vm12771_vm2  ;;  %6290 = vsinq.f32 %v2300_v6  ;;  %5520 = vrot.lane.b32.xlu0 %v2419_v15, %s6387_s1  ;;  %vm2103_vm12 = vcmp.eq.s32.totalorder %v2098_v46, 2  ;;  %v2101_v14 = vxor.u32 2147483648, %v6283_v5  ;;  %v2305_v48 = vadd.s32 3, %v2301_v58  ;;  %v6285_v49 = vpop.eup %6284 }
 0x528   :  { %438 = vst.msk [vmem:[%s12050_s2 + $0xf0] sm:$0xff] %vm12789_vm0, %v12788_v56  ;;  %vm12791_vm9 = vmmov %vm12789_vm0  ;;  %6292 = vcosq.f32 %v2612_v27  ;;  %v2105_v56 = vsel %vm2103_vm12, %v2104_v11, %v6283_v5  ;;  %v6287_v54 = vpop.eup %6286  ;;  %v2506_v30 = vsub.s32 4, %v12817_v36  ;;  %vm2304_vm13 = vweird.f32 %v12800_v32  ;;  %v12824_v11 = vld [vmem:[#allocation115_spill] sm:$0xff]  ;;  %v12831_v32 = vld [vmem:[#allocation109_spill] sm:$0xff] }
 0x529   :  { %439 = vst.msk [vmem:[%s12050_s2 + $0x108] sm:$0xff] %vm12791_vm9, %v12790_v13  ;;  %vm12793_vm2 = vmmov %vm12789_vm0  ;;  %vm1999_vm9 = vcmp.eq.s32.totalorder %v1994_v55, 2  ;;  %6294 = vsinq.f32 %v2612_v27  ;;  %v2306_v57 = vand.u32 3, %v2305_v48  ;;  %v1997_v10 = vxor.u32 2147483648, %v6287_v54  ;;  %v12825_v48 = vld [vmem:[#allocation129_spill] sm:$0xff] }
 0x52a   :  { %440 = vst.msk [vmem:[%s12050_s2 + $0x120] sm:$0xff] %vm12793_vm2, %v12792_v17  ;;  %vm12795_vm8 = vmmov %vm12789_vm0  ;;  %v2102_v17 = vsel %vm2100_vm10, %v6281_v35, %v2101_v14  ;;  %v2818_v14 = vsub.s32 4, %v12824_v11 }
 0x52b   :  { %441 = vst.msk [vmem:[%s12050_s2 + $0x138] sm:$0xff] %vm12795_vm8, %v12794_v63  ;;  %vm12797_vm14 = vmmov %vm12789_vm0  ;;  %v2000_v63 = vxor.u32 2147483648, %v6285_v49  ;;  %v2106_v38 = vsel %vm2099_vm5, %v2102_v17, %v2105_v56  ;;  %vm1992_vm8 = vweird.f32 %v12761_v31  ;;  %vm2308_vm4 = vcmp.eq.s32.totalorder %v2306_v57, 0 }
 0x52c   :  { %442 = vst.msk [vmem:[%s12050_s2 + $0x150] sm:$0xff] %vm12797_vm14, %v12796_v52  ;;  %vm12799_vm6 = vmmov %vm12789_vm0  ;;  %vm12812_vm0 = vcmp.lt.s32.totalorder %v9139_v12, 0  ;;  %v2107_v28 = vsel %vm2096_vm3, nan, %v2106_v38  ;;  %vm1995_vm14 = vcmp.lt.s32.totalorder %v1994_v55, 2  ;;  %vm2307_vm3 = vcmp.lt.s32.totalorder %v2306_v57, 2 }
 0x52d   :  { %443 = vst.msk [vmem:[%s12050_s2 + $0x168] sm:$0xff] %vm12799_vm6, %v12798_v62  ;;  %v2611_v41 = vsel %vm12812_vm0, %v2610_v60, %v12810_v3  ;;  %v12813_v62 = vld [vmem:[#allocation95_spill] sm:$0xff]  ;;  %v2001_v6 = vsel %vm1999_vm9, %v2000_v63, %v6287_v54  ;;  %5514 = vrot.lane.b32.xlu1 %v2107_v28, %s6387_s1  ;;  %vm1996_vm6 = vcmp.eq.s32.totalorder %v1994_v55, 0  ;;  %v12820_v3 = vld [vmem:[#allocation108_spill] sm:$0xff]  ;;  %v2714_v28 = vsub.s32 4, %v12831_v32 }
 0x52e   :  { %v2613_v13 = vsel %vm11298_vm15, 0, %v2611_v41  ;;  %v12814_v23 = vand.u32 2147483647, %v12813_v62  ;;  %vm12819_vm7 = vcmp.lt.s32.totalorder %v12813_v62, 0  ;;  %v1998_v25 = vsel %vm1996_vm6, %v6285_v49, %v1997_v10  ;;  %v12832_v10 = vld [vmem:[#allocation124_spill] sm:$0xff] }
 0x52f   :  { %v2617_v52 = vadd.s32 3, %v2613_v13  ;;  %v2507_v46 = vsel %vm12819_vm7, %v2506_v30, %v12817_v36  ;;  %v2002_v40 = vsel %vm1995_vm14, %v1998_v25, %v2001_v6  ;;  %vm2311_vm15 = vcmp.eq.s32.totalorder %v2306_v57, 2  ;;  %v12827_v57 = vld [vmem:[#allocation81_spill] sm:$0xff] }
 0x530   :  { %vm11321_vm2 = vcmp.le.f32.partialorder %v12814_v23, 0.7853982  ;;  %v6289_v53 = vpop.eup %6288  ;;  %v2003_v55 = vsel %vm1992_vm8, nan, %v2002_v40  ;;  %v12821_v60 = vand.u32 2147483647, %v12820_v3  ;;  %vm12826_vm12 = vcmp.lt.s32.totalorder %v12820_v3, 0 }
 0x531   :  { %v2508_v43 = vsel %vm11321_vm2, %v12813_v62, %v12818_v16  ;;  %v2618_v33 = vand.u32 3, %v2617_v52  ;;  %v2509_v0 = vsel %vm11321_vm2, 0, %v2507_v46  ;;  %v6291_v15 = vpop.eup %6290  ;;  %v2312_v35 = vxor.u32 2147483648, %v6289_v53  ;;  %5512 = vrot.lane.b32.xlu0 %v2003_v55, %s6387_s1  ;;  %v12838_v55 = vld [vmem:[#allocation120_spill] sm:$0xff]  ;;  %v12841_v30 = vld [vmem:[#allocation105_spill] sm:$0xff] }
 0x532   :  { %6296 = vcosq.f32 %v2508_v43  ;;  %v2309_v58 = vxor.u32 2147483648, %v6291_v15  ;;  %vm11345_vm1 = vcmp.le.f32.partialorder %v12821_v60, 0.7853982  ;;  %v2513_v5 = vadd.s32 3, %v2509_v0  ;;  %v6293_v41 = vpop.eup %6292  ;;  %v12839_v60 = vld [vmem:[#allocation132_spill] sm:$0xff] }
 0x533   :  { %6298 = vsinq.f32 %v2508_v43  ;;  %v2313_v27 = vsel %vm2311_vm15, %v2312_v35, %v6291_v15  ;;  %v2820_v31 = vsel %vm11345_vm1, %v12820_v3, %v12825_v48  ;;  %vm2619_vm5 = vcmp.lt.s32.totalorder %v2618_v33, 2  ;;  %v6295_v56 = vpop.eup %6294  ;;  %v12834_v15 = vld [vmem:[#allocation112_spill] sm:$0xff] }
 0x534   :  { %v2310_v49 = vsel %vm2308_vm4, %v6289_v53, %v2309_v58  ;;  %6300 = vcosq.f32 %v2820_v31  ;;  %vm2623_vm10 = vcmp.eq.s32.totalorder %v2618_v33, 2  ;;  %v2624_v17 = vxor.u32 2147483648, %v6293_v41 }
 0x535   :  { %v2314_v13 = vsel %vm2307_vm3, %v2310_v49, %v2313_v27  ;;  %v2819_v63 = vsel %vm12826_vm12, %v2818_v14, %v12824_v11  ;;  %v2621_v23 = vxor.u32 2147483648, %v6295_v56  ;;  %6302 = vsinq.f32 %v2820_v31 }
 0x536   :  { %v2315_v52 = vsel %vm2304_vm13, nan, %v2314_v13  ;;  %v2821_v8 = vsel %vm11345_vm1, 0, %v2819_v63  ;;  %vm2620_vm0 = vcmp.eq.s32.totalorder %v2618_v33, 0  ;;  %v2625_v54 = vsel %vm2623_vm10, %v2624_v17, %v6295_v56 }
 0x537   :  { %5518 = vrot.lane.b32.xlu1 %v2315_v52, %s6387_s1  ;;  %v2514_v38 = vand.u32 3, %v2513_v5  ;;  %v12828_v36 = vand.u32 2147483647, %v12827_v57  ;;  %v2622_v16 = vsel %vm2620_vm0, %v6293_v41, %v2621_v23  ;;  %v2825_v43 = vadd.s32 3, %v2821_v8 }
 0x538   :  { %vm2616_vm2 = vweird.f32 %v9139_v12  ;;  %v2626_v46 = vsel %vm2619_vm5, %v2622_v16, %v2625_v54  ;;  %vm2512_vm8 = vweird.f32 %v12813_v62  ;;  %vm12833_vm14 = vcmp.lt.s32.totalorder %v12827_v57, 0 }
 0x539   :  { %vm11365_vm9 = vcmp.le.f32.partialorder %v12828_v36, 0.7853982  ;;  %v2627_v25 = vsel %vm2616_vm2, nan, %v2626_v46  ;;  %v2715_v0 = vsel %vm12833_vm14, %v2714_v28, %v12831_v32  ;;  %v12835_v40 = vand.u32 2147483647, %v12834_v15  ;;  %v12846_v28 = vld [vmem:[#allocation125_spill] sm:$0xff] }
 0x53a   :  { %v2716_v6 = vsel %vm11365_vm9, %v12827_v57, %v12832_v10  ;;  %5524 = vrot.lane.b32.xlu0 %v2627_v25, %s6387_s1  ;;  %v2717_v33 = vsel %vm11365_vm9, 0, %v2715_v0  ;;  %v3026_v58 = vsub.s32 4, %v12838_v55  ;;  %vm2519_vm13 = vcmp.eq.s32.totalorder %v2514_v38, 2 }
 0x53b   :  { %6304 = vcosq.f32 %v2716_v6  ;;  %vm11382_vm6 = vcmp.le.f32.partialorder %v12835_v40, 0.7853982  ;;  %vm2824_vm7 = vweird.f32 %v12820_v3  ;;  %v2826_v5 = vand.u32 3, %v2825_v43  ;;  %v12858_v43 = vld [vmem:[#allocation133_spill] sm:$0xff] }
 0x53c   :  { %v6297_v53 = vpop.eup %6296  ;;  %6306 = vsinq.f32 %v2716_v6  ;;  %v3028_v24 = vsel %vm11382_vm6, %v12834_v15, %v12839_v60  ;;  %v2721_v11 = vadd.s32 3, %v2717_v33  ;;  %vm12840_vm4 = vcmp.lt.s32.totalorder %v12834_v15, 0 }
 0x53d   :  { %v2520_v12 = vxor.u32 2147483648, %v6297_v53  ;;  %v6299_v27 = vpop.eup %6298  ;;  %v3027_v31 = vsel %vm12840_vm4, %v3026_v58, %v12838_v55  ;;  %6308 = vcosq.f32 %v3028_v24  ;;  %vm2516_vm15 = vcmp.eq.s32.totalorder %v2514_v38, 0 }
 0x53e   :  { %v2517_v14 = vxor.u32 2147483648, %v6299_v27  ;;  %v6301_v41 = vpop.eup %6300  ;;  %v2722_v49 = vand.u32 3, %v2721_v11  ;;  %v3029_v56 = vsel %vm11382_vm6, 0, %v3027_v31  ;;  %6310 = vsinq.f32 %v3028_v24 }
 0x53f   :  { %v2521_v48 = vsel %vm2519_vm13, %v2520_v12, %v6299_v27  ;;  %vm2515_vm1 = vcmp.lt.s32.totalorder %v2514_v38, 2  ;;  %v2832_v17 = vxor.u32 2147483648, %v6301_v41  ;;  %v3033_v63 = vadd.s32 3, %v3029_v56  ;;  %v6303_v52 = vpop.eup %6302  ;;  %v12845_v38 = vld [vmem:[#allocation111_spill] sm:$0xff]  ;;  %v12851_v27 = vld [vmem:[#allocation128_spill] sm:$0xff] }
 0x540   :  { %v2518_v13 = vsel %vm2516_vm15, %v6297_v53, %v2517_v14  ;;  %vm2827_vm3 = vcmp.lt.s32.totalorder %v2826_v5, 2  ;;  %vm2831_vm5 = vcmp.eq.s32.totalorder %v2826_v5, 2  ;;  %vm2720_vm10 = vweird.f32 %v12827_v57  ;;  %v12857_v57 = vld [vmem:[#allocation123_spill] sm:$0xff] }
 0x541   :  { %v2522_v23 = vsel %vm2515_vm1, %v2518_v13, %v2521_v48  ;;  %v2829_v54 = vxor.u32 2147483648, %v6303_v52  ;;  %v2833_v36 = vsel %vm2831_vm5, %v2832_v17, %v6303_v52  ;;  %v12842_v16 = vand.u32 2147483647, %v12841_v30  ;;  %v12853_v52 = vld [vmem:[#allocation114_spill] sm:$0xff] }
 0x542   :  { %v2523_v8 = vsel %vm2512_vm8, nan, %v2522_v23  ;;  %vm2828_vm0 = vcmp.eq.s32.totalorder %v2826_v5, 0  ;;  %vm2724_vm9 = vcmp.eq.s32.totalorder %v2722_v49, 0  ;;  %v2922_v32 = vsub.s32 4, %v12845_v38 }
 0x543   :  { %vm11405_vm12 = vcmp.le.f32.partialorder %v12842_v16, 0.7853982  ;;  %5522 = vrot.lane.b32.xlu1 %v2523_v8, %s6387_s1  ;;  %v2830_v6 = vsel %vm2828_vm0, %v6301_v41, %v2829_v54  ;;  %vm2727_vm2 = vcmp.eq.s32.totalorder %v2722_v49, 2  ;;  %v3034_v46 = vand.u32 3, %v3033_v63 }
 0x544   :  { %v2924_v62 = vsel %vm11405_vm12, %v12841_v30, %v12846_v28  ;;  %v12847_v53 = vand.u32 2147483647, %v9327_v18  ;;  %v2834_v40 = vsel %vm2827_vm3, %v2830_v6, %v2833_v36  ;;  %vm12850_vm14 = vcmp.lt.s32.totalorder %v12841_v30, 0 }
 0x545   :  { %v6305_v10 = vpop.eup %6304  ;;  %v2923_v12 = vsel %vm12850_vm14, %v2922_v32, %v12845_v38  ;;  %6312 = vcosq.f32 %v2924_v62  ;;  %v2835_v33 = vsel %vm2824_vm7, nan, %v2834_v40  ;;  %v3234_v5 = vsub.s32 4, %v12851_v27 }
 0x546   :  { %vm11417_vm8 = vcmp.le.f32.partialorder %v12847_v53, 0.7853982  ;;  %v6307_v0 = vpop.eup %6306  ;;  %v2728_v35 = vxor.u32 2147483648, %v6305_v10  ;;  %v2925_v58 = vsel %vm11405_vm12, 0, %v2923_v12  ;;  %6314 = vsinq.f32 %v2924_v62  ;;  %5528 = vrot.lane.b32.xlu0 %v2835_v33, %s6387_s1 }
 0x547   :  { %v2725_v55 = vxor.u32 2147483648, %v6307_v0  ;;  %v2929_v24 = vadd.s32 3, %v2925_v58  ;;  %v3236_v11 = vsel %vm11417_vm8, %v9327_v18, %v9992_v2  ;;  %v6309_v14 = vpop.eup %6308  ;;  %vm2723_vm6 = vcmp.lt.s32.totalorder %v2722_v49, 2 }
 0x548   :  { %v2729_v60 = vsel %vm2727_vm2, %v2728_v35, %v6307_v0  ;;  %vm3035_vm13 = vcmp.lt.s32.totalorder %v3034_v46, 2  ;;  %6316 = vcosq.f32 %v3236_v11  ;;  %v6311_v48 = vpop.eup %6310  ;;  %vm3039_vm7 = vcmp.eq.s32.totalorder %v3034_v46, 2 }
 0x549   :  { %v2726_v3 = vsel %vm2724_vm9, %v6305_v10, %v2725_v55  ;;  %v3040_v41 = vxor.u32 2147483648, %v6309_v14  ;;  %vm12852_vm4 = vcmp.lt.s32.totalorder %v9327_v18, 0  ;;  %v3037_v17 = vxor.u32 2147483648, %v6311_v48 }
 0x54a   :  { %v2730_v31 = vsel %vm2723_vm6, %v2726_v3, %v2729_v60  ;;  %v3235_v56 = vsel %vm12852_vm4, %v3234_v5, %v12851_v27  ;;  %6318 = vsinq.f32 %v3236_v11  ;;  %vm3036_vm15 = vcmp.eq.s32.totalorder %v3034_v46, 0  ;;  %v12863_v46 = vld [vmem:[#allocation118_spill] sm:$0xff] }
 0x54b   :  { %v2731_v13 = vsel %vm2720_vm10, nan, %v2730_v31  ;;  %v3237_v2 = vsel %vm11417_vm8, 0, %v3235_v56  ;;  %v3041_v49 = vsel %vm3039_vm7, %v3040_v41, %v6311_v48  ;;  %v2930_v63 = vand.u32 3, %v2929_v24 }
 0x54c   :  { %5526 = vrot.lane.b32.xlu1 %v2731_v13, %s6387_s1  ;;  %v12854_v23 = vand.u32 2147483647, %v12853_v52  ;;  %v3038_v54 = vsel %vm3036_vm15, %v6309_v14, %v3037_v17  ;;  %v3241_v36 = vadd.s32 3, %v3237_v2  ;;  %v3546_v16 = vsub.s32 4, %v12857_v57  ;;  %v12865_v14 = vld [vmem:[#allocation117_spill] sm:$0xff]  ;;  %v12869_v13 = vld [vmem:[#allocation127_spill] sm:$0xff] }
 0x54d   :  { %vm3032_vm3 = vweird.f32 %v12834_v15  ;;  %v3042_v32 = vsel %vm3035_vm13, %v3038_v54, %v3041_v49  ;;  %v12859_v28 = vand.u32 2147483647, %v9634_v19  ;;  %vm12862_vm10 = vcmp.lt.s32.totalorder %v12853_v52, 0  ;;  %v12870_v2 = vld [vmem:[#allocation134_spill] sm:$0xff] }
 0x54e   :  { %vm11446_vm1 = vcmp.le.f32.partialorder %v12854_v23, 0.7853982  ;;  %v3043_v10 = vsel %vm3032_vm3, nan, %v3042_v32  ;;  %v3242_v6 = vand.u32 3, %v3241_v36  ;;  %v3547_v53 = vsel %vm12862_vm10, %v3546_v16, %v12857_v57 }
 0x54f   :  { %v3548_v38 = vsel %vm11446_vm1, %v12853_v52, %v12858_v43  ;;  %vm11459_vm5 = vcmp.le.f32.partialorder %v12859_v28, 0.7853982  ;;  %v6313_v25 = vpop.eup %6312  ;;  %5532 = vrot.lane.b32.xlu0 %v3043_v10, %s6387_s1  ;;  %vm2928_vm12 = vweird.f32 %v12841_v30  ;;  %v3549_v15 = vsel %vm11446_vm1, 0, %v3547_v53  ;;  %v11510_v53 = vpop.permute.xlu0 %5484 }
 0x550   :  { %6320 = vcosq.f32 %v3548_v38  ;;  %v3442_v0 = vsub.s32 4, %v12863_v46  ;;  %v3444_v40 = vsel %vm11459_vm5, %v9634_v19, %v10157_v1  ;;  %v6315_v35 = vpop.eup %6314  ;;  %vm2931_vm0 = vcmp.lt.s32.totalorder %v2930_v63, 2 }
 0x551   :  { %6322 = vsinq.f32 %v3548_v38  ;;  %vm2932_vm9 = vcmp.eq.s32.totalorder %v2930_v63, 0  ;;  %vm2935_vm2 = vcmp.eq.s32.totalorder %v2930_v63, 2  ;;  %v2936_v12 = vxor.u32 2147483648, %v6313_v25 }
 0x552   :  { %v2933_v33 = vxor.u32 2147483648, %v6315_v35  ;;  %v3553_v55 = vadd.s32 3, %v3549_v15  ;;  %vm12864_vm8 = vcmp.lt.s32.totalorder %v9634_v19, 0  ;;  %6324 = vcosq.f32 %v3444_v40  ;;  %v6317_v60 = vpop.eup %6316 }
 0x553   :  { %v3443_v58 = vsel %vm12864_vm8, %v3442_v0, %v12863_v46  ;;  %v2937_v24 = vsel %vm2935_vm2, %v2936_v12, %v6315_v35  ;;  %vm3247_vm14 = vcmp.eq.s32.totalorder %v3242_v6, 2  ;;  %6326 = vsinq.f32 %v3444_v40  ;;  %v11518_v35 = vpop.permute.xlu1 %5558 }
 0x554   :  { %v3445_v27 = vsel %vm11459_vm5, 0, %v3443_v58  ;;  %v2934_v1 = vsel %vm2932_vm9, %v6313_v25, %v2933_v33  ;;  %v3248_v5 = vxor.u32 2147483648, %v6317_v60  ;;  %v12866_v3 = vand.u32 2147483647, %v12865_v14  ;;  %v6319_v31 = vpop.eup %6318 }
 0x555   :  { %v3449_v11 = vadd.s32 3, %v3445_v27  ;;  %v2938_v41 = vsel %vm2931_vm0, %v2934_v1, %v2937_v24  ;;  %v3554_v56 = vand.u32 3, %v3553_v55  ;;  %v3130_v17 = vsub.s32 4, %v12869_v13 }
 0x556   :  { %vm11482_vm6 = vcmp.le.f32.partialorder %v12866_v3, 0.7853982  ;;  %v2939_v23 = vsel %vm2928_vm12, nan, %v2938_v41  ;;  %vm3240_vm13 = vweird.f32 %v9327_v18  ;;  %v3245_v8 = vxor.u32 2147483648, %v6319_v31  ;;  %v12881_v41 = vld [vmem:[#allocation136_spill] sm:$0xff] }
 0x557   :  { %v3132_v49 = vsel %vm11482_vm6, %v12865_v14, %v12870_v2  ;;  %v3249_v54 = vsel %vm3247_vm14, %v3248_v5, %v6319_v31  ;;  %5530 = vrot.lane.b32.xlu1 %v2939_v23, %s6387_s1  ;;  %vm3243_vm7 = vcmp.lt.s32.totalorder %v3242_v6, 2  ;;  %vm3244_vm4 = vcmp.eq.s32.totalorder %v3242_v6, 0  ;;  %v12876_v5 = vld [vmem:[#allocation126_spill] sm:$0xff] }
 0x558   :  { %vm3552_vm15 = vweird.f32 %v12853_v52  ;;  %vm12871_vm1 = vcmp.lt.s32.totalorder %v12865_v14, 0  ;;  %v3246_v57 = vsel %vm3244_vm4, %v6317_v60, %v3245_v8  ;;  %v3450_v16 = vand.u32 3, %v3449_v11  ;;  %v12880_v52 = vld [vmem:[#allocation110_spill] sm:$0xff] }
 0x559   :  { %v3131_v63 = vsel %vm12871_vm1, %v3130_v17, %v12869_v13  ;;  %6328 = vcosq.f32 %v3132_v49  ;;  %v3250_v38 = vsel %vm3243_vm7, %v3246_v57, %v3249_v54  ;;  %vm3556_vm3 = vcmp.eq.s32.totalorder %v3554_v56, 0  ;;  %v11539_v13 = vpop.permute.xlu0 %5556  ;;  %v12886_v57 = vld [vmem:[#allocation135_spill] sm:$0xff] }
 0x55a   :  { %v6321_v36 = vpop.eup %6320  ;;  %v3133_v30 = vsel %vm11482_vm6, 0, %v3131_v63  ;;  %vm3559_vm5 = vcmp.eq.s32.totalorder %v3554_v56, 2  ;;  %v3251_v28 = vsel %vm3240_vm13, nan, %v3250_v38  ;;  %6330 = vsinq.f32 %v3132_v49  ;;  %v11553_v63 = vpop.permute.xlu1 %5490 }
 0x55b   :  { %v6323_v43 = vpop.eup %6322  ;;  %v3560_v32 = vxor.u32 2147483648, %v6321_v36  ;;  %v12872_v10 = vand.u32 2147483647, %v9713_v37  ;;  %5536 = vrot.lane.b32.xlu0 %v3251_v28, %s6387_s1  ;;  %v3137_v15 = vadd.s32 3, %v3133_v30  ;;  %v3858_v46 = vsub.s32 4, %v9898_v20 }
 0x55c   :  { %v3557_v62 = vxor.u32 2147483648, %v6323_v43  ;;  %v6325_v0 = vpop.eup %6324  ;;  %vm3555_vm12 = vcmp.lt.s32.totalorder %v3554_v56, 2  ;;  %vm3451_vm0 = vcmp.lt.s32.totalorder %v3450_v16, 2  ;;  %vm3455_vm9 = vcmp.eq.s32.totalorder %v3450_v16, 2 }
 0x55d   :  { %vm11506_vm10 = vcmp.le.f32.partialorder %v12872_v10, 0.7853982  ;;  %v3561_v25 = vsel %vm3559_vm5, %v3560_v32, %v6323_v43  ;;  %v6327_v12 = vpop.eup %6326  ;;  %v3456_v55 = vxor.u32 2147483648, %v6325_v0  ;;  %vm12875_vm2 = vcmp.lt.s32.totalorder %v9713_v37, 0 }
 0x55e   :  { %v3860_v18 = vsel %vm11506_vm10, %v9713_v37, %v10312_v39  ;;  %v3558_v40 = vsel %vm3556_vm3, %v6321_v36, %v3557_v62  ;;  %v3859_v58 = vsel %vm12875_vm2, %v3858_v46, %v9898_v20  ;;  %v3453_v24 = vxor.u32 2147483648, %v6327_v12 }
 0x55f   :  { %6332 = vcosq.f32 %v3860_v18  ;;  %v3562_v33 = vsel %vm3555_vm12, %v3558_v40, %v3561_v25  ;;  %v3861_v39 = vsel %vm11506_vm10, 0, %v3859_v58  ;;  %vm3452_vm8 = vcmp.eq.s32.totalorder %v3450_v16, 0 }
 0x560   :  { %v3563_v60 = vsel %vm3552_vm15, nan, %v3562_v33  ;;  %6334 = vsinq.f32 %v3860_v18  ;;  %v3457_v27 = vsel %vm3455_vm9, %v3456_v55, %v6327_v12  ;;  %v3138_v1 = vand.u32 3, %v3137_v15  ;;  %v11572_v33 = vpop.permute.xlu1 %5562 }
 0x561   :  { %5542 = vrot.lane.b32.xlu1 %v3563_v60, %s6387_s1  ;;  %v12877_v11 = vand.u32 2147483647, %v12876_v5  ;;  %v3454_v20 = vsel %vm3452_vm8, %v6325_v0, %v3453_v24  ;;  %v3865_v48 = vadd.s32 3, %v3861_v39  ;;  %v3338_v31 = vsub.s32 4, %v12880_v52 }
 0x562   :  { %vm3448_vm6 = vweird.f32 %v9634_v19  ;;  %v3458_v17 = vsel %vm3451_vm0, %v3454_v20, %v3457_v27  ;;  %vm3136_vm13 = vweird.f32 %v12865_v14  ;;  %vm12882_vm7 = vcmp.lt.s32.totalorder %v12876_v5, 0  ;;  %v12891_v27 = vld [vmem:[#allocation131_spill] sm:$0xff] }
 0x563   :  { %vm11530_vm14 = vcmp.le.f32.partialorder %v12877_v11, 0.7853982  ;;  %v6329_v2 = vpop.eup %6328  ;;  %v3459_v49 = vsel %vm3448_vm6, nan, %v3458_v17  ;;  %v3339_v23 = vsel %vm12882_vm7, %v3338_v31, %v12880_v52  ;;  %v12883_v8 = vand.u32 2147483647, %v9804_v44  ;;  %v12892_v11 = vld [vmem:[#allocation138_spill] sm:$0xff] }
 0x564   :  { %v3340_v56 = vsel %vm11530_vm14, %v12876_v5, %v12881_v41  ;;  %5540 = vrot.lane.b32.xlu0 %v3459_v49, %s6387_s1  ;;  %v3144_v19 = vxor.u32 2147483648, %v6329_v2  ;;  %v3341_v36 = vsel %vm11530_vm14, 0, %v3339_v23  ;;  %v3650_v16 = vsub.s32 4, %v12886_v57  ;;  %v6331_v43 = vpop.eup %6330 }
 0x565   :  { %6336 = vcosq.f32 %v3340_v56  ;;  %vm11549_vm4 = vcmp.le.f32.partialorder %v12883_v8, 0.7853982  ;;  %vm3143_vm15 = vcmp.eq.s32.totalorder %v3138_v1, 2  ;;  %vm3864_vm1 = vweird.f32 %v9713_v37 }
 0x566   :  { %6338 = vsinq.f32 %v3340_v56  ;;  %v3652_v30 = vsel %vm11549_vm4, %v9804_v44, %v10506_v47  ;;  %v3866_v38 = vand.u32 3, %v3865_v48  ;;  %v3345_v32 = vadd.s32 3, %v3341_v36  ;;  %v11569_v47 = vpop.permute.xlu0 %5486 }
 0x567   :  { %v3141_v28 = vxor.u32 2147483648, %v6331_v43  ;;  %v3145_v62 = vsel %vm3143_vm15, %v3144_v19, %v6331_v43  ;;  %vm12887_vm3 = vcmp.lt.s32.totalorder %v9804_v44, 0  ;;  %6340 = vcosq.f32 %v3652_v30  ;;  %v11610_v43 = vpop.permute.xlu1 %5498 }
 0x568   :  { %v3651_v10 = vsel %vm12887_vm3, %v3650_v16, %v12886_v57  ;;  %vm3140_vm5 = vcmp.eq.s32.totalorder %v3138_v1, 0  ;;  %v3346_v25 = vand.u32 3, %v3345_v32  ;;  %6342 = vsinq.f32 %v3652_v30  ;;  %v12897_v57 = vld [vmem:[#allocation141_spill] sm:$0xff] }
 0x569   :  { %v6333_v6 = vpop.eup %6332  ;;  %v3653_v15 = vsel %vm11549_vm4, 0, %v3651_v10  ;;  %vm3139_vm10 = vcmp.lt.s32.totalorder %v3138_v1, 2  ;;  %v3142_v46 = vsel %vm3140_vm5, %v6329_v2, %v3141_v28  ;;  %vm3867_vm12 = vcmp.lt.s32.totalorder %v3866_v38, 2 }
 0x56a   :  { %v3872_v18 = vxor.u32 2147483648, %v6333_v6  ;;  %v3657_v0 = vadd.s32 3, %v3653_v15  ;;  %v6335_v40 = vpop.eup %6334  ;;  %v3146_v12 = vsel %vm3139_vm10, %v3142_v46, %v3145_v62  ;;  %vm3871_vm0 = vcmp.eq.s32.totalorder %v3866_v38, 2  ;;  %v11598_v49 = vpop.permute.xlu0 %5492 }
 0x56b   :  { %vm3344_vm9 = vweird.f32 %v12876_v5  ;;  %v3147_v55 = vsel %vm3136_vm13, nan, %v3146_v12  ;;  %v3869_v58 = vxor.u32 2147483648, %v6335_v40  ;;  %v12888_v24 = vand.u32 2147483647, %v9564_v7 }
 0x56c   :  { %v3873_v60 = vsel %vm3871_vm0, %v3872_v18, %v6335_v40  ;;  %5534 = vrot.lane.b32.xlu1 %v3147_v55, %s6387_s1  ;;  %vm3868_vm8 = vcmp.eq.s32.totalorder %v3866_v38, 0  ;;  %vm3348_vm14 = vcmp.eq.s32.totalorder %v3346_v25, 0  ;;  %v4170_v1 = vsub.s32 4, %v12891_v27  ;;  %v12902_v55 = vld [vmem:[#allocation137_spill] sm:$0xff] }
 0x56d   :  { %vm11578_vm2 = vcmp.le.f32.partialorder %v12888_v24, 0.7853982  ;;  %v3870_v20 = vsel %vm3868_vm8, %v6333_v6, %v3869_v58  ;;  %vm3351_vm6 = vcmp.eq.s32.totalorder %v3346_v25, 2  ;;  %v3658_v48 = vand.u32 3, %v3657_v0 }
 0x56e   :  { %v4172_v14 = vsel %vm11578_vm2, %v9564_v7, %v12892_v11  ;;  %v12893_v52 = vand.u32 2147483647, %v10016_v22  ;;  %v3874_v56 = vsel %vm3867_vm12, %v3870_v20, %v3873_v60  ;;  %vm12896_vm7 = vcmp.lt.s32.totalorder %v9564_v7, 0  ;;  %v11627_v40 = vpop.permute.xlu0 %5564 }
 0x56f   :  { %v6337_v3 = vpop.eup %6336  ;;  %v4171_v2 = vsel %vm12896_vm7, %v4170_v1, %v12891_v27  ;;  %6344 = vcosq.f32 %v4172_v14  ;;  %v3875_v23 = vsel %vm3864_vm1, nan, %v3874_v56  ;;  %v4482_v16 = vsub.s32 4, %v12897_v57  ;;  %v11642_v1 = vpop.permute.xlu1 %5570 }
 0x570   :  { %vm11590_vm13 = vcmp.le.f32.partialorder %v12893_v52, 0.7853982  ;;  %v6339_v41 = vpop.eup %6338  ;;  %v3352_v17 = vxor.u32 2147483648, %v6337_v3  ;;  %v4173_v54 = vsel %vm11578_vm2, 0, %v4171_v2  ;;  %6346 = vsinq.f32 %v4172_v14  ;;  %5548 = vrot.lane.b32.xlu0 %v3875_v23, %s6387_s1 }
 0x571   :  { %v3349_v8 = vxor.u32 2147483648, %v6339_v41  ;;  %v4177_v36 = vadd.s32 3, %v4173_v54  ;;  %v4484_v30 = vsel %vm11590_vm13, %v10016_v22, %v10531_v42  ;;  %v6341_v37 = vpop.eup %6340  ;;  %vm3347_vm4 = vcmp.lt.s32.totalorder %v3346_v25, 2 }
 0x572   :  { %v3353_v19 = vsel %vm3351_vm6, %v3352_v17, %v6339_v41  ;;  %vm3659_vm15 = vcmp.lt.s32.totalorder %v3658_v48, 2  ;;  %6348 = vcosq.f32 %v4484_v30  ;;  %v6343_v32 = vpop.eup %6342  ;;  %vm3663_vm1 = vcmp.eq.s32.totalorder %v3658_v48, 2  ;;  %v11659_v2 = vpop.permute.xlu0 %5496 }
 0x573   :  { %v3350_v38 = vsel %vm3348_vm14, %v6337_v3, %v3349_v8  ;;  %v3664_v62 = vxor.u32 2147483648, %v6341_v37  ;;  %vm12898_vm3 = vcmp.lt.s32.totalorder %v10016_v22, 0  ;;  %v3661_v42 = vxor.u32 2147483648, %v6343_v32 }
 0x574   :  { %v3354_v28 = vsel %vm3347_vm4, %v3350_v38, %v3353_v19  ;;  %v4483_v10 = vsel %vm12898_vm3, %v4482_v16, %v12897_v57  ;;  %6350 = vsinq.f32 %v4484_v30  ;;  %vm3660_vm5 = vcmp.eq.s32.totalorder %v3658_v48, 0 }
 0x575   :  { %v3355_v6 = vsel %vm3344_vm9, nan, %v3354_v28  ;;  %v4485_v15 = vsel %vm11590_vm13, 0, %v4483_v10  ;;  %v3665_v25 = vsel %vm3663_vm1, %v3664_v62, %v6343_v32  ;;  %v4178_v46 = vand.u32 3, %v4177_v36  ;;  %v12911_v32 = vld [vmem:[#allocation139_spill] sm:$0xff] }
 0x576   :  { %5538 = vrot.lane.b32.xlu1 %v3355_v6, %s6387_s1  ;;  %v12899_v18 = vand.u32 2147483647, %v9871_v4  ;;  %v3662_v5 = vsel %vm3660_vm5, %v6341_v37, %v3661_v42  ;;  %v4489_v12 = vadd.s32 3, %v4485_v15  ;;  %v4794_v58 = vsub.s32 4, %v12902_v55 }
 0x577   :  { %vm3656_vm12 = vweird.f32 %v9804_v44  ;;  %v3666_v24 = vsel %vm3659_vm15, %v3662_v5, %v3665_v25  ;;  %v12903_v39 = vand.u32 2147483647, %v10223_v50  ;;  %vm12906_vm9 = vcmp.lt.s32.totalorder %v9871_v4, 0 }
 0x578   :  { %vm11623_vm10 = vcmp.le.f32.partialorder %v12899_v18, 0.7853982  ;;  %v3667_v11 = vsel %vm3656_vm12, nan, %v3666_v24  ;;  %v4490_v14 = vand.u32 3, %v4489_v12  ;;  %v4795_v3 = vsel %vm12906_vm9, %v4794_v58, %v12902_v55  ;;  %v11688_v18 = vpop.permute.xlu0 %5568 }
 0x579   :  { %v4796_v60 = vsel %vm11623_vm10, %v9871_v4, %v10517_v9  ;;  %vm11638_vm0 = vcmp.le.f32.partialorder %v12903_v39, 0.7853982  ;;  %v6345_v9 = vpop.eup %6344  ;;  %5544 = vrot.lane.b32.xlu0 %v3667_v11, %s6387_s1  ;;  %vm4176_vm2 = vweird.f32 %v9564_v7  ;;  %v4797_v44 = vsel %vm11623_vm10, 0, %v4795_v3 }
 0x57a   :  { %6352 = vcosq.f32 %v4796_v60  ;;  %v4066_v20 = vsub.s32 4, %v10407_v61  ;;  %v4068_v48 = vsel %vm11638_vm0, %v10223_v50, %v10708_v34  ;;  %v6347_v52 = vpop.eup %6346  ;;  %vm4179_vm8 = vcmp.lt.s32.totalorder %v4178_v46, 2 }
 0x57b   :  { %6354 = vsinq.f32 %v4796_v60  ;;  %vm4180_vm14 = vcmp.eq.s32.totalorder %v4178_v46, 0  ;;  %vm4183_vm6 = vcmp.eq.s32.totalorder %v4178_v46, 2  ;;  %v4184_v31 = vxor.u32 2147483648, %v6345_v9 }
 0x57c   :  { %v4181_v41 = vxor.u32 2147483648, %v6347_v52  ;;  %v4801_v56 = vadd.s32 3, %v4797_v44  ;;  %vm12907_vm13 = vcmp.lt.s32.totalorder %v10223_v50, 0  ;;  %6356 = vcosq.f32 %v4068_v48  ;;  %v6349_v23 = vpop.eup %6348 }
 0x57d   :  { %v4067_v17 = vsel %vm12907_vm13, %v4066_v20, %v10407_v61  ;;  %v4185_v8 = vsel %vm4183_vm6, %v4184_v31, %v6347_v52  ;;  %vm4495_vm7 = vcmp.eq.s32.totalorder %v4490_v14, 2  ;;  %6358 = vsinq.f32 %v4068_v48  ;;  %v11669_v61 = vpop.permute.xlu1 %5502 }
 0x57e   :  { %v4069_v34 = vsel %vm11638_vm0, 0, %v4067_v17  ;;  %v4182_v54 = vsel %vm4180_vm14, %v6345_v9, %v4181_v41  ;;  %v4496_v19 = vxor.u32 2147483648, %v6349_v23  ;;  %v12908_v57 = vand.u32 2147483647, %v9875_v29  ;;  %v6351_v30 = vpop.eup %6350 }
 0x57f   :  { %v4073_v36 = vadd.s32 3, %v4069_v34  ;;  %v4186_v37 = vsel %vm4179_vm8, %v4182_v54, %v4185_v8  ;;  %v4802_v38 = vand.u32 3, %v4801_v56  ;;  %v3754_v28 = vsub.s32 4, %v12911_v32  ;;  %v11713_v56 = vpop.permute.xlu0 %5504  ;;  %v12919_v54 = vld [vmem:[#allocation142_spill] sm:$0xff]  ;;  %v12934_v34 = vld [vmem:[#allocation28_spill] sm:$0xff] }
 0x580   :  { %vm11665_vm4 = vcmp.le.f32.partialorder %v12908_v57, 0.7853982  ;;  %v4187_v10 = vsel %vm4176_vm2, nan, %v4186_v37  ;;  %vm4488_vm15 = vweird.f32 %v10016_v22  ;;  %v4493_v6 = vxor.u32 2147483648, %v6351_v30 }
 0x581   :  { %v3756_v62 = vsel %vm11665_vm4, %v9875_v29, %v10524_v51  ;;  %v4497_v42 = vsel %vm4495_vm7, %v4496_v19, %v6351_v30  ;;  %5554 = vrot.lane.b32.xlu1 %v4187_v10, %s6387_s1  ;;  %vm4491_vm1 = vcmp.lt.s32.totalorder %v4490_v14, 2  ;;  %vm4492_vm3 = vcmp.eq.s32.totalorder %v4490_v14, 0  ;;  %v11698_v39 = vpop.permute.xlu1 %5574 }
 0x582   :  { %vm4800_vm5 = vweird.f32 %v9871_v4  ;;  %vm12912_vm10 = vcmp.lt.s32.totalorder %v9875_v29, 0  ;;  %v4494_v51 = vsel %vm4492_vm3, %v6349_v23, %v4493_v6  ;;  %v4074_v46 = vand.u32 3, %v4073_v36  ;;  %v12920_v36 = vld [vmem:[#allocation27_spill] sm:$0xff] }
 0x583   :  { %v3755_v15 = vsel %vm12912_vm10, %v3754_v28, %v12911_v32  ;;  %6360 = vcosq.f32 %v3756_v62  ;;  %v4498_v5 = vsel %vm4491_vm1, %v4494_v51, %v4497_v42  ;;  %vm4804_vm12 = vcmp.eq.s32.totalorder %v4802_v38, 0  ;;  %v12922_v28 = vld [vmem:[#allocation46_spill] sm:$0xff]  ;;  %v12926_v42 = vld [vmem:[#allocation73_spill] sm:$0xff] }
 0x584   :  { %v6353_v25 = vpop.eup %6352  ;;  %v3757_v7 = vsel %vm11665_vm4, 0, %v3755_v15  ;;  %vm4807_vm0 = vcmp.eq.s32.totalorder %v4802_v38, 2  ;;  %v4499_v55 = vsel %vm4488_vm15, nan, %v4498_v5  ;;  %6362 = vsinq.f32 %v3756_v62  ;;  %v11750_v5 = vpop.permute.xlu0 %5508 }
 0x585   :  { %v6355_v0 = vpop.eup %6354  ;;  %v4808_v12 = vxor.u32 2147483648, %v6353_v25  ;;  %v12913_v60 = vand.u32 2147483647, %v10258_v59  ;;  %5560 = vrot.lane.b32.xlu0 %v4499_v55, %s6387_s1  ;;  %v3761_v11 = vadd.s32 3, %v3757_v7  ;;  %v5106_v14 = vsub.s32 4, %v10489_v26  ;;  %v11727_v16 = vpop.permute.xlu1 %5494 }
 0x586   :  { %v4805_v58 = vxor.u32 2147483648, %v6355_v0  ;;  %v6357_v3 = vpop.eup %6356  ;;  %vm4803_vm2 = vcmp.lt.s32.totalorder %v4802_v38, 2  ;;  %vm4075_vm8 = vcmp.lt.s32.totalorder %v4074_v46, 2  ;;  %vm4079_vm14 = vcmp.eq.s32.totalorder %v4074_v46, 2 }
 0x587   :  { %vm11694_vm9 = vcmp.le.f32.partialorder %v12913_v60, 0.7853982  ;;  %v4809_v27 = vsel %vm4807_vm0, %v4808_v12, %v6355_v0  ;;  %v6359_v44 = vpop.eup %6358  ;;  %v4080_v48 = vxor.u32 2147483648, %v6357_v3  ;;  %v5107_v52 = vsel %vm5022_vm11, %v5106_v14, %v10489_v26 }
 0x588   :  { %v5108_v22 = vsel %vm11694_vm9, %v10258_v59, %v11070_v45  ;;  %v4806_v9 = vsel %vm4804_vm12, %v6353_v25, %v4805_v58  ;;  %v4077_v41 = vxor.u32 2147483648, %v6359_v44  ;;  %v5109_v45 = vsel %vm11694_vm9, 0, %v5107_v52  ;;  %v12927_v25 = vld [vmem:[#allocation87_spill] sm:$0xff] }
 0x589   :  { %6364 = vcosq.f32 %v5108_v22  ;;  %v4810_v20 = vsel %vm4803_vm2, %v4806_v9, %v4809_v27  ;;  %vm4076_vm6 = vcmp.eq.s32.totalorder %v4074_v46, 0  ;;  %v4081_v17 = vsel %vm4079_vm14, %v4080_v48, %v6359_v44  ;;  %v11757_v27 = vpop.permute.xlu1 %5488 }
 0x58a   :  { %v4811_v31 = vsel %vm4800_vm5, nan, %v4810_v20  ;;  %6366 = vsinq.f32 %v5108_v22  ;;  %v3762_v23 = vand.u32 3, %v3761_v11  ;;  %v12916_v8 = vand.u32 2147483647, %v10078_v21 }
 0x58b   :  { %5566 = vrot.lane.b32.xlu1 %v4811_v31, %s6387_s1  ;;  %v4078_v4 = vsel %vm4076_vm6, %v6357_v3, %v4077_v41  ;;  %v5113_v26 = vadd.s32 3, %v5109_v45  ;;  %v3962_v19 = vsub.s32 4, %v12919_v54  ;;  %vm4072_vm11 = vweird.f32 %v10223_v50  ;;  %v12929_v31 = vld [vmem:[#allocation140_spill] sm:$0xff] }
 0x58c   :  { %vm11718_vm13 = vcmp.le.f32.partialorder %v12916_v8, 0.7853982  ;;  %v4082_v30 = vsel %vm4075_vm8, %v4078_v4, %v4081_v17  ;;  %vm3760_vm7 = vweird.f32 %v9875_v29  ;;  %vm12921_vm4 = vcmp.lt.s32.totalorder %v10078_v21, 0  ;;  %v5501_v4 = vpop.permute.xlu0 %5500 }
 0x58d   :  { %v3964_v57 = vsel %vm11718_vm13, %v10078_v21, %v12920_v36  ;;  %v6361_v37 = vpop.eup %6360  ;;  %v4083_v38 = vsel %vm4072_vm11, nan, %v4082_v30  ;;  %v3963_v32 = vsel %vm12921_vm4, %v3962_v19, %v12919_v54  ;;  %v12923_v62 = vand.u32 2147483647, %v12922_v28 }
 0x58e   :  { %6368 = vcosq.f32 %v3964_v57  ;;  %5552 = vrot.lane.b32.xlu0 %v4083_v38, %s6387_s1  ;;  %v3768_v50 = vxor.u32 2147483648, %v6361_v37  ;;  %v3965_v6 = vsel %vm11718_vm13, 0, %v3963_v32  ;;  %v5314_v15 = vsub.s32 4, %v12926_v42  ;;  %v6363_v46 = vpop.eup %6362 }
 0x58f   :  { %6370 = vsinq.f32 %v3964_v57  ;;  %vm11737_vm15 = vcmp.le.f32.partialorder %v12923_v62, 0.7853982  ;;  %vm3767_vm1 = vcmp.eq.s32.totalorder %v3762_v23, 2  ;;  %vm5112_vm3 = vweird.f32 %v10258_v59 }
 0x590   :  { %v5316_v51 = vsel %vm11737_vm15, %v12922_v28, %v12927_v25  ;;  %v5114_v7 = vand.u32 3, %v5113_v26  ;;  %v3969_v0 = vadd.s32 3, %v3965_v6  ;;  %v3765_v12 = vxor.u32 2147483648, %v6363_v46 }
 0x591   :  { %v3769_v55 = vsel %vm3767_vm1, %v3768_v50, %v6363_v46  ;;  %vm12928_vm5 = vcmp.lt.s32.totalorder %v12922_v28, 0  ;;  %6372 = vcosq.f32 %v5316_v51  ;;  %vm3763_vm10 = vcmp.lt.s32.totalorder %v3762_v23, 2 }
 0x592   :  { %v5315_v58 = vsel %vm12928_vm5, %v5314_v15, %v12926_v42  ;;  %vm3764_vm12 = vcmp.eq.s32.totalorder %v3762_v23, 0  ;;  %6374 = vsinq.f32 %v5316_v51  ;;  %v3970_v22 = vand.u32 3, %v3969_v0  ;;  %v12933_v23 = vld [vmem:[#allocation20_spill] sm:$0xff] }
 0x593   :  { %v6365_v60 = vpop.eup %6364  ;;  %v5317_v24 = vsel %vm11737_vm15, 0, %v5315_v58  ;;  %v3766_v11 = vsel %vm3764_vm12, %v6361_v37, %v3765_v12  ;;  %vm5115_vm0 = vcmp.lt.s32.totalorder %v5114_v7, 2  ;;  %vm5116_vm9 = vcmp.eq.s32.totalorder %v5114_v7, 0  ;;  %v11825_v37 = vpop.permute.xlu1 %5510 }
 0x594   :  { %v5120_v14 = vxor.u32 2147483648, %v6365_v60  ;;  %v5321_v3 = vadd.s32 3, %v5317_v24  ;;  %v6367_v9 = vpop.eup %6366  ;;  %v3770_v44 = vsel %vm3763_vm10, %v3766_v11, %v3769_v55  ;;  %vm5119_vm2 = vcmp.eq.s32.totalorder %v5114_v7, 2 }
 0x595   :  { %vm3968_vm8 = vweird.f32 %v10078_v21  ;;  %v3771_v20 = vsel %vm3760_vm7, nan, %v3770_v44  ;;  %v5117_v48 = vxor.u32 2147483648, %v6367_v9  ;;  %v12930_v41 = vand.u32 2147483647, %v12929_v31 }
 0x596   :  { %v5121_v52 = vsel %vm5119_vm2, %v5120_v14, %v6367_v9  ;;  %5546 = vrot.lane.b32.xlu1 %v3771_v20, %s6387_s1  ;;  %v11769_v17 = vand.u32 3, %v5321_v3  ;;  %v5418_v8 = vsub.s32 4, %v12933_v23  ;;  %vm5660_vm6 = vcmask 1047576  }
 0x597   :  { %vm11764_vm14 = vcmp.le.f32.partialorder %v12930_v41, 0.7853982  ;;  %v5118_v54 = vsel %vm5116_vm9, %v6365_v60, %v5117_v48  ;;  %vm3971_vm13 = vcmp.lt.s32.totalorder %v3970_v22, 2  ;;  %vm3972_vm11 = vcmp.eq.s32.totalorder %v3970_v22, 0  ;;  %5661 = vst.msk [vmem:[%s12050_s2] sm:$0xff] %vm5660_vm6, %v11510_v53  ;;  %5698 = vst.msk [vmem:[%s12050_s2 + $0x120] sm:$0xff] %vm5660_vm6, %v11539_v13 }
 0x598   :  { %v5420_v29 = vsel %vm11764_vm14, %v12929_v31, %v12934_v34  ;;  %v6369_v26 = vpop.eup %6368  ;;  %vm3975_vm7 = vcmp.eq.s32.totalorder %v3970_v22, 2  ;;  %5665 = vst.msk [vmem:[%s12050_s2 + $0x18] sm:$0xff] %vm5660_vm6, %v11553_v63  ;;  %5701 = vst.msk [vmem:[%s12050_s2 + $0x138] sm:$0xff] %vm5660_vm6, %v11572_v33  ;;  %v5122_v36 = vsel %vm5115_vm0, %v5118_v54, %v5121_v52  ;;  %vm12935_vm4 = vcmp.lt.s32.totalorder %v12929_v31, 0 }
 0x599   :  { %5668 = vst.msk [vmem:[%s12050_s2 + $0x30] sm:$0xff] %vm5660_vm6, %v11659_v2  ;;  %5671 = vst.msk [vmem:[%s12050_s2 + $0x48] sm:$0xff] %vm5660_vm6, %v11669_v61  ;;  %v6371_v19 = vpop.eup %6370  ;;  %v3976_v57 = vxor.u32 2147483648, %v6369_v26  ;;  %v5419_v30 = vsel %vm12935_vm4, %v5418_v8, %v12933_v23  ;;  %6376 = vcosq.f32 %v5420_v29  ;;  %v5123_v38 = vsel %vm5112_vm3, nan, %v5122_v36 }
 0x59a   :  { %5704 = vst.msk [vmem:[%s12050_s2 + $0x150] sm:$0xff] %vm5660_vm6, %v11688_v18  ;;  %5707 = vst.msk [vmem:[%s12050_s2 + $0x168] sm:$0xff] %vm5660_vm6, %v11698_v39  ;;  %v3973_v32 = vxor.u32 2147483648, %v6371_v19  ;;  %v5421_v62 = vsel %vm11764_vm14, 0, %v5419_v30  ;;  %6378 = vsinq.f32 %v5420_v29  ;;  %5572 = vrot.lane.b32.xlu0 %v5123_v38, %s6387_s1  ;;  %vm5327_vm15 = vcmp.eq.s32.totalorder %v11769_v17, 2 }
 0x59b   :  { %5674 = vst.msk [vmem:[%s12050_s2 + $0x60] sm:$0xff] %vm5660_vm6, %v11750_v5  ;;  %v3977_v10 = vsel %vm3975_vm7, %v3976_v57, %v6371_v19  ;;  %vm12936_vm1 = vcmask 23552   ;;  %v6373_v6 = vpop.eup %6372  ;;  %v5425_v7 = vadd.s32 3, %v5421_v62  ;;  %vm5663_vm2 = vcmask 334848  }
 0x59c   :  { %v5604_v50 = vsel %vm12936_vm1, %v11539_v13, %v11518_v35  ;;  %vm12937_vm5 = vmmov %vm12936_vm1  ;;  %v3974_v42 = vsel %vm3972_vm11, %v6369_v26, %v3973_v32  ;;  %v6375_v25 = vpop.eup %6374  ;;  %v5328_v46 = vxor.u32 2147483648, %v6373_v6  ;;  %vm5320_vm14 = vweird.f32 %v12922_v28 }
 0x59d   :  { %v5580_v59 = vsel %vm12937_vm5, %v11510_v53, %v11569_v47  ;;  %5699 = vst [vmem:[%s12050_s2 + $0x128] sm:$0xff] %v5604_v50  ;;  %vm12938_vm3 = vmmov %vm12936_vm1  ;;  %v3978_v51 = vsel %vm3971_vm13, %v3974_v42, %v3977_v10  ;;  %v5325_v0 = vxor.u32 2147483648, %v6375_v25  ;;  %vm5323_vm13 = vcmp.lt.s32.totalorder %v11769_v17, 2 }
 0x59e   :  { %5662 = vst [vmem:[%s12050_s2 + $0x8] sm:$0xff] %v5580_v59  ;;  %v5582_v15 = vsel %vm12938_vm3, %v11553_v63, %v11598_v49  ;;  %vm12939_vm10 = vmmov %vm12936_vm1  ;;  %vm5324_vm11 = vcmp.eq.s32.totalorder %v11769_v17, 0  ;;  %v5329_v21 = vsel %vm5327_vm15, %v5328_v46, %v6375_v25  ;;  %v5426_v11 = vand.u32 3, %v5425_v7 }
 0x59f   :  { %v5606_v13 = vsel %vm12939_vm10, %v11572_v33, %v11627_v40  ;;  %vm12940_vm12 = vmmov %vm12936_vm1  ;;  %5666 = vst [vmem:[%s12050_s2 + $0x20] sm:$0xff] %v5582_v15  ;;  %v5517_v33 = vpop.permute.xlu0 %5516  ;;  %v5326_v55 = vsel %vm5324_vm11, %v6373_v6, %v5325_v0 }
 0x5a0   :  { %v5584_v53 = vsel %vm12940_vm12, %v11659_v2, %v11610_v43  ;;  %5702 = vst [vmem:[%s12050_s2 + $0x140] sm:$0xff] %v5606_v13  ;;  %vm12941_vm0 = vmmov %vm12936_vm1  ;;  %v3979_v2 = vsel %vm3968_vm8, nan, %v3978_v51  ;;  %v5330_v24 = vsel %vm5323_vm13, %v5326_v55, %v5329_v21  ;;  %vm5431_vm5 = vcmp.eq.s32.totalorder %v5426_v11, 2 }
 0x5a1   :  { %5669 = vst [vmem:[%s12050_s2 + $0x38] sm:$0xff] %v5584_v53  ;;  %v5608_v63 = vsel %vm12941_vm0, %v11688_v18, %v11642_v1  ;;  %vm12942_vm9 = vmmov %vm12941_vm0  ;;  %5550 = vrot.lane.b32.xlu1 %v3979_v2, %s6387_s1  ;;  %v5507_v18 = vpop.permute.xlu1 %5506  ;;  %vm5428_vm3 = vcmp.eq.s32.totalorder %v5426_v11, 0  ;;  %vm5427_vm10 = vcmp.lt.s32.totalorder %v5426_v11, 2  ;;  %vm5424_vm12 = vweird.f32 %v12929_v31 }
 0x5a2   :  { %5705 = vst [vmem:[%s12050_s2 + $0x158] sm:$0xff] %v5608_v63  ;;  %v5586_v12 = vsel %vm12942_vm9, %v11669_v61, %v11713_v56  ;;  %vm12943_vm8 = vmmov %vm12941_vm0 }
 0x5a3   :  { %5672 = vst [vmem:[%s12050_s2 + $0x50] sm:$0xff] %v5586_v12  ;;  %v5583_v61 = vsel %vm12943_vm8, %v11598_v49, %v11727_v16  ;;  %vm12944_vm7 = vmmov %vm12941_vm0  ;;  %v6377_v16 = vpop.eup %6376 }
 0x5a4   :  { %v5581_v58 = vsel %vm12944_vm7, %v11569_v47, %v11757_v27  ;;  %vm12945_vm4 = vmmov %vm12941_vm0  ;;  %5667 = vst.msk [vmem:[%s12050_s2 + $0x28] sm:$0xff] %vm5663_vm2, %v5583_v61  ;;  %v5521_v27 = vpop.permute.xlu0 %5520  ;;  %v5432_v14 = vxor.u32 2147483648, %v6377_v16 }
 0x5a5   :  { %v5585_v60 = vsel %vm12945_vm4, %v11610_v43, %v5501_v4  ;;  %5664 = vst.msk [vmem:[%s12050_s2 + $0x10] sm:$0xff] %vm5663_vm2, %v5581_v58  ;;  %vm12946_vm15 = vmmov %vm12941_vm0  ;;  %v5331_v43 = vsel %vm5320_vm14, nan, %v5330_v24  ;;  %v5515_v44 = vpop.permute.xlu1 %5514 }
 0x5a6   :  { %5670 = vst.msk [vmem:[%s12050_s2 + $0x40] sm:$0xff] %vm5663_vm2, %v5585_v60  ;;  %v5588_v47 = vsel %vm12946_vm15, %v11750_v5, %v11825_v37  ;;  %vm12947_vm1 = vmmov %vm12941_vm0  ;;  %5576 = vrot.lane.b32.xlu0 %v5331_v43, %s6387_s1  ;;  %v6379_v5 = vpop.eup %6378  ;;  %v5590_v20 = vsel %vm12941_vm0, %v5515_v44, %v5517_v33 }
 0x5a7   :  { %v5587_v49 = vsel %vm12947_vm1, %v11713_v56, %v5507_v18  ;;  %5675 = vst [vmem:[%s12050_s2 + $0x68] sm:$0xff] %v5588_v47  ;;  %5680 = vst.msk [vmem:[%s12050_s2 + $0x90] sm:$0xff] %vm5660_vm6, %v5521_v27  ;;  %v5429_v56 = vxor.u32 2147483648, %v6379_v5  ;;  %v5433_v28 = vsel %vm5431_vm5, %v5432_v14, %v6379_v5 }
 0x5a8   :  { %5673 = vst.msk [vmem:[%s12050_s2 + $0x58] sm:$0xff] %vm5663_vm2, %v5587_v49  ;;  %5678 = vst [vmem:[%s12050_s2 + $0x80] sm:$0xff] %v5590_v20  ;;  %v5513_v48 = vpop.permute.xlu0 %5512 }
 0x5a9   :  { %v5430_v22 = vsel %vm5428_vm3, %v6377_v16, %v5429_v56  ;;  %5677 = vst.msk [vmem:[%s12050_s2 + $0x78] sm:$0xff] %vm5660_vm6, %v5515_v44  ;;  %vm12948_vm9 = vmmov %vm12941_vm0  ;;  %v5519_v31 = vpop.permute.xlu1 %5518 }
 0x5aa   :  { %v5434_v3 = vsel %vm5427_vm10, %v5430_v22, %v5433_v28  ;;  %v5589_v52 = vsel %vm12948_vm9, %v11825_v37, %v5513_v48  ;;  %vm12949_vm14 = vmmov %vm12941_vm0 }
 0x5ab   :  { %v5435_v9 = vsel %vm5424_vm12, nan, %v5434_v3  ;;  %5676 = vst.msk [vmem:[%s12050_s2 + $0x70] sm:$0xff] %vm5663_vm2, %v5589_v52  ;;  %v5591_v41 = vsel %vm12949_vm14, %v5517_v33, %v5519_v31  ;;  %vm12950_vm13 = vmmov %vm12941_vm0 }
 0x5ac   :  { %5578 = vrot.lane.b32.xlu1 %v5435_v9, %s6387_s1  ;;  %5679 = vst.msk [vmem:[%s12050_s2 + $0x88] sm:$0xff] %vm5663_vm2, %v5591_v41  ;;  %v5525_v45 = vpop.permute.xlu0 %5524  ;;  %vm12951_vm11 = vmmov %vm12941_vm0 }
 0x5ad   :  { %vm12952_vm8 = vmmov %vm12941_vm0 }
 0x5ae   :  { %vm12953_vm7 = vmmov %vm12941_vm0 }
 0x5af   :  { %vm12954_vm4 = vmmov %vm12941_vm0 }
 0x5b0   :  { %vm12955_vm15 = vmmov %vm12941_vm0 }
 0x5b1   :  { %vm12956_vm1 = vmmov %vm12941_vm0 }
 0x5b2   :  { %vm12957_vm5 = vmmov %vm12941_vm0 }
 0x5b3   :  { %vm12958_vm3 = vmmov %vm12941_vm0 }
 0x5b4   :  { %vm12959_vm10 = vmmov %vm12941_vm0 }
 0x5b5   :  { %v5523_v17 = vpop.permute.xlu1 %5522  ;;  %vm12960_vm12 = vmmov %vm12941_vm0 }
 0x5b6   :  { %v5592_v23 = vsel %vm12950_vm13, %v5521_v27, %v5523_v17  ;;  %v5593_v8 = vsel %vm12951_vm11, %v5523_v17, %v5525_v45  ;;  %vm12961_vm9 = vmmov %vm12941_vm0 }
 0x5b7   :  { %5681 = vst [vmem:[%s12050_s2 + $0x98] sm:$0xff] %v5592_v23  ;;  %5682 = vst.msk [vmem:[%s12050_s2 + $0xa0] sm:$0xff] %vm5663_vm2, %v5593_v8 }
 0x5b8   :  { %v5529_v34 = vpop.permute.xlu0 %5528  ;;  %vm12962_vm14 = vmmov %vm12941_vm0 }
 0x5b9   :  { %vm12963_vm13 = vmmov %vm12941_vm0 }
 0x5ba   :  { %vm12964_vm11 = vmmov %vm12941_vm0 }
 0x5be   :  { %v5527_v29 = vpop.permute.xlu1 %5526 }
 0x5bf   :  { %v5594_v4 = vsel %vm12952_vm8, %v5527_v29, %v5529_v34  ;;  %5683 = vst.msk [vmem:[%s12050_s2 + $0xa8] sm:$0xff] %vm5660_vm6, %v5527_v29  ;;  %vm12965_vm8 = vmmov %vm12941_vm0 }
 0x5c0   :  { %5684 = vst [vmem:[%s12050_s2 + $0xb0] sm:$0xff] %v5594_v4 }
 0x5c1   :  { %v5533_v26 = vpop.permute.xlu0 %5532 }
 0x5c2   :  { %5686 = vst.msk [vmem:[%s12050_s2 + $0xc0] sm:$0xff] %vm5660_vm6, %v5533_v26 }
 0x5c9   :  { %v5531_v54 = vpop.permute.xlu1 %5530 }
 0x5ca   :  { %v5595_v19 = vsel %vm12953_vm7, %v5529_v34, %v5531_v54 }
 0x5cb   :  { %5685 = vst.msk [vmem:[%s12050_s2 + $0xb8] sm:$0xff] %vm5663_vm2, %v5595_v19 }
 0x5cd   :  { %v5537_v36 = vpop.permute.xlu0 %5536 }
 0x5d3   :  { %v5543_v57 = vpop.permute.xlu1 %5542 }
 0x5d6   :  { %v5541_v30 = vpop.permute.xlu0 %5540 }
 0x5d7   :  { %v5599_v37 = vsel %vm12954_vm4, %v5541_v30, %v5543_v57 }
 0x5d8   :  { %5691 = vst.msk [vmem:[%s12050_s2 + $0xe8] sm:$0xff] %vm5663_vm2, %v5599_v37 }
 0x5de   :  { %v5535_v38 = vpop.permute.xlu1 %5534 }
 0x5df   :  { %v5596_v32 = vsel %vm12955_vm15, %v5533_v26, %v5535_v38  ;;  %v5597_v62 = vsel %vm12956_vm1, %v5535_v38, %v5537_v36 }
 0x5e0   :  { %5687 = vst [vmem:[%s12050_s2 + $0xc8] sm:$0xff] %v5596_v32  ;;  %5688 = vst.msk [vmem:[%s12050_s2 + $0xd0] sm:$0xff] %vm5663_vm2, %v5597_v62 }
 0x5e2   :  { %v5549_v10 = vpop.permute.xlu0 %5548 }
 0x5e8   :  { %v5539_v50 = vpop.permute.xlu1 %5538 }
 0x5e9   :  { %v5598_v59 = vsel %vm12957_vm5, %v5539_v50, %v5541_v30  ;;  %5689 = vst.msk [vmem:[%s12050_s2 + $0xd8] sm:$0xff] %vm5660_vm6, %v5539_v50 }
 0x5ea   :  { %5690 = vst [vmem:[%s12050_s2 + $0xe0] sm:$0xff] %v5598_v59 }
 0x5eb   :  { %v5545_v6 = vpop.permute.xlu0 %5544 }
 0x5ec   :  { %5692 = vst.msk [vmem:[%s12050_s2 + $0xf0] sm:$0xff] %vm5660_vm6, %v5545_v6 }
 0x5f3   :  { %v5555_v42 = vpop.permute.xlu1 %5554 }
 0x5f7   :  { %v5561_v15 = vpop.permute.xlu0 %5560 }
 0x5f8   :  { %v5605_v13 = vsel %vm12958_vm3, %v11518_v35, %v5561_v15 }
 0x5f9   :  { %5700 = vst.msk [vmem:[%s12050_s2 + $0x130] sm:$0xff] %vm5663_vm2, %v5605_v13 }
 0x5fd   :  { %v5567_v53 = vpop.permute.xlu1 %5566 }
 0x5fe   :  { %v5607_v25 = vsel %vm12959_vm10, %v11627_v40, %v5567_v53 }
 0x5ff   :  { %5703 = vst.msk [vmem:[%s12050_s2 + $0x148] sm:$0xff] %vm5663_vm2, %v5607_v25 }
 0x600   :  { %v5553_v51 = vpop.permute.xlu0 %5552 }
 0x601   :  { %v5603_v46 = vsel %vm12960_vm12, %v5553_v51, %v5555_v42 }
 0x602   :  { %5697 = vst.msk [vmem:[%s12050_s2 + $0x118] sm:$0xff] %vm5663_vm2, %v5603_v46 }
 0x608   :  { %v5547_v35 = vpop.permute.xlu1 %5546 }
 0x609   :  { %v5600_v7 = vsel %vm12941_vm0, %v5545_v6, %v5547_v35  ;;  %v5601_v63 = vsel %vm12961_vm9, %v5547_v35, %v5549_v10 }
 0x60a   :  { %5693 = vst [vmem:[%s12050_s2 + $0xf8] sm:$0xff] %v5600_v7  ;;  %5694 = vst.msk [vmem:[%s12050_s2 + $0x100] sm:$0xff] %vm5663_vm2, %v5601_v63 }
 0x60c   :  { %v5573_v40 = vpop.permute.xlu0 %5572 }
 0x60d   :  { %v5609_v33 = vsel %vm12962_vm14, %v11642_v1, %v5573_v40 }
 0x60e   :  { %5706 = vst.msk [vmem:[%s12050_s2 + $0x160] sm:$0xff] %vm5663_vm2, %v5609_v33 }
 0x613   :  { %v5551_v2 = vpop.permute.xlu1 %5550 }
 0x614   :  { %v5602_v0 = vsel %vm12963_vm13, %v5551_v2, %v5553_v51  ;;  %5695 = vst.msk [vmem:[%s12050_s2 + $0x108] sm:$0xff] %vm5660_vm6, %v5551_v2 }
 0x615   :  { %5696 = vst [vmem:[%s12050_s2 + $0x110] sm:$0xff] %v5602_v0 }
 0x618   :  { %v5577_v12 = vpop.permute.xlu0 %5576 }
 0x619   :  { %v5610_v1 = vsel %vm12964_vm11, %v11698_v39, %v5577_v12 }
 0x61a   :  { %5708 = vst [vmem:[%s12050_s2 + $0x170] sm:$0xff] %v5610_v1 }
 0x61e   :  { %v5579_v21 = vpop.permute.xlu1 %5578 }
 0x61f   :  { %v5611_v18 = vsel %vm12965_vm8, %v5577_v12, %v5579_v21 }
 0x620   :  { %5709 = vst.msk [vmem:[%s12050_s2 + $0x178] sm:$0xff] %vm5663_vm2, %v5611_v18 }

</bundles_post_ra>
